<compile_context>
chip_gen: v7x
topology: tpu7x:2x2x1
jax: 0.10.0
libtpu: 0.0.40
codegen_flags: <defaults>
</compile_context>

<pallas_src>
import numpy as np
import jax
import jax.numpy as jnp
from jax.experimental import pallas as pl
from jax.experimental.pallas import tpu as pltpu

_SQRT_HALF = 0.7071067811865476


# ----------------------------- in-kernel math -----------------------------
def _gelu_exact(x):
    """PyTorch-default (erf) GELU; erf via Abramowitz–Stegun 7.1.26 (<1.5e-7 abs err).

    The polynomial's divide is pushed to the EUP with pl.reciprocal(approx=True);
    flip approx=False if tighter bit-parity with torch is ever required.
    """
    p = 0.3275911
    a1, a2, a3, a4, a5 = 0.254829592, -0.284496736, 1.421413741, -1.453152027, 1.061405429
    z = x * _SQRT_HALF
    az = jnp.abs(z)
    t = pl.reciprocal(1.0 + p * az, approx=True)
    poly = ((((a5 * t + a4) * t + a3) * t + a2) * t + a1) * t
    erf_abs = 1.0 - poly * jnp.exp(-az * az)
    erf = jnp.where(z >= 0.0, erf_abs, -erf_abs)
    return 0.5 * x * (1.0 + erf)


# ----------------------------- geometry helpers -----------------------------
def _geometry(H, W):
    Hp, Wp = H + 2, W + 2
    P = Hp * Wp                         # padded-spatial flat length per image
    M = -(-(Wp + 1) // 8) * 8           # zero-margin rows (multiple of 8, >= Wp+1)
    return Hp, Wp, P, M, M + P + M      # Rtot = margin + data + margin


def _pool_matrix(H, W, Wp, out_h=3, out_w=3):
    # Exact PyTorch AdaptiveAvgPool2d bins [floor(i*H/o), ceil((i+1)*H/o)), expressed
    # over the padded flat index r = (y+1)*Wp + (x+1); zero weight on padding rows.
    P = (H + 2) * Wp
    mat = np.zeros((out_h * out_w, P), np.float32)
    for oh in range(out_h):
        h0, h1 = (oh * H) // out_h, -(-((oh + 1) * H) // out_h)
        for ow in range(out_w):
            w0, w1 = (ow * W) // out_w, -(-((ow + 1) * W) // out_w)
            inv = 1.0 / float((h1 - h0) * (w1 - w0))
            for yy in range(h0, h1):
                for xx in range(w0, w1):
                    mat[oh * out_w + ow, (yy + 1) * Wp + (xx + 1)] = inv
    return mat


def _valid_mask(H, W, Wp):
    # 1.0 at valid (non-padding) pixel rows of the padded flat layout, else 0.0.
    m = np.zeros(((H + 2) * Wp, 1), np.float32)
    for yy in range(H):
        for xx in range(W):
            m[(yy + 1) * Wp + (xx + 1), 0] = 1.0
    return m


# ------------------------------ fused kernel --------------------------------
def _make_kernel(Wp, P, M, c0, c1, c2, c3):
    def kernel(x_ref,
               w1_ref, s1_ref, b1_ref,
               w2_ref, s2_ref, b2_ref,
               w3_ref, s3_ref, b3_ref,
               mask_ref, pm_ref,
               f1w_ref, f1b_ref, f2w_ref, f2b_ref,
               o_ref,
               buf_a, buf_b):

        def conv_bn_gelu(src_ref, w_ref, s_ref, b_ref, cin, cout):
            # 3x3 / stride 1 / pad 1 conv as 9 shifted (P, cin) @ (cin, cout) matmuls
            # over the zero-padded, flattened buffer; shifts are static row offsets.
            def window(k):
                dy, dx = divmod(k, 3)
                start = M + (dy - 1) * Wp + (dx - 1)
                return src_ref[start:start + P, :]

            acc = jnp.dot(window(0), w_ref[0:cin, :], preferred_element_type=jnp.float32)
            for k in range(1, 9):
                acc = acc + jnp.dot(window(k), w_ref[k * cin:(k + 1) * cin, :],
                                    preferred_element_type=jnp.float32)
            return _gelu_exact(acc * s_ref[...] + b_ref[...])

        mask = mask_ref[...]                                  # (P, 1) valid-pixel mask

        # conv1 + BN + GELU (input block already zero-padded by the wrapper).
        a1 = conv_bn_gelu(x_ref, w1_ref, s1_ref, b1_ref, c0, c1)
        buf_a[...] = jnp.zeros_like(buf_a)                    # margins + pad rows -> 0
        buf_a[M:M + P, :] = a1 * mask

        # conv2 + BN + GELU.
        a2 = conv_bn_gelu(buf_a, w2_ref, s2_ref, b2_ref, c1, c2)
        buf_b[...] = jnp.zeros_like(buf_b)
        buf_b[M:M + P, :] = a2 * mask

        # conv3 + BN + GELU (no re-padding needed: pool weights are 0 on pad rows).
        a3 = conv_bn_gelu(buf_b, w3_ref, s3_ref, b3_ref, c2, c3)

        # AdaptiveAvgPool2d((3,3)) as a (9, P) @ (P, c3) matmul with exact torch bins.
        pooled = jnp.dot(pm_ref[...], a3, preferred_element_type=jnp.float32)   # (9, c3)

        # fc1 + GELU.  fc1 weights are pre-permuted so row index = p*c3 + c, letting the
        # (p, c) contraction run as 9 accumulated (1, c3) @ (c3, 32) matmuls without any
        # in-kernel (9, c3) -> (1, 9*c3) relayout.
        h = f1b_ref[...]                                      # (1, 32)
        for q in range(9):
            h = h + jnp.dot(pooled[q:q + 1, :], f1w_ref[q * c3:(q + 1) * c3, :],
                            preferred_element_type=jnp.float32)
        h = _gelu_exact(h)
        # TODO(synk): nn.Dropout(0.3) is the identity at inference; training-mode stochastic masking not implemented.

        # fc2 + tanh: VPU multiply + lane reduction (avoids a 1-column MXU tile).
        y = jnp.sum(h * f2w_ref[...], axis=1, keepdims=True) + f2b_ref[...]     # (1, 1)
        o_ref[...] = jnp.tanh(y)

    return kernel


# ------------------------------ params & forward -----------------------------
def init_params(key):
    keys = jax.random.split(key, 8)

    def conv_block(k, cin, cout):
        kw, kb, kg, kbt, km, kv = jax.random.split(k, 6)
        w = jax.random.normal(kw, (cout, cin, 3, 3), jnp.float32) / np.sqrt(cin * 9.0)
        b = 0.05 * jax.random.normal(kb, (cout,), jnp.float32)
        gamma = 1.0 + 0.1 * jax.random.normal(kg, (cout,), jnp.float32)
        beta = 0.1 * jax.random.normal(kbt, (cout,), jnp.float32)
        rmean = 0.1 * jax.random.normal(km, (cout,), jnp.float32)
        rvar = jax.random.uniform(kv, (cout,), jnp.float32, minval=0.5, maxval=1.5)
        # Fold conv bias + eval-mode BatchNorm into a per-channel affine.
        scale = gamma / jnp.sqrt(rvar + 1e-5)
        bias = (b - rmean) * scale + beta
        # (Cout, Cin, kh, kw) -> (9*Cin, Cout); row index = (dy*3+dx)*Cin + ci.
        w_mat = jnp.transpose(w, (2, 3, 1, 0)).reshape(9 * cin, cout)
        return {"w_mat": w_mat, "scale": scale.reshape(1, cout), "bias": bias.reshape(1, cout)}

    params = {
        "conv1": conv_block(keys[0], 16, 16),
        "conv2": conv_block(keys[1], 16, 32),
        "conv3": conv_block(keys[2], 32, 32),
    }
    w1 = jax.random.normal(keys[3], (32, 32 * 9), jnp.float32) / np.sqrt(32 * 9.0)
    b1 = 0.05 * jax.random.normal(keys[4], (32,), jnp.float32)
    w2 = jax.random.normal(keys[5], (1, 32), jnp.float32) / np.sqrt(32.0)
    b2 = 0.05 * jax.random.normal(keys[6], (1,), jnp.float32)
    # PyTorch flatten of (C,3,3) uses feature index c*9+p; pre-permute fc1 so the
    # kernel-side row index is p*32 + c.
    params["fc1_wp"] = jnp.transpose(w1.reshape(32, 32, 9), (2, 1, 0)).reshape(9 * 32, 32)
    params["fc1_b"] = b1.reshape(1, 32)
    params["fc2_w"] = w2                                   # (1, 32) row for the VPU dot
    params["fc2_b"] = b2.reshape(1, 1)
    return params


@jax.jit
def cnn_forward(x_nchw, params):
    N, c0, H, W = x_nchw.shape
    Hp, Wp, P, M, Rtot = _geometry(H, W)
    c1 = params["conv1"]["w_mat"].shape[1]
    c2 = params["conv2"]["w_mat"].shape[1]
    c3 = params["conv3"]["w_mat"].shape[1]

    # NCHW -> NHWC, zero-pad spatial by 1, flatten (yp, xp) onto the sublane axis,
    # and add M zero margin rows top/bottom so every shifted conv window is in-bounds.
    x = jnp.transpose(x_nchw, (0, 2, 3, 1)).astype(jnp.float32)
    x = jnp.pad(x, ((0, 0), (1, 1), (1, 1), (0, 0))).reshape(N, P, c0)
    x = jnp.pad(x, ((0, 0), (M, Rtot - M - P), (0, 0)))                 # (N, Rtot, c0)

    pm = jnp.asarray(_pool_matrix(H, W, Wp))                            # (9, P)
    mask = jnp.asarray(_valid_mask(H, W, Wp))                           # (P, 1)

    operands = (
        x,
        params["conv1"]["w_mat"], params["conv1"]["scale"], params["conv1"]["bias"],
        params["conv2"]["w_mat"], params["conv2"]["scale"], params["conv2"]["bias"],
        params["conv3"]["w_mat"], params["conv3"]["scale"], params["conv3"]["bias"],
        mask, pm,
        params["fc1_wp"], params["fc1_b"], params["fc2_w"], params["fc2_b"],
    )

    def _resident(a):
        # Full-array block (all 2D) with a constant index map: VMEM-resident and not
        # re-fetched across batch grid steps.
        return pl.BlockSpec(a.shape, lambda n: (0, 0))

    in_specs = [pl.BlockSpec((None, Rtot, c0), lambda n: (n, 0, 0))]
    in_specs += [_resident(a) for a in operands[1:]]

    out = pl.pallas_call(
        _make_kernel(Wp, P, M, c0, c1, c2, c3),
        grid=(N,),
        in_specs=in_specs,
        out_specs=pl.BlockSpec((None, 1, 1), lambda n: (n, 0, 0)),
        out_shape=jax.ShapeDtypeStruct((N, 1, 1), jnp.float32),
        scratch_shapes=[pltpu.VMEM((Rtot, c1), jnp.float32),   # padded conv1 activation
                        pltpu.VMEM((Rtot, c2), jnp.float32)],  # padded conv2 activation
        compiler_params=pltpu.CompilerParams(dimension_semantics=("parallel",)),
    )(*operands)
    return out.reshape(N, 1)


if __name__ == "__main__":
    key = jax.random.PRNGKey(0)
    pkey, xkey = jax.random.split(key)
    params = init_params(pkey)
    # NCHW input: 16 channels (required by conv1); 12x12 spatial.
    x = jax.random.normal(xkey, (2, 16, 12, 12), jnp.float32)
    out = cnn_forward(x, params)
    jax.block_until_ready(out)
    assert out.shape == (2, 1) and out.dtype == jnp.float32
    print("KERNEL_OK")
</pallas_src>

<mosaic_0001>
module attributes {stable_mosaic.version = 11 : i64} {
  func.func @kernel(%arg0: i32, %arg1: memref<1x228x16xf32, #tpu.memory_space<vmem>>, %arg2: memref<144x16xf32, #tpu.memory_space<vmem>>, %arg3: memref<1x16xf32, #tpu.memory_space<vmem>>, %arg4: memref<1x16xf32, #tpu.memory_space<vmem>>, %arg5: memref<144x32xf32, #tpu.memory_space<vmem>>, %arg6: memref<1x32xf32, #tpu.memory_space<vmem>>, %arg7: memref<1x32xf32, #tpu.memory_space<vmem>>, %arg8: memref<288x32xf32, #tpu.memory_space<vmem>>, %arg9: memref<1x32xf32, #tpu.memory_space<vmem>>, %arg10: memref<1x32xf32, #tpu.memory_space<vmem>>, %arg11: memref<196x1xf32, #tpu.memory_space<vmem>>, %arg12: memref<9x196xf32, #tpu.memory_space<vmem>>, %arg13: memref<288x32xf32, #tpu.memory_space<vmem>>, %arg14: memref<1x32xf32, #tpu.memory_space<vmem>>, %arg15: memref<1x32xf32, #tpu.memory_space<vmem>>, %arg16: memref<1x1xf32, #tpu.memory_space<vmem>>, %arg17: memref<1x1x1xf32, #tpu.memory_space<vmem>>, %arg18: memref<228x16xf32, #tpu.memory_space<vmem>>, %arg19: memref<228x32xf32, #tpu.memory_space<vmem>>) attributes {dimension_semantics = [#tpu.dimension_semantics<parallel>], iteration_bounds = array<i64: 2>, scalar_prefetch = 0 : i64, scratch_operands = 2 : i64, tpu.core_type = #tpu.core_type<tc>, window_params = [{transform_indices = @transform_0, window_bounds = array<i64: 1, 228, 16>}, {pipeline_mode = #tpu.pipeline_mode<synchronous>, transform_indices = @transform_1, window_bounds = array<i64: 144, 16>}, {pipeline_mode = #tpu.pipeline_mode<synchronous>, transform_indices = @transform_2, window_bounds = array<i64: 1, 16>}, {pipeline_mode = #tpu.pipeline_mode<synchronous>, transform_indices = @transform_3, window_bounds = array<i64: 1, 16>}, {pipeline_mode = #tpu.pipeline_mode<synchronous>, transform_indices = @transform_4, window_bounds = array<i64: 144, 32>}, {pipeline_mode = #tpu.pipeline_mode<synchronous>, transform_indices = @transform_5, window_bounds = array<i64: 1, 32>}, {pipeline_mode = #tpu.pipeline_mode<synchronous>, transform_indices = @transform_6, window_bounds = array<i64: 1, 32>}, {pipeline_mode = #tpu.pipeline_mode<synchronous>, transform_indices = @transform_7, window_bounds = array<i64: 288, 32>}, {pipeline_mode = #tpu.pipeline_mode<synchronous>, transform_indices = @transform_8, window_bounds = array<i64: 1, 32>}, {pipeline_mode = #tpu.pipeline_mode<synchronous>, transform_indices = @transform_9, window_bounds = array<i64: 1, 32>}, {pipeline_mode = #tpu.pipeline_mode<synchronous>, transform_indices = @transform_10, window_bounds = array<i64: 196, 1>}, {pipeline_mode = #tpu.pipeline_mode<synchronous>, transform_indices = @transform_11, window_bounds = array<i64: 9, 196>}, {pipeline_mode = #tpu.pipeline_mode<synchronous>, transform_indices = @transform_12, window_bounds = array<i64: 288, 32>}, {pipeline_mode = #tpu.pipeline_mode<synchronous>, transform_indices = @transform_13, window_bounds = array<i64: 1, 32>}, {pipeline_mode = #tpu.pipeline_mode<synchronous>, transform_indices = @transform_14, window_bounds = array<i64: 1, 32>}, {pipeline_mode = #tpu.pipeline_mode<synchronous>, transform_indices = @transform_15, window_bounds = array<i64: 1, 1>}, {transform_indices = @transform_16, window_bounds = array<i64: 1, 1, 1>}]} {
    %c0 = arith.constant 0 : index
    %c0_0 = arith.constant 0 : index
    %0 = vector.load %arg11[%c0, %c0_0] : memref<196x1xf32, #tpu.memory_space<vmem>>, vector<196x1xf32>
    %c0_1 = arith.constant 0 : index
    %c1 = arith.constant 1 : index
    %c0_2 = arith.constant 0 : index
    %1 = vector.load %arg1[%c0_1, %c1, %c0_2] : memref<1x228x16xf32, #tpu.memory_space<vmem>>, vector<1x196x16xf32>
    %2 = vector.shape_cast %1 : vector<1x196x16xf32> to vector<196x16xf32>
    %c0_3 = arith.constant 0 : index
    %c0_4 = arith.constant 0 : index
    %3 = vector.load %arg2[%c0_3, %c0_4] : memref<144x16xf32, #tpu.memory_space<vmem>>, vector<16x16xf32>
    %cst = arith.constant dense<0.000000e+00> : vector<196x16xf32>
    %4 = tpu.matmul %2, %3, %cst {dimension_numbers = #tpu.dot_dimension_numbers<[1], [0], [0], [1], [0, 0, 1, 1], [], []>} : vector<196x16xf32>, vector<16x16xf32>, vector<196x16xf32> -> vector<196x16xf32>
    %c0_5 = arith.constant 0 : index
    %c2 = arith.constant 2 : index
    %c0_6 = arith.constant 0 : index
    %5 = vector.load %arg1[%c0_5, %c2, %c0_6] : memref<1x228x16xf32, #tpu.memory_space<vmem>>, vector<1x196x16xf32>
    %6 = vector.shape_cast %5 : vector<1x196x16xf32> to vector<196x16xf32>
    %c16 = arith.constant 16 : index
    %c0_7 = arith.constant 0 : index
    %7 = vector.load %arg2[%c16, %c0_7] : memref<144x16xf32, #tpu.memory_space<vmem>>, vector<16x16xf32>
    %cst_8 = arith.constant dense<0.000000e+00> : vector<196x16xf32>
    %8 = tpu.matmul %6, %7, %cst_8 {dimension_numbers = #tpu.dot_dimension_numbers<[1], [0], [0], [1], [0, 0, 1, 1], [], []>} : vector<196x16xf32>, vector<16x16xf32>, vector<196x16xf32> -> vector<196x16xf32>
    %9 = arith.addf %4, %8 : vector<196x16xf32>
    %c0_9 = arith.constant 0 : index
    %c3 = arith.constant 3 : index
    %c0_10 = arith.constant 0 : index
    %10 = vector.load %arg1[%c0_9, %c3, %c0_10] : memref<1x228x16xf32, #tpu.memory_space<vmem>>, vector<1x196x16xf32>
    %11 = vector.shape_cast %10 : vector<1x196x16xf32> to vector<196x16xf32>
    %c32 = arith.constant 32 : index
    %c0_11 = arith.constant 0 : index
    %12 = vector.load %arg2[%c32, %c0_11] : memref<144x16xf32, #tpu.memory_space<vmem>>, vector<16x16xf32>
    %cst_12 = arith.constant dense<0.000000e+00> : vector<196x16xf32>
    %13 = tpu.matmul %11, %12, %cst_12 {dimension_numbers = #tpu.dot_dimension_numbers<[1], [0], [0], [1], [0, 0, 1, 1], [], []>} : vector<196x16xf32>, vector<16x16xf32>, vector<196x16xf32> -> vector<196x16xf32>
    %14 = arith.addf %9, %13 : vector<196x16xf32>
    %c0_13 = arith.constant 0 : index
    %c15 = arith.constant 15 : index
    %c0_14 = arith.constant 0 : index
    %15 = vector.load %arg1[%c0_13, %c15, %c0_14] : memref<1x228x16xf32, #tpu.memory_space<vmem>>, vector<1x196x16xf32>
    %16 = vector.shape_cast %15 : vector<1x196x16xf32> to vector<196x16xf32>
    %c48 = arith.constant 48 : index
    %c0_15 = arith.constant 0 : index
    %17 = vector.load %arg2[%c48, %c0_15] : memref<144x16xf32, #tpu.memory_space<vmem>>, vector<16x16xf32>
    %cst_16 = arith.constant dense<0.000000e+00> : vector<196x16xf32>
    %18 = tpu.matmul %16, %17, %cst_16 {dimension_numbers = #tpu.dot_dimension_numbers<[1], [0], [0], [1], [0, 0, 1, 1], [], []>} : vector<196x16xf32>, vector<16x16xf32>, vector<196x16xf32> -> vector<196x16xf32>
    %19 = arith.addf %14, %18 : vector<196x16xf32>
    %c0_17 = arith.constant 0 : index
    %c16_18 = arith.constant 16 : index
    %c0_19 = arith.constant 0 : index
    %20 = vector.load %arg1[%c0_17, %c16_18, %c0_19] : memref<1x228x16xf32, #tpu.memory_space<vmem>>, vector<1x196x16xf32>
    %21 = vector.shape_cast %20 : vector<1x196x16xf32> to vector<196x16xf32>
    %c64 = arith.constant 64 : index
    %c0_20 = arith.constant 0 : index
    %22 = vector.load %arg2[%c64, %c0_20] : memref<144x16xf32, #tpu.memory_space<vmem>>, vector<16x16xf32>
    %cst_21 = arith.constant dense<0.000000e+00> : vector<196x16xf32>
    %23 = tpu.matmul %21, %22, %cst_21 {dimension_numbers = #tpu.dot_dimension_numbers<[1], [0], [0], [1], [0, 0, 1, 1], [], []>} : vector<196x16xf32>, vector<16x16xf32>, vector<196x16xf32> -> vector<196x16xf32>
    %24 = arith.addf %19, %23 : vector<196x16xf32>
    %c0_22 = arith.constant 0 : index
    %c17 = arith.constant 17 : index
    %c0_23 = arith.constant 0 : index
    %25 = vector.load %arg1[%c0_22, %c17, %c0_23] : memref<1x228x16xf32, #tpu.memory_space<vmem>>, vector<1x196x16xf32>
    %26 = vector.shape_cast %25 : vector<1x196x16xf32> to vector<196x16xf32>
    %c80 = arith.constant 80 : index
    %c0_24 = arith.constant 0 : index
    %27 = vector.load %arg2[%c80, %c0_24] : memref<144x16xf32, #tpu.memory_space<vmem>>, vector<16x16xf32>
    %cst_25 = arith.constant dense<0.000000e+00> : vector<196x16xf32>
    %28 = tpu.matmul %26, %27, %cst_25 {dimension_numbers = #tpu.dot_dimension_numbers<[1], [0], [0], [1], [0, 0, 1, 1], [], []>} : vector<196x16xf32>, vector<16x16xf32>, vector<196x16xf32> -> vector<196x16xf32>
    %29 = arith.addf %24, %28 : vector<196x16xf32>
    %c0_26 = arith.constant 0 : index
    %c29 = arith.constant 29 : index
    %c0_27 = arith.constant 0 : index
    %30 = vector.load %arg1[%c0_26, %c29, %c0_27] : memref<1x228x16xf32, #tpu.memory_space<vmem>>, vector<1x196x16xf32>
    %31 = vector.shape_cast %30 : vector<1x196x16xf32> to vector<196x16xf32>
    %c96 = arith.constant 96 : index
    %c0_28 = arith.constant 0 : index
    %32 = vector.load %arg2[%c96, %c0_28] : memref<144x16xf32, #tpu.memory_space<vmem>>, vector<16x16xf32>
    %cst_29 = arith.constant dense<0.000000e+00> : vector<196x16xf32>
    %33 = tpu.matmul %31, %32, %cst_29 {dimension_numbers = #tpu.dot_dimension_numbers<[1], [0], [0], [1], [0, 0, 1, 1], [], []>} : vector<196x16xf32>, vector<16x16xf32>, vector<196x16xf32> -> vector<196x16xf32>
    %34 = arith.addf %29, %33 : vector<196x16xf32>
    %c0_30 = arith.constant 0 : index
    %c30 = arith.constant 30 : index
    %c0_31 = arith.constant 0 : index
    %35 = vector.load %arg1[%c0_30, %c30, %c0_31] : memref<1x228x16xf32, #tpu.memory_space<vmem>>, vector<1x196x16xf32>
    %36 = vector.shape_cast %35 : vector<1x196x16xf32> to vector<196x16xf32>
    %c112 = arith.constant 112 : index
    %c0_32 = arith.constant 0 : index
    %37 = vector.load %arg2[%c112, %c0_32] : memref<144x16xf32, #tpu.memory_space<vmem>>, vector<16x16xf32>
    %cst_33 = arith.constant dense<0.000000e+00> : vector<196x16xf32>
    %38 = tpu.matmul %36, %37, %cst_33 {dimension_numbers = #tpu.dot_dimension_numbers<[1], [0], [0], [1], [0, 0, 1, 1], [], []>} : vector<196x16xf32>, vector<16x16xf32>, vector<196x16xf32> -> vector<196x16xf32>
    %39 = arith.addf %34, %38 : vector<196x16xf32>
    %c0_34 = arith.constant 0 : index
    %c31 = arith.constant 31 : index
    %c0_35 = arith.constant 0 : index
    %40 = vector.load %arg1[%c0_34, %c31, %c0_35] : memref<1x228x16xf32, #tpu.memory_space<vmem>>, vector<1x196x16xf32>
    %41 = vector.shape_cast %40 : vector<1x196x16xf32> to vector<196x16xf32>
    %c128 = arith.constant 128 : index
    %c0_36 = arith.constant 0 : index
    %42 = vector.load %arg2[%c128, %c0_36] : memref<144x16xf32, #tpu.memory_space<vmem>>, vector<16x16xf32>
    %cst_37 = arith.constant dense<0.000000e+00> : vector<196x16xf32>
    %43 = tpu.matmul %41, %42, %cst_37 {dimension_numbers = #tpu.dot_dimension_numbers<[1], [0], [0], [1], [0, 0, 1, 1], [], []>} : vector<196x16xf32>, vector<16x16xf32>, vector<196x16xf32> -> vector<196x16xf32>
    %44 = arith.addf %39, %43 : vector<196x16xf32>
    %c0_38 = arith.constant 0 : index
    %c0_39 = arith.constant 0 : index
    %45 = vector.load %arg3[%c0_38, %c0_39] : memref<1x16xf32, #tpu.memory_space<vmem>>, vector<1x16xf32>
    %46 = vector.broadcast %45 : vector<1x16xf32> to vector<196x16xf32>
    %47 = arith.mulf %44, %46 : vector<196x16xf32>
    %c0_40 = arith.constant 0 : index
    %c0_41 = arith.constant 0 : index
    %48 = vector.load %arg4[%c0_40, %c0_41] : memref<1x16xf32, #tpu.memory_space<vmem>>, vector<1x16xf32>
    %49 = vector.broadcast %48 : vector<1x16xf32> to vector<196x16xf32>
    %50 = arith.addf %47, %49 : vector<196x16xf32>
    %cst_42 = arith.constant 0.707106769 : f32
    %51 = vector.broadcast %cst_42 : f32 to vector<196x16xf32>
    %52 = arith.mulf %50, %51 : vector<196x16xf32>
    %53 = math.absf %52 : vector<196x16xf32>
    %cst_43 = arith.constant 0.327591091 : f32
    %54 = vector.broadcast %cst_43 : f32 to vector<196x16xf32>
    %55 = arith.mulf %54, %53 : vector<196x16xf32>
    %cst_44 = arith.constant 1.000000e+00 : f32
    %56 = vector.broadcast %cst_44 : f32 to vector<196x16xf32>
    %57 = arith.addf %56, %55 : vector<196x16xf32>
    %58 = tpu.reciprocal %57 {approx = true} : vector<196x16xf32> -> vector<196x16xf32>
    %cst_45 = arith.constant 1.06140542 : f32
    %59 = vector.broadcast %cst_45 : f32 to vector<196x16xf32>
    %60 = arith.mulf %59, %58 : vector<196x16xf32>
    %cst_46 = arith.constant -1.45315206 : f32
    %61 = vector.broadcast %cst_46 : f32 to vector<196x16xf32>
    %62 = arith.addf %60, %61 : vector<196x16xf32>
    %63 = arith.mulf %62, %58 : vector<196x16xf32>
    %cst_47 = arith.constant 1.42141378 : f32
    %64 = vector.broadcast %cst_47 : f32 to vector<196x16xf32>
    %65 = arith.addf %63, %64 : vector<196x16xf32>
    %66 = arith.mulf %65, %58 : vector<196x16xf32>
    %cst_48 = arith.constant -0.284496725 : f32
    %67 = vector.broadcast %cst_48 : f32 to vector<196x16xf32>
    %68 = arith.addf %66, %67 : vector<196x16xf32>
    %69 = arith.mulf %68, %58 : vector<196x16xf32>
    %cst_49 = arith.constant 0.254829586 : f32
    %70 = vector.broadcast %cst_49 : f32 to vector<196x16xf32>
    %71 = arith.addf %69, %70 : vector<196x16xf32>
    %72 = arith.mulf %71, %58 : vector<196x16xf32>
    %cst_50 = arith.constant 0.000000e+00 : f32
    %73 = vector.broadcast %cst_50 : f32 to vector<196x16xf32>
    %74 = arith.subf %73, %53 : vector<196x16xf32>
    %75 = arith.mulf %74, %53 : vector<196x16xf32>
    %76 = math.exp %75 : vector<196x16xf32>
    %77 = arith.mulf %72, %76 : vector<196x16xf32>
    %cst_51 = arith.constant 1.000000e+00 : f32
    %78 = vector.broadcast %cst_51 : f32 to vector<196x16xf32>
    %79 = arith.subf %78, %77 : vector<196x16xf32>
    %cst_52 = arith.constant 0.000000e+00 : f32
    %80 = vector.broadcast %cst_52 : f32 to vector<196x16xf32>
    %81 = arith.cmpf oge, %52, %80 : vector<196x16xf32>
    %cst_53 = arith.constant 0.000000e+00 : f32
    %82 = vector.broadcast %cst_53 : f32 to vector<196x16xf32>
    %83 = arith.subf %82, %79 : vector<196x16xf32>
    %84 = arith.select %81, %79, %83 : vector<196x16xi1>, vector<196x16xf32>
    %cst_54 = arith.constant 5.000000e-01 : f32
    %85 = vector.broadcast %cst_54 : f32 to vector<196x16xf32>
    %86 = arith.mulf %85, %50 : vector<196x16xf32>
    %cst_55 = arith.constant 1.000000e+00 : f32
    %87 = vector.broadcast %cst_55 : f32 to vector<196x16xf32>
    %88 = arith.addf %87, %84 : vector<196x16xf32>
    %89 = arith.mulf %86, %88 : vector<196x16xf32>
    %cst_56 = arith.constant 0.000000e+00 : f32
    %90 = vector.broadcast %cst_56 : f32 to vector<228x16xf32>
    %c0_57 = arith.constant 0 : index
    %c0_58 = arith.constant 0 : index
    %91 = vector.load %arg18[%c0_57, %c0_58] : memref<228x16xf32, #tpu.memory_space<vmem>>, vector<228x16xf32>
    tpu.vector_store %arg18[%c0_57, %c0_58], %90 {strides = array<i32>} : memref<228x16xf32, #tpu.memory_space<vmem>>, vector<228x16xf32>,
    %92 = vector.broadcast %0 : vector<196x1xf32> to vector<196x16xf32>
    %93 = arith.mulf %89, %92 : vector<196x16xf32>
    %c16_59 = arith.constant 16 : index
    %c0_60 = arith.constant 0 : index
    %94 = vector.load %arg18[%c16_59, %c0_60] : memref<228x16xf32, #tpu.memory_space<vmem>>, vector<196x16xf32>
    tpu.vector_store %arg18[%c16_59, %c0_60], %93 {strides = array<i32>} : memref<228x16xf32, #tpu.memory_space<vmem>>, vector<196x16xf32>,
    %c1_61 = arith.constant 1 : index
    %c0_62 = arith.constant 0 : index
    %95 = vector.load %arg18[%c1_61, %c0_62] : memref<228x16xf32, #tpu.memory_space<vmem>>, vector<196x16xf32>
    %c0_63 = arith.constant 0 : index
    %c0_64 = arith.constant 0 : index
    %96 = vector.load %arg5[%c0_63, %c0_64] : memref<144x32xf32, #tpu.memory_space<vmem>>, vector<16x32xf32>
    %cst_65 = arith.constant dense<0.000000e+00> : vector<196x32xf32>
    %97 = tpu.matmul %95, %96, %cst_65 {dimension_numbers = #tpu.dot_dimension_numbers<[1], [0], [0], [1], [0, 0, 1, 1], [], []>} : vector<196x16xf32>, vector<16x32xf32>, vector<196x32xf32> -> vector<196x32xf32>
    %c2_66 = arith.constant 2 : index
    %c0_67 = arith.constant 0 : index
    %98 = vector.load %arg18[%c2_66, %c0_67] : memref<228x16xf32, #tpu.memory_space<vmem>>, vector<196x16xf32>
    %c16_68 = arith.constant 16 : index
    %c0_69 = arith.constant 0 : index
    %99 = vector.load %arg5[%c16_68, %c0_69] : memref<144x32xf32, #tpu.memory_space<vmem>>, vector<16x32xf32>
    %cst_70 = arith.constant dense<0.000000e+00> : vector<196x32xf32>
    %100 = tpu.matmul %98, %99, %cst_70 {dimension_numbers = #tpu.dot_dimension_numbers<[1], [0], [0], [1], [0, 0, 1, 1], [], []>} : vector<196x16xf32>, vector<16x32xf32>, vector<196x32xf32> -> vector<196x32xf32>
    %101 = arith.addf %97, %100 : vector<196x32xf32>
    %c3_71 = arith.constant 3 : index
    %c0_72 = arith.constant 0 : index
    %102 = vector.load %arg18[%c3_71, %c0_72] : memref<228x16xf32, #tpu.memory_space<vmem>>, vector<196x16xf32>
    %c32_73 = arith.constant 32 : index
    %c0_74 = arith.constant 0 : index
    %103 = vector.load %arg5[%c32_73, %c0_74] : memref<144x32xf32, #tpu.memory_space<vmem>>, vector<16x32xf32>
    %cst_75 = arith.constant dense<0.000000e+00> : vector<196x32xf32>
    %104 = tpu.matmul %102, %103, %cst_75 {dimension_numbers = #tpu.dot_dimension_numbers<[1], [0], [0], [1], [0, 0, 1, 1], [], []>} : vector<196x16xf32>, vector<16x32xf32>, vector<196x32xf32> -> vector<196x32xf32>
    %105 = arith.addf %101, %104 : vector<196x32xf32>
    %c15_76 = arith.constant 15 : index
    %c0_77 = arith.constant 0 : index
    %106 = vector.load %arg18[%c15_76, %c0_77] : memref<228x16xf32, #tpu.memory_space<vmem>>, vector<196x16xf32>
    %c48_78 = arith.constant 48 : index
    %c0_79 = arith.constant 0 : index
    %107 = vector.load %arg5[%c48_78, %c0_79] : memref<144x32xf32, #tpu.memory_space<vmem>>, vector<16x32xf32>
    %cst_80 = arith.constant dense<0.000000e+00> : vector<196x32xf32>
    %108 = tpu.matmul %106, %107, %cst_80 {dimension_numbers = #tpu.dot_dimension_numbers<[1], [0], [0], [1], [0, 0, 1, 1], [], []>} : vector<196x16xf32>, vector<16x32xf32>, vector<196x32xf32> -> vector<196x32xf32>
    %109 = arith.addf %105, %108 : vector<196x32xf32>
    %c16_81 = arith.constant 16 : index
    %c0_82 = arith.constant 0 : index
    %110 = vector.load %arg18[%c16_81, %c0_82] : memref<228x16xf32, #tpu.memory_space<vmem>>, vector<196x16xf32>
    %c64_83 = arith.constant 64 : index
    %c0_84 = arith.constant 0 : index
    %111 = vector.load %arg5[%c64_83, %c0_84] : memref<144x32xf32, #tpu.memory_space<vmem>>, vector<16x32xf32>
    %cst_85 = arith.constant dense<0.000000e+00> : vector<196x32xf32>
    %112 = tpu.matmul %110, %111, %cst_85 {dimension_numbers = #tpu.dot_dimension_numbers<[1], [0], [0], [1], [0, 0, 1, 1], [], []>} : vector<196x16xf32>, vector<16x32xf32>, vector<196x32xf32> -> vector<196x32xf32>
    %113 = arith.addf %109, %112 : vector<196x32xf32>
    %c17_86 = arith.constant 17 : index
    %c0_87 = arith.constant 0 : index
    %114 = vector.load %arg18[%c17_86, %c0_87] : memref<228x16xf32, #tpu.memory_space<vmem>>, vector<196x16xf32>
    %c80_88 = arith.constant 80 : index
    %c0_89 = arith.constant 0 : index
    %115 = vector.load %arg5[%c80_88, %c0_89] : memref<144x32xf32, #tpu.memory_space<vmem>>, vector<16x32xf32>
    %cst_90 = arith.constant dense<0.000000e+00> : vector<196x32xf32>
    %116 = tpu.matmul %114, %115, %cst_90 {dimension_numbers = #tpu.dot_dimension_numbers<[1], [0], [0], [1], [0, 0, 1, 1], [], []>} : vector<196x16xf32>, vector<16x32xf32>, vector<196x32xf32> -> vector<196x32xf32>
    %117 = arith.addf %113, %116 : vector<196x32xf32>
    %c29_91 = arith.constant 29 : index
    %c0_92 = arith.constant 0 : index
    %118 = vector.load %arg18[%c29_91, %c0_92] : memref<228x16xf32, #tpu.memory_space<vmem>>, vector<196x16xf32>
    %c96_93 = arith.constant 96 : index
    %c0_94 = arith.constant 0 : index
    %119 = vector.load %arg5[%c96_93, %c0_94] : memref<144x32xf32, #tpu.memory_space<vmem>>, vector<16x32xf32>
    %cst_95 = arith.constant dense<0.000000e+00> : vector<196x32xf32>
    %120 = tpu.matmul %118, %119, %cst_95 {dimension_numbers = #tpu.dot_dimension_numbers<[1], [0], [0], [1], [0, 0, 1, 1], [], []>} : vector<196x16xf32>, vector<16x32xf32>, vector<196x32xf32> -> vector<196x32xf32>
    %121 = arith.addf %117, %120 : vector<196x32xf32>
    %c30_96 = arith.constant 30 : index
    %c0_97 = arith.constant 0 : index
    %122 = vector.load %arg18[%c30_96, %c0_97] : memref<228x16xf32, #tpu.memory_space<vmem>>, vector<196x16xf32>
    %c112_98 = arith.constant 112 : index
    %c0_99 = arith.constant 0 : index
    %123 = vector.load %arg5[%c112_98, %c0_99] : memref<144x32xf32, #tpu.memory_space<vmem>>, vector<16x32xf32>
    %cst_100 = arith.constant dense<0.000000e+00> : vector<196x32xf32>
    %124 = tpu.matmul %122, %123, %cst_100 {dimension_numbers = #tpu.dot_dimension_numbers<[1], [0], [0], [1], [0, 0, 1, 1], [], []>} : vector<196x16xf32>, vector<16x32xf32>, vector<196x32xf32> -> vector<196x32xf32>
    %125 = arith.addf %121, %124 : vector<196x32xf32>
    %c31_101 = arith.constant 31 : index
    %c0_102 = arith.constant 0 : index
    %126 = vector.load %arg18[%c31_101, %c0_102] : memref<228x16xf32, #tpu.memory_space<vmem>>, vector<196x16xf32>
    %c128_103 = arith.constant 128 : index
    %c0_104 = arith.constant 0 : index
    %127 = vector.load %arg5[%c128_103, %c0_104] : memref<144x32xf32, #tpu.memory_space<vmem>>, vector<16x32xf32>
    %cst_105 = arith.constant dense<0.000000e+00> : vector<196x32xf32>
    %128 = tpu.matmul %126, %127, %cst_105 {dimension_numbers = #tpu.dot_dimension_numbers<[1], [0], [0], [1], [0, 0, 1, 1], [], []>} : vector<196x16xf32>, vector<16x32xf32>, vector<196x32xf32> -> vector<196x32xf32>
    %129 = arith.addf %125, %128 : vector<196x32xf32>
    %c0_106 = arith.constant 0 : index
    %c0_107 = arith.constant 0 : index
    %130 = vector.load %arg6[%c0_106, %c0_107] : memref<1x32xf32, #tpu.memory_space<vmem>>, vector<1x32xf32>
    %131 = vector.broadcast %130 : vector<1x32xf32> to vector<196x32xf32>
    %132 = arith.mulf %129, %131 : vector<196x32xf32>
    %c0_108 = arith.constant 0 : index
    %c0_109 = arith.constant 0 : index
    %133 = vector.load %arg7[%c0_108, %c0_109] : memref<1x32xf32, #tpu.memory_space<vmem>>, vector<1x32xf32>
    %134 = vector.broadcast %133 : vector<1x32xf32> to vector<196x32xf32>
    %135 = arith.addf %132, %134 : vector<196x32xf32>
    %cst_110 = arith.constant 0.707106769 : f32
    %136 = vector.broadcast %cst_110 : f32 to vector<196x32xf32>
    %137 = arith.mulf %135, %136 : vector<196x32xf32>
    %138 = math.absf %137 : vector<196x32xf32>
    %cst_111 = arith.constant 0.327591091 : f32
    %139 = vector.broadcast %cst_111 : f32 to vector<196x32xf32>
    %140 = arith.mulf %139, %138 : vector<196x32xf32>
    %cst_112 = arith.constant 1.000000e+00 : f32
    %141 = vector.broadcast %cst_112 : f32 to vector<196x32xf32>
    %142 = arith.addf %141, %140 : vector<196x32xf32>
    %143 = tpu.reciprocal %142 {approx = true} : vector<196x32xf32> -> vector<196x32xf32>
    %cst_113 = arith.constant 1.06140542 : f32
    %144 = vector.broadcast %cst_113 : f32 to vector<196x32xf32>
    %145 = arith.mulf %144, %143 : vector<196x32xf32>
    %cst_114 = arith.constant -1.45315206 : f32
    %146 = vector.broadcast %cst_114 : f32 to vector<196x32xf32>
    %147 = arith.addf %145, %146 : vector<196x32xf32>
    %148 = arith.mulf %147, %143 : vector<196x32xf32>
    %cst_115 = arith.constant 1.42141378 : f32
    %149 = vector.broadcast %cst_115 : f32 to vector<196x32xf32>
    %150 = arith.addf %148, %149 : vector<196x32xf32>
    %151 = arith.mulf %150, %143 : vector<196x32xf32>
    %cst_116 = arith.constant -0.284496725 : f32
    %152 = vector.broadcast %cst_116 : f32 to vector<196x32xf32>
    %153 = arith.addf %151, %152 : vector<196x32xf32>
    %154 = arith.mulf %153, %143 : vector<196x32xf32>
    %cst_117 = arith.constant 0.254829586 : f32
    %155 = vector.broadcast %cst_117 : f32 to vector<196x32xf32>
    %156 = arith.addf %154, %155 : vector<196x32xf32>
    %157 = arith.mulf %156, %143 : vector<196x32xf32>
    %cst_118 = arith.constant 0.000000e+00 : f32
    %158 = vector.broadcast %cst_118 : f32 to vector<196x32xf32>
    %159 = arith.subf %158, %138 : vector<196x32xf32>
    %160 = arith.mulf %159, %138 : vector<196x32xf32>
    %161 = math.exp %160 : vector<196x32xf32>
    %162 = arith.mulf %157, %161 : vector<196x32xf32>
    %cst_119 = arith.constant 1.000000e+00 : f32
    %163 = vector.broadcast %cst_119 : f32 to vector<196x32xf32>
    %164 = arith.subf %163, %162 : vector<196x32xf32>
    %cst_120 = arith.constant 0.000000e+00 : f32
    %165 = vector.broadcast %cst_120 : f32 to vector<196x32xf32>
    %166 = arith.cmpf oge, %137, %165 : vector<196x32xf32>
    %cst_121 = arith.constant 0.000000e+00 : f32
    %167 = vector.broadcast %cst_121 : f32 to vector<196x32xf32>
    %168 = arith.subf %167, %164 : vector<196x32xf32>
    %169 = arith.select %166, %164, %168 : vector<196x32xi1>, vector<196x32xf32>
    %cst_122 = arith.constant 5.000000e-01 : f32
    %170 = vector.broadcast %cst_122 : f32 to vector<196x32xf32>
    %171 = arith.mulf %170, %135 : vector<196x32xf32>
    %cst_123 = arith.constant 1.000000e+00 : f32
    %172 = vector.broadcast %cst_123 : f32 to vector<196x32xf32>
    %173 = arith.addf %172, %169 : vector<196x32xf32>
    %174 = arith.mulf %171, %173 : vector<196x32xf32>
    %cst_124 = arith.constant 0.000000e+00 : f32
    %175 = vector.broadcast %cst_124 : f32 to vector<228x32xf32>
    %c0_125 = arith.constant 0 : index
    %c0_126 = arith.constant 0 : index
    %176 = vector.load %arg19[%c0_125, %c0_126] : memref<228x32xf32, #tpu.memory_space<vmem>>, vector<228x32xf32>
    tpu.vector_store %arg19[%c0_125, %c0_126], %175 {strides = array<i32>} : memref<228x32xf32, #tpu.memory_space<vmem>>, vector<228x32xf32>,
    %177 = vector.broadcast %0 : vector<196x1xf32> to vector<196x32xf32>
    %178 = arith.mulf %174, %177 : vector<196x32xf32>
    %c16_127 = arith.constant 16 : index
    %c0_128 = arith.constant 0 : index
    %179 = vector.load %arg19[%c16_127, %c0_128] : memref<228x32xf32, #tpu.memory_space<vmem>>, vector<196x32xf32>
    tpu.vector_store %arg19[%c16_127, %c0_128], %178 {strides = array<i32>} : memref<228x32xf32, #tpu.memory_space<vmem>>, vector<196x32xf32>,
    %c1_129 = arith.constant 1 : index
    %c0_130 = arith.constant 0 : index
    %180 = vector.load %arg19[%c1_129, %c0_130] : memref<228x32xf32, #tpu.memory_space<vmem>>, vector<196x32xf32>
    %c0_131 = arith.constant 0 : index
    %c0_132 = arith.constant 0 : index
    %181 = vector.load %arg8[%c0_131, %c0_132] : memref<288x32xf32, #tpu.memory_space<vmem>>, vector<32x32xf32>
    %cst_133 = arith.constant dense<0.000000e+00> : vector<196x32xf32>
    %182 = tpu.matmul %180, %181, %cst_133 {dimension_numbers = #tpu.dot_dimension_numbers<[1], [0], [0], [1], [0, 0, 1, 1], [], []>} : vector<196x32xf32>, vector<32x32xf32>, vector<196x32xf32> -> vector<196x32xf32>
    %c2_134 = arith.constant 2 : index
    %c0_135 = arith.constant 0 : index
    %183 = vector.load %arg19[%c2_134, %c0_135] : memref<228x32xf32, #tpu.memory_space<vmem>>, vector<196x32xf32>
    %c32_136 = arith.constant 32 : index
    %c0_137 = arith.constant 0 : index
    %184 = vector.load %arg8[%c32_136, %c0_137] : memref<288x32xf32, #tpu.memory_space<vmem>>, vector<32x32xf32>
    %cst_138 = arith.constant dense<0.000000e+00> : vector<196x32xf32>
    %185 = tpu.matmul %183, %184, %cst_138 {dimension_numbers = #tpu.dot_dimension_numbers<[1], [0], [0], [1], [0, 0, 1, 1], [], []>} : vector<196x32xf32>, vector<32x32xf32>, vector<196x32xf32> -> vector<196x32xf32>
    %186 = arith.addf %182, %185 : vector<196x32xf32>
    %c3_139 = arith.constant 3 : index
    %c0_140 = arith.constant 0 : index
    %187 = vector.load %arg19[%c3_139, %c0_140] : memref<228x32xf32, #tpu.memory_space<vmem>>, vector<196x32xf32>
    %c64_141 = arith.constant 64 : index
    %c0_142 = arith.constant 0 : index
    %188 = vector.load %arg8[%c64_141, %c0_142] : memref<288x32xf32, #tpu.memory_space<vmem>>, vector<32x32xf32>
    %cst_143 = arith.constant dense<0.000000e+00> : vector<196x32xf32>
    %189 = tpu.matmul %187, %188, %cst_143 {dimension_numbers = #tpu.dot_dimension_numbers<[1], [0], [0], [1], [0, 0, 1, 1], [], []>} : vector<196x32xf32>, vector<32x32xf32>, vector<196x32xf32> -> vector<196x32xf32>
    %190 = arith.addf %186, %189 : vector<196x32xf32>
    %c15_144 = arith.constant 15 : index
    %c0_145 = arith.constant 0 : index
    %191 = vector.load %arg19[%c15_144, %c0_145] : memref<228x32xf32, #tpu.memory_space<vmem>>, vector<196x32xf32>
    %c96_146 = arith.constant 96 : index
    %c0_147 = arith.constant 0 : index
    %192 = vector.load %arg8[%c96_146, %c0_147] : memref<288x32xf32, #tpu.memory_space<vmem>>, vector<32x32xf32>
    %cst_148 = arith.constant dense<0.000000e+00> : vector<196x32xf32>
    %193 = tpu.matmul %191, %192, %cst_148 {dimension_numbers = #tpu.dot_dimension_numbers<[1], [0], [0], [1], [0, 0, 1, 1], [], []>} : vector<196x32xf32>, vector<32x32xf32>, vector<196x32xf32> -> vector<196x32xf32>
    %194 = arith.addf %190, %193 : vector<196x32xf32>
    %c16_149 = arith.constant 16 : index
    %c0_150 = arith.constant 0 : index
    %195 = vector.load %arg19[%c16_149, %c0_150] : memref<228x32xf32, #tpu.memory_space<vmem>>, vector<196x32xf32>
    %c128_151 = arith.constant 128 : index
    %c0_152 = arith.constant 0 : index
    %196 = vector.load %arg8[%c128_151, %c0_152] : memref<288x32xf32, #tpu.memory_space<vmem>>, vector<32x32xf32>
    %cst_153 = arith.constant dense<0.000000e+00> : vector<196x32xf32>
    %197 = tpu.matmul %195, %196, %cst_153 {dimension_numbers = #tpu.dot_dimension_numbers<[1], [0], [0], [1], [0, 0, 1, 1], [], []>} : vector<196x32xf32>, vector<32x32xf32>, vector<196x32xf32> -> vector<196x32xf32>
    %198 = arith.addf %194, %197 : vector<196x32xf32>
    %c17_154 = arith.constant 17 : index
    %c0_155 = arith.constant 0 : index
    %199 = vector.load %arg19[%c17_154, %c0_155] : memref<228x32xf32, #tpu.memory_space<vmem>>, vector<196x32xf32>
    %c160 = arith.constant 160 : index
    %c0_156 = arith.constant 0 : index
    %200 = vector.load %arg8[%c160, %c0_156] : memref<288x32xf32, #tpu.memory_space<vmem>>, vector<32x32xf32>
    %cst_157 = arith.constant dense<0.000000e+00> : vector<196x32xf32>
    %201 = tpu.matmul %199, %200, %cst_157 {dimension_numbers = #tpu.dot_dimension_numbers<[1], [0], [0], [1], [0, 0, 1, 1], [], []>} : vector<196x32xf32>, vector<32x32xf32>, vector<196x32xf32> -> vector<196x32xf32>
    %202 = arith.addf %198, %201 : vector<196x32xf32>
    %c29_158 = arith.constant 29 : index
    %c0_159 = arith.constant 0 : index
    %203 = vector.load %arg19[%c29_158, %c0_159] : memref<228x32xf32, #tpu.memory_space<vmem>>, vector<196x32xf32>
    %c192 = arith.constant 192 : index
    %c0_160 = arith.constant 0 : index
    %204 = vector.load %arg8[%c192, %c0_160] : memref<288x32xf32, #tpu.memory_space<vmem>>, vector<32x32xf32>
    %cst_161 = arith.constant dense<0.000000e+00> : vector<196x32xf32>
    %205 = tpu.matmul %203, %204, %cst_161 {dimension_numbers = #tpu.dot_dimension_numbers<[1], [0], [0], [1], [0, 0, 1, 1], [], []>} : vector<196x32xf32>, vector<32x32xf32>, vector<196x32xf32> -> vector<196x32xf32>
    %206 = arith.addf %202, %205 : vector<196x32xf32>
    %c30_162 = arith.constant 30 : index
    %c0_163 = arith.constant 0 : index
    %207 = vector.load %arg19[%c30_162, %c0_163] : memref<228x32xf32, #tpu.memory_space<vmem>>, vector<196x32xf32>
    %c224 = arith.constant 224 : index
    %c0_164 = arith.constant 0 : index
    %208 = vector.load %arg8[%c224, %c0_164] : memref<288x32xf32, #tpu.memory_space<vmem>>, vector<32x32xf32>
    %cst_165 = arith.constant dense<0.000000e+00> : vector<196x32xf32>
    %209 = tpu.matmul %207, %208, %cst_165 {dimension_numbers = #tpu.dot_dimension_numbers<[1], [0], [0], [1], [0, 0, 1, 1], [], []>} : vector<196x32xf32>, vector<32x32xf32>, vector<196x32xf32> -> vector<196x32xf32>
    %210 = arith.addf %206, %209 : vector<196x32xf32>
    %c31_166 = arith.constant 31 : index
    %c0_167 = arith.constant 0 : index
    %211 = vector.load %arg19[%c31_166, %c0_167] : memref<228x32xf32, #tpu.memory_space<vmem>>, vector<196x32xf32>
    %c256 = arith.constant 256 : index
    %c0_168 = arith.constant 0 : index
    %212 = vector.load %arg8[%c256, %c0_168] : memref<288x32xf32, #tpu.memory_space<vmem>>, vector<32x32xf32>
    %cst_169 = arith.constant dense<0.000000e+00> : vector<196x32xf32>
    %213 = tpu.matmul %211, %212, %cst_169 {dimension_numbers = #tpu.dot_dimension_numbers<[1], [0], [0], [1], [0, 0, 1, 1], [], []>} : vector<196x32xf32>, vector<32x32xf32>, vector<196x32xf32> -> vector<196x32xf32>
    %214 = arith.addf %210, %213 : vector<196x32xf32>
    %c0_170 = arith.constant 0 : index
    %c0_171 = arith.constant 0 : index
    %215 = vector.load %arg9[%c0_170, %c0_171] : memref<1x32xf32, #tpu.memory_space<vmem>>, vector<1x32xf32>
    %216 = vector.broadcast %215 : vector<1x32xf32> to vector<196x32xf32>
    %217 = arith.mulf %214, %216 : vector<196x32xf32>
    %c0_172 = arith.constant 0 : index
    %c0_173 = arith.constant 0 : index
    %218 = vector.load %arg10[%c0_172, %c0_173] : memref<1x32xf32, #tpu.memory_space<vmem>>, vector<1x32xf32>
    %219 = vector.broadcast %218 : vector<1x32xf32> to vector<196x32xf32>
    %220 = arith.addf %217, %219 : vector<196x32xf32>
    %cst_174 = arith.constant 0.707106769 : f32
    %221 = vector.broadcast %cst_174 : f32 to vector<196x32xf32>
    %222 = arith.mulf %220, %221 : vector<196x32xf32>
    %223 = math.absf %222 : vector<196x32xf32>
    %cst_175 = arith.constant 0.327591091 : f32
    %224 = vector.broadcast %cst_175 : f32 to vector<196x32xf32>
    %225 = arith.mulf %224, %223 : vector<196x32xf32>
    %cst_176 = arith.constant 1.000000e+00 : f32
    %226 = vector.broadcast %cst_176 : f32 to vector<196x32xf32>
    %227 = arith.addf %226, %225 : vector<196x32xf32>
    %228 = tpu.reciprocal %227 {approx = true} : vector<196x32xf32> -> vector<196x32xf32>
    %cst_177 = arith.constant 1.06140542 : f32
    %229 = vector.broadcast %cst_177 : f32 to vector<196x32xf32>
    %230 = arith.mulf %229, %228 : vector<196x32xf32>
    %cst_178 = arith.constant -1.45315206 : f32
    %231 = vector.broadcast %cst_178 : f32 to vector<196x32xf32>
    %232 = arith.addf %230, %231 : vector<196x32xf32>
    %233 = arith.mulf %232, %228 : vector<196x32xf32>
    %cst_179 = arith.constant 1.42141378 : f32
    %234 = vector.broadcast %cst_179 : f32 to vector<196x32xf32>
    %235 = arith.addf %233, %234 : vector<196x32xf32>
    %236 = arith.mulf %235, %228 : vector<196x32xf32>
    %cst_180 = arith.constant -0.284496725 : f32
    %237 = vector.broadcast %cst_180 : f32 to vector<196x32xf32>
    %238 = arith.addf %236, %237 : vector<196x32xf32>
    %239 = arith.mulf %238, %228 : vector<196x32xf32>
    %cst_181 = arith.constant 0.254829586 : f32
    %240 = vector.broadcast %cst_181 : f32 to vector<196x32xf32>
    %241 = arith.addf %239, %240 : vector<196x32xf32>
    %242 = arith.mulf %241, %228 : vector<196x32xf32>
    %cst_182 = arith.constant 0.000000e+00 : f32
    %243 = vector.broadcast %cst_182 : f32 to vector<196x32xf32>
    %244 = arith.subf %243, %223 : vector<196x32xf32>
    %245 = arith.mulf %244, %223 : vector<196x32xf32>
    %246 = math.exp %245 : vector<196x32xf32>
    %247 = arith.mulf %242, %246 : vector<196x32xf32>
    %cst_183 = arith.constant 1.000000e+00 : f32
    %248 = vector.broadcast %cst_183 : f32 to vector<196x32xf32>
    %249 = arith.subf %248, %247 : vector<196x32xf32>
    %cst_184 = arith.constant 0.000000e+00 : f32
    %250 = vector.broadcast %cst_184 : f32 to vector<196x32xf32>
    %251 = arith.cmpf oge, %222, %250 : vector<196x32xf32>
    %cst_185 = arith.constant 0.000000e+00 : f32
    %252 = vector.broadcast %cst_185 : f32 to vector<196x32xf32>
    %253 = arith.subf %252, %249 : vector<196x32xf32>
    %254 = arith.select %251, %249, %253 : vector<196x32xi1>, vector<196x32xf32>
    %cst_186 = arith.constant 5.000000e-01 : f32
    %255 = vector.broadcast %cst_186 : f32 to vector<196x32xf32>
    %256 = arith.mulf %255, %220 : vector<196x32xf32>
    %cst_187 = arith.constant 1.000000e+00 : f32
    %257 = vector.broadcast %cst_187 : f32 to vector<196x32xf32>
    %258 = arith.addf %257, %254 : vector<196x32xf32>
    %259 = arith.mulf %256, %258 : vector<196x32xf32>
    %c0_188 = arith.constant 0 : index
    %c0_189 = arith.constant 0 : index
    %260 = vector.load %arg12[%c0_188, %c0_189] : memref<9x196xf32, #tpu.memory_space<vmem>>, vector<9x196xf32>
    %cst_190 = arith.constant dense<0.000000e+00> : vector<9x32xf32>
    %261 = tpu.matmul %260, %259, %cst_190 {dimension_numbers = #tpu.dot_dimension_numbers<[1], [0], [0], [1], [0, 0, 1, 1], [], []>} : vector<9x196xf32>, vector<196x32xf32>, vector<9x32xf32> -> vector<9x32xf32>
    %c0_191 = arith.constant 0 : index
    %c0_192 = arith.constant 0 : index
    %262 = vector.load %arg14[%c0_191, %c0_192] : memref<1x32xf32, #tpu.memory_space<vmem>>, vector<1x32xf32>
    %263 = vector.extract_strided_slice %261 {offsets = [0, 0], sizes = [1, 32], strides = [1, 1]} : vector<9x32xf32> to vector<1x32xf32>
    %c0_193 = arith.constant 0 : index
    %c0_194 = arith.constant 0 : index
    %264 = vector.load %arg13[%c0_193, %c0_194] : memref<288x32xf32, #tpu.memory_space<vmem>>, vector<32x32xf32>
    %cst_195 = arith.constant dense<0.000000e+00> : vector<1x32xf32>
    %265 = tpu.matmul %263, %264, %cst_195 {dimension_numbers = #tpu.dot_dimension_numbers<[1], [0], [0], [1], [0, 0, 1, 1], [], []>} : vector<1x32xf32>, vector<32x32xf32>, vector<1x32xf32> -> vector<1x32xf32>
    %266 = arith.addf %262, %265 : vector<1x32xf32>
    %267 = vector.extract_strided_slice %261 {offsets = [1, 0], sizes = [1, 32], strides = [1, 1]} : vector<9x32xf32> to vector<1x32xf32>
    %c32_196 = arith.constant 32 : index
    %c0_197 = arith.constant 0 : index
    %268 = vector.load %arg13[%c32_196, %c0_197] : memref<288x32xf32, #tpu.memory_space<vmem>>, vector<32x32xf32>
    %cst_198 = arith.constant dense<0.000000e+00> : vector<1x32xf32>
    %269 = tpu.matmul %267, %268, %cst_198 {dimension_numbers = #tpu.dot_dimension_numbers<[1], [0], [0], [1], [0, 0, 1, 1], [], []>} : vector<1x32xf32>, vector<32x32xf32>, vector<1x32xf32> -> vector<1x32xf32>
    %270 = arith.addf %266, %269 : vector<1x32xf32>
    %271 = vector.extract_strided_slice %261 {offsets = [2, 0], sizes = [1, 32], strides = [1, 1]} : vector<9x32xf32> to vector<1x32xf32>
    %c64_199 = arith.constant 64 : index
    %c0_200 = arith.constant 0 : index
    %272 = vector.load %arg13[%c64_199, %c0_200] : memref<288x32xf32, #tpu.memory_space<vmem>>, vector<32x32xf32>
    %cst_201 = arith.constant dense<0.000000e+00> : vector<1x32xf32>
    %273 = tpu.matmul %271, %272, %cst_201 {dimension_numbers = #tpu.dot_dimension_numbers<[1], [0], [0], [1], [0, 0, 1, 1], [], []>} : vector<1x32xf32>, vector<32x32xf32>, vector<1x32xf32> -> vector<1x32xf32>
    %274 = arith.addf %270, %273 : vector<1x32xf32>
    %275 = vector.extract_strided_slice %261 {offsets = [3, 0], sizes = [1, 32], strides = [1, 1]} : vector<9x32xf32> to vector<1x32xf32>
    %c96_202 = arith.constant 96 : index
    %c0_203 = arith.constant 0 : index
    %276 = vector.load %arg13[%c96_202, %c0_203] : memref<288x32xf32, #tpu.memory_space<vmem>>, vector<32x32xf32>
    %cst_204 = arith.constant dense<0.000000e+00> : vector<1x32xf32>
    %277 = tpu.matmul %275, %276, %cst_204 {dimension_numbers = #tpu.dot_dimension_numbers<[1], [0], [0], [1], [0, 0, 1, 1], [], []>} : vector<1x32xf32>, vector<32x32xf32>, vector<1x32xf32> -> vector<1x32xf32>
    %278 = arith.addf %274, %277 : vector<1x32xf32>
    %279 = vector.extract_strided_slice %261 {offsets = [4, 0], sizes = [1, 32], strides = [1, 1]} : vector<9x32xf32> to vector<1x32xf32>
    %c128_205 = arith.constant 128 : index
    %c0_206 = arith.constant 0 : index
    %280 = vector.load %arg13[%c128_205, %c0_206] : memref<288x32xf32, #tpu.memory_space<vmem>>, vector<32x32xf32>
    %cst_207 = arith.constant dense<0.000000e+00> : vector<1x32xf32>
    %281 = tpu.matmul %279, %280, %cst_207 {dimension_numbers = #tpu.dot_dimension_numbers<[1], [0], [0], [1], [0, 0, 1, 1], [], []>} : vector<1x32xf32>, vector<32x32xf32>, vector<1x32xf32> -> vector<1x32xf32>
    %282 = arith.addf %278, %281 : vector<1x32xf32>
    %283 = vector.extract_strided_slice %261 {offsets = [5, 0], sizes = [1, 32], strides = [1, 1]} : vector<9x32xf32> to vector<1x32xf32>
    %c160_208 = arith.constant 160 : index
    %c0_209 = arith.constant 0 : index
    %284 = vector.load %arg13[%c160_208, %c0_209] : memref<288x32xf32, #tpu.memory_space<vmem>>, vector<32x32xf32>
    %cst_210 = arith.constant dense<0.000000e+00> : vector<1x32xf32>
    %285 = tpu.matmul %283, %284, %cst_210 {dimension_numbers = #tpu.dot_dimension_numbers<[1], [0], [0], [1], [0, 0, 1, 1], [], []>} : vector<1x32xf32>, vector<32x32xf32>, vector<1x32xf32> -> vector<1x32xf32>
    %286 = arith.addf %282, %285 : vector<1x32xf32>
    %287 = vector.extract_strided_slice %261 {offsets = [6, 0], sizes = [1, 32], strides = [1, 1]} : vector<9x32xf32> to vector<1x32xf32>
    %c192_211 = arith.constant 192 : index
    %c0_212 = arith.constant 0 : index
    %288 = vector.load %arg13[%c192_211, %c0_212] : memref<288x32xf32, #tpu.memory_space<vmem>>, vector<32x32xf32>
    %cst_213 = arith.constant dense<0.000000e+00> : vector<1x32xf32>
    %289 = tpu.matmul %287, %288, %cst_213 {dimension_numbers = #tpu.dot_dimension_numbers<[1], [0], [0], [1], [0, 0, 1, 1], [], []>} : vector<1x32xf32>, vector<32x32xf32>, vector<1x32xf32> -> vector<1x32xf32>
    %290 = arith.addf %286, %289 : vector<1x32xf32>
    %291 = vector.extract_strided_slice %261 {offsets = [7, 0], sizes = [1, 32], strides = [1, 1]} : vector<9x32xf32> to vector<1x32xf32>
    %c224_214 = arith.constant 224 : index
    %c0_215 = arith.constant 0 : index
    %292 = vector.load %arg13[%c224_214, %c0_215] : memref<288x32xf32, #tpu.memory_space<vmem>>, vector<32x32xf32>
    %cst_216 = arith.constant dense<0.000000e+00> : vector<1x32xf32>
    %293 = tpu.matmul %291, %292, %cst_216 {dimension_numbers = #tpu.dot_dimension_numbers<[1], [0], [0], [1], [0, 0, 1, 1], [], []>} : vector<1x32xf32>, vector<32x32xf32>, vector<1x32xf32> -> vector<1x32xf32>
    %294 = arith.addf %290, %293 : vector<1x32xf32>
    %295 = vector.extract_strided_slice %261 {offsets = [8, 0], sizes = [1, 32], strides = [1, 1]} : vector<9x32xf32> to vector<1x32xf32>
    %c256_217 = arith.constant 256 : index
    %c0_218 = arith.constant 0 : index
    %296 = vector.load %arg13[%c256_217, %c0_218] : memref<288x32xf32, #tpu.memory_space<vmem>>, vector<32x32xf32>
    %cst_219 = arith.constant dense<0.000000e+00> : vector<1x32xf32>
    %297 = tpu.matmul %295, %296, %cst_219 {dimension_numbers = #tpu.dot_dimension_numbers<[1], [0], [0], [1], [0, 0, 1, 1], [], []>} : vector<1x32xf32>, vector<32x32xf32>, vector<1x32xf32> -> vector<1x32xf32>
    %298 = arith.addf %294, %297 : vector<1x32xf32>
    %cst_220 = arith.constant 0.707106769 : f32
    %299 = vector.broadcast %cst_220 : f32 to vector<1x32xf32>
    %300 = arith.mulf %298, %299 : vector<1x32xf32>
    %301 = math.absf %300 : vector<1x32xf32>
    %cst_221 = arith.constant 0.327591091 : f32
    %302 = vector.broadcast %cst_221 : f32 to vector<1x32xf32>
    %303 = arith.mulf %302, %301 : vector<1x32xf32>
    %cst_222 = arith.constant 1.000000e+00 : f32
    %304 = vector.broadcast %cst_222 : f32 to vector<1x32xf32>
    %305 = arith.addf %304, %303 : vector<1x32xf32>
    %306 = tpu.reciprocal %305 {approx = true} : vector<1x32xf32> -> vector<1x32xf32>
    %cst_223 = arith.constant 1.06140542 : f32
    %307 = vector.broadcast %cst_223 : f32 to vector<1x32xf32>
    %308 = arith.mulf %307, %306 : vector<1x32xf32>
    %cst_224 = arith.constant -1.45315206 : f32
    %309 = vector.broadcast %cst_224 : f32 to vector<1x32xf32>
    %310 = arith.addf %308, %309 : vector<1x32xf32>
    %311 = arith.mulf %310, %306 : vector<1x32xf32>
    %cst_225 = arith.constant 1.42141378 : f32
    %312 = vector.broadcast %cst_225 : f32 to vector<1x32xf32>
    %313 = arith.addf %311, %312 : vector<1x32xf32>
    %314 = arith.mulf %313, %306 : vector<1x32xf32>
    %cst_226 = arith.constant -0.284496725 : f32
    %315 = vector.broadcast %cst_226 : f32 to vector<1x32xf32>
    %316 = arith.addf %314, %315 : vector<1x32xf32>
    %317 = arith.mulf %316, %306 : vector<1x32xf32>
    %cst_227 = arith.constant 0.254829586 : f32
    %318 = vector.broadcast %cst_227 : f32 to vector<1x32xf32>
    %319 = arith.addf %317, %318 : vector<1x32xf32>
    %320 = arith.mulf %319, %306 : vector<1x32xf32>
    %cst_228 = arith.constant 0.000000e+00 : f32
    %321 = vector.broadcast %cst_228 : f32 to vector<1x32xf32>
    %322 = arith.subf %321, %301 : vector<1x32xf32>
    %323 = arith.mulf %322, %301 : vector<1x32xf32>
    %324 = math.exp %323 : vector<1x32xf32>
    %325 = arith.mulf %320, %324 : vector<1x32xf32>
    %cst_229 = arith.constant 1.000000e+00 : f32
    %326 = vector.broadcast %cst_229 : f32 to vector<1x32xf32>
    %327 = arith.subf %326, %325 : vector<1x32xf32>
    %cst_230 = arith.constant 0.000000e+00 : f32
    %328 = vector.broadcast %cst_230 : f32 to vector<1x32xf32>
    %329 = arith.cmpf oge, %300, %328 : vector<1x32xf32>
    %cst_231 = arith.constant 0.000000e+00 : f32
    %330 = vector.broadcast %cst_231 : f32 to vector<1x32xf32>
    %331 = arith.subf %330, %327 : vector<1x32xf32>
    %332 = arith.select %329, %327, %331 : vector<1x32xi1>, vector<1x32xf32>
    %cst_232 = arith.constant 5.000000e-01 : f32
    %333 = vector.broadcast %cst_232 : f32 to vector<1x32xf32>
    %334 = arith.mulf %333, %298 : vector<1x32xf32>
    %cst_233 = arith.constant 1.000000e+00 : f32
    %335 = vector.broadcast %cst_233 : f32 to vector<1x32xf32>
    %336 = arith.addf %335, %332 : vector<1x32xf32>
    %337 = arith.mulf %334, %336 : vector<1x32xf32>
    %c0_234 = arith.constant 0 : index
    %c0_235 = arith.constant 0 : index
    %338 = vector.load %arg15[%c0_234, %c0_235] : memref<1x32xf32, #tpu.memory_space<vmem>>, vector<1x32xf32>
    %339 = arith.mulf %337, %338 : vector<1x32xf32>
    %cst_236 = arith.constant dense<0.000000e+00> : vector<1xf32>
    %340 = vector.multi_reduction <add>, %339, %cst_236 [1] : vector<1x32xf32> to vector<1xf32>
    %341 = vector.shape_cast %340 : vector<1xf32> to vector<1x1xf32>
    %c0_237 = arith.constant 0 : index
    %c0_238 = arith.constant 0 : index
    %342 = vector.load %arg16[%c0_237, %c0_238] : memref<1x1xf32, #tpu.memory_space<vmem>>, vector<1x1xf32>
    %343 = arith.addf %341, %342 : vector<1x1xf32>
    %344 = math.tanh %343 : vector<1x1xf32>
    %c0_239 = arith.constant 0 : index
    %c0_240 = arith.constant 0 : index
    %c0_241 = arith.constant 0 : index
    %345 = vector.load %arg17[%c0_239, %c0_240, %c0_241] : memref<1x1x1xf32, #tpu.memory_space<vmem>>, vector<1x1x1xf32>
    %346 = vector.shape_cast %345 : vector<1x1x1xf32> to vector<1x1xf32>
    %347 = vector.shape_cast %344 : vector<1x1xf32> to vector<1x1x1xf32>
    tpu.vector_store %arg17[%c0_239, %c0_240, %c0_241], %347 {strides = array<i32>} : memref<1x1x1xf32, #tpu.memory_space<vmem>>, vector<1x1x1xf32>,
    return
  }
  func.func @transform_0(%arg0: i32) -> (i32, i32, i32) {
    %c0_i32 = arith.constant 0 : i32
    %c0_i32_0 = arith.constant 0 : i32
    %c0_i32_1 = arith.constant 0 : i32
    return %arg0, %c0_i32, %c0_i32_0 : i32, i32, i32
  }
  func.func @transform_1(%arg0: i32) -> (i32, i32) {
    %c0_i32 = arith.constant 0 : i32
    %c0_i32_0 = arith.constant 0 : i32
    %c0_i32_1 = arith.constant 0 : i32
    return %c0_i32, %c0_i32_0 : i32, i32
  }
  func.func @transform_2(%arg0: i32) -> (i32, i32) {
    %c0_i32 = arith.constant 0 : i32
    %c0_i32_0 = arith.constant 0 : i32
    %c0_i32_1 = arith.constant 0 : i32
    return %c0_i32, %c0_i32_0 : i32, i32
  }
  func.func @transform_3(%arg0: i32) -> (i32, i32) {
    %c0_i32 = arith.constant 0 : i32
    %c0_i32_0 = arith.constant 0 : i32
    %c0_i32_1 = arith.constant 0 : i32
    return %c0_i32, %c0_i32_0 : i32, i32
  }
  func.func @transform_4(%arg0: i32) -> (i32, i32) {
    %c0_i32 = arith.constant 0 : i32
    %c0_i32_0 = arith.constant 0 : i32
    %c0_i32_1 = arith.constant 0 : i32
    return %c0_i32, %c0_i32_0 : i32, i32
  }
  func.func @transform_5(%arg0: i32) -> (i32, i32) {
    %c0_i32 = arith.constant 0 : i32
    %c0_i32_0 = arith.constant 0 : i32
    %c0_i32_1 = arith.constant 0 : i32
    return %c0_i32, %c0_i32_0 : i32, i32
  }
  func.func @transform_6(%arg0: i32) -> (i32, i32) {
    %c0_i32 = arith.constant 0 : i32
    %c0_i32_0 = arith.constant 0 : i32
    %c0_i32_1 = arith.constant 0 : i32
    return %c0_i32, %c0_i32_0 : i32, i32
  }
  func.func @transform_7(%arg0: i32) -> (i32, i32) {
    %c0_i32 = arith.constant 0 : i32
    %c0_i32_0 = arith.constant 0 : i32
    %c0_i32_1 = arith.constant 0 : i32
    return %c0_i32, %c0_i32_0 : i32, i32
  }
  func.func @transform_8(%arg0: i32) -> (i32, i32) {
    %c0_i32 = arith.constant 0 : i32
    %c0_i32_0 = arith.constant 0 : i32
    %c0_i32_1 = arith.constant 0 : i32
    return %c0_i32, %c0_i32_0 : i32, i32
  }
  func.func @transform_9(%arg0: i32) -> (i32, i32) {
    %c0_i32 = arith.constant 0 : i32
    %c0_i32_0 = arith.constant 0 : i32
    %c0_i32_1 = arith.constant 0 : i32
    return %c0_i32, %c0_i32_0 : i32, i32
  }
  func.func @transform_10(%arg0: i32) -> (i32, i32) {
    %c0_i32 = arith.constant 0 : i32
    %c0_i32_0 = arith.constant 0 : i32
    %c0_i32_1 = arith.constant 0 : i32
    return %c0_i32, %c0_i32_0 : i32, i32
  }
  func.func @transform_11(%arg0: i32) -> (i32, i32) {
    %c0_i32 = arith.constant 0 : i32
    %c0_i32_0 = arith.constant 0 : i32
    %c0_i32_1 = arith.constant 0 : i32
    return %c0_i32, %c0_i32_0 : i32, i32
  }
  func.func @transform_12(%arg0: i32) -> (i32, i32) {
    %c0_i32 = arith.constant 0 : i32
    %c0_i32_0 = arith.constant 0 : i32
    %c0_i32_1 = arith.constant 0 : i32
    return %c0_i32, %c0_i32_0 : i32, i32
  }
  func.func @transform_13(%arg0: i32) -> (i32, i32) {
    %c0_i32 = arith.constant 0 : i32
    %c0_i32_0 = arith.constant 0 : i32
    %c0_i32_1 = arith.constant 0 : i32
    return %c0_i32, %c0_i32_0 : i32, i32
  }
  func.func @transform_14(%arg0: i32) -> (i32, i32) {
    %c0_i32 = arith.constant 0 : i32
    %c0_i32_0 = arith.constant 0 : i32
    %c0_i32_1 = arith.constant 0 : i32
    return %c0_i32, %c0_i32_0 : i32, i32
  }
  func.func @transform_15(%arg0: i32) -> (i32, i32) {
    %c0_i32 = arith.constant 0 : i32
    %c0_i32_0 = arith.constant 0 : i32
    %c0_i32_1 = arith.constant 0 : i32
    return %c0_i32, %c0_i32_0 : i32, i32
  }
  func.func @transform_16(%arg0: i32) -> (i32, i32, i32) {
    %c0_i32 = arith.constant 0 : i32
    %c0_i32_0 = arith.constant 0 : i32
    %c0_i32_1 = arith.constant 0 : i32
    return %arg0, %c0_i32, %c0_i32_0 : i32, i32, i32
  }
}

</mosaic_0001>

<bundles_post_ra>
// kernel: cnn_forward.1
= control target key start
LH: loop header
LB: loop body
LE: loop exit
PB: predicated region body
PF: predicated region fallthrough
CT: control target
= control target key end

     0   :  { %s17858_s23 = smov 0   ;;  %s23306_s0 = inlined_call_operand.vmem [shape: f32[2,228,16], index: 0, kind: input, shape index: {}]   ;;  %s23307_s1 = inlined_call_operand.vmem [shape: f32[144,16], index: 1, kind: input, shape index: {}]   ;;  %s23308_s2 = inlined_call_operand.vmem [shape: f32[1,16], index: 2, kind: input, shape index: {}]   ;;  %s23309_s3 = inlined_call_operand.vmem [shape: f32[1,16], index: 3, kind: input, shape index: {}]   ;;  %s23310_s4 = inlined_call_operand.vmem [shape: f32[144,32], index: 4, kind: input, shape index: {}]   ;;  %s23311_s5 = inlined_call_operand.vmem [shape: f32[1,32], index: 5, kind: input, shape index: {}]   ;;  %s23312_s6 = inlined_call_operand.vmem [shape: f32[1,32], index: 6, kind: input, shape index: {}]   ;;  %s23313_s7 = inlined_call_operand.vmem [shape: f32[288,32], index: 7, kind: input, shape index: {}]   ;;  %s23314_s8 = inlined_call_operand.vmem [shape: f32[1,32], index: 8, kind: input, shape index: {}]   ;;  %s23315_s9 = inlined_call_operand.vmem [shape: f32[1,32], index: 9, kind: input, shape index: {}]   ;;  %s23316_s10 = inlined_call_operand.vmem [shape: f32[196,1], index: 10, kind: input, shape index: {}]   ;;  %s23317_s11 = inlined_call_operand.vmem [shape: f32[9,196], index: 11, kind: input, shape index: {}]   ;;  %s23318_s12 = inlined_call_operand.vmem [shape: f32[288,32], index: 12, kind: input, shape index: {}]   ;;  %s23319_s13 = inlined_call_operand.vmem [shape: f32[1,32], index: 13, kind: input, shape index: {}]   ;;  %s23320_s14 = inlined_call_operand.vmem [shape: f32[1,32], index: 14, kind: input, shape index: {}]   ;;  %s23321_s15 = inlined_call_operand.<no memory space> [shape: f32[1,1], index: 15, kind: input, shape index: {}]   ;;  %s23322_s16 = inlined_call_operand.vmem [shape: f32[2,1,1], index: 16, kind: output, shape index: {}]  }
   0x1   :  { %23345 = sst [smem:[#allocation20_spill]] %s23306_s0  ;;  %v21_v0 = vstv %s23321_s15 }
   0x2   :  { %22 = vst [vmem:[#allocation4] sm:$0x1] %v21_v0 }
   0x3 LB: > { %s12278_s24 = sadd.s32 4294967295, %s17764_s23   ;;  %p12282_p0 = scmp.ge.s32.totalorder %s17764_s23, 1  ;;  %s17764_s23 = sphi %s17858_s23, %s28_s23  }
   0x4   : > { %p464_p1 = scmp.lt.s32.totalorder %s17764_s23, 3 }
   0x6   : > { %p465_p2 = pnand %p12282_p0, %p464_p1 }
   0x8   : > { %468 = sbr.rel (%p465_p2) target bundleno = 3790 (0xece), region = 84 }
   0xf   : > { %v597_v1 = vld [vmem:[%s23307_s1 + $0x10] sm:$0xff]  ;;  %v598_v2 = vld [vmem:[%s23307_s1 + $0x18] sm:$0xff]  ;;  %v1789_v3 = vld [vmem:[%s23307_s1 + $0x40] sm:$0xff]  ;;  %v23323_v4 = vmov 0.0|0.0   ;;  %p17882_p3 = scmp.lt.s32.totalorder %s12278_s24, 1  ;;  %vm599_vm0 = vcmask 130048  }
  0x10   : > { %16039 = vmatprep.subr.bf16.mxu1 %v23323_v4  ;;  %16051 = vmatprep.subr.bf16.mxu0 %v23323_v4  ;;  %v16040_v5 = vpack.c.bf16 %v598_v2, %v597_v1  ;;  %v1790_v6 = vld [vmem:[%s23307_s1 + $0x48] sm:$0xff]  ;;  %vm17767_vm1 = vmmov 0   ;;  %v23325_v8 = vmov 0.0   ;;  %v2106_v9 = vld [vmem:[%s23307_s1 + $0x50] sm:$0xff]  ;;  %v2107_v10 = vld [vmem:[%s23307_s1 + $0x58] sm:$0xff]  ;;  %s23347_s30 = sld [smem:[#allocation20_spill]] }
  0x11   : > { %v17886_v7 = vpack.c.bf16 %v1790_v6, %v1789_v3  ;;  %13775 = vmatprep.mubr.msk.f32.mxu1 %vm17767_vm1, %v23325_v8  ;;  %14091 = vmatprep.mubr.msk.f32.mxu0 %vm17767_vm1, %v23325_v8  ;;  %4063 = vst.msk [vmem:[#allocation2] sm:$0xff] %vm599_vm0, %v23325_v8  ;;  %4064 = vst.msk [vmem:[#allocation2 + $0x8] sm:$0xff] %vm599_vm0, %v23325_v8  ;;  %s23403_s24 = smov (!%p17882_p3, %s12278_s24), 1  ;;  %v570_v11 = vld [vmem:[%s23307_s1] sm:$0xff]  ;;  %v571_v12 = vld [vmem:[%s23307_s1 + $0x8] sm:$0xff]  ;;  %v16055_v13 = vpack.c.bf16 %v2107_v10, %v2106_v9 }
  0x12   : > { %4065 = vst.msk [vmem:[#allocation2 + $0x10] sm:$0xff] %vm599_vm0, %v23325_v8  ;;  %4066 = vst.msk [vmem:[#allocation2 + $0x18] sm:$0xff] %vm599_vm0, %v23325_v8  ;;  %16041 = vmatpush3.bf16.msra.mxu1 %v16040_v5  ;;  %s17431_s27 = smul.u32 232, %s23403_s24  ;;  %v16043_v14 = vpack.c.bf16 %v571_v12, %v570_v11  ;;  %v2423_v59 = vld [vmem:[%s23307_s1 + $0x60] sm:$0xff]  ;;  %v2424_v60 = vld [vmem:[%s23307_s1 + $0x68] sm:$0xff] }
  0x13   : > { %4067 = vst.msk [vmem:[#allocation2 + $0x20] sm:$0xff] %vm599_vm0, %v23325_v8  ;;  %4068 = vst.msk [vmem:[#allocation2 + $0x28] sm:$0xff] %vm599_vm0, %v23325_v8  ;;  %16053 = vmatpush3.bf16.msra.mxu0 %v17886_v7  ;;  %16042 = vmatprep.subr.bf16.mxu1 %v23323_v4  ;;  %v16058_v63 = vpack.c.bf16 %v2424_v60, %v2423_v59  ;;  %v1155_v5 = vld [vmem:[%s23307_s1 + $0x20] sm:$0xff]  ;;  %v1156_v6 = vld [vmem:[%s23307_s1 + $0x28] sm:$0xff] }
  0x14   : > { %4069 = vst.msk [vmem:[#allocation2 + $0x30] sm:$0xff] %vm599_vm0, %v23325_v8  ;;  %4070 = vst.msk [vmem:[#allocation2 + $0x38] sm:$0xff] %vm599_vm0, %v23325_v8  ;;  %16054 = vmatprep.subr.bf16.mxu0 %v23323_v4  ;;  %v16046_v11 = vpack.c.bf16 %v1156_v6, %v1155_v5 }
  0x15   : > { %4071 = vst.msk [vmem:[#allocation2 + $0x40] sm:$0xff] %vm599_vm0, %v23325_v8  ;;  %4072 = vst.msk [vmem:[#allocation2 + $0x48] sm:$0xff] %vm599_vm0, %v23325_v8 }
  0x16   : > { %4073 = vst.msk [vmem:[#allocation2 + $0x50] sm:$0xff] %vm599_vm0, %v23325_v8  ;;  %4074 = vst.msk [vmem:[#allocation2 + $0x58] sm:$0xff] %vm599_vm0, %v23325_v8  ;;  %s17973_s0 = scalar_lea.vmem %s23347_s30, %s17431_s27  ;;  %s519_s30 = scalar_lea.vmem %s23322_s16, %s23403_s24 }
  0x17   : > { %4075 = vst.msk [vmem:[#allocation2 + $0x60] sm:$0xff] %vm599_vm0, %v23325_v8  ;;  %4076 = vst.msk [vmem:[#allocation2 + $0x68] sm:$0xff] %vm599_vm0, %v23325_v8  ;;  %v572_v15 = vld [vmem:[%s17973_s0 + $0x2] sm:$0xff]  ;;  %v1764_v16 = vld [vmem:[%s17973_s0 + $0x10] sm:$0xff] }
  0x18   : > { %4077 = vst.msk [vmem:[#allocation2 + $0x70] sm:$0xff] %vm599_vm0, %v23325_v8  ;;  %4078 = vst.msk [vmem:[#allocation2 + $0x78] sm:$0xff] %vm599_vm0, %v23325_v8  ;;  %13776 = vmatmul.mubr.msk.f32.vlgmr.msra.gmra.mrb[0].mxu1 %vm599_vm0, %v572_v15  ;;  %14092 = vmatmul.mubr.msk.f32.vlgmr.msra.gmra.mrb[0].mxu0 %vm599_vm0, %v1764_v16  ;;  %v573_v17 = vld [vmem:[%s17973_s0 + $0xa] sm:$0xff]  ;;  %v1765_v18 = vld [vmem:[%s17973_s0 + $0x18] sm:$0xff] }
  0x19   : > { %4079 = vst.msk [vmem:[#allocation2 + $0x80] sm:$0xff] %vm599_vm0, %v23325_v8  ;;  %4080 = vst.msk [vmem:[#allocation2 + $0x88] sm:$0xff] %vm599_vm0, %v23325_v8  ;;  %13778 = vmatprep.mubr.msk.f32.mxu1 %vm17767_vm1, %v23325_v8  ;;  %14094 = vmatprep.mubr.msk.f32.mxu0 %vm17767_vm1, %v23325_v8  ;;  %v574_v19 = vld [vmem:[%s17973_s0 + $0x12] sm:$0xff]  ;;  %v1766_v20 = vld [vmem:[%s17973_s0 + $0x20] sm:$0xff] }
  0x1a   : > { %4081 = vst.msk [vmem:[#allocation2 + $0x90] sm:$0xff] %vm599_vm0, %v23325_v8  ;;  %4082 = vst.msk [vmem:[#allocation2 + $0x98] sm:$0xff] %vm599_vm0, %v23325_v8  ;;  %16056 = vmatpush3.bf16.msra.mxu0 %v16055_v13  ;;  %16044 = vmatpush3.bf16.msra.mxu1 %v16043_v14  ;;  %v575_v21 = vld [vmem:[%s17973_s0 + $0x1a] sm:$0xff]  ;;  %v1767_v22 = vld [vmem:[%s17973_s0 + $0x28] sm:$0xff] }
  0x1b   : > { %4083 = vst.msk [vmem:[#allocation2 + $0xa0] sm:$0xff] %vm599_vm0, %v23325_v8  ;;  %4084 = vst.msk [vmem:[#allocation2 + $0xa8] sm:$0xff] %vm599_vm0, %v23325_v8  ;;  %16057 = vmatprep.subr.bf16.mxu0 %v23323_v4  ;;  %16045 = vmatprep.subr.bf16.mxu1 %v23323_v4  ;;  %v576_v23 = vld [vmem:[%s17973_s0 + $0x22] sm:$0xff]  ;;  %v1768_v24 = vld [vmem:[%s17973_s0 + $0x30] sm:$0xff] }
  0x1c   : > { %4085 = vst.msk [vmem:[#allocation2 + $0xb0] sm:$0xff] %vm599_vm0, %v23325_v8  ;;  %4086 = vst.msk [vmem:[#allocation2 + $0xb8] sm:$0xff] %vm599_vm0, %v23325_v8  ;;  %13779 = vmatmul.mubr.msk.f32.gmra.mrb[2].mxu1 %vm599_vm0, %v573_v17  ;;  %14095 = vmatmul.mubr.msk.f32.gmra.mrb[2].mxu0 %vm599_vm0, %v1765_v18  ;;  %v577_v25 = vld [vmem:[%s17973_s0 + $0x2a] sm:$0xff]  ;;  %v1769_v26 = vld [vmem:[%s17973_s0 + $0x38] sm:$0xff] }
  0x1d   : > { %4087 = vst.msk [vmem:[#allocation2 + $0xc0] sm:$0xff] %vm599_vm0, %v23325_v8  ;;  %4088 = vst.msk [vmem:[#allocation2 + $0xc8] sm:$0xff] %vm599_vm0, %v23325_v8  ;;  %13781 = vmatprep.mubr.msk.f32.mxu1 %vm17767_vm1, %v23325_v8  ;;  %14097 = vmatprep.mubr.msk.f32.mxu0 %vm17767_vm1, %v23325_v8  ;;  %v578_v27 = vld [vmem:[%s17973_s0 + $0x32] sm:$0xff]  ;;  %v1770_v28 = vld [vmem:[%s17973_s0 + $0x40] sm:$0xff] }
  0x1e   : > { %4089 = vst.msk [vmem:[#allocation2 + $0xd0] sm:$0xff] %vm599_vm0, %v23325_v8  ;;  %4090 = vst.msk [vmem:[#allocation2 + $0xd8] sm:$0xff] %vm599_vm0, %v23325_v8  ;;  %v579_v29 = vld [vmem:[%s17973_s0 + $0x3a] sm:$0xff]  ;;  %v1771_v30 = vld [vmem:[%s17973_s0 + $0x48] sm:$0xff] }
  0x1f   : > { %v580_v31 = vld [vmem:[%s17973_s0 + $0x42] sm:$0xff]  ;;  %v1772_v32 = vld [vmem:[%s17973_s0 + $0x50] sm:$0xff]  ;;  %v1773_v34 = vld [vmem:[%s17973_s0 + $0x58] sm:$0xff] }
  0x20   : > { %13782 = vmatmul.mubr.msk.f32.gmra.mrb[4].mxu1 %vm599_vm0, %v574_v19  ;;  %14098 = vmatmul.mubr.msk.f32.gmra.mrb[4].mxu0 %vm599_vm0, %v1766_v20  ;;  %v581_v33 = vld [vmem:[%s17973_s0 + $0x4a] sm:$0xff]  ;;  %v582_v35 = vld [vmem:[%s17973_s0 + $0x52] sm:$0xff]  ;;  %v1774_v36 = vld [vmem:[%s17973_s0 + $0x60] sm:$0xff] }
  0x21   : > { %13784 = vmatprep.mubr.msk.f32.mxu1 %vm17767_vm1, %v23325_v8  ;;  %14100 = vmatprep.mubr.msk.f32.mxu0 %vm17767_vm1, %v23325_v8  ;;  %v583_v37 = vld [vmem:[%s17973_s0 + $0x5a] sm:$0xff]  ;;  %v1775_v38 = vld [vmem:[%s17973_s0 + $0x68] sm:$0xff]  ;;  %v1776_v40 = vld [vmem:[%s17973_s0 + $0x70] sm:$0xff] }
  0x22   : > { %v584_v39 = vld [vmem:[%s17973_s0 + $0x62] sm:$0xff]  ;;  %v585_v41 = vld [vmem:[%s17973_s0 + $0x6a] sm:$0xff]  ;;  %v1777_v42 = vld [vmem:[%s17973_s0 + $0x78] sm:$0xff] }
  0x23   : > { %v586_v43 = vld [vmem:[%s17973_s0 + $0x72] sm:$0xff]  ;;  %v1778_v44 = vld [vmem:[%s17973_s0 + $0x80] sm:$0xff]  ;;  %v1779_v46 = vld [vmem:[%s17973_s0 + $0x88] sm:$0xff] }
  0x24   : > { %13785 = vmatmul.mubr.msk.f32.gmra.mrb[6].mxu1 %vm599_vm0, %v575_v21  ;;  %14101 = vmatmul.mubr.msk.f32.gmra.mrb[6].mxu0 %vm599_vm0, %v1767_v22  ;;  %v587_v45 = vld [vmem:[%s17973_s0 + $0x7a] sm:$0xff]  ;;  %v588_v47 = vld [vmem:[%s17973_s0 + $0x82] sm:$0xff]  ;;  %v1780_v48 = vld [vmem:[%s17973_s0 + $0x90] sm:$0xff] }
  0x25   : > { %13787 = vmatprep.mubr.msk.f32.mxu1 %vm17767_vm1, %v23325_v8  ;;  %14103 = vmatprep.mubr.msk.f32.mxu0 %vm17767_vm1, %v23325_v8  ;;  %v589_v49 = vld [vmem:[%s17973_s0 + $0x8a] sm:$0xff]  ;;  %v1781_v50 = vld [vmem:[%s17973_s0 + $0x98] sm:$0xff]  ;;  %v1782_v52 = vld [vmem:[%s17973_s0 + $0xa0] sm:$0xff] }
  0x26   : > { %v590_v51 = vld [vmem:[%s17973_s0 + $0x92] sm:$0xff]  ;;  %v591_v53 = vld [vmem:[%s17973_s0 + $0x9a] sm:$0xff]  ;;  %v1783_v54 = vld [vmem:[%s17973_s0 + $0xa8] sm:$0xff] }
  0x27   : > { %v592_v55 = vld [vmem:[%s17973_s0 + $0xa2] sm:$0xff]  ;;  %v1784_v56 = vld [vmem:[%s17973_s0 + $0xb0] sm:$0xff]  ;;  %v1785_v58 = vld [vmem:[%s17973_s0 + $0xb8] sm:$0xff] }
  0x28   : > { %13788 = vmatmul.mubr.msk.f32.gmra.mrb[8].mxu1 %vm599_vm0, %v576_v23  ;;  %14104 = vmatmul.mubr.msk.f32.gmra.mrb[8].mxu0 %vm599_vm0, %v1768_v24  ;;  %v593_v57 = vld [vmem:[%s17973_s0 + $0xaa] sm:$0xff]  ;;  %v594_v61 = vld [vmem:[%s17973_s0 + $0xb2] sm:$0xff]  ;;  %v595_v0 = vld [vmem:[%s17973_s0 + $0xba] sm:$0xff] }
  0x29   : > { %13790 = vmatprep.mubr.msk.f32.mxu1 %vm17767_vm1, %v23325_v8  ;;  %14106 = vmatprep.mubr.msk.f32.mxu0 %vm17767_vm1, %v23325_v8  ;;  %v2081_v62 = vld [vmem:[%s17973_s0 + $0x11] sm:$0xff]  ;;  %v2082_v1 = vld [vmem:[%s17973_s0 + $0x19] sm:$0xff]  ;;  %v596_v2 = vld [vmem:[%s17973_s0 + $0xc2] sm:$0xf] }
  0x2a   : > { %v2083_v3 = vld [vmem:[%s17973_s0 + $0x21] sm:$0xff]  ;;  %v2084_v10 = vld [vmem:[%s17973_s0 + $0x29] sm:$0xff]  ;;  %v2085_v13 = vld [vmem:[%s17973_s0 + $0x31] sm:$0xff] }
  0x2b   : > { %v545_v9 = vld [vmem:[%s17973_s0 + $0x1] sm:$0xff]  ;;  %v546_v12 = vld [vmem:[%s17973_s0 + $0x9] sm:$0xff]  ;;  %v2086_v14 = vld [vmem:[%s17973_s0 + $0x39] sm:$0xff] }
  0x2c   : > { %13791 = vmatmul.mubr.msk.f32.gmra.mrb[10].mxu1 %vm599_vm0, %v577_v25  ;;  %14107 = vmatmul.mubr.msk.f32.gmra.mrb[10].mxu0 %vm599_vm0, %v1769_v26  ;;  %v2087_v15 = vld [vmem:[%s17973_s0 + $0x41] sm:$0xff]  ;;  %v2088_v16 = vld [vmem:[%s17973_s0 + $0x49] sm:$0xff]  ;;  %v2089_v17 = vld [vmem:[%s17973_s0 + $0x51] sm:$0xff] }
  0x2d   : > { %13793 = vmatprep.mubr.msk.f32.mxu1 %vm17767_vm1, %v23325_v8  ;;  %14109 = vmatprep.mubr.msk.f32.mxu0 %vm17767_vm1, %v23325_v8  ;;  %v2090_v18 = vld [vmem:[%s17973_s0 + $0x59] sm:$0xff]  ;;  %v2091_v19 = vld [vmem:[%s17973_s0 + $0x61] sm:$0xff]  ;;  %v2092_v20 = vld [vmem:[%s17973_s0 + $0x69] sm:$0xff] }
  0x2e   : > { %v2093_v21 = vld [vmem:[%s17973_s0 + $0x71] sm:$0xff]  ;;  %v2094_v22 = vld [vmem:[%s17973_s0 + $0x79] sm:$0xff]  ;;  %v2095_v23 = vld [vmem:[%s17973_s0 + $0x81] sm:$0xff] }
  0x2f   : > { %v2096_v24 = vld [vmem:[%s17973_s0 + $0x89] sm:$0xff]  ;;  %v2097_v25 = vld [vmem:[%s17973_s0 + $0x91] sm:$0xff]  ;;  %v2098_v26 = vld [vmem:[%s17973_s0 + $0x99] sm:$0xff] }
  0x30   : > { %13794 = vmatmul.mubr.msk.f32.gmra.mrb[12].mxu1 %vm599_vm0, %v578_v27  ;;  %14110 = vmatmul.mubr.msk.f32.gmra.mrb[12].mxu0 %vm599_vm0, %v1770_v28  ;;  %v2099_v27 = vld [vmem:[%s17973_s0 + $0xa1] sm:$0xff]  ;;  %v2100_v28 = vld [vmem:[%s17973_s0 + $0xa9] sm:$0xff]  ;;  %v2413_v6 = vld [vmem:[%s17973_s0 + $0x95] sm:$0xff] }
  0x31   : > { %13796 = vmatprep.mubr.msk.f32.mxu1 %vm17767_vm1, %v23325_v8  ;;  %14112 = vmatprep.mubr.msk.f32.mxu0 %vm17767_vm1, %v23325_v8  ;;  %v2408_v59 = vld [vmem:[%s17973_s0 + $0x6d] sm:$0xff]  ;;  %v1138_v60 = vld [vmem:[%s17973_s0 + $0x43] sm:$0xff] }
  0x32   : > { %v1142_v5 = vld [vmem:[%s17973_s0 + $0x63] sm:$0xff] }
  0x34   : > { %13797 = vmatmul.mubr.msk.f32.gmra.mrb[14].mxu1 %vm599_vm0, %v579_v29  ;;  %14113 = vmatmul.mubr.msk.f32.gmra.mrb[14].mxu0 %vm599_vm0, %v1771_v30  ;;  %v2101_v29 = vld [vmem:[%s17973_s0 + $0xb1] sm:$0xff]  ;;  %v2102_v30 = vld [vmem:[%s17973_s0 + $0xb9] sm:$0xff] }
  0x35   : > { %13799 = vmatprep.mubr.msk.f32.mxu1 %vm17767_vm1, %v23325_v8  ;;  %14115 = vmatprep.mubr.msk.f32.mxu0 %vm17767_vm1, %v23325_v8 }
  0x38   : > { %13800 = vmatmul.mubr.msk.f32.gmra.mrb[16].mxu1 %vm599_vm0, %v580_v31  ;;  %14116 = vmatmul.mubr.msk.f32.gmra.mrb[16].mxu0 %vm599_vm0, %v1772_v32  ;;  %v2103_v31 = vld [vmem:[%s17973_s0 + $0xc1] sm:$0xff]  ;;  %v2104_v32 = vld [vmem:[%s17973_s0 + $0xc9] sm:$0xff] }
  0x39   : > { %13802 = vmatprep.mubr.msk.f32.mxu1 %vm17767_vm1, %v23325_v8  ;;  %14118 = vmatprep.mubr.msk.f32.mxu0 %vm17767_vm1, %v23325_v8 }
  0x3c   : > { %13803 = vmatmul.mubr.msk.f32.gmra.mrb[18].mxu1 %vm599_vm0, %v581_v33  ;;  %14119 = vmatmul.mubr.msk.f32.gmra.mrb[18].mxu0 %vm599_vm0, %v1773_v34  ;;  %v2105_v33 = vld [vmem:[%s17973_s0 + $0xd1] sm:$0xf] }
  0x3d   : > { %13805 = vmatprep.mubr.msk.f32.mxu1 %vm17767_vm1, %v23325_v8  ;;  %14121 = vmatprep.mubr.msk.f32.mxu0 %vm17767_vm1, %v23325_v8  ;;  %v2740_v34 = vld [vmem:[%s23307_s1 + $0x70] sm:$0xff] }
  0x40   : > { %13806 = vmatmul.mubr.msk.f32.gmra.mrb[20].mxu1 %vm599_vm0, %v582_v35  ;;  %14122 = vmatmul.mubr.msk.f32.gmra.mrb[20].mxu0 %vm599_vm0, %v1774_v36  ;;  %v2741_v35 = vld [vmem:[%s23307_s1 + $0x78] sm:$0xff] }
  0x41   : > { %13808 = vmatprep.mubr.msk.f32.mxu1 %vm17767_vm1, %v23325_v8  ;;  %14124 = vmatprep.mubr.msk.f32.mxu0 %vm17767_vm1, %v23325_v8  ;;  %v2398_v36 = vld [vmem:[%s17973_s0 + $0x1d] sm:$0xff] }
  0x44   : > { %13809 = vmatmul.mubr.msk.f32.gmra.mrb[22].mxu1 %vm599_vm0, %v583_v37  ;;  %14125 = vmatmul.mubr.msk.f32.gmra.mrb[22].mxu0 %vm599_vm0, %v1775_v38  ;;  %v16061_v37 = vpack.c.bf16 %v2741_v35, %v2740_v34  ;;  %v2399_v38 = vld [vmem:[%s17973_s0 + $0x25] sm:$0xff]  ;;  %v2717_v35 = vld [vmem:[%s17973_s0 + $0x2e] sm:$0xff] }
  0x45   : > { %13811 = vmatprep.mubr.msk.f32.mxu1 %vm17767_vm1, %v23325_v8  ;;  %14127 = vmatprep.mubr.msk.f32.mxu0 %vm17767_vm1, %v23325_v8  ;;  %v1154_v34 = vld [vmem:[%s17973_s0 + $0xc3] sm:$0xf] }
  0x48   : > { %13812 = vmatmul.mubr.msk.f32.gmra.mrb[24].mxu1 %vm599_vm0, %v584_v39  ;;  %14128 = vmatmul.mubr.msk.f32.gmra.mrb[24].mxu0 %vm599_vm0, %v1776_v40  ;;  %v569_v39 = vld [vmem:[%s17973_s0 + $0xc1] sm:$0xf]  ;;  %v2400_v40 = vld [vmem:[%s17973_s0 + $0x2d] sm:$0xff] }
  0x49   : > { %13814 = vmatprep.mubr.msk.f32.mxu1 %vm17767_vm1, %v23325_v8  ;;  %14130 = vmatprep.mubr.msk.f32.mxu0 %vm17767_vm1, %v23325_v8 }
  0x4c   : > { %13815 = vmatmul.mubr.msk.f32.gmra.mrb[26].mxu1 %vm599_vm0, %v585_v41  ;;  %14131 = vmatmul.mubr.msk.f32.gmra.mrb[26].mxu0 %vm599_vm0, %v1777_v42  ;;  %v1472_v41 = vld [vmem:[%s23307_s1 + $0x30] sm:$0xff]  ;;  %v1473_v42 = vld [vmem:[%s23307_s1 + $0x38] sm:$0xff] }
  0x4d   : > { %13817 = vmatprep.mubr.msk.f32.mxu1 %vm17767_vm1, %v23325_v8  ;;  %14133 = vmatprep.mubr.msk.f32.mxu0 %vm17767_vm1, %v23325_v8 }
  0x50   : > { %13818 = vmatmul.mubr.msk.f32.gmra.mrb[28].mxu1 %vm599_vm0, %v586_v43  ;;  %14134 = vmatmul.mubr.msk.f32.gmra.mrb[28].mxu0 %vm599_vm0, %v1778_v44  ;;  %v1130_v43 = vld [vmem:[%s17973_s0 + $0x3] sm:$0xff]  ;;  %v2401_v44 = vld [vmem:[%s17973_s0 + $0x35] sm:$0xff] }
  0x51   : > { %13820 = vmatprep.mubr.msk.f32.mxu1 %vm17767_vm1, %v23325_v8  ;;  %14136 = vmatprep.mubr.msk.f32.mxu0 %vm17767_vm1, %v23325_v8 }
  0x54   : > { %13821 = vmatmul.mubr.msk.f32.gmra.mrb[30].mxu1 %vm599_vm0, %v587_v45  ;;  %14137 = vmatmul.mubr.msk.f32.gmra.mrb[30].mxu0 %vm599_vm0, %v1779_v46  ;;  %v16049_v45 = vpack.c.bf16 %v1473_v42, %v1472_v41  ;;  %v1131_v46 = vld [vmem:[%s17973_s0 + $0xb] sm:$0xff] }
  0x55   : > { %13823 = vmatprep.mubr.msk.f32.mxu1 %vm17767_vm1, %v23325_v8  ;;  %14139 = vmatprep.mubr.msk.f32.mxu0 %vm17767_vm1, %v23325_v8  ;;  %v2720_v41 = vld [vmem:[%s17973_s0 + $0x46] sm:$0xff]  ;;  %v2721_v42 = vld [vmem:[%s17973_s0 + $0x4e] sm:$0xff] }
  0x58   : > { %13824 = vmatmul.mubr.msk.f32.gmra.mrb[32].mxu1 %vm599_vm0, %v588_v47  ;;  %14140 = vmatmul.mubr.msk.f32.gmra.mrb[32].mxu0 %vm599_vm0, %v1780_v48  ;;  %v2402_v47 = vld [vmem:[%s17973_s0 + $0x3d] sm:$0xff]  ;;  %v1132_v48 = vld [vmem:[%s17973_s0 + $0x13] sm:$0xff] }
  0x59   : > { %13826 = vmatprep.mubr.msk.f32.mxu1 %vm17767_vm1, %v23325_v8  ;;  %14142 = vmatprep.mubr.msk.f32.mxu0 %vm17767_vm1, %v23325_v8 }
  0x5c   : > { %13827 = vmatmul.mubr.msk.f32.gmra.mrb[34].mxu1 %vm599_vm0, %v589_v49  ;;  %14143 = vmatmul.mubr.msk.f32.gmra.mrb[34].mxu0 %vm599_vm0, %v1781_v50  ;;  %v2403_v49 = vld [vmem:[%s17973_s0 + $0x45] sm:$0xff]  ;;  %v1133_v50 = vld [vmem:[%s17973_s0 + $0x1b] sm:$0xff] }
  0x5d   : > { %13829 = vmatprep.mubr.msk.f32.mxu1 %vm17767_vm1, %v23325_v8  ;;  %14145 = vmatprep.mubr.msk.f32.mxu0 %vm17767_vm1, %v23325_v8 }
  0x60   : > { %13830 = vmatmul.mubr.msk.f32.gmra.mrb[36].mxu1 %vm599_vm0, %v590_v51  ;;  %14146 = vmatmul.mubr.msk.f32.gmra.mrb[36].mxu0 %vm599_vm0, %v1782_v52  ;;  %v2404_v51 = vld [vmem:[%s17973_s0 + $0x4d] sm:$0xff]  ;;  %v1134_v52 = vld [vmem:[%s17973_s0 + $0x23] sm:$0xff] }
  0x61   : > { %13832 = vmatprep.mubr.msk.f32.mxu1 %vm17767_vm1, %v23325_v8  ;;  %14148 = vmatprep.mubr.msk.f32.mxu0 %vm17767_vm1, %v23325_v8 }
  0x64   : > { %13833 = vmatmul.mubr.msk.f32.gmra.mrb[38].mxu1 %vm599_vm0, %v591_v53  ;;  %14149 = vmatmul.mubr.msk.f32.gmra.mrb[38].mxu0 %vm599_vm0, %v1783_v54  ;;  %v2405_v53 = vld [vmem:[%s17973_s0 + $0x55] sm:$0xff]  ;;  %v1135_v54 = vld [vmem:[%s17973_s0 + $0x2b] sm:$0xff] }
  0x65   : > { %13835 = vmatprep.mubr.msk.f32.mxu1 %vm17767_vm1, %v23325_v8  ;;  %14151 = vmatprep.mubr.msk.f32.mxu0 %vm17767_vm1, %v23325_v8 }
  0x68   : > { %13836 = vmatmul.mubr.msk.f32.gmra.mrb[40].mxu1 %vm599_vm0, %v592_v55  ;;  %14152 = vmatmul.mubr.msk.f32.gmra.mrb[40].mxu0 %vm599_vm0, %v1784_v56  ;;  %v2406_v55 = vld [vmem:[%s17973_s0 + $0x5d] sm:$0xff]  ;;  %v1136_v56 = vld [vmem:[%s17973_s0 + $0x33] sm:$0xff] }
  0x69   : > { %13838 = vmatprep.mubr.msk.f32.mxu1 %vm17767_vm1, %v23325_v8  ;;  %14154 = vmatprep.mubr.msk.f32.mxu0 %vm17767_vm1, %v23325_v8 }
  0x6c   : > { %13839 = vmatmul.mubr.msk.f32.gmra.mrb[42].mxu1 %vm599_vm0, %v593_v57  ;;  %14155 = vmatmul.mubr.msk.f32.gmra.mrb[42].mxu0 %vm599_vm0, %v1785_v58  ;;  %v2407_v57 = vld [vmem:[%s17973_s0 + $0x65] sm:$0xff]  ;;  %v1137_v58 = vld [vmem:[%s17973_s0 + $0x3b] sm:$0xff] }
  0x6d   : > { %13841 = vmatprep.mubr.msk.f32.mxu1 %vm17767_vm1, %v23325_v8  ;;  %14170 = vmatprep.mubr.msk.f32.mxu0 %vm17767_vm1, %v23325_v8 }
  0x70   : > { %13842 = vmatmul.mubr.msk.f32.gmra.mrb[44].mxu1 %vm599_vm0, %v594_v61  ;;  %14171 = vmatmul.mubr.msk.f32.vlgmr.msra.gmra.mrb[0].mxu0 %vm599_vm0, %v2081_v62  ;;  %v2409_v61 = vld [vmem:[%s17973_s0 + $0x75] sm:$0xff] }
  0x71   : > { %13844 = vmatprep.mubr.msk.f32.mxu1 %vm17767_vm1, %v23325_v8  ;;  %14173 = vmatprep.mubr.msk.f32.mxu0 %vm17767_vm1, %v23325_v8 }
  0x72   : > { %16059 = vmatpush3.bf16.msra.mxu0 %v16058_v63  ;;  %v2410_v63 = vld [vmem:[%s17973_s0 + $0x7d] sm:$0xff] }
  0x73   : > { %16060 = vmatprep.subr.bf16.mxu0 %v23323_v4 }
  0x74   : > { %13845 = vmatmul.mubr.msk.f32.gmra.mrb[46].mxu1 %vm599_vm0, %v595_v0  ;;  %14174 = vmatmul.mubr.msk.f32.gmra.mrb[2].mxu0 %vm599_vm0, %v2082_v1  ;;  %v1140_v0 = vld [vmem:[%s17973_s0 + $0x53] sm:$0xff] }
  0x75   : > { %13847 = vmatprep.mubr.msk.f32.mxu1 %vm17767_vm1, %v23325_v8  ;;  %14176 = vmatprep.mubr.msk.f32.mxu0 %vm17767_vm1, %v23325_v8 }
  0x78   : > { %13848 = vmatmul.mubr.msk.f32.gmra.mrb[48].mxu1 %vm599_vm0, %v596_v2  ;;  %14177 = vmatmul.mubr.msk.f32.gmra.mrb[4].mxu0 %vm599_vm0, %v2083_v3  ;;  %v1141_v2 = vld [vmem:[%s17973_s0 + $0x5b] sm:$0xff] }
  0x79   : > { %13854 = vmatprep.mubr.msk.f32.mxu1 %vm17767_vm1, %v23325_v8  ;;  %14179 = vmatprep.mubr.msk.f32.mxu0 %vm17767_vm1, %v23325_v8 }
  0x7c   : > { %13855 = vmatmul.mubr.msk.f32.vlgmr.msra.gmra.mrb[0].mxu1 %vm599_vm0, %v545_v9  ;;  %14180 = vmatmul.mubr.msk.f32.gmra.mrb[6].mxu0 %vm599_vm0, %v2084_v10  ;;  %v1143_v9 = vld [vmem:[%s17973_s0 + $0x6b] sm:$0xff] }
  0x7d   : > { %13857 = vmatprep.mubr.msk.f32.mxu1 %vm17767_vm1, %v23325_v8  ;;  %14182 = vmatprep.mubr.msk.f32.mxu0 %vm17767_vm1, %v23325_v8 }
  0x7e   : > { %16047 = vmatpush3.bf16.msra.mxu1 %v16046_v11  ;;  %v1144_v11 = vld [vmem:[%s17973_s0 + $0x73] sm:$0xff] }
  0x7f   : > { %16048 = vmatprep.subr.bf16.mxu1 %v23323_v4 }
  0x80   : > { %13858 = vmatmul.mubr.msk.f32.gmra.mrb[2].mxu1 %vm599_vm0, %v546_v12  ;;  %14183 = vmatmul.mubr.msk.f32.gmra.mrb[8].mxu0 %vm599_vm0, %v2085_v13  ;;  %v2415_v12 = vld [vmem:[%s17973_s0 + $0xa5] sm:$0xff] }
  0x81   : > { %13860 = vmatprep.mubr.msk.f32.mxu1 %vm17767_vm1, %v23325_v8  ;;  %14185 = vmatprep.mubr.msk.f32.mxu0 %vm17767_vm1, %v23325_v8 }
  0x84   : > { %13861 = vmatmul.mubr.msk.f32.gmra.mrb[4].mxu1 %vm599_vm0, %v2081_v62  ;;  %14186 = vmatmul.mubr.msk.f32.gmra.mrb[10].mxu0 %vm599_vm0, %v2086_v14  ;;  %v1139_v62 = vld [vmem:[%s17973_s0 + $0x4b] sm:$0xff] }
  0x85   : > { %13863 = vmatprep.mubr.msk.f32.mxu1 %vm17767_vm1, %v23325_v8  ;;  %14188 = vmatprep.mubr.msk.f32.mxu0 %vm17767_vm1, %v23325_v8 }
  0x88   : > { %13864 = vmatmul.mubr.msk.f32.gmra.mrb[6].mxu1 %vm599_vm0, %v2082_v1  ;;  %14189 = vmatmul.mubr.msk.f32.gmra.mrb[12].mxu0 %vm599_vm0, %v2087_v15  ;;  %v2411_v1 = vld [vmem:[%s17973_s0 + $0x85] sm:$0xff] }
  0x89   : > { %13866 = vmatprep.mubr.msk.f32.mxu1 %vm17767_vm1, %v23325_v8  ;;  %14191 = vmatprep.mubr.msk.f32.mxu0 %vm17767_vm1, %v23325_v8 }
  0x8c   : > { %13867 = vmatmul.mubr.msk.f32.gmra.mrb[8].mxu1 %vm599_vm0, %v2083_v3  ;;  %14192 = vmatmul.mubr.msk.f32.gmra.mrb[14].mxu0 %vm599_vm0, %v2088_v16  ;;  %v2412_v3 = vld [vmem:[%s17973_s0 + $0x8d] sm:$0xff] }
  0x8d   : > { %13869 = vmatprep.mubr.msk.f32.mxu1 %vm17767_vm1, %v23325_v8  ;;  %14194 = vmatprep.mubr.msk.f32.mxu0 %vm17767_vm1, %v23325_v8 }
  0x90   : > { %13870 = vmatmul.mubr.msk.f32.gmra.mrb[10].mxu1 %vm599_vm0, %v2084_v10  ;;  %14195 = vmatmul.mubr.msk.f32.gmra.mrb[16].mxu0 %vm599_vm0, %v2089_v17  ;;  %v2414_v10 = vld [vmem:[%s17973_s0 + $0x9d] sm:$0xff] }
  0x91   : > { %13872 = vmatprep.mubr.msk.f32.mxu1 %vm17767_vm1, %v23325_v8  ;;  %14197 = vmatprep.mubr.msk.f32.mxu0 %vm17767_vm1, %v23325_v8 }
  0x94   : > { %13873 = vmatmul.mubr.msk.f32.gmra.mrb[12].mxu1 %vm599_vm0, %v2085_v13  ;;  %14198 = vmatmul.mubr.msk.f32.gmra.mrb[18].mxu0 %vm599_vm0, %v2090_v18  ;;  %v1145_v13 = vld [vmem:[%s17973_s0 + $0x7b] sm:$0xff] }
  0x95   : > { %13875 = vmatprep.mubr.msk.f32.mxu1 %vm17767_vm1, %v23325_v8  ;;  %14200 = vmatprep.mubr.msk.f32.mxu0 %vm17767_vm1, %v23325_v8 }
  0x98   : > { %13876 = vmatmul.mubr.msk.f32.gmra.mrb[14].mxu1 %vm599_vm0, %v2086_v14  ;;  %14201 = vmatmul.mubr.msk.f32.gmra.mrb[20].mxu0 %vm599_vm0, %v2091_v19  ;;  %v2416_v14 = vld [vmem:[%s17973_s0 + $0xad] sm:$0xff] }
  0x99   : > { %13878 = vmatprep.mubr.msk.f32.mxu1 %vm17767_vm1, %v23325_v8  ;;  %14203 = vmatprep.mubr.msk.f32.mxu0 %vm17767_vm1, %v23325_v8 }
  0x9c   : > { %13879 = vmatmul.mubr.msk.f32.gmra.mrb[16].mxu1 %vm599_vm0, %v2087_v15  ;;  %14204 = vmatmul.mubr.msk.f32.gmra.mrb[22].mxu0 %vm599_vm0, %v2092_v20  ;;  %v1146_v15 = vld [vmem:[%s17973_s0 + $0x83] sm:$0xff] }
  0x9d   : > { %13881 = vmatprep.mubr.msk.f32.mxu1 %vm17767_vm1, %v23325_v8  ;;  %14206 = vmatprep.mubr.msk.f32.mxu0 %vm17767_vm1, %v23325_v8 }
  0xa0   : > { %13882 = vmatmul.mubr.msk.f32.gmra.mrb[18].mxu1 %vm599_vm0, %v2088_v16  ;;  %14207 = vmatmul.mubr.msk.f32.gmra.mrb[24].mxu0 %vm599_vm0, %v2093_v21  ;;  %v2417_v16 = vld [vmem:[%s17973_s0 + $0xb5] sm:$0xff] }
  0xa1   : > { %13884 = vmatprep.mubr.msk.f32.mxu1 %vm17767_vm1, %v23325_v8  ;;  %14209 = vmatprep.mubr.msk.f32.mxu0 %vm17767_vm1, %v23325_v8 }
  0xa4   : > { %13885 = vmatmul.mubr.msk.f32.gmra.mrb[20].mxu1 %vm599_vm0, %v2089_v17  ;;  %14210 = vmatmul.mubr.msk.f32.gmra.mrb[26].mxu0 %vm599_vm0, %v2094_v22  ;;  %v1147_v17 = vld [vmem:[%s17973_s0 + $0x8b] sm:$0xff] }
  0xa5   : > { %13887 = vmatprep.mubr.msk.f32.mxu1 %vm17767_vm1, %v23325_v8  ;;  %14212 = vmatprep.mubr.msk.f32.mxu0 %vm17767_vm1, %v23325_v8 }
  0xa8   : > { %13888 = vmatmul.mubr.msk.f32.gmra.mrb[22].mxu1 %vm599_vm0, %v2090_v18  ;;  %14213 = vmatmul.mubr.msk.f32.gmra.mrb[28].mxu0 %vm599_vm0, %v2095_v23  ;;  %v2418_v18 = vld [vmem:[%s17973_s0 + $0xbd] sm:$0xff] }
  0xa9   : > { %13890 = vmatprep.mubr.msk.f32.mxu1 %vm17767_vm1, %v23325_v8  ;;  %14215 = vmatprep.mubr.msk.f32.mxu0 %vm17767_vm1, %v23325_v8 }
  0xac   : > { %13891 = vmatmul.mubr.msk.f32.gmra.mrb[24].mxu1 %vm599_vm0, %v2091_v19  ;;  %14216 = vmatmul.mubr.msk.f32.gmra.mrb[30].mxu0 %vm599_vm0, %v2096_v24  ;;  %v1148_v19 = vld [vmem:[%s17973_s0 + $0x93] sm:$0xff] }
  0xad   : > { %13893 = vmatprep.mubr.msk.f32.mxu1 %vm17767_vm1, %v23325_v8  ;;  %14218 = vmatprep.mubr.msk.f32.mxu0 %vm17767_vm1, %v23325_v8 }
  0xb0   : > { %13894 = vmatmul.mubr.msk.f32.gmra.mrb[26].mxu1 %vm599_vm0, %v2092_v20  ;;  %14219 = vmatmul.mubr.msk.f32.gmra.mrb[32].mxu0 %vm599_vm0, %v2097_v25  ;;  %v2419_v20 = vld [vmem:[%s17973_s0 + $0xc5] sm:$0xff] }
  0xb1   : > { %13896 = vmatprep.mubr.msk.f32.mxu1 %vm17767_vm1, %v23325_v8  ;;  %14221 = vmatprep.mubr.msk.f32.mxu0 %vm17767_vm1, %v23325_v8 }
  0xb4   : > { %13897 = vmatmul.mubr.msk.f32.gmra.mrb[28].mxu1 %vm599_vm0, %v2093_v21  ;;  %14222 = vmatmul.mubr.msk.f32.gmra.mrb[34].mxu0 %vm599_vm0, %v2098_v26  ;;  %v1149_v21 = vld [vmem:[%s17973_s0 + $0x9b] sm:$0xff] }
  0xb5   : > { %13899 = vmatprep.mubr.msk.f32.mxu1 %vm17767_vm1, %v23325_v8  ;;  %14224 = vmatprep.mubr.msk.f32.mxu0 %vm17767_vm1, %v23325_v8 }
  0xb8   : > { %13900 = vmatmul.mubr.msk.f32.gmra.mrb[30].mxu1 %vm599_vm0, %v2094_v22  ;;  %14225 = vmatmul.mubr.msk.f32.gmra.mrb[36].mxu0 %vm599_vm0, %v2099_v27  ;;  %v2420_v22 = vld [vmem:[%s17973_s0 + $0xcd] sm:$0xff] }
  0xb9   : > { %13902 = vmatprep.mubr.msk.f32.mxu1 %vm17767_vm1, %v23325_v8  ;;  %14227 = vmatprep.mubr.msk.f32.mxu0 %vm17767_vm1, %v23325_v8 }
  0xbc   : > { %13903 = vmatmul.mubr.msk.f32.gmra.mrb[32].mxu1 %vm599_vm0, %v2095_v23  ;;  %14228 = vmatmul.mubr.msk.f32.gmra.mrb[38].mxu0 %vm599_vm0, %v2100_v28  ;;  %v1150_v23 = vld [vmem:[%s17973_s0 + $0xa3] sm:$0xff] }
  0xbd   : > { %13905 = vmatprep.mubr.msk.f32.mxu1 %vm17767_vm1, %v23325_v8  ;;  %14230 = vmatprep.mubr.msk.f32.mxu0 %vm17767_vm1, %v23325_v8 }
  0xc0   : > { %13906 = vmatmul.mubr.msk.f32.gmra.mrb[34].mxu1 %vm599_vm0, %v2096_v24  ;;  %14231 = vmatmul.mubr.msk.f32.gmra.mrb[40].mxu0 %vm599_vm0, %v2101_v29  ;;  %v2421_v24 = vld [vmem:[%s17973_s0 + $0xd5] sm:$0xff] }
  0xc1   : > { %13908 = vmatprep.mubr.msk.f32.mxu1 %vm17767_vm1, %v23325_v8  ;;  %14233 = vmatprep.mubr.msk.f32.mxu0 %vm17767_vm1, %v23325_v8 }
  0xc4   : > { %13909 = vmatmul.mubr.msk.f32.gmra.mrb[36].mxu1 %vm599_vm0, %v2097_v25  ;;  %14234 = vmatmul.mubr.msk.f32.gmra.mrb[42].mxu0 %vm599_vm0, %v2102_v30  ;;  %v1151_v25 = vld [vmem:[%s17973_s0 + $0xab] sm:$0xff] }
  0xc5   : > { %13911 = vmatprep.mubr.msk.f32.mxu1 %vm17767_vm1, %v23325_v8  ;;  %14236 = vmatprep.mubr.msk.f32.mxu0 %vm17767_vm1, %v23325_v8 }
  0xc8   : > { %13912 = vmatmul.mubr.msk.f32.gmra.mrb[38].mxu1 %vm599_vm0, %v2098_v26  ;;  %14237 = vmatmul.mubr.msk.f32.gmra.mrb[44].mxu0 %vm599_vm0, %v2103_v31  ;;  %v2422_v26 = vld [vmem:[%s17973_s0 + $0xdd] sm:$0xf] }
  0xc9   : > { %13914 = vmatprep.mubr.msk.f32.mxu1 %vm17767_vm1, %v23325_v8  ;;  %14239 = vmatprep.mubr.msk.f32.mxu0 %vm17767_vm1, %v23325_v8 }
  0xcc   : > { %13915 = vmatmul.mubr.msk.f32.gmra.mrb[40].mxu1 %vm599_vm0, %v2099_v27  ;;  %14240 = vmatmul.mubr.msk.f32.gmra.mrb[46].mxu0 %vm599_vm0, %v2104_v32  ;;  %v3057_v27 = vld [vmem:[%s23307_s1 + $0x80] sm:$0xff] }
  0xcd   : > { %13917 = vmatprep.mubr.msk.f32.mxu1 %vm17767_vm1, %v23325_v8  ;;  %14242 = vmatprep.mubr.msk.f32.mxu0 %vm17767_vm1, %v23325_v8  ;;  %v1153_v32 = vld [vmem:[%s17973_s0 + $0xbb] sm:$0xff] }
  0xd0   : > { %13918 = vmatmul.mubr.msk.f32.gmra.mrb[42].mxu1 %vm599_vm0, %v2100_v28  ;;  %14243 = vmatmul.mubr.msk.f32.gmra.mrb[48].mxu0 %vm599_vm0, %v2105_v33  ;;  %v3058_v28 = vld [vmem:[%s23307_s1 + $0x88] sm:$0xff] }
  0xd1   : > { %13920 = vmatprep.mubr.msk.f32.mxu1 %vm17767_vm1, %v23325_v8  ;;  %14249 = vmatprep.mubr.msk.f32.mxu0 %vm17767_vm1, %v23325_v8  ;;  %v16064_v31 = vpack.c.bf16 %v3058_v28, %v3057_v27  ;;  %v2716_v33 = vld [vmem:[%s17973_s0 + $0x26] sm:$0xff]  ;;  %v531_v27 = vld [vmem:[%s23316_s10 + $0x58] sm:$0xff]  ;;  %v534_v28 = vld [vmem:[%s23316_s10 + $0x70] sm:$0xff] }
  0xd4   : > { %13921 = vmatmul.mubr.msk.f32.gmra.mrb[44].mxu1 %vm599_vm0, %v2101_v29  ;;  %14250 = vmatmul.mubr.msk.f32.vlgmr.msra.gmra.mrb[0].mxu0 %vm599_vm0, %v2398_v36  ;;  %v1152_v29 = vld [vmem:[%s17973_s0 + $0xb3] sm:$0xff] }
  0xd5   : > { %13923 = vmatprep.mubr.msk.f32.mxu1 %vm17767_vm1, %v23325_v8  ;;  %14252 = vmatprep.mubr.msk.f32.mxu0 %vm17767_vm1, %v23325_v8  ;;  %v1447_v36 = vld [vmem:[%s17973_s0 + $0xf] sm:$0xff] }
  0xd6   : > { %16062 = vmatpush3.bf16.msra.mxu0 %v16061_v37  ;;  %v2718_v37 = vld [vmem:[%s17973_s0 + $0x36] sm:$0xff] }
  0xd7   : > { %16063 = vmatprep.subr.bf16.mxu0 %v23323_v4 }
  0xd8   : > { %13924 = vmatmul.mubr.msk.f32.gmra.mrb[46].mxu1 %vm599_vm0, %v2102_v30  ;;  %14253 = vmatmul.mubr.msk.f32.gmra.mrb[2].mxu0 %vm599_vm0, %v2399_v38  ;;  %v2715_v30 = vld [vmem:[%s17973_s0 + $0x1e] sm:$0xff] }
  0xd9   : > { %13926 = vmatprep.mubr.msk.f32.mxu1 %vm17767_vm1, %v23325_v8  ;;  %14255 = vmatprep.mubr.msk.f32.mxu0 %vm17767_vm1, %v23325_v8  ;;  %v1448_v38 = vld [vmem:[%s17973_s0 + $0x17] sm:$0xff] }
  0xdc   : > { %13927 = vmatmul.mubr.msk.f32.gmra.mrb[48].mxu1 %vm599_vm0, %v569_v39  ;;  %14256 = vmatmul.mubr.msk.f32.gmra.mrb[4].mxu0 %vm599_vm0, %v2400_v40  ;;  %v2719_v39 = vld [vmem:[%s17973_s0 + $0x3e] sm:$0xff] }
  0xdd   : > { %13933 = vmatprep.mubr.msk.f32.mxu1 %vm17767_vm1, %v23325_v8  ;;  %14258 = vmatprep.mubr.msk.f32.mxu0 %vm17767_vm1, %v23325_v8  ;;  %v18609_v40 = vld [vmem:[%s17973_s0 + $0x1f] sm:$0xff] }
  0xe0   : > { %13934 = vmatmul.mubr.msk.f32.vlgmr.msra.gmra.mrb[0].mxu1 %vm599_vm0, %v1130_v43  ;;  %14259 = vmatmul.mubr.msk.f32.gmra.mrb[6].mxu0 %vm599_vm0, %v2401_v44  ;;  %v18631_v43 = vld [vmem:[%s17973_s0 + $0x2f] sm:$0xff] }
  0xe1   : > { %13936 = vmatprep.mubr.msk.f32.mxu1 %vm17767_vm1, %v23325_v8  ;;  %14261 = vmatprep.mubr.msk.f32.mxu0 %vm17767_vm1, %v23325_v8  ;;  %v2722_v44 = vld [vmem:[%s17973_s0 + $0x56] sm:$0xff] }
  0xe2   : > { %16050 = vmatpush3.bf16.msra.mxu1 %v16049_v45  ;;  %v18642_v45 = vld [vmem:[%s17973_s0 + $0x37] sm:$0xff] }
  0xe3   : > { %16237 = vmatprep.subr.bf16.mxu1 %v23323_v4 }
  0xe4   : > { %13937 = vmatmul.mubr.msk.f32.gmra.mrb[2].mxu1 %vm599_vm0, %v1131_v46  ;;  %14262 = vmatmul.mubr.msk.f32.gmra.mrb[8].mxu0 %vm599_vm0, %v2402_v47  ;;  %v2723_v46 = vld [vmem:[%s17973_s0 + $0x5e] sm:$0xff] }
  0xe5   : > { %13939 = vmatprep.mubr.msk.f32.mxu1 %vm17767_vm1, %v23325_v8  ;;  %14264 = vmatprep.mubr.msk.f32.mxu0 %vm17767_vm1, %v23325_v8  ;;  %v18653_v47 = vld [vmem:[%s17973_s0 + $0x3f] sm:$0xff] }
  0xe8   : > { %13940 = vmatmul.mubr.msk.f32.gmra.mrb[4].mxu1 %vm599_vm0, %v1132_v48  ;;  %14265 = vmatmul.mubr.msk.f32.gmra.mrb[10].mxu0 %vm599_vm0, %v2403_v49  ;;  %v2724_v48 = vld [vmem:[%s17973_s0 + $0x66] sm:$0xff] }
  0xe9   : > { %13942 = vmatprep.mubr.msk.f32.mxu1 %vm17767_vm1, %v23325_v8  ;;  %14267 = vmatprep.mubr.msk.f32.mxu0 %vm17767_vm1, %v23325_v8  ;;  %v18664_v49 = vld [vmem:[%s17973_s0 + $0x47] sm:$0xff] }
  0xec   : > { %13943 = vmatmul.mubr.msk.f32.gmra.mrb[6].mxu1 %vm599_vm0, %v1133_v50  ;;  %14268 = vmatmul.mubr.msk.f32.gmra.mrb[12].mxu0 %vm599_vm0, %v2404_v51  ;;  %v2725_v50 = vld [vmem:[%s17973_s0 + $0x6e] sm:$0xff] }
  0xed   : > { %13945 = vmatprep.mubr.msk.f32.mxu1 %vm17767_vm1, %v23325_v8  ;;  %14270 = vmatprep.mubr.msk.f32.mxu0 %vm17767_vm1, %v23325_v8  ;;  %v18675_v51 = vld [vmem:[%s17973_s0 + $0x4f] sm:$0xff] }
  0xf0   : > { %13946 = vmatmul.mubr.msk.f32.gmra.mrb[8].mxu1 %vm599_vm0, %v1134_v52  ;;  %14271 = vmatmul.mubr.msk.f32.gmra.mrb[14].mxu0 %vm599_vm0, %v2405_v53  ;;  %v2726_v52 = vld [vmem:[%s17973_s0 + $0x76] sm:$0xff] }
  0xf1   : > { %13948 = vmatprep.mubr.msk.f32.mxu1 %vm17767_vm1, %v23325_v8  ;;  %14273 = vmatprep.mubr.msk.f32.mxu0 %vm17767_vm1, %v23325_v8  ;;  %v18686_v53 = vld [vmem:[%s17973_s0 + $0x57] sm:$0xff] }
  0xf4   : > { %13949 = vmatmul.mubr.msk.f32.gmra.mrb[10].mxu1 %vm599_vm0, %v1135_v54  ;;  %14274 = vmatmul.mubr.msk.f32.gmra.mrb[16].mxu0 %vm599_vm0, %v2406_v55  ;;  %v2727_v54 = vld [vmem:[%s17973_s0 + $0x7e] sm:$0xff] }
  0xf5   : > { %13951 = vmatprep.mubr.msk.f32.mxu1 %vm17767_vm1, %v23325_v8  ;;  %14276 = vmatprep.mubr.msk.f32.mxu0 %vm17767_vm1, %v23325_v8  ;;  %v18697_v55 = vld [vmem:[%s17973_s0 + $0x5f] sm:$0xff] }
  0xf8   : > { %13952 = vmatmul.mubr.msk.f32.gmra.mrb[12].mxu1 %vm599_vm0, %v1136_v56  ;;  %14277 = vmatmul.mubr.msk.f32.gmra.mrb[18].mxu0 %vm599_vm0, %v2407_v57  ;;  %v2728_v56 = vld [vmem:[%s17973_s0 + $0x86] sm:$0xff] }
  0xf9   : > { %13954 = vmatprep.mubr.msk.f32.mxu1 %vm17767_vm1, %v23325_v8  ;;  %14279 = vmatprep.mubr.msk.f32.mxu0 %vm17767_vm1, %v23325_v8  ;;  %v18708_v57 = vld [vmem:[%s17973_s0 + $0x67] sm:$0xff] }
  0xfc   : > { %13955 = vmatmul.mubr.msk.f32.gmra.mrb[14].mxu1 %vm599_vm0, %v1137_v58  ;;  %14280 = vmatmul.mubr.msk.f32.gmra.mrb[20].mxu0 %vm599_vm0, %v2408_v59  ;;  %v2729_v58 = vld [vmem:[%s17973_s0 + $0x8e] sm:$0xff] }
  0xfd   : > { %13957 = vmatprep.mubr.msk.f32.mxu1 %vm17767_vm1, %v23325_v8  ;;  %14282 = vmatprep.mubr.msk.f32.mxu0 %vm17767_vm1, %v23325_v8  ;;  %v18719_v59 = vld [vmem:[%s17973_s0 + $0x6f] sm:$0xff] }
 0x100   : > { %13958 = vmatmul.mubr.msk.f32.gmra.mrb[16].mxu1 %vm599_vm0, %v1138_v60  ;;  %14283 = vmatmul.mubr.msk.f32.gmra.mrb[22].mxu0 %vm599_vm0, %v2409_v61  ;;  %v2730_v60 = vld [vmem:[%s17973_s0 + $0x96] sm:$0xff]  ;;  %v520_v61 = vld [vmem:[%s23316_s10] sm:$0xff] }
 0x101   : > { %13960 = vmatprep.mubr.msk.f32.mxu1 %vm17767_vm1, %v23325_v8  ;;  %14285 = vmatprep.mubr.msk.f32.mxu0 %vm17767_vm1, %v23325_v8 }
 0x104   : > { %13961 = vmatmul.mubr.msk.f32.gmra.mrb[18].mxu1 %vm599_vm0, %v1139_v62  ;;  %14286 = vmatmul.mubr.msk.f32.gmra.mrb[24].mxu0 %vm599_vm0, %v2410_v63  ;;  %v18733_v62 = vld [vmem:[%s17973_s0 + $0x77] sm:$0xff] }
 0x105   : > { %13963 = vmatprep.mubr.msk.f32.mxu1 %vm17767_vm1, %v23325_v8  ;;  %14288 = vmatprep.mubr.msk.f32.mxu0 %vm17767_vm1, %v23325_v8  ;;  %v2731_v63 = vld [vmem:[%s17973_s0 + $0x9e] sm:$0xff] }
 0x108   : > { %13964 = vmatmul.mubr.msk.f32.gmra.mrb[20].mxu1 %vm599_vm0, %v1140_v0  ;;  %14289 = vmatmul.mubr.msk.f32.gmra.mrb[26].mxu0 %vm599_vm0, %v2411_v1  ;;  %v17769_v0 = vmov 0   ;;  %v521_v1 = vld [vmem:[%s23316_s10 + $0x8] sm:$0xff] }
 0x109   : > { %13966 = vmatprep.mubr.msk.f32.mxu1 %vm17767_vm1, %v23325_v8  ;;  %14291 = vmatprep.mubr.msk.f32.mxu0 %vm17767_vm1, %v23325_v8 }
 0x10a   : > { %17444 = vset.pattern.permute.xlu0 %v17769_v0  ;;  %17445 = vset.pattern.permute.xlu1 %v17769_v0 }
 0x10b   : > { %4095 = vperm.xlu0 %17444, %v520_v61  }
 0x10c   : > { %13967 = vmatmul.mubr.msk.f32.gmra.mrb[22].mxu1 %vm599_vm0, %v1141_v2  ;;  %14292 = vmatmul.mubr.msk.f32.gmra.mrb[28].mxu0 %vm599_vm0, %v2412_v3  ;;  %v18747_v2 = vld [vmem:[%s17973_s0 + $0x7f] sm:$0xff] }
 0x10d   : > { %13969 = vmatprep.mubr.msk.f32.mxu1 %vm17767_vm1, %v23325_v8  ;;  %14294 = vmatprep.mubr.msk.f32.mxu0 %vm17767_vm1, %v23325_v8  ;;  %v2732_v3 = vld [vmem:[%s17973_s0 + $0xa6] sm:$0xff] }
 0x10f   : > { %4100 = vperm.xlu0 %17444, %v521_v1  }
 0x110   : > { %13970 = vmatmul.mubr.msk.f32.gmra.mrb[24].mxu1 %vm599_vm0, %v1142_v5  ;;  %14295 = vmatmul.mubr.msk.f32.gmra.mrb[30].mxu0 %vm599_vm0, %v2413_v6  ;;  %v524_v5 = vld [vmem:[%s23316_s10 + $0x20] sm:$0xff]  ;;  %v522_v6 = vld [vmem:[%s23316_s10 + $0x10] sm:$0xff] }
 0x111   : > { %13972 = vmatprep.mubr.msk.f32.mxu1 %vm17767_vm1, %v23325_v8  ;;  %14297 = vmatprep.mubr.msk.f32.mxu0 %vm17767_vm1, %v23325_v8 }
 0x112   : > { %4105 = vperm.xlu1 %17445, %v522_v6  }
 0x113   : > { %4115 = vperm.xlu0 %17444, %v524_v5  }
 0x114   : > { %13973 = vmatmul.mubr.msk.f32.gmra.mrb[26].mxu1 %vm599_vm0, %v1143_v9  ;;  %14298 = vmatmul.mubr.msk.f32.gmra.mrb[32].mxu0 %vm599_vm0, %v2414_v10  ;;  %v18764_v9 = vld [vmem:[%s17973_s0 + $0x87] sm:$0xff] }
 0x115   : > { %13975 = vmatprep.mubr.msk.f32.mxu1 %vm17767_vm1, %v23325_v8  ;;  %14300 = vmatprep.mubr.msk.f32.mxu0 %vm17767_vm1, %v23325_v8  ;;  %v2733_v10 = vld [vmem:[%s17973_s0 + $0xae] sm:$0xff] }
 0x118   : > { %13976 = vmatmul.mubr.msk.f32.gmra.mrb[28].mxu1 %vm599_vm0, %v1144_v11  ;;  %14301 = vmatmul.mubr.msk.f32.gmra.mrb[34].mxu0 %vm599_vm0, %v2415_v12  ;;  %v523_v11 = vld [vmem:[%s23316_s10 + $0x18] sm:$0xff]  ;;  %v526_v12 = vld [vmem:[%s23316_s10 + $0x30] sm:$0xff] }
 0x119   : > { %13978 = vmatprep.mubr.msk.f32.mxu1 %vm17767_vm1, %v23325_v8  ;;  %14303 = vmatprep.mubr.msk.f32.mxu0 %vm17767_vm1, %v23325_v8 }
 0x11a   : > { %4110 = vperm.xlu1 %17445, %v523_v11   ;;  %4125 = vperm.xlu0 %17444, %v526_v12  }
 0x11c   : > { %13979 = vmatmul.mubr.msk.f32.gmra.mrb[30].mxu1 %vm599_vm0, %v1145_v13  ;;  %14304 = vmatmul.mubr.msk.f32.gmra.mrb[36].mxu0 %vm599_vm0, %v2416_v14  ;;  %v18781_v13 = vld [vmem:[%s17973_s0 + $0x8f] sm:$0xff] }
 0x11d   : > { %13981 = vmatprep.mubr.msk.f32.mxu1 %vm17767_vm1, %v23325_v8  ;;  %14306 = vmatprep.mubr.msk.f32.mxu0 %vm17767_vm1, %v23325_v8  ;;  %v2734_v14 = vld [vmem:[%s17973_s0 + $0xb6] sm:$0xff] }
 0x120   : > { %13982 = vmatmul.mubr.msk.f32.gmra.mrb[32].mxu1 %vm599_vm0, %v1146_v15  ;;  %14307 = vmatmul.mubr.msk.f32.gmra.mrb[38].mxu0 %vm599_vm0, %v2417_v16  ;;  %v525_v15 = vld [vmem:[%s23316_s10 + $0x28] sm:$0xff]  ;;  %v528_v16 = vld [vmem:[%s23316_s10 + $0x40] sm:$0xff] }
 0x121   : > { %13984 = vmatprep.mubr.msk.f32.mxu1 %vm17767_vm1, %v23325_v8  ;;  %14309 = vmatprep.mubr.msk.f32.mxu0 %vm17767_vm1, %v23325_v8 }
 0x122   : > { %4120 = vperm.xlu1 %17445, %v525_v15   ;;  %4135 = vperm.xlu0 %17444, %v528_v16  }
 0x124   : > { %13985 = vmatmul.mubr.msk.f32.gmra.mrb[34].mxu1 %vm599_vm0, %v1147_v17  ;;  %14310 = vmatmul.mubr.msk.f32.gmra.mrb[40].mxu0 %vm599_vm0, %v2418_v18  ;;  %v18798_v17 = vld [vmem:[%s17973_s0 + $0x97] sm:$0xff] }
 0x125   : > { %13987 = vmatprep.mubr.msk.f32.mxu1 %vm17767_vm1, %v23325_v8  ;;  %14312 = vmatprep.mubr.msk.f32.mxu0 %vm17767_vm1, %v23325_v8  ;;  %v2735_v18 = vld [vmem:[%s17973_s0 + $0xbe] sm:$0xff] }
 0x128   : > { %13988 = vmatmul.mubr.msk.f32.gmra.mrb[36].mxu1 %vm599_vm0, %v1148_v19  ;;  %14313 = vmatmul.mubr.msk.f32.gmra.mrb[42].mxu0 %vm599_vm0, %v2419_v20  ;;  %v527_v19 = vld [vmem:[%s23316_s10 + $0x38] sm:$0xff]  ;;  %v530_v20 = vld [vmem:[%s23316_s10 + $0x50] sm:$0xff] }
 0x129   : > { %13990 = vmatprep.mubr.msk.f32.mxu1 %vm17767_vm1, %v23325_v8  ;;  %14315 = vmatprep.mubr.msk.f32.mxu0 %vm17767_vm1, %v23325_v8 }
 0x12a   : > { %4130 = vperm.xlu1 %17445, %v527_v19   ;;  %4145 = vperm.xlu0 %17444, %v530_v20   ;;  %v4321_v19 = vld [vmem:[%s23310_s4 + $0x18] sm:$0xff] }
 0x12c   : > { %13991 = vmatmul.mubr.msk.f32.gmra.mrb[38].mxu1 %vm599_vm0, %v1149_v21  ;;  %14316 = vmatmul.mubr.msk.f32.gmra.mrb[44].mxu0 %vm599_vm0, %v2420_v22  ;;  %v18815_v21 = vld [vmem:[%s17973_s0 + $0x9f] sm:$0xff] }
 0x12d   : > { %13993 = vmatprep.mubr.msk.f32.mxu1 %vm17767_vm1, %v23325_v8  ;;  %14318 = vmatprep.mubr.msk.f32.mxu0 %vm17767_vm1, %v23325_v8  ;;  %v2736_v22 = vld [vmem:[%s17973_s0 + $0xc6] sm:$0xff] }
 0x130   : > { %13994 = vmatmul.mubr.msk.f32.gmra.mrb[40].mxu1 %vm599_vm0, %v1150_v23  ;;  %14319 = vmatmul.mubr.msk.f32.gmra.mrb[46].mxu0 %vm599_vm0, %v2421_v24  ;;  %v529_v23 = vld [vmem:[%s23316_s10 + $0x48] sm:$0xff]  ;;  %v532_v24 = vld [vmem:[%s23316_s10 + $0x60] sm:$0xff] }
 0x131   : > { %13996 = vmatprep.mubr.msk.f32.mxu1 %vm17767_vm1, %v23325_v8  ;;  %14321 = vmatprep.mubr.msk.f32.mxu0 %vm17767_vm1, %v23325_v8 }
 0x132   : > { %4140 = vperm.xlu1 %17445, %v529_v23   ;;  %4155 = vperm.xlu0 %17444, %v532_v24  }
 0x134   : > { %13997 = vmatmul.mubr.msk.f32.gmra.mrb[42].mxu1 %vm599_vm0, %v1151_v25  ;;  %14322 = vmatmul.mubr.msk.f32.gmra.mrb[48].mxu0 %vm599_vm0, %v2422_v26  ;;  %v18832_v25 = vld [vmem:[%s17973_s0 + $0xa7] sm:$0xff] }
 0x135   : > { %13999 = vmatprep.mubr.msk.f32.mxu1 %vm17767_vm1, %v23325_v8  ;;  %14328 = vmatprep.mubr.msk.f32.mxu0 %vm17767_vm1, %v23325_v8  ;;  %v2737_v26 = vld [vmem:[%s17973_s0 + $0xce] sm:$0xff] }
 0x136   : > { %4150 = vperm.xlu1 %17445, %v531_v27   ;;  %4165 = vperm.xlu0 %17444, %v534_v28  }
 0x138   : > { %14000 = vmatmul.mubr.msk.f32.gmra.mrb[44].mxu1 %vm599_vm0, %v1152_v29  ;;  %14329 = vmatmul.mubr.msk.f32.vlgmr.msra.gmra.mrb[0].mxu0 %vm599_vm0, %v2715_v30  ;;  %v18849_v29 = vld [vmem:[%s17973_s0 + $0xaf] sm:$0xff] }
 0x139   : > { %14002 = vmatprep.mubr.msk.f32.mxu1 %vm17767_vm1, %v23325_v8  ;;  %14331 = vmatprep.mubr.msk.f32.mxu0 %vm17767_vm1, %v23325_v8  ;;  %v2738_v30 = vld [vmem:[%s17973_s0 + $0xd6] sm:$0xff] }
 0x13a   : > { %16065 = vmatpush3.bf16.msra.mxu0 %v16064_v31  ;;  %v536_v31 = vld [vmem:[%s23316_s10 + $0x80] sm:$0xff] }
 0x13b   : > { %16093 = vmatprep.subr.bf16.mxu0 %v23323_v4  ;;  %4175 = vperm.xlu0 %17444, %v536_v31  }
 0x13c   : > { %14003 = vmatmul.mubr.msk.f32.gmra.mrb[46].mxu1 %vm599_vm0, %v1153_v32  ;;  %14332 = vmatmul.mubr.msk.f32.gmra.mrb[2].mxu0 %vm599_vm0, %v2716_v33  ;;  %v18863_v32 = vld [vmem:[%s17973_s0 + $0xb7] sm:$0xff] }
 0x13d   : > { %14005 = vmatprep.mubr.msk.f32.mxu1 %vm17767_vm1, %v23325_v8  ;;  %14334 = vmatprep.mubr.msk.f32.mxu0 %vm17767_vm1, %v23325_v8  ;;  %v2739_v33 = vld [vmem:[%s17973_s0 + $0xde] sm:$0xf] }
 0x140   : > { %14006 = vmatmul.mubr.msk.f32.gmra.mrb[48].mxu1 %vm599_vm0, %v1154_v34  ;;  %14335 = vmatmul.mubr.msk.f32.gmra.mrb[4].mxu0 %vm599_vm0, %v2717_v35  ;;  %v533_v34 = vld [vmem:[%s23316_s10 + $0x68] sm:$0xff]  ;;  %v538_v35 = vld [vmem:[%s23316_s10 + $0x90] sm:$0xff] }
 0x141   : > { %14012 = vmatprep.mubr.msk.f32.mxu1 %vm17767_vm1, %v23325_v8  ;;  %14337 = vmatprep.mubr.msk.f32.mxu0 %vm17767_vm1, %v23325_v8 }
 0x142   : > { %4160 = vperm.xlu1 %17445, %v533_v34   ;;  %4185 = vperm.xlu0 %17444, %v538_v35  }
 0x144   : > { %14013 = vmatmul.mubr.msk.f32.vlgmr.msra.gmra.mrb[0].mxu1 %vm599_vm0, %v1447_v36  ;;  %14338 = vmatmul.mubr.msk.f32.gmra.mrb[6].mxu0 %vm599_vm0, %v2718_v37  ;;  %v18880_v36 = vld [vmem:[%s17973_s0 + $0xbf] sm:$0xff] }
 0x145   : > { %14015 = vmatprep.mubr.msk.f32.mxu1 %vm17767_vm1, %v23325_v8  ;;  %14340 = vmatprep.mubr.msk.f32.mxu0 %vm17767_vm1, %v23325_v8  ;;  %v535_v37 = vld [vmem:[%s23316_s10 + $0x78] sm:$0xff] }
 0x146   : > { %16238 = vmatpush3.bf16.msra.mxu1 %v17886_v7  ;;  %v18620_v7 = vld [vmem:[%s17973_s0 + $0x27] sm:$0xff]  ;;  %4170 = vperm.xlu1 %17445, %v535_v37  }
 0x147   : > { %16066 = vmatprep.subr.bf16.mxu1 %v23323_v4 }
 0x148   : > { %14016 = vmatmul.mubr.msk.f32.gmra.mrb[2].mxu1 %vm599_vm0, %v1448_v38  ;;  %14341 = vmatmul.mubr.msk.f32.gmra.mrb[8].mxu0 %vm599_vm0, %v2719_v39  ;;  %v540_v38 = vld [vmem:[%s23316_s10 + $0xa0] sm:$0xff] }
 0x149   : > { %14018 = vmatprep.mubr.msk.f32.mxu1 %vm17767_vm1, %v23325_v8  ;;  %14343 = vmatprep.mubr.msk.f32.mxu0 %vm17767_vm1, %v23325_v8  ;;  %v18897_v39 = vld [vmem:[%s17973_s0 + $0xc7] sm:$0xff] }
 0x14a   : > { %4195 = vperm.xlu0 %17444, %v540_v38  }
 0x14c   : > { %14019 = vmatmul.mubr.msk.f32.gmra.mrb[4].mxu1 %vm599_vm0, %v18609_v40  ;;  %14344 = vmatmul.mubr.msk.f32.gmra.mrb[10].mxu0 %vm599_vm0, %v2720_v41  ;;  %v542_v41 = vld [vmem:[%s23316_s10 + $0xb0] sm:$0xff] }
 0x14d   : > { %14021 = vmatprep.mubr.msk.f32.mxu1 %vm17767_vm1, %v23325_v8  ;;  %14346 = vmatprep.mubr.msk.f32.mxu0 %vm17767_vm1, %v23325_v8 }
 0x14e   : > { %4205 = vperm.xlu0 %17444, %v542_v41  }
 0x150   : > { %14022 = vmatmul.mubr.msk.f32.gmra.mrb[6].mxu1 %vm599_vm0, %v18620_v7  ;;  %14347 = vmatmul.mubr.msk.f32.gmra.mrb[12].mxu0 %vm599_vm0, %v2721_v42  ;;  %v1471_v42 = vld [vmem:[%s17973_s0 + $0xcf] sm:$0xf] }
 0x151   : > { %14024 = vmatprep.mubr.msk.f32.mxu1 %vm17767_vm1, %v23325_v8  ;;  %14349 = vmatprep.mubr.msk.f32.mxu0 %vm17767_vm1, %v23325_v8 }
 0x154   : > { %14025 = vmatmul.mubr.msk.f32.gmra.mrb[8].mxu1 %vm599_vm0, %v18631_v43  ;;  %14350 = vmatmul.mubr.msk.f32.gmra.mrb[14].mxu0 %vm599_vm0, %v2722_v44  ;;  %v544_v44 = vld [vmem:[%s23316_s10 + $0xc0] sm:$0xf] }
 0x155   : > { %14027 = vmatprep.mubr.msk.f32.mxu1 %vm17767_vm1, %v23325_v8  ;;  %14352 = vmatprep.mubr.msk.f32.mxu0 %vm17767_vm1, %v23325_v8 }
 0x156   : > { %4215 = vperm.xlu0 %17444, %v544_v44  }
 0x158   : > { %14028 = vmatmul.mubr.msk.f32.gmra.mrb[10].mxu1 %vm599_vm0, %v18642_v45  ;;  %14353 = vmatmul.mubr.msk.f32.gmra.mrb[16].mxu0 %vm599_vm0, %v2723_v46  ;;  %v1786_v46 = vld [vmem:[%s17973_s0 + $0xc0] sm:$0xff] }
 0x159   : > { %14030 = vmatprep.mubr.msk.f32.mxu1 %vm17767_vm1, %v23325_v8  ;;  %14355 = vmatprep.mubr.msk.f32.mxu0 %vm17767_vm1, %v23325_v8 }
 0x15c   : > { %14031 = vmatmul.mubr.msk.f32.gmra.mrb[12].mxu1 %vm599_vm0, %v18653_v47  ;;  %14356 = vmatmul.mubr.msk.f32.gmra.mrb[18].mxu0 %vm599_vm0, %v2724_v48  ;;  %v1787_v48 = vld [vmem:[%s17973_s0 + $0xc8] sm:$0xff] }
 0x15d   : > { %14033 = vmatprep.mubr.msk.f32.mxu1 %vm17767_vm1, %v23325_v8  ;;  %14358 = vmatprep.mubr.msk.f32.mxu0 %vm17767_vm1, %v23325_v8 }
 0x160   : > { %14034 = vmatmul.mubr.msk.f32.gmra.mrb[14].mxu1 %vm599_vm0, %v18664_v49  ;;  %14359 = vmatmul.mubr.msk.f32.gmra.mrb[20].mxu0 %vm599_vm0, %v2725_v50  ;;  %v1788_v50 = vld [vmem:[%s17973_s0 + $0xd0] sm:$0xf] }
 0x161   : > { %14036 = vmatprep.mubr.msk.f32.mxu1 %vm17767_vm1, %v23325_v8  ;;  %14361 = vmatprep.mubr.msk.f32.mxu0 %vm17767_vm1, %v23325_v8 }
 0x164   : > { %14037 = vmatmul.mubr.msk.f32.gmra.mrb[16].mxu1 %vm599_vm0, %v18675_v51  ;;  %14362 = vmatmul.mubr.msk.f32.gmra.mrb[22].mxu0 %vm599_vm0, %v2726_v52 }
 0x165   : > { %14039 = vmatprep.mubr.msk.f32.mxu1 %vm17767_vm1, %v23325_v8  ;;  %14364 = vmatprep.mubr.msk.f32.mxu0 %vm17767_vm1, %v23325_v8 }
 0x168   : > { %14040 = vmatmul.mubr.msk.f32.gmra.mrb[18].mxu1 %vm599_vm0, %v18686_v53  ;;  %14365 = vmatmul.mubr.msk.f32.gmra.mrb[24].mxu0 %vm599_vm0, %v2727_v54 }
 0x169   : > { %14042 = vmatprep.mubr.msk.f32.mxu1 %vm17767_vm1, %v23325_v8  ;;  %14367 = vmatprep.mubr.msk.f32.mxu0 %vm17767_vm1, %v23325_v8 }
 0x16c   : > { %14043 = vmatmul.mubr.msk.f32.gmra.mrb[20].mxu1 %vm599_vm0, %v18697_v55  ;;  %14368 = vmatmul.mubr.msk.f32.gmra.mrb[26].mxu0 %vm599_vm0, %v2728_v56 }
 0x16d   : > { %14045 = vmatprep.mubr.msk.f32.mxu1 %vm17767_vm1, %v23325_v8  ;;  %14370 = vmatprep.mubr.msk.f32.mxu0 %vm17767_vm1, %v23325_v8 }
 0x170   : > { %14046 = vmatmul.mubr.msk.f32.gmra.mrb[22].mxu1 %vm599_vm0, %v18708_v57  ;;  %14371 = vmatmul.mubr.msk.f32.gmra.mrb[28].mxu0 %vm599_vm0, %v2729_v58 }
 0x171   : > { %14048 = vmatprep.mubr.msk.f32.mxu1 %vm17767_vm1, %v23325_v8  ;;  %14373 = vmatprep.mubr.msk.f32.mxu0 %vm17767_vm1, %v23325_v8 }
 0x174   : > { %14049 = vmatmul.mubr.msk.f32.gmra.mrb[24].mxu1 %vm599_vm0, %v18719_v59  ;;  %14374 = vmatmul.mubr.msk.f32.gmra.mrb[30].mxu0 %vm599_vm0, %v2730_v60 }
 0x175   : > { %14051 = vmatprep.mubr.msk.f32.mxu1 %vm17767_vm1, %v23325_v8  ;;  %14376 = vmatprep.mubr.msk.f32.mxu0 %vm17767_vm1, %v23325_v8 }
 0x178   : > { %14052 = vmatmul.mubr.msk.f32.gmra.mrb[26].mxu1 %vm599_vm0, %v18733_v62  ;;  %14377 = vmatmul.mubr.msk.f32.gmra.mrb[32].mxu0 %vm599_vm0, %v2731_v63 }
 0x179   : > { %14054 = vmatprep.mubr.msk.f32.mxu1 %vm17767_vm1, %v23325_v8  ;;  %14379 = vmatprep.mubr.msk.f32.mxu0 %vm17767_vm1, %v23325_v8 }
 0x17c   : > { %14055 = vmatmul.mubr.msk.f32.gmra.mrb[28].mxu1 %vm599_vm0, %v18747_v2  ;;  %14380 = vmatmul.mubr.msk.f32.gmra.mrb[34].mxu0 %vm599_vm0, %v2732_v3 }
 0x17d   : > { %14057 = vmatprep.mubr.msk.f32.mxu1 %vm17767_vm1, %v23325_v8  ;;  %14382 = vmatprep.mubr.msk.f32.mxu0 %vm17767_vm1, %v23325_v8 }
 0x180   : > { %14058 = vmatmul.mubr.msk.f32.gmra.mrb[30].mxu1 %vm599_vm0, %v18764_v9  ;;  %14383 = vmatmul.mubr.msk.f32.gmra.mrb[36].mxu0 %vm599_vm0, %v2733_v10 }
 0x181   : > { %14060 = vmatprep.mubr.msk.f32.mxu1 %vm17767_vm1, %v23325_v8  ;;  %14385 = vmatprep.mubr.msk.f32.mxu0 %vm17767_vm1, %v23325_v8 }
 0x184   : > { %14061 = vmatmul.mubr.msk.f32.gmra.mrb[32].mxu1 %vm599_vm0, %v18781_v13  ;;  %14386 = vmatmul.mubr.msk.f32.gmra.mrb[38].mxu0 %vm599_vm0, %v2734_v14 }
 0x185   : > { %14063 = vmatprep.mubr.msk.f32.mxu1 %vm17767_vm1, %v23325_v8  ;;  %14388 = vmatprep.mubr.msk.f32.mxu0 %vm17767_vm1, %v23325_v8 }
 0x188   : > { %14064 = vmatmul.mubr.msk.f32.gmra.mrb[34].mxu1 %vm599_vm0, %v18798_v17  ;;  %14389 = vmatmul.mubr.msk.f32.gmra.mrb[40].mxu0 %vm599_vm0, %v2735_v18  ;;  %v4320_v18 = vld [vmem:[%s23310_s4 + $0x10] sm:$0xff] }
 0x189   : > { %14066 = vmatprep.mubr.msk.f32.mxu1 %vm17767_vm1, %v23325_v8  ;;  %14391 = vmatprep.mubr.msk.f32.mxu0 %vm17767_vm1, %v23325_v8 }
 0x18c   : > { %14067 = vmatmul.mubr.msk.f32.gmra.mrb[36].mxu1 %vm599_vm0, %v18815_v21  ;;  %14392 = vmatmul.mubr.msk.f32.gmra.mrb[42].mxu0 %vm599_vm0, %v2736_v22 }
 0x18d   : > { %14069 = vmatprep.mubr.msk.f32.mxu1 %vm17767_vm1, %v23325_v8  ;;  %14394 = vmatprep.mubr.msk.f32.mxu0 %vm17767_vm1, %v23325_v8 }
 0x190   : > { %14070 = vmatmul.mubr.msk.f32.gmra.mrb[38].mxu1 %vm599_vm0, %v18832_v25  ;;  %14395 = vmatmul.mubr.msk.f32.gmra.mrb[44].mxu0 %vm599_vm0, %v2737_v26  ;;  %v4295_v26 = vld [vmem:[#allocation2 + $0x2] sm:$0xff] }
 0x191   : > { %14072 = vmatprep.mubr.msk.f32.mxu1 %vm17767_vm1, %v23325_v8  ;;  %14397 = vmatprep.mubr.msk.f32.mxu0 %vm17767_vm1, %v23325_v8 }
 0x194   : > { %14073 = vmatmul.mubr.msk.f32.gmra.mrb[40].mxu1 %vm599_vm0, %v18849_v29  ;;  %14398 = vmatmul.mubr.msk.f32.gmra.mrb[46].mxu0 %vm599_vm0, %v2738_v30 }
 0x195   : > { %14075 = vmatprep.mubr.msk.f32.mxu1 %vm17767_vm1, %v23325_v8  ;;  %14400 = vmatprep.mubr.msk.f32.mxu0 %vm17767_vm1, %v23325_v8 }
 0x198   : > { %14076 = vmatmul.mubr.msk.f32.gmra.mrb[42].mxu1 %vm599_vm0, %v18863_v32  ;;  %14401 = vmatmul.mubr.msk.f32.gmra.mrb[48].mxu0 %vm599_vm0, %v2739_v33 }
 0x199   : > { %14078 = vmatprep.mubr.msk.f32.mxu1 %vm17767_vm1, %v23325_v8  ;;  %14407 = vmatprep.mubr.msk.f32.mxu0 %vm17767_vm1, %v23325_v8 }
 0x19c   : > { %14079 = vmatmul.mubr.msk.f32.gmra.mrb[44].mxu1 %vm599_vm0, %v18880_v36  ;;  %14408 = vmatmul.mubr.msk.f32.vlgmr.msra.gmra.mrb[0].mxu0 %vm599_vm0, %v18609_v40  ;;  %v537_v40 = vld [vmem:[%s23316_s10 + $0x88] sm:$0xff] }
 0x19d   : > { %14081 = vmatprep.mubr.msk.f32.mxu1 %vm17767_vm1, %v23325_v8  ;;  %14410 = vmatprep.mubr.msk.f32.mxu0 %vm17767_vm1, %v23325_v8 }
 0x19e   : > { %4180 = vperm.xlu1 %17445, %v537_v40   ;;  %v19086_v40 = vld [vmem:[%s23308_s2] ss:$0 sm:$0xff] }
 0x1a0   : > { %14082 = vmatmul.mubr.msk.f32.gmra.mrb[46].mxu1 %vm599_vm0, %v18897_v39  ;;  %14411 = vmatmul.mubr.msk.f32.gmra.mrb[2].mxu0 %vm599_vm0, %v18620_v7  ;;  %v539_v7 = vld [vmem:[%s23316_s10 + $0x98] sm:$0xff] }
 0x1a1   : > { %14084 = vmatprep.mubr.msk.f32.mxu1 %vm17767_vm1, %v23325_v8  ;;  %14413 = vmatprep.mubr.msk.f32.mxu0 %vm17767_vm1, %v23325_v8 }
 0x1a2   : > { %4190 = vperm.xlu1 %17445, %v539_v7   ;;  %v19091_v7 = vld [vmem:[%s23309_s3] ss:$0 sm:$0xff] }
 0x1a4   : > { %14085 = vmatmul.mubr.msk.f32.gmra.mrb[48].mxu1 %vm599_vm0, %v1471_v42  ;;  %14414 = vmatmul.mubr.msk.f32.gmra.mrb[4].mxu0 %vm599_vm0, %v18631_v43  ;;  %v541_v43 = vld [vmem:[%s23316_s10 + $0xa8] sm:$0xff] }
 0x1a5   : > { %14157 = vmatprep.mubr.msk.f32.mxu1 %vm17767_vm1, %v23325_v8  ;;  %14416 = vmatprep.mubr.msk.f32.mxu0 %vm17767_vm1, %v23325_v8 }
 0x1a6   : > { %4200 = vperm.xlu1 %17445, %v541_v43  }
 0x1a8   : > { %14158 = vmatmul.mubr.msk.f32.vlgmr.msra.gmra.mrb[44].mxu1 %vm599_vm0, %v1786_v46  ;;  %14417 = vmatmul.mubr.msk.f32.gmra.mrb[6].mxu0 %vm599_vm0, %v18642_v45  ;;  %v543_v45 = vld [vmem:[%s23316_s10 + $0xb8] sm:$0xff] }
 0x1a9   : > { %14160 = vmatprep.mubr.msk.f32.mxu1 %vm17767_vm1, %v23325_v8  ;;  %14419 = vmatprep.mubr.msk.f32.mxu0 %vm17767_vm1, %v23325_v8 }
 0x1aa   : > { %4210 = vperm.xlu1 %17445, %v543_v45  }
 0x1ac   : > { %14161 = vmatmul.mubr.msk.f32.gmra.mrb[46].mxu1 %vm599_vm0, %v1787_v48  ;;  %14420 = vmatmul.mubr.msk.f32.gmra.mrb[8].mxu0 %vm599_vm0, %v18653_v47  ;;  %v3054_v47 = vld [vmem:[%s17973_s0 + $0xcf] sm:$0xff] }
 0x1ad   : > { %14163 = vmatprep.mubr.msk.f32.mxu1 %vm17767_vm1, %v23325_v8  ;;  %14422 = vmatprep.mubr.msk.f32.mxu0 %vm17767_vm1, %v23325_v8 }
 0x1b0   : > { %14164 = vmatmul.mubr.msk.f32.gmra.mrb[48].mxu1 %vm599_vm0, %v1788_v50  ;;  %14423 = vmatmul.mubr.msk.f32.gmra.mrb[10].mxu0 %vm599_vm0, %v18664_v49  ;;  %v3055_v49 = vld [vmem:[%s17973_s0 + $0xd7] sm:$0xff] }
 0x1b1   : > { %14425 = vmatprep.mubr.msk.f32.mxu0 %vm17767_vm1, %v23325_v8  ;;  %14486 = vmatprep.mubr.msk.f32.mxu1 %vm17767_vm1, %v23325_v8 }
 0x1b4   : > { %14426 = vmatmul.mubr.msk.f32.gmra.mrb[12].mxu0 %vm599_vm0, %v18675_v51  ;;  %v3056_v51 = vld [vmem:[%s17973_s0 + $0xdf] sm:$0xf] }
 0x1b5   : > { %14428 = vmatprep.mubr.msk.f32.mxu0 %vm17767_vm1, %v23325_v8 }
 0x1b8   : > { %14429 = vmatmul.mubr.msk.f32.gmra.mrb[14].mxu0 %vm599_vm0, %v18686_v53 }
 0x1b9   : > { %14431 = vmatprep.mubr.msk.f32.mxu0 %vm17767_vm1, %v23325_v8 }
 0x1bc   : > { %14432 = vmatmul.mubr.msk.f32.gmra.mrb[16].mxu0 %vm599_vm0, %v18697_v55 }
 0x1bd   : > { %14434 = vmatprep.mubr.msk.f32.mxu0 %vm17767_vm1, %v23325_v8 }
 0x1c0   : > { %14435 = vmatmul.mubr.msk.f32.gmra.mrb[18].mxu0 %vm599_vm0, %v18708_v57 }
 0x1c1   : > { %14437 = vmatprep.mubr.msk.f32.mxu0 %vm17767_vm1, %v23325_v8 }
 0x1c4   : > { %14438 = vmatmul.mubr.msk.f32.gmra.mrb[20].mxu0 %vm599_vm0, %v18719_v59 }
 0x1c5   : > { %14440 = vmatprep.mubr.msk.f32.mxu0 %vm17767_vm1, %v23325_v8 }
 0x1c8   : > { %14441 = vmatmul.mubr.msk.f32.gmra.mrb[22].mxu0 %vm599_vm0, %v18733_v62 }
 0x1c9   : > { %14443 = vmatprep.mubr.msk.f32.mxu0 %vm17767_vm1, %v23325_v8 }
 0x1cc   : > { %14444 = vmatmul.mubr.msk.f32.gmra.mrb[24].mxu0 %vm599_vm0, %v18747_v2 }
 0x1cd   : > { %14446 = vmatprep.mubr.msk.f32.mxu0 %vm17767_vm1, %v23325_v8 }
 0x1d0   : > { %14447 = vmatmul.mubr.msk.f32.gmra.mrb[26].mxu0 %vm599_vm0, %v18764_v9 }
 0x1d1   : > { %14449 = vmatprep.mubr.msk.f32.mxu0 %vm17767_vm1, %v23325_v8 }
 0x1d4   : > { %14450 = vmatmul.mubr.msk.f32.gmra.mrb[28].mxu0 %vm599_vm0, %v18781_v13 }
 0x1d5   : > { %14452 = vmatprep.mubr.msk.f32.mxu0 %vm17767_vm1, %v23325_v8 }
 0x1d8   : > { %14453 = vmatmul.mubr.msk.f32.gmra.mrb[30].mxu0 %vm599_vm0, %v18798_v17 }
 0x1d9   : > { %14455 = vmatprep.mubr.msk.f32.mxu0 %vm17767_vm1, %v23325_v8 }
 0x1dc   : > { %14456 = vmatmul.mubr.msk.f32.gmra.mrb[32].mxu0 %vm599_vm0, %v18815_v21  ;;  %v16067_v21 = vpack.c.bf16 %v4321_v19, %v4320_v18 }
 0x1dd   : > { %14458 = vmatprep.mubr.msk.f32.mxu0 %vm17767_vm1, %v23325_v8 }
 0x1de   : > { %16068 = vmatpush3.bf16.msra.mxu1 %v16067_v21 }
 0x1df   : > { %16069 = vmatprep.subr.bf16.mxu1 %v23323_v4 }
 0x1e0   : > { %14459 = vmatmul.mubr.msk.f32.gmra.mrb[34].mxu0 %vm599_vm0, %v18832_v25 }
 0x1e1   : > { %14461 = vmatprep.mubr.msk.f32.mxu0 %vm17767_vm1, %v23325_v8  ;;  %14487 = vmatmul.mubr.msk.f32.vlgmr.msra.gmra.mrb[50].mxu1 %vm599_vm0, %v4295_v26 }
 0x1e2   : > { %14489 = vmatprep.mubr.msk.f32.mxu1 %vm17767_vm1, %v23325_v8 }
 0x1e4   : > { %14462 = vmatmul.mubr.msk.f32.gmra.mrb[36].mxu0 %vm599_vm0, %v18849_v29 }
 0x1e5   : > { %14464 = vmatprep.mubr.msk.f32.mxu0 %vm17767_vm1, %v23325_v8 }
 0x1e8   : > { %14465 = vmatmul.mubr.msk.f32.gmra.mrb[38].mxu0 %vm599_vm0, %v18863_v32 }
 0x1e9   : > { %14467 = vmatprep.mubr.msk.f32.mxu0 %vm17767_vm1, %v23325_v8 }
 0x1ec   : > { %14468 = vmatmul.mubr.msk.f32.gmra.mrb[40].mxu0 %vm599_vm0, %v18880_v36 }
 0x1ed   : > { %14470 = vmatprep.mubr.msk.f32.mxu0 %vm17767_vm1, %v23325_v8 }
 0x1f0   : > { %14471 = vmatmul.mubr.msk.f32.gmra.mrb[42].mxu0 %vm599_vm0, %v18897_v39 }
 0x1f1   : > { %14473 = vmatprep.mubr.msk.f32.mxu0 %vm17767_vm1, %v23325_v8 }
 0x1f4   : > { %14474 = vmatmul.mubr.msk.f32.gmra.mrb[44].mxu0 %vm599_vm0, %v3054_v47 }
 0x1f5   : > { %14476 = vmatprep.mubr.msk.f32.mxu0 %vm17767_vm1, %v23325_v8 }
 0x1f8   : > { %14477 = vmatmul.mubr.msk.f32.gmra.mrb[46].mxu0 %vm599_vm0, %v3055_v49 }
 0x1f9   : > { %14479 = vmatprep.mubr.msk.f32.mxu0 %vm17767_vm1, %v23325_v8 }
 0x1fc   : > { %14480 = vmatmul.mubr.msk.f32.gmra.mrb[48].mxu0 %vm599_vm0, %v3056_v51 }
 0x1fd   : > { %15201 = vmatprep.mubr.msk.f32.mxu0 %vm17767_vm1, %v23325_v8 }
 0x217   : > { %v1615_v52 = vpop.f32.mrb[0].mxu1 }
 0x218   : > { %v14014_v53 = vpop.f32.mrb[1].mxu1 }
 0x21b   : > { %v1620_v54 = vpop.f32.mrb[2].mxu1 }
 0x21c   : > { %v14017_v55 = vpop.f32.mrb[3].mxu1 }
 0x21f   : > { %v19033_v56 = vpop.f32.mrb[4].mxu1 }
 0x220   : > { %v14020_v57 = vpop.f32.mrb[5].mxu1 }
 0x223   : > { %v19035_v58 = vpop.f32.mrb[6].mxu1 }
 0x224   : > { %v14023_v59 = vpop.f32.mrb[7].mxu1 }
 0x227   : > { %v19037_v60 = vpop.f32.mrb[8].mxu1 }
 0x228   : > { %v14026_v61 = vpop.f32.mrb[9].mxu1 }
 0x22b   : > { %v19039_v62 = vpop.f32.mrb[10].mxu1 }
 0x22c   : > { %v14029_v63 = vpop.f32.mrb[11].mxu1 }
 0x22f   : > { %v19041_v0 = vpop.f32.mrb[12].mxu1 }
 0x230   : > { %v14032_v1 = vpop.f32.mrb[13].mxu1 }
 0x233   : > { %v19043_v2 = vpop.f32.mrb[14].mxu1 }
 0x234   : > { %v14035_v3 = vpop.f32.mrb[15].mxu1 }
 0x237   : > { %v19045_v5 = vpop.f32.mrb[16].mxu1 }
 0x238   : > { %v14038_v6 = vpop.f32.mrb[17].mxu1 }
 0x23b   : > { %v19047_v9 = vpop.f32.mrb[18].mxu1 }
 0x23c   : > { %v14041_v10 = vpop.f32.mrb[19].mxu1 }
 0x23f   : > { %v19049_v11 = vpop.f32.mrb[20].mxu1 }
 0x240   : > { %v14044_v12 = vpop.f32.mrb[21].mxu1 }
 0x243   : > { %v19051_v13 = vpop.f32.mrb[22].mxu1 }
 0x244   : > { %v14047_v14 = vpop.f32.mrb[23].mxu1 }
 0x247   : > { %v19053_v15 = vpop.f32.mrb[24].mxu1 }
 0x248   : > { %v14050_v16 = vpop.f32.mrb[25].mxu1 }
 0x24b   : > { %v19055_v17 = vpop.f32.mrb[26].mxu1 }
 0x24c   : > { %v14053_v20 = vpop.f32.mrb[27].mxu1 }
 0x24f   : > { %v19063_v22 = vpop.f32.mrb[28].mxu1 }
 0x250   : > { %v14056_v23 = vpop.f32.mrb[29].mxu1 }
 0x253   : > { %v19066_v24 = vpop.f32.mrb[30].mxu1 }
 0x254   : > { %v14059_v25 = vpop.f32.mrb[31].mxu1 }
 0x257   : > { %v19069_v27 = vpop.f32.mrb[32].mxu1 }
 0x258   : > { %v14062_v28 = vpop.f32.mrb[33].mxu1 }
 0x25b   : > { %v19073_v29 = vpop.f32.mrb[34].mxu1 }
 0x25c   : > { %v14065_v30 = vpop.f32.mrb[35].mxu1 }
 0x25f   : > { %v19075_v31 = vpop.f32.mrb[36].mxu1 }
 0x260   : > { %23348 = vst [vmem:[#allocation5_spill] sm:$0xff] %v19075_v31  ;;  %v14068_v32 = vpop.f32.mrb[37].mxu1 }
 0x263   : > { %v19077_v33 = vpop.f32.mrb[38].mxu1 }
 0x264   : > { %23349 = vst [vmem:[#allocation6_spill] sm:$0xff] %v19077_v33  ;;  %v14071_v34 = vpop.f32.mrb[39].mxu1 }
 0x267   : > { %v19079_v35 = vpop.f32.mrb[40].mxu1 }
 0x268   : > { %23350 = vst [vmem:[#allocation7_spill] sm:$0xff] %v19079_v35  ;;  %v14074_v36 = vpop.f32.mrb[41].mxu1 }
 0x26b   : > { %v19081_v37 = vpop.f32.mrb[42].mxu1 }
 0x26c   : > { %23351 = vst [vmem:[#allocation8_spill] sm:$0xff] %v19081_v37  ;;  %v14077_v38 = vpop.f32.mrb[43].mxu1 }
 0x26f   : > { %v3200_v39 = vpop.f32.mrb[0].mxu0 }
 0x270   : > { %v16239_v41 = vadd.f32 %v3200_v39, %v1615_v52  ;;  %v14409_v42 = vpop.f32.mrb[1].mxu0 }
 0x272   : > { %v3356_v44 = vmul.f32 %v16239_v41, %v19086_v40 }
 0x273   : > { %v3205_v46 = vpop.f32.mrb[2].mxu0 }
 0x274   : > { %v3388_v43 = vadd.f32 %v19091_v7, %v3356_v44  ;;  %v16240_v48 = vadd.f32 %v3205_v46, %v1620_v54  ;;  %v14412_v45 = vpop.f32.mrb[3].mxu0 }
 0x276   : > { %v19095_v50 = vmul.f32 0.70710677, %v3388_v43  ;;  %v3357_v47 = vmul.f32 %v16240_v48, %v19086_v40 }
 0x277   : > { %v3210_v49 = vpop.f32.mrb[4].mxu0 }
 0x278   : > { %v3438_v51 = vand.u32 2147483647, %v19095_v50  ;;  %v3389_v52 = vadd.f32 %v19091_v7, %v3357_v47  ;;  %v16241_v53 = vadd.f32 %v3210_v49, %v19033_v56  ;;  %v14415_v55 = vpop.f32.mrb[5].mxu0  ;;  %vm3913_vm2 = vcmp.ge.f32.partialorder %v19095_v50, 0.0 }
 0x27a   : > { %v3463_v57 = vmul.f32 0.3275911, %v3438_v51  ;;  %v19101_v59 = vmul.f32 0.70710677, %v3389_v52  ;;  %v3358_v61 = vmul.f32 %v16241_v53, %v19086_v40  ;;  %v3763_v56 = vsub.f32 0.0, %v3438_v51 }
 0x27b   : > { %v19104_v63 = vpop.f32.mrb[44].mxu1  ;;  %v3215_v54 = vpop.f32.mrb[6].mxu0 }
 0x27c   : > { %23352 = vst [vmem:[#allocation9_spill] sm:$0xff] %v19104_v63  ;;  %v3488_v1 = vadd.f32 1.0, %v3463_v57  ;;  %v3439_v3 = vand.u32 2147483647, %v19101_v59  ;;  %v3390_v6 = vadd.f32 %v19091_v7, %v3358_v61  ;;  %v14159_v10 = vpop.f32.mrb[45].mxu1  ;;  %v14418_v12 = vpop.f32.mrb[7].mxu0  ;;  %v16242_v14 = vadd.f32 %v3215_v54, %v19035_v58 }
 0x27d   : > { %v3788_v34 = vmul.f32 %v3763_v56, %v3438_v51  ;;  %vm3914_vm3 = vcmp.ge.f32.partialorder %v19101_v59, 0.0 }
 0x27e   : > { %17446 = vrcp.f32 %v3488_v1  ;;  %v3464_v16 = vmul.f32 0.3275911, %v3439_v3  ;;  %v19109_v18 = vmul.f32 0.70710677, %v3390_v6  ;;  %v3359_v19 = vmul.f32 %v16242_v14, %v19086_v40 }
 0x27f   : > { %v19112_v20 = vpop.f32.mrb[46].mxu1  ;;  %v3220_v21 = vpop.f32.mrb[8].mxu0  ;;  %v3764_v25 = vsub.f32 0.0, %v3439_v3  ;;  %v3813_v53 = vmul.f32 1.442695, %v3788_v34  ;;  %v19129_v1 = vmul.f32 0.5, %v3388_v43 }
 0x280   : > { %23353 = vst [vmem:[#allocation10_spill] sm:$0xff] %v19112_v20  ;;  %v3489_v23 = vadd.f32 1.0, %v3464_v16  ;;  %v16243_v26 = vadd.f32 %v3220_v21, %v19037_v60  ;;  %v14162_v28 = vpop.f32.mrb[47].mxu1  ;;  %v14421_v30 = vpop.f32.mrb[9].mxu0  ;;  %v3440_v32 = vand.u32 2147483647, %v19109_v18  ;;  %v3391_v58 = vadd.f32 %v19091_v7, %v3359_v19 }
 0x281   : > { %v3789_v42 = vmul.f32 %v3764_v25, %v3439_v3  ;;  %v19141_v28 = vmul.f32 0.5, %v3390_v6  ;;  %vm3915_vm4 = vcmp.ge.f32.partialorder %v19109_v18, 0.0 }
 0x282   : > { %17448 = vrcp.f32 %v3489_v23  ;;  %v3360_v36 = vmul.f32 %v16243_v26, %v19086_v40  ;;  %v3465_v38 = vmul.f32 0.3275911, %v3440_v32  ;;  %v19118_v39 = vmul.f32 0.70710677, %v3391_v58 }
 0x283   : > { %v19120_v41 = vpop.f32.mrb[48].mxu1  ;;  %v3225_v46 = vpop.f32.mrb[10].mxu0  ;;  %v3765_v45 = vsub.f32 0.0, %v3440_v32  ;;  %v3815_v56 = vmul.f32 1.442695, %v3789_v42  ;;  %v19139_v26 = vmul.f32 0.5, %v3389_v52 }
 0x284   : > { %23354 = vst [vmem:[#allocation11_spill] sm:$0xff] %v19120_v41  ;;  %v3392_v44 = vadd.f32 %v19091_v7, %v3360_v36  ;;  %v14165_v60 = vpop.f32.mrb[49].mxu1  ;;  %v3490_v48 = vadd.f32 1.0, %v3465_v38  ;;  %v3441_v47 = vand.u32 2147483647, %v19118_v39  ;;  %v16244_v49 = vadd.f32 %v3225_v46, %v19039_v62  ;;  %v14424_v51 = vpop.f32.mrb[11].mxu0 }
 0x285   : > { %v3790_v16 = vmul.f32 %v3765_v45, %v3440_v32  ;;  %vm3916_vm5 = vcmp.ge.f32.partialorder %v19118_v39, 0.0 }
 0x286   : > { %v19125_v55 = vmul.f32 0.70710677, %v3392_v44  ;;  %17450 = vrcp.f32 %v3490_v48  ;;  %v3466_v57 = vmul.f32 0.3275911, %v3441_v47  ;;  %v3361_v10 = vmul.f32 %v16244_v49, %v19086_v40 }
 0x287   : > { %v3230_v61 = vpop.f32.mrb[12].mxu0  ;;  %17452 = vpow2.f32 %v3813_v53  ;;  %v3766_v34 = vsub.f32 0.0, %v3441_v47  ;;  %v3817_v52 = vmul.f32 1.442695, %v3790_v16  ;;  %v19157_v53 = vmul.f32 0.5, %v3392_v44 }
 0x288   : > { %v19127_v54 = vpop.eup %17446  ;;  %v3442_v3 = vand.u32 2147483647, %v19125_v55  ;;  %v16245_v12 = vadd.f32 %v3230_v61, %v19041_v0  ;;  %v14427_v14 = vpop.f32.mrb[13].mxu0  ;;  %v3491_v19 = vadd.f32 1.0, %v3466_v57  ;;  %v19136_v23 = vadd.f32 %v19091_v7, %v3361_v10 }
 0x289   : > { %v3538_v62 = vmul.f32 1.0614054, %v19127_v54  ;;  %v19159_v57 = vmul.f32 0.5, %v3391_v58  ;;  %v3791_v61 = vmul.f32 %v3766_v34, %v3441_v47  ;;  %vm3917_vm6 = vcmp.ge.f32.partialorder %v19125_v55, 0.0 }
 0x28a   : > { %v3467_v21 = vmul.f32 0.3275911, %v3442_v3  ;;  %v3362_v43 = vmul.f32 %v16245_v12, %v19086_v40  ;;  %17454 = vrcp.f32 %v3491_v19  ;;  %v19146_v32 = vmul.f32 0.70710677, %v19136_v23 }
 0x28b   : > { %v3563_v25 = vadd.f32 -1.4531521, %v3538_v62  ;;  %v3235_v0 = vpop.f32.mrb[14].mxu0  ;;  %17456 = vpow2.f32 %v3815_v56  ;;  %v3767_v6 = vsub.f32 0.0, %v3442_v3 }
 0x28c   : > { %v19143_v30 = vpop.eup %17448  ;;  %v3492_v36 = vadd.f32 1.0, %v3467_v21  ;;  %v19149_v38 = vadd.f32 %v19091_v7, %v3362_v43  ;;  %v14430_v42 = vpop.f32.mrb[15].mxu0  ;;  %v3443_v48 = vand.u32 2147483647, %v19146_v32  ;;  %v16246_v21 = vadd.f32 %v3235_v0, %v19043_v2 }
 0x28d   : > { %v3588_v46 = vmul.f32 %v19127_v54, %v3563_v25  ;;  %v3539_v60 = vmul.f32 1.0614054, %v19143_v30  ;;  %v3792_v44 = vmul.f32 %v3767_v6, %v3442_v3  ;;  %vm3918_vm7 = vcmp.ge.f32.partialorder %v19146_v32, 0.0 }
 0x28e   : > { %17458 = vrcp.f32 %v3492_v36  ;;  %v19155_v45 = vmul.f32 0.70710677, %v19149_v38  ;;  %v3468_v10 = vmul.f32 0.3275911, %v3443_v48  ;;  %v3768_v12 = vsub.f32 0.0, %v3443_v48 }
 0x28f   : > { %v3613_v49 = vadd.f32 1.4214138, %v3588_v46  ;;  %v3564_v51 = vadd.f32 -1.4531521, %v3539_v60  ;;  %v3240_v56 = vpop.f32.mrb[16].mxu0  ;;  %17460 = vpow2.f32 %v3817_v52  ;;  %v3363_v46 = vmul.f32 %v16246_v21, %v19086_v40 }
 0x290   : > { %v3444_v14 = vand.u32 2147483647, %v19155_v45  ;;  %v19162_v62 = vpop.eup %17450  ;;  %v14433_v43 = vpop.f32.mrb[17].mxu0  ;;  %v3493_v25 = vadd.f32 1.0, %v3468_v10  ;;  %v3793_v42 = vmul.f32 %v3768_v12, %v3443_v48  ;;  %v3821_v48 = vmul.f32 1.442695, %v3792_v44 }
 0x291   : > { %v3638_v16 = vmul.f32 %v19127_v54, %v3613_v49  ;;  %v3589_v19 = vmul.f32 %v19143_v30, %v3564_v51  ;;  %v3540_v58 = vmul.f32 1.0614054, %v19162_v62  ;;  %v17453_v4 = vpop.eup %17452  ;;  %v3819_v49 = vmul.f32 1.442695, %v3791_v61 }
 0x292   : > { %v3469_v47 = vmul.f32 0.3275911, %v3444_v14  ;;  %17462 = vrcp.f32 %v3493_v25  ;;  %v3769_v6 = vsub.f32 0.0, %v3444_v14  ;;  %v19176_v10 = vadd.f32 %v19091_v7, %v3363_v46 }
 0x293   : > { %v3663_v34 = vadd.f32 -0.28449672, %v3638_v16  ;;  %v3614_v36 = vadd.f32 1.4214138, %v3589_v19  ;;  %v19169_v60 = vpop.f32.mrb[18].mxu0  ;;  %v16247_v61 = vadd.f32 %v3240_v56, %v19045_v5  ;;  %vm3919_vm8 = vcmp.ge.f32.partialorder %v19155_v45, 0.0 }
 0x294   : > { %v3565_v52 = vadd.f32 -1.4531521, %v3540_v58  ;;  %v3494_v51 = vadd.f32 1.0, %v3469_v47  ;;  %v14436_v8 = vpop.f32.mrb[19].mxu0  ;;  %v19171_v2 = vpop.eup %17454  ;;  %v3823_v43 = vmul.f32 1.442695, %v3793_v42  ;;  %v3794_v56 = vmul.f32 %v3769_v6, %v3444_v14 }
 0x295   : > { %v3688_v3 = vmul.f32 %v19127_v54, %v3663_v34  ;;  %v3639_v0 = vmul.f32 %v19143_v30, %v3614_v36  ;;  %v3541_v16 = vmul.f32 1.0614054, %v19171_v2  ;;  %v17457_v19 = vpop.eup %17456  ;;  %v19185_v44 = vmul.f32 0.70710677, %v19176_v10 }
 0x296   : > { %v3590_v12 = vmul.f32 %v19162_v62, %v3565_v52  ;;  %17464 = vrcp.f32 %v3494_v51  ;;  %v3364_v51 = vmul.f32 %v16247_v61, %v19086_v40  ;;  %v3825_v61 = vmul.f32 1.442695, %v3794_v56 }
 0x297   : > { %v3713_v21 = vadd.f32 0.2548296, %v3688_v3  ;;  %v3664_v8 = vadd.f32 -0.28449672, %v3639_v0  ;;  %17466 = vpow2.f32 %v3819_v49  ;;  %v3566_v47 = vadd.f32 -1.4531521, %v3541_v16 }
 0x298   : > { %v19181_v58 = vpop.eup %17458  ;;  %v3615_v25 = vadd.f32 1.4214138, %v3590_v12  ;;  %v19190_v46 = vpop.f32.mrb[20].mxu0  ;;  %v3445_v49 = vand.u32 2147483647, %v19185_v44  ;;  %17468 = vpow2.f32 %v3821_v48  ;;  %vm3920_vm9 = vcmp.ge.f32.partialorder %v19185_v44, 0.0 }
 0x299   : > { %v3738_v34 = vmul.f32 %v19127_v54, %v3713_v21  ;;  %v3689_v36 = vmul.f32 %v19143_v30, %v3664_v8  ;;  %v3542_v5 = vmul.f32 1.0614054, %v19181_v58  ;;  %v3591_v52 = vmul.f32 %v19171_v2, %v3566_v47  ;;  %v14439_v3 = vpop.f32.mrb[21].mxu0  ;;  %v17461_v0 = vpop.eup %17460 }
 0x29a   : > { %v3640_v42 = vmul.f32 %v19162_v62, %v3615_v25  ;;  %17470 = vpow2.f32 %v3823_v43  ;;  %v3470_v8 = vmul.f32 0.3275911, %v3445_v49  ;;  %v16249_v55 = vadd.f32 %v19190_v46, %v19049_v11 }
 0x29b   : > { %v3863_v12 = vmul.f32 %v17453_v4, %v3738_v34  ;;  %v3714_v16 = vadd.f32 0.2548296, %v3689_v36  ;;  %v3567_v54 = vadd.f32 -1.4531521, %v3542_v5  ;;  %v19196_v21 = vpop.f32.mrb[22].mxu0  ;;  %v19206_v36 = vadd.f32 %v19091_v7, %v3364_v51 }
 0x29c   : > { %v3665_v14 = vadd.f32 -0.28449672, %v3640_v42  ;;  %v3616_v6 = vadd.f32 1.4214138, %v3591_v52  ;;  %v14442_v3 = vpop.f32.mrb[23].mxu0  ;;  %v19201_v20 = vpop.eup %17462  ;;  %v3495_v34 = vadd.f32 1.0, %v3470_v8 }
 0x29d   : > { %v3888_v25 = vsub.f32 1.0, %v3863_v12  ;;  %v3739_v47 = vmul.f32 %v19143_v30, %v3714_v16  ;;  %v3592_v41 = vmul.f32 %v19181_v58, %v3567_v54  ;;  %v3543_v52 = vmul.f32 1.0614054, %v19201_v20 }
 0x29e   : > { %v3690_v4 = vmul.f32 %v19162_v62, %v3665_v14  ;;  %v3641_v48 = vmul.f32 %v19171_v2, %v3616_v6  ;;  %17472 = vrcp.f32 %v3495_v34  ;;  %v3770_v16 = vsub.f32 0.0, %v3445_v49  ;;  %v19220_v34 = vpop.permute.xlu0 %4095 }
 0x29f   : > { %v3938_v43 = vsub.f32 0.0, %v3888_v25  ;;  %v3864_v5 = vmul.f32 %v17457_v19, %v3739_v47  ;;  %v3617_v42 = vadd.f32 1.4214138, %v3592_v41  ;;  %v19209_v30 = vpop.f32.mrb[24].mxu0  ;;  %v3568_v41 = vadd.f32 -1.4531521, %v3543_v52 }
 0x2a0   : > { %v3715_v12 = vadd.f32 0.2548296, %v3690_v4  ;;  %v3666_v56 = vadd.f32 -0.28449672, %v3641_v48  ;;  %v14445_v54 = vpop.f32.mrb[25].mxu0  ;;  %v19211_v3 = vpop.eup %17464  ;;  %17474 = vpow2.f32 %v3825_v61 }
 0x2a1   : > { %v3963_v14 = vsel %vm3913_vm2, %v3888_v25, %v3938_v43  ;;  %v3889_v6 = vsub.f32 1.0, %v3864_v5  ;;  %v3642_v51 = vmul.f32 %v19181_v58, %v3617_v42  ;;  %v17467_v19 = vpop.eup %17466  ;;  %v3544_v48 = vmul.f32 1.0614054, %v19211_v3 }
 0x2a2   : > { %v4013_v8 = vadd.f32 1.0, %v3963_v14  ;;  %v3740_v47 = vmul.f32 %v19162_v62, %v3715_v12  ;;  %v3691_v4 = vmul.f32 %v19171_v2, %v3666_v56  ;;  %v3593_v50 = vmul.f32 %v19201_v20, %v3568_v41  ;;  %v17469_v56 = vpop.eup %17468 }
 0x2a3   : > { %v3939_v54 = vsub.f32 0.0, %v3889_v6  ;;  %v3667_v63 = vadd.f32 -0.28449672, %v3642_v51  ;;  %v19224_v25 = vmul.f32 0.70710677, %v19206_v36  ;;  %v19226_v43 = vpop.f32.mrb[26].mxu0  ;;  %v3795_v41 = vmul.f32 %v3770_v16, %v3445_v49 }
 0x2a4   : > { %v4038_v5 = vmul.f32 %v4013_v8, %v19129_v1  ;;  %v3865_v42 = vmul.f32 %v17461_v0, %v3740_v47  ;;  %v3716_v52 = vadd.f32 0.2548296, %v3691_v4  ;;  %v3569_v62 = vadd.f32 -1.4531521, %v3544_v48  ;;  %v14448_v12 = vpop.f32.mrb[27].mxu0  ;;  %v19233_v35 = vpop.eup %17470 }
 0x2a5   : > { %v3964_v14 = vsel %vm3914_vm3, %v3889_v6, %v3939_v54  ;;  %v3692_v37 = vmul.f32 %v19181_v58, %v3667_v63  ;;  %v3618_v51 = vadd.f32 1.4214138, %v3593_v50  ;;  %v3446_v6 = vand.u32 2147483647, %v19224_v25  ;;  %v19244_v54 = vpop.permute.xlu0 %4100 }
 0x2a6   : > { %v4218_v33 = vmul.f32 %v19220_v34, %v4038_v5  ;;  %v4014_v31 = vadd.f32 1.0, %v3964_v14  ;;  %v3890_v1 = vsub.f32 1.0, %v3865_v42  ;;  %v3741_v0 = vmul.f32 %v19171_v2, %v3716_v52 }
 0x2a7   : > { %v3717_v8 = vadd.f32 0.2548296, %v3692_v37  ;;  %v3594_v47 = vmul.f32 %v19211_v3, %v3569_v62  ;;  %v3643_v59 = vmul.f32 %v19201_v20, %v3618_v51  ;;  %v19240_v63 = vpop.f32.mrb[28].mxu0  ;;  %v3471_v5 = vmul.f32 0.3275911, %v3446_v6 }
 0x2a8   : > { %4243 = vst.msk [vmem:[#allocation2 + $0x10] sm:$0xff] %vm599_vm0, %v4218_v33  ;;  %v4039_v49 = vmul.f32 %v4014_v31, %v19139_v26  ;;  %v3940_v16 = vsub.f32 0.0, %v3890_v1  ;;  %v3866_v4 = vmul.f32 %v17467_v19, %v3741_v0  ;;  %v14451_v48 = vpop.f32.mrb[29].mxu0  ;;  %v19247_v42 = vpop.eup %17472  ;;  %v3827_v31 = vmul.f32 1.442695, %v3795_v41 }
 0x2a9   : > { %v3742_v37 = vmul.f32 %v19181_v58, %v3717_v8  ;;  %v3619_v2 = vadd.f32 1.4214138, %v3594_v47  ;;  %v3668_v50 = vadd.f32 -0.28449672, %v3643_v59  ;;  %v19257_v58 = vpop.permute.xlu1 %4105  ;;  %v3545_v0 = vmul.f32 1.0614054, %v19247_v42  ;;  %v19295_v46 = vpop.permute.xlu0 %4115 }
 0x2aa   : > { %v4219_v52 = vmul.f32 %v19244_v54, %v4039_v49  ;;  %v3965_v33 = vsel %vm3915_vm4, %v3890_v1, %v3940_v16  ;;  %v3891_v62 = vsub.f32 1.0, %v3866_v4  ;;  %v3496_v8 = vadd.f32 1.0, %v3471_v5 }
 0x2ab   : > { %v3867_v26 = vmul.f32 %v17469_v56, %v3742_v37  ;;  %v4015_v19 = vadd.f32 1.0, %v3965_v33  ;;  %v3644_v61 = vmul.f32 %v19211_v3, %v3619_v2  ;;  %v3693_v12 = vmul.f32 %v19201_v20, %v3668_v50  ;;  %v19254_v14 = vpop.f32.mrb[30].mxu0 }
 0x2ac   : > { %4244 = vst.msk [vmem:[#allocation2 + $0x18] sm:$0xff] %vm599_vm0, %v4219_v52  ;;  %v3941_v51 = vsub.f32 0.0, %v3891_v62  ;;  %v3771_v18 = vsub.f32 0.0, %v3446_v6  ;;  %v14454_v1 = vpop.f32.mrb[31].mxu0  ;;  %v3570_v16 = vadd.f32 -1.4531521, %v3545_v0  ;;  %17476 = vrcp.f32 %v3496_v8 }
 0x2ad   : > { %v3892_v47 = vsub.f32 1.0, %v3867_v26  ;;  %v4040_v56 = vmul.f32 %v4015_v19, %v19141_v28  ;;  %v3669_v41 = vadd.f32 -0.28449672, %v3644_v61  ;;  %v3718_v59 = vadd.f32 0.2548296, %v3693_v12 }
 0x2ae   : > { %v3966_v49 = vsel %vm3916_vm5, %v3891_v62, %v3941_v51  ;;  %17478 = vpow2.f32 %v3827_v31  ;;  %v3595_v52 = vmul.f32 %v19247_v42, %v3570_v16  ;;  %v3796_v33 = vmul.f32 %v3771_v18, %v3446_v6  ;;  %v19279_v6 = vpop.permute.xlu1 %4110 }
 0x2af   : > { %v3942_v4 = vsub.f32 0.0, %v3892_v47  ;;  %v4220_v48 = vmul.f32 %v19257_v58, %v4040_v56  ;;  %v4016_v37 = vadd.f32 1.0, %v3966_v49  ;;  %v3694_v2 = vmul.f32 %v19211_v3, %v3669_v41  ;;  %v19266_v50 = vpop.f32.mrb[32].mxu0  ;;  %v4296_v5 = vld [vmem:[#allocation2 + $0xa] sm:$0xff] }
 0x2b0   : > { %v3743_v28 = vmul.f32 %v19201_v20, %v3718_v59  ;;  %v14457_v26 = vpop.f32.mrb[33].mxu0  ;;  %14490 = vmatmul.mubr.msk.f32.gmra.mrb[52].mxu1 %vm599_vm0, %v4296_v5  ;;  %v16248_v61 = vadd.f32 %v19169_v60, %v19047_v9  ;;  %v23355_v12 = vmov 0.0   ;;  %v17475_v20 = vpop.eup %17474  ;;  %v3620_v0 = vadd.f32 1.4214138, %v3595_v52 }
 0x2b1   : > { %v3967_v39 = vsel %vm3917_vm6, %v3892_v47, %v3942_v4  ;;  %4245 = vst.msk [vmem:[#allocation2 + $0x20] sm:$0xff] %vm599_vm0, %v4220_v48  ;;  %v4041_v62 = vmul.f32 %v4016_v37, %v19159_v57  ;;  %v3719_v19 = vadd.f32 0.2548296, %v3694_v2  ;;  %14492 = vmatprep.mubr.msk.f32.mxu1 %vm17767_vm1, %v23355_v12  ;;  %v16250_v9 = vadd.f32 %v19196_v21, %v19051_v13 }
 0x2b2   : > { %v4017_v31 = vadd.f32 1.0, %v3967_v39  ;;  %v3868_v51 = vmul.f32 %v19233_v35, %v3743_v28  ;;  %v3365_v18 = vmul.f32 %v16248_v61, %v19086_v40  ;;  %v3645_v35 = vmul.f32 %v19247_v42, %v3620_v0 }
 0x2b3   : > { %v4221_v8 = vmul.f32 %v19279_v6, %v4041_v62  ;;  %v3744_v57 = vmul.f32 %v19211_v3, %v3719_v19  ;;  %v19289_v60 = vpop.f32.mrb[34].mxu0  ;;  %v4297_v1 = vld [vmem:[#allocation2 + $0x12] sm:$0xff]  ;;  %v3366_v41 = vmul.f32 %v16249_v55, %v19086_v40  ;;  %v3367_v21 = vmul.f32 %v16250_v9, %v19086_v40 }
 0x2b4   : > { %v4042_v47 = vmul.f32 %v4017_v31, %v19157_v53  ;;  %v3893_v56 = vsub.f32 1.0, %v3868_v51  ;;  %v14460_v11 = vpop.f32.mrb[35].mxu0  ;;  %14493 = vmatmul.mubr.msk.f32.gmra.mrb[54].mxu1 %vm599_vm0, %v4297_v1  ;;  %v19299_v13 = vadd.f32 %v19091_v7, %v3365_v18  ;;  %v19304_v53 = vadd.f32 %v19209_v30, %v19053_v15 }
 0x2b5   : > { %4246 = vst.msk [vmem:[#allocation2 + $0x28] sm:$0xff] %vm599_vm0, %v4221_v8  ;;  %v3869_v3 = vmul.f32 %v17475_v20, %v3744_v57  ;;  %14495 = vmatprep.mubr.msk.f32.mxu1 %vm17767_vm1, %v23355_v12  ;;  %v3670_v16 = vadd.f32 -0.28449672, %v3645_v35  ;;  %v19310_v4 = vadd.f32 %v19091_v7, %v3366_v41  ;;  %v3993_v37 = vmul.f32 0.5, %v19136_v23 }
 0x2b6   : > { %v4222_v59 = vmul.f32 %v19295_v46, %v4042_v47  ;;  %v3943_v49 = vsub.f32 0.0, %v3893_v56  ;;  %v19315_v2 = vmul.f32 0.70710677, %v19299_v13  ;;  %v19319_v30 = vpop.eup %17476  ;;  %v3829_v52 = vmul.f32 1.442695, %v3796_v33  ;;  %v19339_v47 = vpop.permute.xlu1 %4120 }
 0x2b7   : > { %v3894_v48 = vsub.f32 1.0, %v3869_v3  ;;  %v19317_v15 = vpop.f32.mrb[36].mxu0  ;;  %v3695_v28 = vmul.f32 %v19247_v42, %v3670_v16  ;;  %v19324_v26 = vmul.f32 0.70710677, %v19310_v4  ;;  %v3546_v19 = vmul.f32 1.0614054, %v19319_v30 }
 0x2b8   : > { %4247 = vst.msk [vmem:[#allocation2 + $0x30] sm:$0xff] %vm599_vm0, %v4222_v59  ;;  %v3968_v5 = vsel %vm3918_vm7, %v3893_v56, %v3943_v49  ;;  %v14463_v39 = vpop.f32.mrb[37].mxu0  ;;  %v4298_v32 = vld [vmem:[#allocation2 + $0x1a] sm:$0xff]  ;;  %v3447_v61 = vand.u32 2147483647, %v19315_v2  ;;  %v17479_v20 = vpop.eup %17478  ;;  %v19332_v33 = vadd.f32 %v19091_v7, %v3367_v21  ;;  %v3994_v9 = vmul.f32 0.5, %v19149_v38 }
 0x2b9   : > { %v3944_v62 = vsub.f32 0.0, %v3894_v48  ;;  %v4018_v23 = vadd.f32 1.0, %v3968_v5  ;;  %14496 = vmatmul.mubr.msk.f32.gmra.mrb[56].mxu1 %vm599_vm0, %v4298_v32  ;;  %v3720_v31 = vadd.f32 0.2548296, %v3695_v28  ;;  %v3448_v51 = vand.u32 2147483647, %v19324_v26 }
 0x2ba   : > { %14498 = vmatprep.mubr.msk.f32.mxu1 %vm17767_vm1, %v23355_v12  ;;  %v3571_v8 = vadd.f32 -1.4531521, %v3546_v19  ;;  %v3472_v57 = vmul.f32 0.3275911, %v3447_v61  ;;  %17480 = vpow2.f32 %v3829_v52  ;;  %v3772_v16 = vsub.f32 0.0, %v3447_v61 }
 0x2bb   : > { %v3969_v0 = vsel %vm3919_vm8, %v3894_v48, %v3944_v62  ;;  %v4043_v55 = vmul.f32 %v4018_v23, %v3993_v37  ;;  %v19336_v18 = vpop.f32.mrb[38].mxu0  ;;  %v3745_v45 = vmul.f32 %v19247_v42, %v3720_v31  ;;  %v3473_v56 = vmul.f32 0.3275911, %v3448_v51  ;;  %v19347_v48 = vpop.permute.xlu0 %4125 }
 0x2bc   : > { %v4019_v1 = vadd.f32 1.0, %v3969_v0  ;;  %v14466_v35 = vpop.f32.mrb[39].mxu0  ;;  %v4299_v41 = vld [vmem:[#allocation2 + $0x22] sm:$0xff]  ;;  %v3596_v3 = vmul.f32 %v19319_v30, %v3571_v8  ;;  %v3497_v21 = vadd.f32 1.0, %v3472_v57  ;;  %v19351_v37 = vmul.f32 0.70710677, %v19332_v33 }
 0x2bd   : > { %v4223_v11 = vmul.f32 %v19339_v47, %v4043_v55  ;;  %14499 = vmatmul.mubr.msk.f32.gmra.mrb[58].mxu1 %vm599_vm0, %v4299_v41  ;;  %v3870_v49 = vmul.f32 %v17479_v20, %v3745_v45  ;;  %v3498_v38 = vadd.f32 1.0, %v3473_v56  ;;  %v3773_v23 = vsub.f32 0.0, %v3448_v51 }
 0x2be   : > { %v4044_v59 = vmul.f32 %v4019_v1, %v3994_v9  ;;  %14501 = vmatprep.mubr.msk.f32.mxu1 %vm17767_vm1, %v23355_v12  ;;  %v3621_v42 = vadd.f32 1.4214138, %v3596_v3  ;;  %17482 = vrcp.f32 %v3497_v21  ;;  %v3449_v19 = vand.u32 2147483647, %v19351_v37 }
 0x2bf   : > { %4248 = vst.msk [vmem:[#allocation2 + $0x38] sm:$0xff] %vm599_vm0, %v4223_v11  ;;  %v19353_v5 = vpop.f32.mrb[40].mxu0  ;;  %v4300_v28 = vld [vmem:[#allocation2 + $0x2a] sm:$0xff]  ;;  %v3895_v39 = vsub.f32 1.0, %v3870_v49  ;;  %17484 = vrcp.f32 %v3498_v38  ;;  %v3368_v31 = vmul.f32 %v19304_v53, %v19086_v40  ;;  %v3995_v0 = vmul.f32 0.5, %v19176_v10 }
 0x2c0   : > { %v4224_v52 = vmul.f32 %v19347_v48, %v4044_v59  ;;  %v14469_v32 = vpop.f32.mrb[41].mxu0  ;;  %v3646_v62 = vmul.f32 %v19319_v30, %v3621_v42  ;;  %v3797_v8 = vmul.f32 %v3772_v16, %v3447_v61  ;;  %v3474_v57 = vmul.f32 0.3275911, %v3449_v19 }
 0x2c1   : > { %14502 = vmatmul.mubr.msk.f32.gmra.mrb[60].mxu1 %vm599_vm0, %v4300_v28  ;;  %v3945_v20 = vsub.f32 0.0, %v3895_v39  ;;  %v19369_v45 = vadd.f32 %v19091_v7, %v3368_v31  ;;  %v16252_v44 = vadd.f32 %v19226_v43, %v19055_v17  ;;  %v16253_v53 = vadd.f32 %v19240_v63, %v19063_v22  ;;  %v19384_v63 = vpop.permute.xlu1 %4130 }
 0x2c2   : > { %4249 = vst.msk [vmem:[#allocation2 + $0x40] sm:$0xff] %vm599_vm0, %v4224_v52  ;;  %14504 = vmatprep.mubr.msk.f32.mxu1 %vm17767_vm1, %v23355_v12  ;;  %v3671_v55 = vadd.f32 -0.28449672, %v3646_v62  ;;  %v3798_v10 = vmul.f32 %v3773_v23, %v3448_v51  ;;  %v3499_v11 = vadd.f32 1.0, %v3474_v57  ;;  %v3774_v61 = vsub.f32 0.0, %v3449_v19  ;;  %23356 = vst [vmem:[#allocation12_spill] sm:$0xff] %v19384_v63 }
 0x2c3   : > { %v19366_v9 = vpop.f32.mrb[42].mxu0  ;;  %v3970_v1 = vsel %vm3920_vm9, %v3895_v39, %v3945_v20  ;;  %v19377_v3 = vmul.f32 0.70710677, %v19369_v45  ;;  %v3369_v21 = vmul.f32 %v16252_v44, %v19086_v40  ;;  %v3370_v59 = vmul.f32 %v16253_v53, %v19086_v40 }
 0x2c4   : > { %v14472_v56 = vpop.f32.mrb[43].mxu0  ;;  %v4020_v35 = vadd.f32 1.0, %v3970_v1  ;;  %v3696_v41 = vmul.f32 %v19319_v30, %v3671_v55  ;;  %v17481_v16 = vpop.eup %17480  ;;  %17486 = vrcp.f32 %v3499_v11  ;;  %vm3921_vm10 = vcmp.ge.f32.partialorder %v19224_v25, 0.0 }
 0x2c5   : > { %v19388_v51 = vmul.f32 0.5, %v19206_v36  ;;  %v3450_v38 = vand.u32 2147483647, %v19377_v3  ;;  %v19392_v42 = vadd.f32 %v19091_v7, %v3369_v21  ;;  %v19395_v28 = vadd.f32 %v19091_v7, %v3370_v59 }
 0x2c6   : > { %v4301_v49 = vld [vmem:[#allocation2 + $0x32] sm:$0xff]  ;;  %v4045_v17 = vmul.f32 %v4020_v35, %v3995_v0  ;;  %v3721_v43 = vadd.f32 0.2548296, %v3696_v41  ;;  %v3831_v36 = vmul.f32 1.442695, %v3797_v8  ;;  %v19405_v23 = vadd.f32 %v19254_v14, %v19066_v24 }
 0x2c7   : > { %14505 = vmatmul.mubr.msk.f32.gmra.mrb[62].mxu1 %vm599_vm0, %v4301_v49  ;;  %v19382_v22 = vpop.f32.mrb[44].mxu0  ;;  %v3833_v55 = vmul.f32 1.442695, %v3798_v10  ;;  %v3799_v57 = vmul.f32 %v3774_v61, %v3449_v19  ;;  %v3475_v1 = vmul.f32 0.3275911, %v3450_v38  ;;  %v19420_v14 = vmul.f32 0.5, %v19299_v13 }
 0x2c8   : > { %14507 = vmatprep.mubr.msk.f32.mxu1 %vm17767_vm1, %v23355_v12  ;;  %v14475_v52 = vpop.f32.mrb[45].mxu0  ;;  %v19399_v39 = vpop.eup %17482  ;;  %v4225_v32 = vmul.f32 %v19384_v63, %v4045_v17  ;;  %v3746_v62 = vmul.f32 %v19319_v30, %v3721_v43  ;;  %v19413_v30 = vmul.f32 0.70710677, %v19392_v42  ;;  %v19416_v8 = vmul.f32 0.70710677, %v19395_v28 }
 0x2c9   : > { %v4302_v20 = vld [vmem:[#allocation2 + $0x3a] sm:$0xff]  ;;  %v19407_v31 = vpop.eup %17484  ;;  %v3547_v0 = vmul.f32 1.0614054, %v19399_v39  ;;  %v3500_v56 = vadd.f32 1.0, %v3475_v1  ;;  %v3775_v19 = vsub.f32 0.0, %v3450_v38  ;;  %17488 = vpow2.f32 %v3831_v36 }
 0x2ca   : > { %4250 = vst.msk [vmem:[#allocation2 + $0x48] sm:$0xff] %vm599_vm0, %v4225_v32  ;;  %v3871_v44 = vmul.f32 %v17481_v16, %v3746_v62  ;;  %v3548_v53 = vmul.f32 1.0614054, %v19407_v31  ;;  %v3451_v11 = vand.u32 2147483647, %v19413_v30  ;;  %vm3922_vm11 = vcmp.ge.f32.partialorder %v19315_v2, 0.0 }
 0x2cb   : > { %14508 = vmatmul.mubr.msk.f32.gmra.mrb[64].mxu1 %vm599_vm0, %v4302_v20  ;;  %v3572_v24 = vadd.f32 -1.4531521, %v3547_v0  ;;  %v19422_v35 = vpop.f32.mrb[46].mxu0  ;;  %v3835_v21 = vmul.f32 1.442695, %v3799_v57  ;;  %17490 = vrcp.f32 %v3500_v56  ;;  %v3800_v62 = vmul.f32 %v3775_v19, %v3450_v38 }
 0x2cc   : > { %14510 = vmatprep.mubr.msk.f32.mxu1 %vm17767_vm1, %v23355_v12  ;;  %v3896_v41 = vsub.f32 1.0, %v3871_v44  ;;  %v3573_v10 = vadd.f32 -1.4531521, %v3548_v53  ;;  %v3452_v59 = vand.u32 2147483647, %v19416_v8  ;;  %v14478_v13 = vpop.f32.mrb[47].mxu0  ;;  %17492 = vpow2.f32 %v3833_v55 }
 0x2cd   : > { %v3597_v61 = vmul.f32 %v19399_v39, %v3572_v24  ;;  %v3476_v17 = vmul.f32 0.3275911, %v3451_v11  ;;  %v3776_v43 = vsub.f32 0.0, %v3451_v11  ;;  %v19440_v38 = vmul.f32 0.5, %v19310_v4  ;;  %v4293_v4 = vld [vmem:[%s23310_s4] sm:$0xff] }
 0x2ce   : > { %v3946_v49 = vsub.f32 0.0, %v3896_v41  ;;  %v3598_v16 = vmul.f32 %v19407_v31, %v3573_v10  ;;  %v3477_v36 = vmul.f32 0.3275911, %v3452_v59  ;;  %v19432_v0 = vpop.eup %17486  ;;  %v3777_v53 = vsub.f32 0.0, %v3452_v59 }
 0x2cf   : > { %v19430_v52 = vpop.f32.mrb[48].mxu0  ;;  %v3622_v32 = vadd.f32 1.4214138, %v3597_v61  ;;  %v3501_v44 = vadd.f32 1.0, %v3476_v17  ;;  %v3549_v10 = vmul.f32 1.0614054, %v19432_v0  ;;  %v3801_v19 = vmul.f32 %v3776_v43, %v3451_v11 }
 0x2d0   : > { %v14481_v20 = vpop.f32.mrb[49].mxu0  ;;  %v3971_v57 = vsel %vm3921_vm10, %v3896_v41, %v3946_v49  ;;  %v3623_v1 = vadd.f32 1.4214138, %v3598_v16  ;;  %v3502_v13 = vadd.f32 1.0, %v3477_v36  ;;  %v19446_v49 = vpop.permute.xlu0 %4135  ;;  %v3837_v17 = vmul.f32 1.442695, %v3800_v62 }
 0x2d1   : > { %v4021_v24 = vadd.f32 1.0, %v3971_v57  ;;  %v3647_v56 = vmul.f32 %v19399_v39, %v3622_v32  ;;  %v4303_v63 = vld [vmem:[#allocation2 + $0x42] sm:$0xff]  ;;  %17494 = vrcp.f32 %v3501_v44  ;;  %v3574_v61 = vadd.f32 -1.4531521, %v3549_v10 }
 0x2d2   : > { %v3648_v55 = vmul.f32 %v19407_v31, %v3623_v1  ;;  %14511 = vmatmul.mubr.msk.f32.gmra.mrb[66].mxu1 %vm599_vm0, %v4303_v63  ;;  %17496 = vrcp.f32 %v3502_v13  ;;  %v3802_v32 = vmul.f32 %v3777_v53, %v3452_v59  ;;  %v4294_v63 = vld [vmem:[%s23310_s4 + $0x8] sm:$0xff]  ;;  %v3371_v36 = vmul.f32 %v19405_v23, %v19086_v40 }
 0x2d3   : > { %v4046_v25 = vmul.f32 %v4021_v24, %v19388_v51  ;;  %v3672_v41 = vadd.f32 -0.28449672, %v3647_v56  ;;  %14513 = vmatprep.mubr.msk.f32.mxu1 %vm17767_vm1, %v23355_v12  ;;  %17498 = vpow2.f32 %v3835_v21  ;;  %v3599_v43 = vmul.f32 %v19432_v0, %v3574_v61  ;;  %v17489_v21 = vpop.eup %17488 }
 0x2d4   : > { %v3673_v16 = vadd.f32 -0.28449672, %v3648_v55  ;;  %v3839_v62 = vmul.f32 1.442695, %v3801_v19  ;;  %v16255_v20 = vadd.f32 %v19266_v50, %v19069_v27  ;;  %v16256_v57 = vadd.f32 %v19289_v60, %v19073_v29 }
 0x2d5   : > { %v4226_v51 = vmul.f32 %v19446_v49, %v4046_v25  ;;  %v3697_v11 = vmul.f32 %v19399_v39, %v3672_v41  ;;  %v19464_v1 = vpop.eup %17490  ;;  %v3624_v53 = vadd.f32 1.4214138, %v3599_v43  ;;  %v19468_v24 = vadd.f32 %v19091_v7, %v3371_v36 }
 0x2d6   : > { %v3698_v59 = vmul.f32 %v19407_v31, %v3673_v16  ;;  %v16070_v23 = vpack.c.bf16 %v4294_v63, %v4293_v4  ;;  %v3550_v10 = vmul.f32 1.0614054, %v19464_v1  ;;  %v3841_v13 = vmul.f32 1.442695, %v3802_v32  ;;  %v17493_v27 = vpop.eup %17492 }
 0x2d7   : > { %4251 = vst.msk [vmem:[#allocation2 + $0x50] sm:$0xff] %vm599_vm0, %v4226_v51  ;;  %v3722_v44 = vadd.f32 0.2548296, %v3697_v11  ;;  %v3372_v55 = vmul.f32 %v16255_v20, %v19086_v40  ;;  %v3649_v29 = vmul.f32 %v19432_v0, %v3624_v53  ;;  %v19476_v60 = vmul.f32 0.70710677, %v19468_v24 }
 0x2d8   : > { %v3723_v56 = vadd.f32 0.2548296, %v3698_v59  ;;  %16071 = vmatpush3.bf16.msra.mxu1 %v16070_v23  ;;  %vm3923_vm12 = vcmp.ge.f32.partialorder %v19324_v26, 0.0  ;;  %v3575_v25 = vadd.f32 -1.4531521, %v3550_v10  ;;  %17500 = vpow2.f32 %v3837_v17 }
 0x2d9   : > { %v3747_v50 = vmul.f32 %v19399_v39, %v3722_v44  ;;  %v23357_v41 = vmov 0.0|0.0   ;;  %v3674_v61 = vadd.f32 -0.28449672, %v3649_v29  ;;  %17502 = vpow2.f32 %v3839_v62  ;;  %v19496_v20 = vld [vmem:[%s23308_s2] ss:$0 sm:$0xff] }
 0x2da   : > { %v3748_v19 = vmul.f32 %v19407_v31, %v3723_v56  ;;  %16072 = vmatprep.subr.bf16.mxu1 %v23357_v41  ;;  %v3453_v39 = vand.u32 2147483647, %v19476_v60  ;;  %v3600_v4 = vmul.f32 %v19464_v1, %v3575_v25  ;;  %17504 = vpow2.f32 %v3841_v13 }
 0x2db   : > { %v3872_v40 = vmul.f32 %v17489_v21, %v3747_v50  ;;  %v19482_v16 = vpop.eup %17494  ;;  %v19486_v63 = vadd.f32 %v19091_v7, %v3372_v55  ;;  %v3699_v17 = vmul.f32 %v19432_v0, %v3674_v61  ;;  %v3373_v7 = vmul.f32 %v19496_v20, %v16256_v57 }
 0x2dc   : > { %v3873_v32 = vmul.f32 %v17493_v27, %v3748_v19  ;;  %v19488_v31 = vpop.eup %17496  ;;  %v3551_v11 = vmul.f32 1.0614054, %v19482_v16  ;;  %v3478_v43 = vmul.f32 0.3275911, %v3453_v39  ;;  %v3625_v59 = vadd.f32 1.4214138, %v3600_v4 }
 0x2dd   : > { %v3897_v51 = vsub.f32 1.0, %v3872_v40  ;;  %v17499_v36 = vpop.eup %17498  ;;  %v3552_v62 = vmul.f32 1.0614054, %v19488_v31  ;;  %v3724_v53 = vadd.f32 0.2548296, %v3699_v17  ;;  %vm3924_vm13 = vcmp.ge.f32.partialorder %v19351_v37, 0.0 }
 0x2de   : > { %v3898_v21 = vsub.f32 1.0, %v3873_v32  ;;  %v3576_v23 = vadd.f32 -1.4531521, %v3551_v11  ;;  %v3503_v56 = vadd.f32 1.0, %v3478_v43  ;;  %v3650_v13 = vmul.f32 %v19464_v1, %v3625_v59  ;;  %v4304_v50 = vld [vmem:[#allocation2 + $0x4a] sm:$0xff] }
 0x2df   : > { %v3947_v44 = vsub.f32 0.0, %v3897_v51  ;;  %v3577_v55 = vadd.f32 -1.4531521, %v3552_v62  ;;  %v19502_v27 = vmul.f32 0.70710677, %v19486_v63  ;;  %v3749_v19 = vmul.f32 %v19432_v0, %v3724_v53  ;;  %14514 = vmatmul.mubr.msk.f32.gmra.mrb[68].mxu1 %vm599_vm0, %v4304_v50  ;;  %v23358_v37 = vld [vmem:[#allocation5_spill] sm:$0xff] }
 0x2e0   : > { %v3948_v10 = vsub.f32 0.0, %v3898_v21  ;;  %v3601_v57 = vmul.f32 %v19482_v16, %v3576_v23  ;;  %17506 = vrcp.f32 %v3503_v56  ;;  %v3675_v61 = vadd.f32 -0.28449672, %v3650_v13  ;;  %14516 = vmatprep.mubr.msk.f32.mxu1 %vm17767_vm1, %v23355_v12 }
 0x2e1   : > { %v3972_v29 = vsel %vm3922_vm11, %v3897_v51, %v3947_v44  ;;  %v3602_v32 = vmul.f32 %v19488_v31, %v3577_v55  ;;  %v3874_v2 = vmul.f32 %v17499_v36, %v3749_v19  ;;  %v3778_v17 = vsub.f32 0.0, %v3453_v39  ;;  %v19526_v36 = vld [vmem:[%s23309_s3] ss:$0 sm:$0xff] }
 0x2e2   : > { %v4022_v25 = vadd.f32 1.0, %v3972_v29  ;;  %v3973_v40 = vsel %vm3923_vm12, %v3898_v21, %v3948_v10  ;;  %v3626_v51 = vadd.f32 1.4214138, %v3601_v57  ;;  %v17501_v0 = vpop.eup %17500  ;;  %v3700_v43 = vmul.f32 %v19464_v1, %v3675_v61  ;;  %v19519_v21 = vpop.permute.xlu1 %4140 }
 0x2e3   : > { %v4023_v4 = vadd.f32 1.0, %v3973_v40  ;;  %v3627_v59 = vadd.f32 1.4214138, %v3602_v32  ;;  %v19517_v62 = vand.u32 2147483647, %v19502_v27  ;;  %v17503_v26 = vpop.eup %17502  ;;  %v3899_v53 = vsub.f32 1.0, %v3874_v2  ;;  %v19531_v10 = vpop.permute.xlu0 %4145 }
 0x2e4   : > { %v4047_v11 = vmul.f32 %v4022_v25, %v19420_v14  ;;  %v3651_v23 = vmul.f32 %v19482_v16, %v3626_v51  ;;  %v19529_v14 = vadd.f32 %v19526_v36, %v3373_v7  ;;  %v17505_v56 = vpop.eup %17504  ;;  %v3725_v55 = vadd.f32 0.2548296, %v3700_v43 }
 0x2e5   : > { %v4048_v44 = vmul.f32 %v4023_v4, %v19440_v38  ;;  %v3652_v50 = vmul.f32 %v19488_v31, %v3627_v59  ;;  %v3479_v38 = vmul.f32 0.3275911, %v19517_v62  ;;  %v3949_v19 = vsub.f32 0.0, %v3899_v53 }
 0x2e6   : > { %v4227_v13 = vmul.f32 %v19519_v21, %v4047_v11  ;;  %v3676_v57 = vadd.f32 -0.28449672, %v3651_v23  ;;  %v3803_v25 = vmul.f32 %v3778_v17, %v3453_v39  ;;  %v3999_v7 = vmul.f32 0.5, %v19332_v33 }
 0x2e7   : > { %v4228_v29 = vmul.f32 %v19531_v10, %v4048_v44  ;;  %v3750_v40 = vmul.f32 %v19464_v1, %v3725_v55  ;;  %v3677_v61 = vadd.f32 -0.28449672, %v3652_v50  ;;  %v3504_v32 = vadd.f32 1.0, %v3479_v38  ;;  %v19557_v50 = vpop.permute.xlu1 %4150 }
 0x2e8   : > { %4252 = vst.msk [vmem:[#allocation2 + $0x58] sm:$0xff] %vm599_vm0, %v4227_v13  ;;  %v3974_v4 = vsel %vm3924_vm13, %v3899_v53, %v3949_v19  ;;  %v4000_v2 = vmul.f32 0.5, %v19369_v45  ;;  %v3701_v51 = vmul.f32 %v19482_v16, %v3676_v57  ;;  %v19546_v11 = vmul.f32 0.70710677, %v19529_v14  ;;  %23359 = vst [vmem:[#allocation5_spill] sm:$0xff] %v19557_v50 }
 0x2e9   : > { %4253 = vst.msk [vmem:[#allocation2 + $0x60] sm:$0xff] %vm599_vm0, %v4228_v29  ;;  %v4024_v39 = vadd.f32 1.0, %v3974_v4  ;;  %v3875_v17 = vmul.f32 %v17501_v0, %v3750_v40  ;;  %v3702_v33 = vmul.f32 %v19488_v31, %v3677_v61  ;;  %17508 = vrcp.f32 %v3504_v32 }
 0x2ea   : > { %v19549_v1 = vpop.eup %17506  ;;  %v3726_v43 = vadd.f32 0.2548296, %v3701_v51  ;;  %v3843_v59 = vmul.f32 1.442695, %v3803_v25  ;;  %v19552_v44 = vand.u32 2147483647, %v19546_v11  ;;  %v16257_v45 = vadd.f32 %v19317_v15, %v23358_v37 }
 0x2eb   : > { %v4049_v53 = vmul.f32 %v4024_v39, %v3999_v7  ;;  %v3900_v23 = vsub.f32 1.0, %v3875_v17  ;;  %v3727_v13 = vadd.f32 0.2548296, %v3702_v33  ;;  %v3553_v55 = vmul.f32 1.0614054, %v19549_v1  ;;  %v23360_v33 = vld [vmem:[#allocation6_spill] sm:$0xff] }
 0x2ec   : > { %vm3925_vm14 = vcmp.ge.f32.partialorder %v19377_v3, 0.0  ;;  %v3751_v0 = vmul.f32 %v19482_v16, %v3726_v43  ;;  %v4001_v38 = vmul.f32 0.5, %v19392_v42  ;;  %v3480_v29 = vmul.f32 0.3275911, %v19552_v44 }
 0x2ed   : > { %v4229_v19 = vmul.f32 %v19557_v50, %v4049_v53  ;;  %v3950_v57 = vsub.f32 0.0, %v3900_v23  ;;  %v3752_v15 = vmul.f32 %v19488_v31, %v3727_v13  ;;  %v3578_v25 = vadd.f32 -1.4531521, %v3553_v55  ;;  %v23361_v53 = vld [vmem:[#allocation7_spill] sm:$0xff]  ;;  %v19581_v55 = vpop.permute.xlu0 %4155 }
 0x2ee   : > { %v3876_v7 = vmul.f32 %v17503_v26, %v3751_v0  ;;  %vm3926_vm15 = vcmp.ge.f32.partialorder %v19413_v30, 0.0  ;;  %v3779_v40 = vsub.f32 0.0, %v19517_v62  ;;  %v3505_v61 = vadd.f32 1.0, %v3480_v29  ;;  %23362 = vst [vmem:[#allocation6_spill] sm:$0xff] %v19581_v55 }
 0x2ef   : > { %v4305_v32 = vld [vmem:[#allocation2 + $0x52] sm:$0xff]  ;;  %4254 = vst.msk [vmem:[#allocation2 + $0x68] sm:$0xff] %vm599_vm0, %v4229_v19  ;;  %v3975_v3 = vsel %vm3925_vm14, %v3900_v23, %v3950_v57  ;;  %v3877_v16 = vmul.f32 %v17505_v56, %v3752_v15  ;;  %v3603_v42 = vmul.f32 %v19549_v1, %v3578_v25  ;;  %17510 = vpow2.f32 %v3843_v59 }
 0x2f0   : > { %14517 = vmatmul.mubr.msk.f32.gmra.mrb[70].mxu1 %vm599_vm0, %v4305_v32  ;;  %v4025_v4 = vadd.f32 1.0, %v3975_v3  ;;  %v3901_v51 = vsub.f32 1.0, %v3876_v7  ;;  %vm3927_vm2 = vcmp.ge.f32.partialorder %v19416_v8, 0.0  ;;  %17512 = vrcp.f32 %v3505_v61  ;;  %v4306_v31 = vld [vmem:[#allocation2 + $0x5a] sm:$0xff] }
 0x2f1   : > { %14519 = vmatprep.mubr.msk.f32.mxu1 %vm17767_vm1, %v23355_v12  ;;  %v3902_v26 = vsub.f32 1.0, %v3877_v16  ;;  %v3628_v39 = vadd.f32 1.4214138, %v3603_v42  ;;  %v3374_v17 = vmul.f32 %v19496_v20, %v16257_v45  ;;  %v16258_v56 = vadd.f32 %v19336_v18, %v23360_v33 }
 0x2f2   : > { %v4050_v43 = vmul.f32 %v4025_v4, %v4000_v2  ;;  %v3951_v59 = vsub.f32 0.0, %v3901_v51  ;;  %v3804_v37 = vmul.f32 %v3779_v40, %v19517_v62  ;;  %v16259_v23 = vadd.f32 %v19353_v5, %v23361_v53 }
 0x2f3   : > { %v19579_v13 = vpop.eup %17508  ;;  %v3952_v0 = vsub.f32 0.0, %v3902_v26  ;;  %v3653_v29 = vmul.f32 %v19549_v1, %v3628_v39  ;;  %v19585_v19 = vadd.f32 %v19526_v36, %v3374_v17  ;;  %v3375_v45 = vmul.f32 %v19496_v20, %v16258_v56  ;;  %v19618_v17 = vpop.permute.xlu0 %4165 }
 0x2f4   : > { %14520 = vmatmul.mubr.msk.f32.gmra.mrb[72].mxu1 %vm599_vm0, %v4306_v31  ;;  %v4230_v18 = vmul.f32 %v19581_v55, %v4050_v43  ;;  %v3976_v62 = vsel %vm3926_vm15, %v3901_v51, %v3951_v59  ;;  %v3554_v5 = vmul.f32 1.0614054, %v19579_v13  ;;  %v3780_v2 = vsub.f32 0.0, %v19552_v44  ;;  %v19609_v51 = vpop.permute.xlu1 %4160  ;;  %23364 = vst [vmem:[#allocation13_spill] sm:$0xff] %v19618_v17 }
 0x2f5   : > { %14522 = vmatprep.mubr.msk.f32.mxu1 %vm17767_vm1, %v23355_v12  ;;  %v4026_v57 = vadd.f32 1.0, %v3976_v62  ;;  %v3977_v15 = vsel %vm3927_vm2, %v3902_v26, %v3952_v0  ;;  %v3678_v25 = vadd.f32 -0.28449672, %v3653_v29  ;;  %v19599_v7 = vmul.f32 0.70710677, %v19585_v19  ;;  %23363 = vst [vmem:[#allocation7_spill] sm:$0xff] %v19609_v51 }
 0x2f6   : > { %4255 = vst.msk [vmem:[#allocation2 + $0x70] sm:$0xff] %vm599_vm0, %v4230_v18  ;;  %v4002_v30 = vmul.f32 0.5, %v19395_v28  ;;  %v4027_v40 = vadd.f32 1.0, %v3977_v15  ;;  %v3579_v61 = vadd.f32 -1.4531521, %v3554_v5  ;;  %v19604_v32 = vadd.f32 %v19526_v36, %v3375_v45  ;;  %v4307_v3 = vld [vmem:[#allocation2 + $0x62] sm:$0xff] }
 0x2f7   : > { %v4051_v16 = vmul.f32 %v4026_v57, %v4001_v38  ;;  %v3703_v42 = vmul.f32 %v19549_v1, %v3678_v25  ;;  %v3845_v4 = vmul.f32 1.442695, %v3804_v37  ;;  %v3456_v8 = vand.u32 2147483647, %v19599_v7 }
 0x2f8   : > { %14523 = vmatmul.mubr.msk.f32.gmra.mrb[74].mxu1 %vm599_vm0, %v4307_v3  ;;  %v4052_v31 = vmul.f32 %v4027_v40, %v4002_v30  ;;  %v3604_v26 = vmul.f32 %v19579_v13, %v3579_v61  ;;  %v19613_v28 = vmul.f32 0.70710677, %v19604_v32  ;;  %v3376_v39 = vmul.f32 %v19496_v20, %v16259_v23 }
 0x2f9   : > { %14525 = vmatprep.mubr.msk.f32.mxu1 %vm17767_vm1, %v23355_v12  ;;  %v17511_v38 = vpop.eup %17510  ;;  %v4231_v33 = vmul.f32 %v19609_v51, %v4051_v16  ;;  %v3728_v56 = vadd.f32 0.2548296, %v3703_v42  ;;  %v3805_v43 = vmul.f32 %v3780_v2, %v19552_v44  ;;  %v3481_v59 = vmul.f32 0.3275911, %v3456_v8  ;;  %v5487_v51 = vld [vmem:[#allocation2 + $0x18] sm:$0xff] }
 0x2fa   : > { %v19622_v37 = vpop.eup %17512  ;;  %v4232_v53 = vmul.f32 %v19618_v17, %v4052_v31  ;;  %v3629_v0 = vadd.f32 1.4214138, %v3604_v26  ;;  %v19626_v29 = vand.u32 2147483647, %v19613_v28  ;;  %17514 = vpow2.f32 %v3845_v4  ;;  %v5486_v17 = vld [vmem:[#allocation2 + $0x10] sm:$0xff] }
 0x2fb   : > { %4256 = vst.msk [vmem:[#allocation2 + $0x78] sm:$0xff] %vm599_vm0, %v4231_v33  ;;  %v3753_v23 = vmul.f32 %v19549_v1, %v3728_v56  ;;  %v3555_v45 = vmul.f32 1.0614054, %v19622_v37  ;;  %v3506_v18 = vadd.f32 1.0, %v3481_v59  ;;  %v19635_v5 = vadd.f32 %v19526_v36, %v3376_v39  ;;  %v23365_v39 = vld [vmem:[#allocation8_spill] sm:$0xff] }
 0x2fc   : > { %4257 = vst.msk [vmem:[#allocation2 + $0x80] sm:$0xff] %vm599_vm0, %v4232_v53  ;;  %v3654_v44 = vmul.f32 %v19579_v13, %v3629_v0  ;;  %v3482_v62 = vmul.f32 0.3275911, %v19626_v29  ;;  %v3847_v15 = vmul.f32 1.442695, %v3805_v43  ;;  %v3781_v1 = vsub.f32 0.0, %v3456_v8 }
 0x2fd   : > { %v3878_v2 = vmul.f32 %v17511_v38, %v3753_v23  ;;  %v3580_v57 = vadd.f32 -1.4531521, %v3555_v45  ;;  %17516 = vrcp.f32 %v3506_v18  ;;  %v4308_v25 = vld [vmem:[#allocation2 + $0x6a] sm:$0xff]  ;;  %v19638_v61 = vmul.f32 0.70710677, %v19635_v5 }
 0x2fe   : > { %v3679_v30 = vadd.f32 -0.28449672, %v3654_v44  ;;  %v3507_v40 = vadd.f32 1.0, %v3482_v62  ;;  %14526 = vmatmul.mubr.msk.f32.gmra.mrb[76].mxu1 %vm599_vm0, %v4308_v25  ;;  %vm3928_vm3 = vcmp.ge.f32.partialorder %v19476_v60, 0.0  ;;  %v16260_v38 = vadd.f32 %v19366_v9, %v23365_v39  ;;  %v23366_v45 = vld [vmem:[#allocation9_spill] sm:$0xff] }
 0x2ff   : > { %v3903_v3 = vsub.f32 1.0, %v3878_v2  ;;  %v3605_v16 = vmul.f32 %v19622_v37, %v3580_v57  ;;  %14528 = vmatprep.mubr.msk.f32.mxu1 %vm17767_vm1, %v23355_v12  ;;  %v19646_v4 = vand.u32 2147483647, %v19638_v61  ;;  %v3806_v56 = vmul.f32 %v3781_v1, %v3456_v8 }
 0x300   : > { %v3704_v42 = vmul.f32 %v19579_v13, %v3679_v30  ;;  %17518 = vrcp.f32 %v3507_v40  ;;  %v3377_v23 = vmul.f32 %v19496_v20, %v16260_v38  ;;  %v16261_v18 = vadd.f32 %v19382_v22, %v23366_v45  ;;  %v23367_v22 = vld [vmem:[#allocation10_spill] sm:$0xff] }
 0x301   : > { %v3953_v31 = vsub.f32 0.0, %v3903_v3  ;;  %v3630_v26 = vadd.f32 1.4214138, %v3605_v16  ;;  %17520 = vpow2.f32 %v3847_v15  ;;  %v3483_v43 = vmul.f32 0.3275911, %v19646_v4 }
 0x302   : > { %v3729_v33 = vadd.f32 0.2548296, %v3704_v42  ;;  %v4309_v59 = vld [vmem:[#allocation2 + $0x72] sm:$0xff]  ;;  %v4003_v60 = vmul.f32 0.5, %v19468_v24  ;;  %v19662_v15 = vadd.f32 %v19526_v36, %v3377_v23  ;;  %v3378_v25 = vmul.f32 %v19496_v20, %v16261_v18 }
 0x303   : > { %v3978_v53 = vsel %vm3928_vm3, %v3903_v3, %v3953_v31  ;;  %v3655_v0 = vmul.f32 %v19622_v37, %v3630_v26  ;;  %14529 = vmatmul.mubr.msk.f32.gmra.mrb[78].mxu1 %vm599_vm0, %v4309_v59  ;;  %v3508_v62 = vadd.f32 1.0, %v3483_v43  ;;  %v4310_v8 = vld [vmem:[#allocation2 + $0x7a] sm:$0xff]  ;;  %v16262_v30 = vadd.f32 %v19422_v35, %v23367_v22  ;;  %v19670_v3 = vpop.permute.xlu1 %4170 }
 0x304   : > { %v4028_v44 = vadd.f32 1.0, %v3978_v53  ;;  %v3754_v9 = vmul.f32 %v19579_v13, %v3729_v33  ;;  %14531 = vmatprep.mubr.msk.f32.mxu1 %vm17767_vm1, %v23355_v12  ;;  %v17515_v2 = vpop.eup %17514  ;;  %v3782_v40 = vsub.f32 0.0, %v19626_v29  ;;  %23368 = vst [vmem:[#allocation8_spill] sm:$0xff] %v19670_v3  ;;  %v3849_v42 = vmul.f32 1.442695, %v3806_v56 }
 0x305   : > { %v3680_v57 = vadd.f32 -0.28449672, %v3655_v0  ;;  %17522 = vrcp.f32 %v3508_v62  ;;  %v19674_v31 = vmul.f32 0.70710677, %v19662_v15  ;;  %v19677_v26 = vadd.f32 %v19526_v36, %v3378_v25 }
 0x306   : > { %v4053_v1 = vmul.f32 %v4028_v44, %v4003_v60  ;;  %v3879_v24 = vmul.f32 %v17515_v2, %v3754_v9  ;;  %vm3929_vm4 = vcmp.ge.f32.partialorder %v19502_v27, 0.0  ;;  %v4004_v33 = vmul.f32 0.5, %v19486_v63 }
 0x307   : > { %v19668_v13 = vpop.eup %17516  ;;  %v3705_v16 = vmul.f32 %v19622_v37, %v3680_v57  ;;  %14532 = vmatmul.mubr.msk.f32.gmra.mrb[80].mxu1 %vm599_vm0, %v4310_v8  ;;  %v3459_v43 = vand.u32 2147483647, %v19674_v31  ;;  %vm3930_vm5 = vcmp.ge.f32.partialorder %v19546_v11, 0.0  ;;  %v3807_v23 = vmul.f32 %v3782_v40, %v19626_v29 }
 0x308   : > { %v4233_v35 = vmul.f32 %v19670_v3, %v4053_v1  ;;  %v3904_v39 = vsub.f32 1.0, %v3879_v24  ;;  %v3556_v38 = vmul.f32 1.0614054, %v19668_v13  ;;  %14534 = vmatprep.mubr.msk.f32.mxu1 %vm17767_vm1, %v23355_v12  ;;  %v19693_v45 = vmul.f32 0.70710677, %v19677_v26 }
 0x309   : > { %v3730_v56 = vadd.f32 0.2548296, %v3705_v16  ;;  %17524 = vpow2.f32 %v3849_v42  ;;  %v3484_v60 = vmul.f32 0.3275911, %v3459_v43  ;;  %v3783_v8 = vsub.f32 0.0, %v19646_v4 }
 0x30a   : > { %v19687_v59 = vpop.eup %17518  ;;  %4258 = vst.msk [vmem:[#allocation2 + $0x88] sm:$0xff] %vm599_vm0, %v4233_v35  ;;  %v3954_v53 = vsub.f32 0.0, %v3904_v39  ;;  %v3581_v0 = vadd.f32 -1.4531521, %v3556_v38  ;;  %v19702_v2 = vand.u32 2147483647, %v19693_v45  ;;  %v3379_v40 = vmul.f32 %v19496_v20, %v16262_v30 }
 0x30b   : > { %v3755_v18 = vmul.f32 %v19622_v37, %v3730_v56  ;;  %v3557_v63 = vmul.f32 1.0614054, %v19687_v59  ;;  %v17521_v44 = vpop.eup %17520  ;;  %v3509_v22 = vadd.f32 1.0, %v3484_v60  ;;  %v3851_v1 = vmul.f32 1.442695, %v3807_v23 }
 0x30c   : > { %v3979_v9 = vsel %vm3929_vm4, %v3904_v39, %v3954_v53  ;;  %v3606_v62 = vmul.f32 %v19668_v13, %v3581_v0  ;;  %v3485_v24 = vmul.f32 0.3275911, %v19702_v2  ;;  %v19709_v39 = vpop.permute.xlu0 %4175  ;;  %v3808_v56 = vmul.f32 %v3783_v8, %v19646_v4 }
 0x30d   : > { %v4029_v29 = vadd.f32 1.0, %v3979_v9  ;;  %v3880_v57 = vmul.f32 %v17521_v44, %v3755_v18  ;;  %v3582_v25 = vadd.f32 -1.4531521, %v3557_v63  ;;  %17526 = vrcp.f32 %v3509_v22  ;;  %23369 = vst [vmem:[#allocation9_spill] sm:$0xff] %v19709_v39 }
 0x30e   : > { %v3631_v37 = vadd.f32 1.4214138, %v3606_v62  ;;  %v3784_v53 = vsub.f32 0.0, %v3459_v43  ;;  %v3510_v0 = vadd.f32 1.0, %v3485_v24  ;;  %v4005_v60 = vmul.f32 0.5, %v19529_v14  ;;  %v23370_v24 = vld [vmem:[#allocation11_spill] sm:$0xff] }
 0x30f   : > { %v4054_v16 = vmul.f32 %v4029_v29, %v4004_v33  ;;  %v3905_v27 = vsub.f32 1.0, %v3880_v57  ;;  %v3607_v42 = vmul.f32 %v19687_v59, %v3582_v25  ;;  %v19707_v35 = vpop.eup %17522  ;;  %17528 = vpow2.f32 %v3851_v1 }
 0x310   : > { %v3656_v38 = vmul.f32 %v19668_v13, %v3631_v37  ;;  %v3558_v30 = vmul.f32 1.0614054, %v19707_v35  ;;  %v19717_v9 = vadd.f32 %v19526_v36, %v3379_v40  ;;  %17530 = vrcp.f32 %v3510_v0  ;;  %v19737_v0 = vpop.permute.xlu1 %4180 }
 0x311   : > { %v4234_v23 = vmul.f32 %v19709_v39, %v4054_v16  ;;  %v3955_v18 = vsub.f32 0.0, %v3905_v27  ;;  %v3632_v63 = vadd.f32 1.4214138, %v3607_v42  ;;  %v4311_v33 = vld [vmem:[#allocation2 + $0x82] sm:$0xff]  ;;  %v3853_v57 = vmul.f32 1.442695, %v3808_v56 }
 0x312   : > { %v3681_v44 = vadd.f32 -0.28449672, %v3656_v38  ;;  %14535 = vmatmul.mubr.msk.f32.gmra.mrb[82].mxu1 %vm599_vm0, %v4311_v33  ;;  %v3583_v8 = vadd.f32 -1.4531521, %v3558_v30  ;;  %v19728_v25 = vmul.f32 0.70710677, %v19717_v9  ;;  %v3809_v11 = vmul.f32 %v3784_v53, %v3459_v43 }
 0x313   : > { %4259 = vst.msk [vmem:[#allocation2 + $0x90] sm:$0xff] %vm599_vm0, %v4234_v23  ;;  %v3980_v4 = vsel %vm3930_vm5, %v3905_v27, %v3955_v18  ;;  %v3657_v62 = vmul.f32 %v19687_v59, %v3632_v63  ;;  %14537 = vmatprep.mubr.msk.f32.mxu1 %vm17767_vm1, %v23355_v12  ;;  %v17525_v22 = vpop.eup %17524  ;;  %v16263_v40 = vadd.f32 %v19430_v52, %v23370_v24  ;;  %v3785_v42 = vsub.f32 0.0, %v19702_v2 }
 0x314   : > { %v4030_v14 = vadd.f32 1.0, %v3980_v4  ;;  %v3706_v29 = vmul.f32 %v19668_v13, %v3681_v44  ;;  %v3608_v1 = vmul.f32 %v19707_v35, %v3583_v8  ;;  %v19735_v38 = vand.u32 2147483647, %v19728_v25  ;;  %23371 = vst [vmem:[#allocation10_spill] sm:$0xff] %v19737_v0 }
 0x315   : > { %v3682_v37 = vadd.f32 -0.28449672, %v3657_v62  ;;  %v3380_v18 = vmul.f32 %v19496_v20, %v16263_v40  ;;  %vm4091_vm6 = vcmask 125952   ;;  %17532 = vpow2.f32 %v3853_v57 }
 0x316   : > { %v4055_v16 = vmul.f32 %v4030_v14, %v4005_v60  ;;  %v3731_v27 = vadd.f32 0.2548296, %v3706_v29  ;;  %v3633_v23 = vadd.f32 1.4214138, %v3608_v1  ;;  %v3486_v52 = vmul.f32 0.3275911, %v19735_v38 }
 0x317   : > { %v3707_v56 = vmul.f32 %v19687_v59, %v3682_v37  ;;  %4092 = vst.msk [vmem:[#allocation2 + $0xe0] sm:$0xf] %vm4091_vm6, %v23355_v12  ;;  %v19746_v63 = vpop.eup %17526  ;;  %v19750_v60 = vadd.f32 %v19526_v36, %v3380_v18  ;;  %v3855_v29 = vmul.f32 1.442695, %v3809_v11  ;;  %v4006_v1 = vmul.f32 0.5, %v19585_v19 }
 0x318   : > { %v4235_v43 = vmul.f32 %v19737_v0, %v4055_v16  ;;  %v3756_v53 = vmul.f32 %v19668_v13, %v3731_v27  ;;  %v3658_v33 = vmul.f32 %v19707_v35, %v3633_v23  ;;  %v3559_v44 = vmul.f32 1.0614054, %v19746_v63  ;;  %v5829_v0 = vld [vmem:[%s23310_s4 + $0x58] sm:$0xff] }
 0x319   : > { %v3732_v30 = vadd.f32 0.2548296, %v3707_v56  ;;  %v3810_v13 = vmul.f32 %v3785_v42, %v19702_v2  ;;  %v3511_v4 = vadd.f32 1.0, %v3486_v52  ;;  %v19757_v57 = vmul.f32 0.70710677, %v19750_v60  ;;  %v17529_v36 = vpop.eup %17528 }
 0x31a   : > { %4260 = vst.msk [vmem:[#allocation2 + $0x98] sm:$0xff] %vm599_vm0, %v4235_v43  ;;  %v3881_v20 = vmul.f32 %v17525_v22, %v3756_v53  ;;  %v4312_v62 = vld [vmem:[#allocation2 + $0x8a] sm:$0xff]  ;;  %v3683_v14 = vadd.f32 -0.28449672, %v3658_v33  ;;  %v3584_v22 = vadd.f32 -1.4531521, %v3559_v44  ;;  %v19763_v2 = vpop.eup %17530 }
 0x31b   : > { %v3757_v8 = vmul.f32 %v19687_v59, %v3732_v30  ;;  %14538 = vmatmul.mubr.msk.f32.gmra.mrb[84].mxu1 %vm599_vm0, %v4312_v62  ;;  %17534 = vrcp.f32 %v3511_v4  ;;  %vm3931_vm7 = vcmp.ge.f32.partialorder %v19599_v7, 0.0  ;;  %v19768_v24 = vand.u32 2147483647, %v19757_v57 }
 0x31c   : > { %v3906_v37 = vsub.f32 1.0, %v3881_v20  ;;  %14540 = vmatprep.mubr.msk.f32.mxu1 %vm17767_vm1, %v23355_v12  ;;  %v3708_v11 = vmul.f32 %v19707_v35, %v3683_v14  ;;  %v3609_v16 = vmul.f32 %v19746_v63, %v3584_v22  ;;  %v3560_v19 = vmul.f32 1.0614054, %v19763_v2 }
 0x31d   : > { %v3882_v59 = vmul.f32 %v17529_v36, %v3757_v8  ;;  %v3857_v27 = vmul.f32 1.442695, %v3810_v13  ;;  %17536 = vpow2.f32 %v3855_v29  ;;  %v3487_v23 = vmul.f32 0.3275911, %v19768_v24  ;;  %v19781_v36 = vpop.permute.xlu0 %4185 }
 0x31e   : > { %v3956_v40 = vsub.f32 0.0, %v3906_v37  ;;  %v3733_v56 = vadd.f32 0.2548296, %v3708_v11  ;;  %v3634_v43 = vadd.f32 1.4214138, %v3609_v16  ;;  %v3786_v53 = vsub.f32 0.0, %v19735_v38 }
 0x31f   : > { %v3907_v42 = vsub.f32 1.0, %v3882_v59  ;;  %v3585_v7 = vadd.f32 -1.4531521, %v3560_v19  ;;  %v3512_v20 = vadd.f32 1.0, %v3487_v23  ;;  %v17533_v4 = vpop.eup %17532  ;;  %vm3932_vm8 = vcmp.ge.f32.partialorder %v19613_v28, 0.0  ;;  %23372 = vst [vmem:[#allocation11_spill] sm:$0xff] %v19781_v36 }
 0x320   : > { %v3981_v18 = vsel %vm3931_vm7, %v3906_v37, %v3956_v40  ;;  %v3758_v33 = vmul.f32 %v19707_v35, %v3733_v56  ;;  %v3659_v13 = vmul.f32 %v19746_v63, %v3634_v43  ;;  %v4007_v35 = vmul.f32 0.5, %v19604_v32  ;;  %v19790_v56 = vpop.permute.xlu1 %4190 }
 0x321   : > { %v4031_v52 = vadd.f32 1.0, %v3981_v18  ;;  %v3957_v30 = vsub.f32 0.0, %v3907_v42  ;;  %v4313_v44 = vld [vmem:[#allocation2 + $0x92] sm:$0xff]  ;;  %v3610_v62 = vmul.f32 %v19763_v2, %v3585_v7  ;;  %17538 = vrcp.f32 %v3512_v20  ;;  %23373 = vst [vmem:[#allocation14_spill] sm:$0xff] %v19790_v56 }
 0x322   : > { %14541 = vmatmul.mubr.msk.f32.gmra.mrb[86].mxu1 %vm599_vm0, %v4313_v44  ;;  %v3883_v29 = vmul.f32 %v17533_v4, %v3758_v33  ;;  %v3684_v22 = vadd.f32 -0.28449672, %v3659_v13  ;;  %17540 = vpow2.f32 %v3857_v27  ;;  %v3811_v40 = vmul.f32 %v3786_v53, %v19735_v38 }
 0x323   : > { %v4056_v8 = vmul.f32 %v4031_v52, %v4006_v1  ;;  %v3982_v14 = vsel %vm3932_vm8, %v3907_v42, %v3957_v30  ;;  %14543 = vmatprep.mubr.msk.f32.mxu1 %vm17767_vm1, %v23355_v12  ;;  %v3635_v28 = vadd.f32 1.4214138, %v3610_v62  ;;  %vm3933_vm9 = vcmp.ge.f32.partialorder %v19638_v61, 0.0 }
 0x324   : > { %v4032_v37 = vadd.f32 1.0, %v3982_v14  ;;  %v3908_v11 = vsub.f32 1.0, %v3883_v29  ;;  %v3709_v19 = vmul.f32 %v19746_v63, %v3684_v22  ;;  %v3859_v52 = vmul.f32 1.442695, %v3811_v40  ;;  %v19802_v29 = vpop.permute.xlu0 %4195 }
 0x325   : > { %v4236_v59 = vmul.f32 %v19781_v36, %v4056_v8  ;;  %v19786_v1 = vpop.eup %17534  ;;  %v3660_v42 = vmul.f32 %v19763_v2, %v3635_v28  ;;  %v3787_v30 = vsub.f32 0.0, %v19768_v24  ;;  %v4008_v33 = vmul.f32 0.5, %v19635_v5  ;;  %23374 = vst [vmem:[#allocation15_spill] sm:$0xff] %v19802_v29  ;;  %v5828_v36 = vld [vmem:[%s23310_s4 + $0x50] sm:$0xff] }
 0x326   : > { %v4057_v16 = vmul.f32 %v4032_v37, %v4007_v35  ;;  %v3958_v32 = vsub.f32 0.0, %v3908_v11  ;;  %v3561_v23 = vmul.f32 1.0614054, %v19786_v1  ;;  %v3734_v27 = vadd.f32 0.2548296, %v3709_v19 }
 0x327   : > { %4261 = vst.msk [vmem:[#allocation2 + $0xa0] sm:$0xff] %vm599_vm0, %v4236_v59  ;;  %v3685_v38 = vadd.f32 -0.28449672, %v3660_v42  ;;  %v17537_v43 = vpop.eup %17536  ;;  %17542 = vpow2.f32 %v3859_v52  ;;  %v3812_v37 = vmul.f32 %v3787_v30, %v19768_v24  ;;  %vm3934_vm10 = vcmp.ge.f32.partialorder %v19674_v31, 0.0 }
 0x328   : > { %v4237_v18 = vmul.f32 %v19790_v56, %v4057_v16  ;;  %v3983_v7 = vsel %vm3933_vm9, %v3908_v11, %v3958_v32  ;;  %v3586_v53 = vadd.f32 -1.4531521, %v3561_v23  ;;  %v3759_v44 = vmul.f32 %v19746_v63, %v3734_v27 }
 0x329   : > { %v4033_v20 = vadd.f32 1.0, %v3983_v7  ;;  %v3710_v4 = vmul.f32 %v19763_v2, %v3685_v38  ;;  %v3861_v32 = vmul.f32 1.442695, %v3812_v37  ;;  %v4009_v38 = vmul.f32 0.5, %v19662_v15 }
 0x32a   : > { %4262 = vst.msk [vmem:[#allocation2 + $0xa8] sm:$0xff] %vm599_vm0, %v4237_v18  ;;  %v3611_v13 = vmul.f32 %v19786_v1, %v3586_v53  ;;  %v3884_v62 = vmul.f32 %v17537_v43, %v3759_v44  ;;  %vm3935_vm11 = vcmp.ge.f32.partialorder %v19693_v45, 0.0  ;;  %vm3936_vm12 = vcmp.ge.f32.partialorder %v19728_v25, 0.0 }
 0x32b   : > { %v4058_v61 = vmul.f32 %v4033_v20, %v4008_v33  ;;  %v3735_v8 = vadd.f32 0.2548296, %v3710_v4  ;;  %v17539_v14 = vpop.eup %17538  ;;  %17544 = vpow2.f32 %v3861_v32  ;;  %v19819_v33 = vpop.permute.xlu1 %4200  ;;  %vm3937_vm13 = vcmp.ge.f32.partialorder %v19757_v57, 0.0 }
 0x32c   : > { %v3636_v35 = vadd.f32 1.4214138, %v3611_v13  ;;  %v3909_v5 = vsub.f32 1.0, %v3884_v62  ;;  %v3562_v63 = vmul.f32 1.0614054, %v17539_v14  ;;  %v17541_v11 = vpop.eup %17540  ;;  %23375 = vst [vmem:[#allocation16_spill] sm:$0xff] %v19819_v33  ;;  %v16082_v3 = vpack.c.bf16 %v5829_v0, %v5828_v36 }
 0x32d   : > { %v4238_v22 = vmul.f32 %v19802_v29, %v4058_v61  ;;  %v3760_v28 = vmul.f32 %v19763_v2, %v3735_v8  ;;  %v4010_v13 = vmul.f32 0.5, %v19677_v26  ;;  %v5489_v0 = vld [vmem:[#allocation2 + $0x28] sm:$0xff]  ;;  %vm7785_vm14 = vcmask 261120  }
 0x32e   : > { %v4314_v59 = vld [vmem:[#allocation2 + $0x9a] sm:$0xff]  ;;  %v3661_v40 = vmul.f32 %v19786_v1, %v3636_v35  ;;  %v3959_v16 = vsub.f32 0.0, %v3909_v5  ;;  %v3587_v42 = vadd.f32 -1.4531521, %v3562_v63  ;;  %v5493_v36 = vld [vmem:[#allocation2 + $0x48] sm:$0xff]  ;;  %7788 = vst.msk [vmem:[#allocation3 + $0x10] sm:$0xff] %vm7785_vm14, %v23355_v12 }
 0x32f   : > { %14544 = vmatmul.mubr.msk.f32.gmra.mrb[88].mxu1 %vm599_vm0, %v4314_v59  ;;  %4263 = vst.msk [vmem:[#allocation2 + $0xb0] sm:$0xff] %vm599_vm0, %v4238_v22  ;;  %v3885_v19 = vmul.f32 %v17541_v11, %v3760_v28  ;;  %v19828_v22 = vpop.permute.xlu0 %4205 }
 0x330   : > { %14546 = vmatprep.mubr.msk.f32.mxu1 %vm17767_vm1, %v23355_v12  ;;  %v3686_v24 = vadd.f32 -0.28449672, %v3661_v40  ;;  %v3984_v23 = vsel %vm3934_vm10, %v3909_v5, %v3959_v16  ;;  %v3612_v27 = vmul.f32 %v17539_v14, %v3587_v42  ;;  %23376 = vst [vmem:[#allocation17_spill] sm:$0xff] %v19828_v22  ;;  %v4011_v16 = vmul.f32 0.5, %v19717_v9  ;;  %7786 = vst.msk [vmem:[#allocation3] sm:$0xff] %vm7785_vm14, %v23355_v12 }
 0x331   : > { %v4315_v2 = vld [vmem:[#allocation2 + $0xa2] sm:$0xff]  ;;  %v3910_v18 = vsub.f32 1.0, %v3885_v19  ;;  %v4034_v43 = vadd.f32 1.0, %v3984_v23  ;;  %v17543_v15 = vpop.eup %17542  ;;  %v19837_v23 = vpop.permute.xlu1 %4210  ;;  %7787 = vst.msk [vmem:[#allocation3 + $0x8] sm:$0xff] %vm7785_vm14, %v23355_v12  ;;  %7789 = vst.msk [vmem:[#allocation3 + $0x18] sm:$0xff] %vm7785_vm14, %v23355_v12 }
 0x332   : > { %v3711_v7 = vmul.f32 %v19786_v1, %v3686_v24  ;;  %v3637_v52 = vadd.f32 1.4214138, %v3612_v27  ;;  %23377 = vst [vmem:[#allocation18_spill] sm:$0xff] %v19837_v23  ;;  %v4012_v27 = vmul.f32 0.5, %v19750_v60  ;;  %7790 = vst.msk [vmem:[#allocation3 + $0x20] sm:$0xff] %vm7785_vm14, %v23355_v12 }
 0x333   : > { %14547 = vmatmul.mubr.msk.f32.gmra.mrb[90].mxu1 %vm599_vm0, %v4315_v2  ;;  %v3960_v53 = vsub.f32 0.0, %v3910_v18  ;;  %v4059_v30 = vmul.f32 %v4034_v43, %v4009_v38  ;;  %v4877_v43 = vld [vmem:[%s23310_s4 + $0x20] sm:$0xff]  ;;  %7791 = vst.msk [vmem:[#allocation3 + $0x28] sm:$0xff] %vm7785_vm14, %v23355_v12  ;;  %7792 = vst.msk [vmem:[#allocation3 + $0x30] sm:$0xff] %vm7785_vm14, %v23355_v12 }
 0x334   : > { %14549 = vmatprep.mubr.msk.f32.mxu1 %vm17767_vm1, %v23355_v12  ;;  %v3736_v31 = vadd.f32 0.2548296, %v3711_v7  ;;  %v3662_v44 = vmul.f32 %v17539_v14, %v3637_v52  ;;  %v4878_v7 = vld [vmem:[%s23310_s4 + $0x28] sm:$0xff]  ;;  %v19853_v52 = vpop.permute.xlu0 %4215  ;;  %7793 = vst.msk [vmem:[#allocation3 + $0x38] sm:$0xff] %vm7785_vm14, %v23355_v12  ;;  %7794 = vst.msk [vmem:[#allocation3 + $0x40] sm:$0xff] %vm7785_vm14, %v23355_v12 }
 0x335   : > { %v3985_v20 = vsel %vm3935_vm11, %v3910_v18, %v3960_v53  ;;  %v4239_v4 = vmul.f32 %v19819_v33, %v4059_v30  ;;  %v17545_v11 = vpop.eup %17544  ;;  %23378 = vst [vmem:[#allocation19_spill] sm:$0xff] %v19853_v52  ;;  %v4268_v30 = vld [vmem:[#allocation2 + $0x1] sm:$0xff]  ;;  %v16073_v60 = vpack.c.bf16 %v4878_v7, %v4877_v43  ;;  %v4857_v7 = vld [vmem:[#allocation2 + $0x2b] sm:$0xff]  ;;  %7795 = vst.msk [vmem:[#allocation3 + $0x48] sm:$0xff] %vm7785_vm14, %v23355_v12 }
 0x336   : > { %v4035_v61 = vadd.f32 1.0, %v3985_v20  ;;  %v3761_v62 = vmul.f32 %v19786_v1, %v3736_v31  ;;  %v4316_v8 = vld [vmem:[#allocation2 + $0xaa] sm:$0xff]  ;;  %v3687_v35 = vadd.f32 -0.28449672, %v3662_v44  ;;  %7796 = vst.msk [vmem:[#allocation3 + $0x50] sm:$0xff] %vm7785_vm14, %v23355_v12  ;;  %7797 = vst.msk [vmem:[#allocation3 + $0x58] sm:$0xff] %vm7785_vm14, %v23355_v12 }
 0x337   : > { %14550 = vmatmul.mubr.msk.f32.gmra.mrb[92].mxu1 %vm599_vm0, %v4316_v8  ;;  %4264 = vst.msk [vmem:[#allocation2 + $0xb8] sm:$0xff] %vm599_vm0, %v4239_v4  ;;  %v4269_v20 = vld [vmem:[#allocation2 + $0x9] sm:$0xff]  ;;  %v19866_v44 = vld [vmem:[#allocation2 + $0x11] sm:$0xff]  ;;  %v19878_v4 = vld [vmem:[#allocation2 + $0x21] sm:$0xff] }
 0x338   : > { %v4060_v45 = vmul.f32 %v4035_v61, %v4010_v13  ;;  %v3886_v37 = vmul.f32 %v17543_v15, %v3761_v62  ;;  %14552 = vmatprep.mubr.msk.f32.mxu1 %vm17767_vm1, %v23355_v12  ;;  %v3712_v5 = vmul.f32 %v17539_v14, %v3687_v35  ;;  %v19872_v15 = vld [vmem:[#allocation2 + $0x19] sm:$0xff]  ;;  %v19884_v13 = vld [vmem:[#allocation2 + $0x29] sm:$0xff]  ;;  %v19890_v61 = vld [vmem:[#allocation2 + $0x31] sm:$0xff]  ;;  %7798 = vst.msk [vmem:[#allocation3 + $0x60] sm:$0xff] %vm7785_vm14, %v23355_v12 }
 0x339   : > { %v19896_v62 = vld [vmem:[#allocation2 + $0x39] sm:$0xff]  ;;  %v19902_v8 = vld [vmem:[#allocation2 + $0x41] sm:$0xff]  ;;  %v19908_v35 = vld [vmem:[#allocation2 + $0x49] sm:$0xff]  ;;  %7799 = vst.msk [vmem:[#allocation3 + $0x68] sm:$0xff] %vm7785_vm14, %v23355_v12 }
 0x33a   : > { %v4240_v28 = vmul.f32 %v19828_v22, %v4060_v45  ;;  %v3911_v26 = vsub.f32 1.0, %v3886_v37  ;;  %v3737_v63 = vadd.f32 0.2548296, %v3712_v5  ;;  %v19914_v45 = vld [vmem:[#allocation2 + $0x51] sm:$0xff]  ;;  %v19920_v37 = vld [vmem:[#allocation2 + $0x59] sm:$0xff]  ;;  %v19926_v5 = vld [vmem:[#allocation2 + $0x61] sm:$0xff] }
 0x33b   : > { %v4856_v43 = vld [vmem:[#allocation2 + $0x23] sm:$0xff]  ;;  %v20204_v22 = vld [vmem:[#allocation2 + $0xaf] sm:$0xff]  ;;  %7800 = vst.msk [vmem:[#allocation3 + $0x70] sm:$0xff] %vm7785_vm14, %v23355_v12  ;;  %7801 = vst.msk [vmem:[#allocation3 + $0x78] sm:$0xff] %vm7785_vm14, %v23355_v12 }
 0x33c   : > { %4265 = vst.msk [vmem:[#allocation2 + $0xc0] sm:$0xff] %vm599_vm0, %v4240_v28  ;;  %v3961_v1 = vsub.f32 0.0, %v3911_v26  ;;  %v3762_v59 = vmul.f32 %v17539_v14, %v3737_v63  ;;  %v19932_v28 = vld [vmem:[#allocation2 + $0x69] sm:$0xff]  ;;  %v19944_v63 = vld [vmem:[#allocation2 + $0x79] sm:$0xff] }
 0x33d   : > { %7802 = vst.msk [vmem:[#allocation3 + $0x80] sm:$0xff] %vm7785_vm14, %v23355_v12  ;;  %7803 = vst.msk [vmem:[#allocation3 + $0x88] sm:$0xff] %vm7785_vm14, %v23355_v12 }
 0x33e   : > { %v3986_v40 = vsel %vm3936_vm12, %v3911_v26, %v3961_v1  ;;  %v3887_v42 = vmul.f32 %v17545_v11, %v3762_v59  ;;  %v4317_v24 = vld [vmem:[#allocation2 + $0xb2] sm:$0xff]  ;;  %v19950_v1 = vld [vmem:[#allocation2 + $0x81] sm:$0xff]  ;;  %v19956_v59 = vld [vmem:[#allocation2 + $0x89] sm:$0xff]  ;;  %7804 = vst.msk [vmem:[#allocation3 + $0x90] sm:$0xff] %vm7785_vm14, %v23355_v12 }
 0x33f   : > { %v4036_v19 = vadd.f32 1.0, %v3986_v40  ;;  %14553 = vmatmul.mubr.msk.f32.gmra.mrb[94].mxu1 %vm599_vm0, %v4317_v24  ;;  %v19938_v26 = vld [vmem:[#allocation2 + $0x71] sm:$0xff]  ;;  %v19968_v40 = vld [vmem:[#allocation2 + $0x99] sm:$0xff]  ;;  %7805 = vst.msk [vmem:[#allocation3 + $0x98] sm:$0xff] %vm7785_vm14, %v23355_v12  ;;  %7806 = vst.msk [vmem:[#allocation3 + $0xa0] sm:$0xff] %vm7785_vm14, %v23355_v12 }
 0x340   : > { %v3912_v2 = vsub.f32 1.0, %v3887_v42  ;;  %14555 = vmatprep.mubr.msk.f32.mxu1 %vm17767_vm1, %v23355_v12  ;;  %v19962_v11 = vld [vmem:[#allocation2 + $0x91] sm:$0xff]  ;;  %7807 = vst.msk [vmem:[#allocation3 + $0xa8] sm:$0xff] %vm7785_vm14, %v23355_v12  ;;  %7808 = vst.msk [vmem:[#allocation3 + $0xb0] sm:$0xff] %vm7785_vm14, %v23355_v12 }
 0x341   : > { %v4061_v32 = vmul.f32 %v4036_v19, %v4011_v16  ;;  %v19974_v16 = vld [vmem:[#allocation2 + $0xa1] sm:$0xff]  ;;  %v19980_v19 = vld [vmem:[#allocation2 + $0xa9] sm:$0xff]  ;;  %v19986_v42 = vld [vmem:[#allocation2 + $0xb1] sm:$0xff]  ;;  %7809 = vst.msk [vmem:[#allocation3 + $0xb8] sm:$0xff] %vm7785_vm14, %v23355_v12 }
 0x342   : > { %v3962_v25 = vsub.f32 0.0, %v3912_v2  ;;  %v20210_v33 = vld [vmem:[#allocation2 + $0xb7] sm:$0xff]  ;;  %7810 = vst.msk [vmem:[#allocation3 + $0xc0] sm:$0xff] %vm7785_vm14, %v23355_v12  ;;  %7811 = vst.msk [vmem:[#allocation3 + $0xc8] sm:$0xff] %vm7785_vm14, %v23355_v12 }
 0x343   : > { %v4241_v18 = vmul.f32 %v19837_v23, %v4061_v32  ;;  %v4318_v14 = vld [vmem:[#allocation2 + $0xba] sm:$0xff]  ;;  %v4319_v57 = vld [vmem:[#allocation2 + $0xc2] sm:$0xf]  ;;  %v5194_v32 = vld [vmem:[%s23310_s4 + $0x30] sm:$0xff]  ;;  %7812 = vst.msk [vmem:[#allocation3 + $0xd0] sm:$0xff] %vm7785_vm14, %v23355_v12 }
 0x344   : > { %14556 = vmatmul.mubr.msk.f32.gmra.mrb[96].mxu1 %vm599_vm0, %v4318_v14  ;;  %v3987_v9 = vsel %vm3937_vm13, %v3912_v2, %v3962_v25  ;;  %v19992_v24 = vld [vmem:[#allocation2 + $0xb9] sm:$0xff]  ;;  %v4852_v25 = vld [vmem:[#allocation2 + $0x3] sm:$0xff]  ;;  %7813 = vst.msk [vmem:[#allocation3 + $0xd8] sm:$0xff] %vm7785_vm14, %v23355_v12 }
 0x345   : > { %4266 = vst.msk [vmem:[#allocation2 + $0xc8] sm:$0xff] %vm599_vm0, %v4241_v18  ;;  %14558 = vmatprep.mubr.msk.f32.mxu1 %vm17767_vm1, %v23355_v12  ;;  %v4037_v38 = vadd.f32 1.0, %v3987_v9  ;;  %v5195_v2 = vld [vmem:[%s23310_s4 + $0x38] sm:$0xff]  ;;  %v4292_v18 = vld [vmem:[#allocation2 + $0xc1] sm:$0xf]  ;;  %v4853_v9 = vld [vmem:[#allocation2 + $0xb] sm:$0xff] }
 0x346   : > { %v16076_v14 = vpack.c.bf16 %v5195_v2, %v5194_v32  ;;  %v4864_v32 = vld [vmem:[#allocation2 + $0x63] sm:$0xff]  ;;  %v4865_v2 = vld [vmem:[#allocation2 + $0x6b] sm:$0xff] }
 0x347   : > { %v4062_v53 = vmul.f32 %v4037_v38, %v4012_v27  ;;  %v4854_v27 = vld [vmem:[#allocation2 + $0x13] sm:$0xff]  ;;  %v4855_v38 = vld [vmem:[#allocation2 + $0x1b] sm:$0xff]  ;;  %v20198_v23 = vld [vmem:[#allocation2 + $0xa7] sm:$0xff] }
 0x348   : > { %14559 = vmatmul.mubr.msk.f32.gmra.mrb[98].mxu1 %vm599_vm0, %v4319_v57  ;;  %v4858_v57 = vld [vmem:[#allocation2 + $0x33] sm:$0xff]  ;;  %v20216_v29 = vld [vmem:[#allocation2 + $0xbf] sm:$0xff] }
 0x349   : > { %14565 = vmatprep.mubr.msk.f32.mxu1 %vm17767_vm1, %v23355_v12  ;;  %v4242_v31 = vmul.f32 %v19853_v52, %v4062_v53  ;;  %v4859_v53 = vld [vmem:[#allocation2 + $0x3b] sm:$0xff] }
 0x34a   : > { %v20192_v52 = vld [vmem:[#allocation2 + $0x9f] sm:$0xff] }
 0x34b   : > { %4267 = vst.msk [vmem:[#allocation2 + $0xd0] sm:$0xf] %vm4091_vm6, %v4242_v31  ;;  %v4862_v31 = vld [vmem:[#allocation2 + $0x53] sm:$0xff] }
 0x34c   : > { %14566 = vmatmul.mubr.msk.f32.vlgmr.msra.gmra.mrb[50].mxu1 %vm599_vm0, %v4268_v30  ;;  %v4860_v30 = vld [vmem:[#allocation2 + $0x43] sm:$0xff] }
 0x34d   : > { %14568 = vmatprep.mubr.msk.f32.mxu1 %vm17767_vm1, %v23355_v12  ;;  %16074 = vmatpush3.bf16.msra.mxu1 %v16073_v60  ;;  %v4861_v60 = vld [vmem:[#allocation2 + $0x4b] sm:$0xff] }
 0x34e   : > { %16075 = vmatprep.subr.bf16.mxu1 %v23357_v41  ;;  %v20222_v56 = vld [vmem:[#allocation2 + $0xc7] sm:$0xff] }
 0x350   : > { %14569 = vmatmul.mubr.msk.f32.gmra.mrb[52].mxu1 %vm599_vm0, %v4269_v20  ;;  %v4863_v20 = vld [vmem:[#allocation2 + $0x5b] sm:$0xff] }
 0x351   : > { %14571 = vmatprep.mubr.msk.f32.mxu1 %vm17767_vm1, %v23355_v12 }
 0x352   : > { %v5193_v39 = vld [vmem:[#allocation2 + $0xcf] sm:$0xf] }
 0x354   : > { %14572 = vmatmul.mubr.msk.f32.gmra.mrb[54].mxu1 %vm599_vm0, %v19866_v44 }
 0x355   : > { %14574 = vmatprep.mubr.msk.f32.mxu1 %vm17767_vm1, %v23355_v12 }
 0x358   : > { %14575 = vmatmul.mubr.msk.f32.gmra.mrb[56].mxu1 %vm599_vm0, %v19872_v15 }
 0x359   : > { %14577 = vmatprep.mubr.msk.f32.mxu1 %vm17767_vm1, %v23355_v12 }
 0x35c   : > { %14578 = vmatmul.mubr.msk.f32.gmra.mrb[58].mxu1 %vm599_vm0, %v19878_v4 }
 0x35d   : > { %14580 = vmatprep.mubr.msk.f32.mxu1 %vm17767_vm1, %v23355_v12 }
 0x360   : > { %14581 = vmatmul.mubr.msk.f32.gmra.mrb[60].mxu1 %vm599_vm0, %v19884_v13 }
 0x361   : > { %14583 = vmatprep.mubr.msk.f32.mxu1 %vm17767_vm1, %v23355_v12 }
 0x364   : > { %14584 = vmatmul.mubr.msk.f32.gmra.mrb[62].mxu1 %vm599_vm0, %v19890_v61 }
 0x365   : > { %14586 = vmatprep.mubr.msk.f32.mxu1 %vm17767_vm1, %v23355_v12 }
 0x368   : > { %14587 = vmatmul.mubr.msk.f32.gmra.mrb[64].mxu1 %vm599_vm0, %v19896_v62 }
 0x369   : > { %14589 = vmatprep.mubr.msk.f32.mxu1 %vm17767_vm1, %v23355_v12 }
 0x36c   : > { %14590 = vmatmul.mubr.msk.f32.gmra.mrb[66].mxu1 %vm599_vm0, %v19902_v8 }
 0x36d   : > { %14592 = vmatprep.mubr.msk.f32.mxu1 %vm17767_vm1, %v23355_v12 }
 0x370   : > { %14593 = vmatmul.mubr.msk.f32.gmra.mrb[68].mxu1 %vm599_vm0, %v19908_v35 }
 0x371   : > { %14595 = vmatprep.mubr.msk.f32.mxu1 %vm17767_vm1, %v23355_v12 }
 0x374   : > { %14596 = vmatmul.mubr.msk.f32.gmra.mrb[70].mxu1 %vm599_vm0, %v19914_v45 }
 0x375   : > { %14598 = vmatprep.mubr.msk.f32.mxu1 %vm17767_vm1, %v23355_v12 }
 0x378   : > { %14599 = vmatmul.mubr.msk.f32.gmra.mrb[72].mxu1 %vm599_vm0, %v19920_v37 }
 0x379   : > { %14601 = vmatprep.mubr.msk.f32.mxu1 %vm17767_vm1, %v23355_v12 }
 0x37c   : > { %14602 = vmatmul.mubr.msk.f32.gmra.mrb[74].mxu1 %vm599_vm0, %v19926_v5 }
 0x37d   : > { %14604 = vmatprep.mubr.msk.f32.mxu1 %vm17767_vm1, %v23355_v12 }
 0x380   : > { %14605 = vmatmul.mubr.msk.f32.gmra.mrb[76].mxu1 %vm599_vm0, %v19932_v28 }
 0x381   : > { %14607 = vmatprep.mubr.msk.f32.mxu1 %vm17767_vm1, %v23355_v12 }
 0x384   : > { %14608 = vmatmul.mubr.msk.f32.gmra.mrb[78].mxu1 %vm599_vm0, %v19938_v26 }
 0x385   : > { %14610 = vmatprep.mubr.msk.f32.mxu1 %vm17767_vm1, %v23355_v12 }
 0x388   : > { %14611 = vmatmul.mubr.msk.f32.gmra.mrb[80].mxu1 %vm599_vm0, %v19944_v63 }
 0x389   : > { %14613 = vmatprep.mubr.msk.f32.mxu1 %vm17767_vm1, %v23355_v12 }
 0x38c   : > { %14614 = vmatmul.mubr.msk.f32.gmra.mrb[82].mxu1 %vm599_vm0, %v19950_v1 }
 0x38d   : > { %14616 = vmatprep.mubr.msk.f32.mxu1 %vm17767_vm1, %v23355_v12 }
 0x390   : > { %14617 = vmatmul.mubr.msk.f32.gmra.mrb[84].mxu1 %vm599_vm0, %v19956_v59 }
 0x391   : > { %14619 = vmatprep.mubr.msk.f32.mxu1 %vm17767_vm1, %v23355_v12 }
 0x394   : > { %14620 = vmatmul.mubr.msk.f32.gmra.mrb[86].mxu1 %vm599_vm0, %v19962_v11 }
 0x395   : > { %14622 = vmatprep.mubr.msk.f32.mxu1 %vm17767_vm1, %v23355_v12 }
 0x398   : > { %14623 = vmatmul.mubr.msk.f32.gmra.mrb[88].mxu1 %vm599_vm0, %v19968_v40 }
 0x399   : > { %14625 = vmatprep.mubr.msk.f32.mxu1 %vm17767_vm1, %v23355_v12 }
 0x39c   : > { %14626 = vmatmul.mubr.msk.f32.gmra.mrb[90].mxu1 %vm599_vm0, %v19974_v16 }
 0x39d   : > { %14628 = vmatprep.mubr.msk.f32.mxu1 %vm17767_vm1, %v23355_v12 }
 0x3a0   : > { %14629 = vmatmul.mubr.msk.f32.gmra.mrb[92].mxu1 %vm599_vm0, %v19980_v19 }
 0x3a1   : > { %14631 = vmatprep.mubr.msk.f32.mxu1 %vm17767_vm1, %v23355_v12 }
 0x3a4   : > { %14632 = vmatmul.mubr.msk.f32.gmra.mrb[94].mxu1 %vm599_vm0, %v19986_v42 }
 0x3a5   : > { %14634 = vmatprep.mubr.msk.f32.mxu1 %vm17767_vm1, %v23355_v12 }
 0x3a8   : > { %14635 = vmatmul.mubr.msk.f32.gmra.mrb[96].mxu1 %vm599_vm0, %v19992_v24 }
 0x3a9   : > { %14637 = vmatprep.mubr.msk.f32.mxu1 %vm17767_vm1, %v23355_v12 }
 0x3ac   : > { %14638 = vmatmul.mubr.msk.f32.gmra.mrb[98].mxu1 %vm599_vm0, %v4292_v18  ;;  %v4866_v18 = vld [vmem:[#allocation2 + $0x73] sm:$0xff] }
 0x3ad   : > { %14644 = vmatprep.mubr.msk.f32.mxu1 %vm17767_vm1, %v23355_v12 }
 0x3b0   : > { %14645 = vmatmul.mubr.msk.f32.vlgmr.msra.gmra.mrb[50].mxu1 %vm599_vm0, %v4852_v25  ;;  %v4867_v25 = vld [vmem:[#allocation2 + $0x7b] sm:$0xff] }
 0x3b1   : > { %14647 = vmatprep.mubr.msk.f32.mxu1 %vm17767_vm1, %v23355_v12  ;;  %16077 = vmatpush3.bf16.msra.mxu1 %v16076_v14  ;;  %v4868_v14 = vld [vmem:[#allocation2 + $0x83] sm:$0xff] }
 0x3b2   : > { %16078 = vmatprep.subr.bf16.mxu1 %v23357_v41 }
 0x3b4   : > { %14648 = vmatmul.mubr.msk.f32.gmra.mrb[52].mxu1 %vm599_vm0, %v4853_v9  ;;  %v4869_v9 = vld [vmem:[#allocation2 + $0x8b] sm:$0xff] }
 0x3b5   : > { %14650 = vmatprep.mubr.msk.f32.mxu1 %vm17767_vm1, %v23355_v12 }
 0x3b8   : > { %14651 = vmatmul.mubr.msk.f32.gmra.mrb[54].mxu1 %vm599_vm0, %v4854_v27  ;;  %v4870_v27 = vld [vmem:[#allocation2 + $0x93] sm:$0xff] }
 0x3b9   : > { %14653 = vmatprep.mubr.msk.f32.mxu1 %vm17767_vm1, %v23355_v12 }
 0x3bc   : > { %14654 = vmatmul.mubr.msk.f32.gmra.mrb[56].mxu1 %vm599_vm0, %v4855_v38  ;;  %v4871_v38 = vld [vmem:[#allocation2 + $0x9b] sm:$0xff] }
 0x3bd   : > { %14656 = vmatprep.mubr.msk.f32.mxu1 %vm17767_vm1, %v23355_v12 }
 0x3c0   : > { %14657 = vmatmul.mubr.msk.f32.gmra.mrb[58].mxu1 %vm599_vm0, %v4856_v43  ;;  %v4872_v43 = vld [vmem:[#allocation2 + $0xa3] sm:$0xff] }
 0x3c1   : > { %14659 = vmatprep.mubr.msk.f32.mxu1 %vm17767_vm1, %v23355_v12 }
 0x3c4   : > { %14660 = vmatmul.mubr.msk.f32.gmra.mrb[60].mxu1 %vm599_vm0, %v4857_v7  ;;  %v4873_v7 = vld [vmem:[#allocation2 + $0xab] sm:$0xff] }
 0x3c5   : > { %14662 = vmatprep.mubr.msk.f32.mxu1 %vm17767_vm1, %v23355_v12 }
 0x3c8   : > { %14663 = vmatmul.mubr.msk.f32.gmra.mrb[62].mxu1 %vm599_vm0, %v4858_v57  ;;  %v4874_v57 = vld [vmem:[#allocation2 + $0xb3] sm:$0xff] }
 0x3c9   : > { %14665 = vmatprep.mubr.msk.f32.mxu1 %vm17767_vm1, %v23355_v12 }
 0x3cc   : > { %14666 = vmatmul.mubr.msk.f32.gmra.mrb[64].mxu1 %vm599_vm0, %v4859_v53  ;;  %v4875_v53 = vld [vmem:[#allocation2 + $0xbb] sm:$0xff] }
 0x3cd   : > { %14668 = vmatprep.mubr.msk.f32.mxu1 %vm17767_vm1, %v23355_v12 }
 0x3d0   : > { %14669 = vmatmul.mubr.msk.f32.gmra.mrb[66].mxu1 %vm599_vm0, %v4860_v30  ;;  %v5511_v30 = vld [vmem:[%s23310_s4 + $0x40] sm:$0xff] }
 0x3d1   : > { %14671 = vmatprep.mubr.msk.f32.mxu1 %vm17767_vm1, %v23355_v12 }
 0x3d4   : > { %14672 = vmatmul.mubr.msk.f32.gmra.mrb[68].mxu1 %vm599_vm0, %v4861_v60  ;;  %v5512_v60 = vld [vmem:[%s23310_s4 + $0x48] sm:$0xff] }
 0x3d5   : > { %14674 = vmatprep.mubr.msk.f32.mxu1 %vm17767_vm1, %v23355_v12 }
 0x3d8   : > { %14675 = vmatmul.mubr.msk.f32.gmra.mrb[70].mxu1 %vm599_vm0, %v4862_v31  ;;  %v4876_v31 = vld [vmem:[#allocation2 + $0xc3] sm:$0xf] }
 0x3d9   : > { %14677 = vmatprep.mubr.msk.f32.mxu1 %vm17767_vm1, %v23355_v12 }
 0x3dc   : > { %14678 = vmatmul.mubr.msk.f32.gmra.mrb[72].mxu1 %vm599_vm0, %v4863_v20  ;;  %v16079_v20 = vpack.c.bf16 %v5512_v60, %v5511_v30  ;;  %v20156_v30 = vld [vmem:[#allocation2 + $0x6f] sm:$0xff]  ;;  %v20162_v60 = vld [vmem:[#allocation2 + $0x77] sm:$0xff] }
 0x3dd   : > { %14680 = vmatprep.mubr.msk.f32.mxu1 %vm17767_vm1, %v23355_v12 }
 0x3e0   : > { %14681 = vmatmul.mubr.msk.f32.gmra.mrb[74].mxu1 %vm599_vm0, %v4864_v32  ;;  %v5169_v32 = vld [vmem:[#allocation2 + $0xf] sm:$0xff] }
 0x3e1   : > { %14683 = vmatprep.mubr.msk.f32.mxu1 %vm17767_vm1, %v23355_v12 }
 0x3e4   : > { %14684 = vmatmul.mubr.msk.f32.gmra.mrb[76].mxu1 %vm599_vm0, %v4865_v2  ;;  %v5170_v2 = vld [vmem:[#allocation2 + $0x17] sm:$0xff] }
 0x3e5   : > { %14686 = vmatprep.mubr.msk.f32.mxu1 %vm17767_vm1, %v23355_v12 }
 0x3e8   : > { %14687 = vmatmul.mubr.msk.f32.gmra.mrb[78].mxu1 %vm599_vm0, %v4866_v18  ;;  %v20096_v18 = vld [vmem:[#allocation2 + $0x1f] sm:$0xff] }
 0x3e9   : > { %14689 = vmatprep.mubr.msk.f32.mxu1 %vm17767_vm1, %v23355_v12 }
 0x3ec   : > { %14690 = vmatmul.mubr.msk.f32.gmra.mrb[80].mxu1 %vm599_vm0, %v4867_v25  ;;  %v20102_v25 = vld [vmem:[#allocation2 + $0x27] sm:$0xff] }
 0x3ed   : > { %14692 = vmatprep.mubr.msk.f32.mxu1 %vm17767_vm1, %v23355_v12 }
 0x3f0   : > { %14693 = vmatmul.mubr.msk.f32.gmra.mrb[82].mxu1 %vm599_vm0, %v4868_v14  ;;  %v20108_v14 = vld [vmem:[#allocation2 + $0x2f] sm:$0xff] }
 0x3f1   : > { %14695 = vmatprep.mubr.msk.f32.mxu1 %vm17767_vm1, %v23355_v12 }
 0x3f4   : > { %14696 = vmatmul.mubr.msk.f32.gmra.mrb[84].mxu1 %vm599_vm0, %v4869_v9  ;;  %v20114_v9 = vld [vmem:[#allocation2 + $0x37] sm:$0xff] }
 0x3f5   : > { %14698 = vmatprep.mubr.msk.f32.mxu1 %vm17767_vm1, %v23355_v12 }
 0x3f8   : > { %14699 = vmatmul.mubr.msk.f32.gmra.mrb[86].mxu1 %vm599_vm0, %v4870_v27  ;;  %v20120_v27 = vld [vmem:[#allocation2 + $0x3f] sm:$0xff] }
 0x3f9   : > { %14701 = vmatprep.mubr.msk.f32.mxu1 %vm17767_vm1, %v23355_v12 }
 0x3fc   : > { %14702 = vmatmul.mubr.msk.f32.gmra.mrb[88].mxu1 %vm599_vm0, %v4871_v38  ;;  %v20126_v38 = vld [vmem:[#allocation2 + $0x47] sm:$0xff] }
 0x3fd   : > { %14704 = vmatprep.mubr.msk.f32.mxu1 %vm17767_vm1, %v23355_v12 }
 0x400   : > { %14705 = vmatmul.mubr.msk.f32.gmra.mrb[90].mxu1 %vm599_vm0, %v4872_v43  ;;  %v20132_v43 = vld [vmem:[#allocation2 + $0x4f] sm:$0xff] }
 0x401   : > { %14707 = vmatprep.mubr.msk.f32.mxu1 %vm17767_vm1, %v23355_v12 }
 0x404   : > { %14708 = vmatmul.mubr.msk.f32.gmra.mrb[92].mxu1 %vm599_vm0, %v4873_v7  ;;  %v20138_v7 = vld [vmem:[#allocation2 + $0x57] sm:$0xff] }
 0x405   : > { %14710 = vmatprep.mubr.msk.f32.mxu1 %vm17767_vm1, %v23355_v12 }
 0x408   : > { %14711 = vmatmul.mubr.msk.f32.gmra.mrb[94].mxu1 %vm599_vm0, %v4874_v57  ;;  %v20144_v57 = vld [vmem:[#allocation2 + $0x5f] sm:$0xff] }
 0x409   : > { %14713 = vmatprep.mubr.msk.f32.mxu1 %vm17767_vm1, %v23355_v12 }
 0x40c   : > { %14714 = vmatmul.mubr.msk.f32.gmra.mrb[96].mxu1 %vm599_vm0, %v4875_v53  ;;  %v20150_v53 = vld [vmem:[#allocation2 + $0x67] sm:$0xff] }
 0x40d   : > { %14716 = vmatprep.mubr.msk.f32.mxu1 %vm17767_vm1, %v23355_v12 }
 0x410   : > { %14717 = vmatmul.mubr.msk.f32.gmra.mrb[98].mxu1 %vm599_vm0, %v4876_v31  ;;  %v20168_v31 = vld [vmem:[#allocation2 + $0x7f] sm:$0xff] }
 0x411   : > { %14723 = vmatprep.mubr.msk.f32.mxu1 %vm17767_vm1, %v23355_v12 }
 0x414   : > { %14724 = vmatmul.mubr.msk.f32.vlgmr.msra.gmra.mrb[50].mxu1 %vm599_vm0, %v5169_v32  ;;  %v20180_v32 = vld [vmem:[#allocation2 + $0x8f] sm:$0xff] }
 0x415   : > { %14726 = vmatprep.mubr.msk.f32.mxu1 %vm17767_vm1, %v23355_v12  ;;  %16080 = vmatpush3.bf16.msra.mxu1 %v16079_v20  ;;  %v20174_v20 = vld [vmem:[#allocation2 + $0x87] sm:$0xff] }
 0x416   : > { %16081 = vmatprep.subr.bf16.mxu1 %v23357_v41 }
 0x418   : > { %14727 = vmatmul.mubr.msk.f32.gmra.mrb[52].mxu1 %vm599_vm0, %v5170_v2  ;;  %v20186_v2 = vld [vmem:[#allocation2 + $0x97] sm:$0xff] }
 0x419   : > { %14729 = vmatprep.mubr.msk.f32.mxu1 %vm17767_vm1, %v23355_v12 }
 0x41c   : > { %14730 = vmatmul.mubr.msk.f32.gmra.mrb[54].mxu1 %vm599_vm0, %v20096_v18 }
 0x41d   : > { %14732 = vmatprep.mubr.msk.f32.mxu1 %vm17767_vm1, %v23355_v12 }
 0x420   : > { %14733 = vmatmul.mubr.msk.f32.gmra.mrb[56].mxu1 %vm599_vm0, %v20102_v25 }
 0x421   : > { %14735 = vmatprep.mubr.msk.f32.mxu1 %vm17767_vm1, %v23355_v12 }
 0x424   : > { %14736 = vmatmul.mubr.msk.f32.gmra.mrb[58].mxu1 %vm599_vm0, %v20108_v14 }
 0x425   : > { %14738 = vmatprep.mubr.msk.f32.mxu1 %vm17767_vm1, %v23355_v12 }
 0x428   : > { %14739 = vmatmul.mubr.msk.f32.gmra.mrb[60].mxu1 %vm599_vm0, %v20114_v9 }
 0x429   : > { %14741 = vmatprep.mubr.msk.f32.mxu1 %vm17767_vm1, %v23355_v12 }
 0x42c   : > { %14742 = vmatmul.mubr.msk.f32.gmra.mrb[62].mxu1 %vm599_vm0, %v20120_v27 }
 0x42d   : > { %14744 = vmatprep.mubr.msk.f32.mxu1 %vm17767_vm1, %v23355_v12 }
 0x430   : > { %14745 = vmatmul.mubr.msk.f32.gmra.mrb[64].mxu1 %vm599_vm0, %v20126_v38 }
 0x431   : > { %14747 = vmatprep.mubr.msk.f32.mxu1 %vm17767_vm1, %v23355_v12 }
 0x434   : > { %14748 = vmatmul.mubr.msk.f32.gmra.mrb[66].mxu1 %vm599_vm0, %v20132_v43 }
 0x435   : > { %14750 = vmatprep.mubr.msk.f32.mxu1 %vm17767_vm1, %v23355_v12 }
 0x438   : > { %14751 = vmatmul.mubr.msk.f32.gmra.mrb[68].mxu1 %vm599_vm0, %v20138_v7 }
 0x439   : > { %14753 = vmatprep.mubr.msk.f32.mxu1 %vm17767_vm1, %v23355_v12 }
 0x43c   : > { %14754 = vmatmul.mubr.msk.f32.gmra.mrb[70].mxu1 %vm599_vm0, %v20144_v57 }
 0x43d   : > { %14756 = vmatprep.mubr.msk.f32.mxu1 %vm17767_vm1, %v23355_v12 }
 0x440   : > { %14757 = vmatmul.mubr.msk.f32.gmra.mrb[72].mxu1 %vm599_vm0, %v20150_v53 }
 0x441   : > { %14759 = vmatprep.mubr.msk.f32.mxu1 %vm17767_vm1, %v23355_v12 }
 0x444   : > { %14760 = vmatmul.mubr.msk.f32.gmra.mrb[74].mxu1 %vm599_vm0, %v20156_v30 }
 0x445   : > { %14762 = vmatprep.mubr.msk.f32.mxu1 %vm17767_vm1, %v23355_v12 }
 0x448   : > { %14763 = vmatmul.mubr.msk.f32.gmra.mrb[76].mxu1 %vm599_vm0, %v20162_v60 }
 0x449   : > { %14765 = vmatprep.mubr.msk.f32.mxu1 %vm17767_vm1, %v23355_v12 }
 0x44c   : > { %14766 = vmatmul.mubr.msk.f32.gmra.mrb[78].mxu1 %vm599_vm0, %v20168_v31 }
 0x44d   : > { %14768 = vmatprep.mubr.msk.f32.mxu1 %vm17767_vm1, %v23355_v12 }
 0x450   : > { %14769 = vmatmul.mubr.msk.f32.gmra.mrb[80].mxu1 %vm599_vm0, %v20174_v20 }
 0x451   : > { %14771 = vmatprep.mubr.msk.f32.mxu1 %vm17767_vm1, %v23355_v12 }
 0x454   : > { %14772 = vmatmul.mubr.msk.f32.gmra.mrb[82].mxu1 %vm599_vm0, %v20180_v32 }
 0x455   : > { %14774 = vmatprep.mubr.msk.f32.mxu1 %vm17767_vm1, %v23355_v12 }
 0x458   : > { %14775 = vmatmul.mubr.msk.f32.gmra.mrb[84].mxu1 %vm599_vm0, %v20186_v2 }
 0x459   : > { %14777 = vmatprep.mubr.msk.f32.mxu1 %vm17767_vm1, %v23355_v12 }
 0x45c   : > { %14778 = vmatmul.mubr.msk.f32.gmra.mrb[86].mxu1 %vm599_vm0, %v20192_v52 }
 0x45d   : > { %14780 = vmatprep.mubr.msk.f32.mxu1 %vm17767_vm1, %v23355_v12 }
 0x460   : > { %14781 = vmatmul.mubr.msk.f32.gmra.mrb[88].mxu1 %vm599_vm0, %v20198_v23 }
 0x461   : > { %14783 = vmatprep.mubr.msk.f32.mxu1 %vm17767_vm1, %v23355_v12 }
 0x464   : > { %14784 = vmatmul.mubr.msk.f32.gmra.mrb[90].mxu1 %vm599_vm0, %v20204_v22 }
 0x465   : > { %14786 = vmatprep.mubr.msk.f32.mxu1 %vm17767_vm1, %v23355_v12 }
 0x468   : > { %14787 = vmatmul.mubr.msk.f32.gmra.mrb[92].mxu1 %vm599_vm0, %v20210_v33 }
 0x469   : > { %14789 = vmatprep.mubr.msk.f32.mxu1 %vm17767_vm1, %v23355_v12 }
 0x46c   : > { %14790 = vmatmul.mubr.msk.f32.gmra.mrb[94].mxu1 %vm599_vm0, %v20216_v29 }
 0x46d   : > { %14792 = vmatprep.mubr.msk.f32.mxu1 %vm17767_vm1, %v23355_v12 }
 0x470   : > { %14793 = vmatmul.mubr.msk.f32.gmra.mrb[96].mxu1 %vm599_vm0, %v20222_v56 }
 0x471   : > { %14795 = vmatprep.mubr.msk.f32.mxu1 %vm17767_vm1, %v23355_v12 }
 0x474   : > { %14796 = vmatmul.mubr.msk.f32.gmra.mrb[98].mxu1 %vm599_vm0, %v5193_v39  ;;  %v5488_v39 = vld [vmem:[#allocation2 + $0x20] sm:$0xff] }
 0x475   : > { %14802 = vmatprep.mubr.msk.f32.mxu1 %vm17767_vm1, %v23355_v12 }
 0x478   : > { %14803 = vmatmul.mubr.msk.f32.vlgmr.msra.gmra.mrb[50].mxu1 %vm599_vm0, %v5486_v17  ;;  %v5490_v17 = vld [vmem:[#allocation2 + $0x30] sm:$0xff] }
 0x479   : > { %14805 = vmatprep.mubr.msk.f32.mxu1 %vm17767_vm1, %v23355_v12  ;;  %16083 = vmatpush3.bf16.msra.mxu1 %v16082_v3  ;;  %v5492_v3 = vld [vmem:[#allocation2 + $0x40] sm:$0xff] }
 0x47a   : > { %16084 = vmatprep.subr.bf16.mxu1 %v23357_v41 }
 0x47c   : > { %14806 = vmatmul.mubr.msk.f32.gmra.mrb[52].mxu1 %vm599_vm0, %v5487_v51  ;;  %v5491_v51 = vld [vmem:[#allocation2 + $0x38] sm:$0xff] }
 0x47d   : > { %14808 = vmatprep.mubr.msk.f32.mxu1 %vm17767_vm1, %v23355_v12 }
 0x480   : > { %14809 = vmatmul.mubr.msk.f32.gmra.mrb[54].mxu1 %vm599_vm0, %v5488_v39  ;;  %v5494_v39 = vld [vmem:[#allocation2 + $0x50] sm:$0xff] }
 0x481   : > { %14811 = vmatprep.mubr.msk.f32.mxu1 %vm17767_vm1, %v23355_v12 }
 0x484   : > { %14812 = vmatmul.mubr.msk.f32.gmra.mrb[56].mxu1 %vm599_vm0, %v5489_v0  ;;  %v5495_v0 = vld [vmem:[#allocation2 + $0x58] sm:$0xff] }
 0x485   : > { %14814 = vmatprep.mubr.msk.f32.mxu1 %vm17767_vm1, %v23355_v12 }
 0x488   : > { %14815 = vmatmul.mubr.msk.f32.gmra.mrb[58].mxu1 %vm599_vm0, %v5490_v17  ;;  %v5496_v17 = vld [vmem:[#allocation2 + $0x60] sm:$0xff] }
 0x489   : > { %14817 = vmatprep.mubr.msk.f32.mxu1 %vm17767_vm1, %v23355_v12 }
 0x48c   : > { %14818 = vmatmul.mubr.msk.f32.gmra.mrb[60].mxu1 %vm599_vm0, %v5491_v51  ;;  %v5497_v51 = vld [vmem:[#allocation2 + $0x68] sm:$0xff] }
 0x48d   : > { %14820 = vmatprep.mubr.msk.f32.mxu1 %vm17767_vm1, %v23355_v12 }
 0x490   : > { %14821 = vmatmul.mubr.msk.f32.gmra.mrb[62].mxu1 %vm599_vm0, %v5492_v3  ;;  %v5498_v3 = vld [vmem:[#allocation2 + $0x70] sm:$0xff] }
 0x491   : > { %14823 = vmatprep.mubr.msk.f32.mxu1 %vm17767_vm1, %v23355_v12 }
 0x494   : > { %14824 = vmatmul.mubr.msk.f32.gmra.mrb[64].mxu1 %vm599_vm0, %v5493_v36  ;;  %v5499_v36 = vld [vmem:[#allocation2 + $0x78] sm:$0xff] }
 0x495   : > { %14826 = vmatprep.mubr.msk.f32.mxu1 %vm17767_vm1, %v23355_v12 }
 0x498   : > { %14827 = vmatmul.mubr.msk.f32.gmra.mrb[66].mxu1 %vm599_vm0, %v5494_v39  ;;  %v5500_v39 = vld [vmem:[#allocation2 + $0x80] sm:$0xff] }
 0x499   : > { %14829 = vmatprep.mubr.msk.f32.mxu1 %vm17767_vm1, %v23355_v12 }
 0x49c   : > { %14830 = vmatmul.mubr.msk.f32.gmra.mrb[68].mxu1 %vm599_vm0, %v5495_v0  ;;  %v5501_v0 = vld [vmem:[#allocation2 + $0x88] sm:$0xff] }
 0x49d   : > { %14832 = vmatprep.mubr.msk.f32.mxu1 %vm17767_vm1, %v23355_v12 }
 0x4a0   : > { %14833 = vmatmul.mubr.msk.f32.gmra.mrb[70].mxu1 %vm599_vm0, %v5496_v17  ;;  %v5502_v17 = vld [vmem:[#allocation2 + $0x90] sm:$0xff] }
 0x4a1   : > { %14835 = vmatprep.mubr.msk.f32.mxu1 %vm17767_vm1, %v23355_v12 }
 0x4a4   : > { %14836 = vmatmul.mubr.msk.f32.gmra.mrb[72].mxu1 %vm599_vm0, %v5497_v51  ;;  %v5503_v51 = vld [vmem:[#allocation2 + $0x98] sm:$0xff] }
 0x4a5   : > { %14838 = vmatprep.mubr.msk.f32.mxu1 %vm17767_vm1, %v23355_v12 }
 0x4a8   : > { %14839 = vmatmul.mubr.msk.f32.gmra.mrb[74].mxu1 %vm599_vm0, %v5498_v3  ;;  %v5504_v3 = vld [vmem:[#allocation2 + $0xa0] sm:$0xff] }
 0x4a9   : > { %14841 = vmatprep.mubr.msk.f32.mxu1 %vm17767_vm1, %v23355_v12 }
 0x4ac   : > { %14842 = vmatmul.mubr.msk.f32.gmra.mrb[76].mxu1 %vm599_vm0, %v5499_v36  ;;  %v5505_v36 = vld [vmem:[#allocation2 + $0xa8] sm:$0xff] }
 0x4ad   : > { %14844 = vmatprep.mubr.msk.f32.mxu1 %vm17767_vm1, %v23355_v12 }
 0x4b0   : > { %14845 = vmatmul.mubr.msk.f32.gmra.mrb[78].mxu1 %vm599_vm0, %v5500_v39  ;;  %v5506_v39 = vld [vmem:[#allocation2 + $0xb0] sm:$0xff] }
 0x4b1   : > { %14847 = vmatprep.mubr.msk.f32.mxu1 %vm17767_vm1, %v23355_v12 }
 0x4b4   : > { %14848 = vmatmul.mubr.msk.f32.gmra.mrb[80].mxu1 %vm599_vm0, %v5501_v0  ;;  %v5507_v0 = vld [vmem:[#allocation2 + $0xb8] sm:$0xff] }
 0x4b5   : > { %14850 = vmatprep.mubr.msk.f32.mxu1 %vm17767_vm1, %v23355_v12 }
 0x4b8   : > { %14851 = vmatmul.mubr.msk.f32.gmra.mrb[82].mxu1 %vm599_vm0, %v5502_v17  ;;  %v5508_v17 = vld [vmem:[#allocation2 + $0xc0] sm:$0xff] }
 0x4b9   : > { %14853 = vmatprep.mubr.msk.f32.mxu1 %vm17767_vm1, %v23355_v12 }
 0x4bc   : > { %14854 = vmatmul.mubr.msk.f32.gmra.mrb[84].mxu1 %vm599_vm0, %v5503_v51  ;;  %v5509_v51 = vld [vmem:[#allocation2 + $0xc8] sm:$0xff] }
 0x4bd   : > { %14856 = vmatprep.mubr.msk.f32.mxu1 %vm17767_vm1, %v23355_v12 }
 0x4c0   : > { %14857 = vmatmul.mubr.msk.f32.gmra.mrb[86].mxu1 %vm599_vm0, %v5504_v3  ;;  %v6145_v3 = vld [vmem:[%s23310_s4 + $0x60] sm:$0xff] }
 0x4c1   : > { %14859 = vmatprep.mubr.msk.f32.mxu1 %vm17767_vm1, %v23355_v12 }
 0x4c4   : > { %14860 = vmatmul.mubr.msk.f32.gmra.mrb[88].mxu1 %vm599_vm0, %v5505_v36  ;;  %v6146_v36 = vld [vmem:[%s23310_s4 + $0x68] sm:$0xff] }
 0x4c5   : > { %14862 = vmatprep.mubr.msk.f32.mxu1 %vm17767_vm1, %v23355_v12 }
 0x4c8   : > { %14863 = vmatmul.mubr.msk.f32.gmra.mrb[90].mxu1 %vm599_vm0, %v5506_v39  ;;  %v5510_v39 = vld [vmem:[#allocation2 + $0xd0] sm:$0xf] }
 0x4c9   : > { %14865 = vmatprep.mubr.msk.f32.mxu1 %vm17767_vm1, %v23355_v12 }
 0x4cc   : > { %14866 = vmatmul.mubr.msk.f32.gmra.mrb[92].mxu1 %vm599_vm0, %v5507_v0  ;;  %v16085_v0 = vpack.c.bf16 %v6146_v36, %v6145_v3  ;;  %v6138_v3 = vld [vmem:[#allocation2 + $0xad] sm:$0xff]  ;;  %v6139_v36 = vld [vmem:[#allocation2 + $0xb5] sm:$0xff] }
 0x4cd   : > { %14868 = vmatprep.mubr.msk.f32.mxu1 %vm17767_vm1, %v23355_v12 }
 0x4d0   : > { %14869 = vmatmul.mubr.msk.f32.gmra.mrb[94].mxu1 %vm599_vm0, %v5508_v17  ;;  %v6136_v17 = vld [vmem:[#allocation2 + $0x9d] sm:$0xff] }
 0x4d1   : > { %14871 = vmatprep.mubr.msk.f32.mxu1 %vm17767_vm1, %v23355_v12 }
 0x4d4   : > { %14872 = vmatmul.mubr.msk.f32.gmra.mrb[96].mxu1 %vm599_vm0, %v5509_v51  ;;  %v6137_v51 = vld [vmem:[#allocation2 + $0xa5] sm:$0xff] }
 0x4d5   : > { %14874 = vmatprep.mubr.msk.f32.mxu1 %vm17767_vm1, %v23355_v12 }
 0x4d8   : > { %14875 = vmatmul.mubr.msk.f32.gmra.mrb[98].mxu1 %vm599_vm0, %v5510_v39  ;;  %v6140_v39 = vld [vmem:[#allocation2 + $0xbd] sm:$0xff] }
 0x4d9   : > { %14881 = vmatprep.mubr.msk.f32.mxu1 %vm17767_vm1, %v23355_v12 }
 0x4dc   : > { %14882 = vmatmul.mubr.msk.f32.vlgmr.msra.gmra.mrb[50].mxu1 %vm599_vm0, %v19866_v44  ;;  %v5825_v44 = vld [vmem:[#allocation2 + $0xc1] sm:$0xff] }
 0x4dd   : > { %14884 = vmatprep.mubr.msk.f32.mxu1 %vm17767_vm1, %v23355_v12  ;;  %16086 = vmatpush3.bf16.msra.mxu1 %v16085_v0  ;;  %v6141_v0 = vld [vmem:[#allocation2 + $0xc5] sm:$0xff] }
 0x4de   : > { %16087 = vmatprep.subr.bf16.mxu1 %v23357_v41 }
 0x4e0   : > { %14885 = vmatmul.mubr.msk.f32.gmra.mrb[52].mxu1 %vm599_vm0, %v19872_v15  ;;  %v5826_v15 = vld [vmem:[#allocation2 + $0xc9] sm:$0xff] }
 0x4e1   : > { %14887 = vmatprep.mubr.msk.f32.mxu1 %vm17767_vm1, %v23355_v12 }
 0x4e4   : > { %14888 = vmatmul.mubr.msk.f32.gmra.mrb[54].mxu1 %vm599_vm0, %v19878_v4  ;;  %v6462_v4 = vld [vmem:[%s23310_s4 + $0x70] sm:$0xff] }
 0x4e5   : > { %14890 = vmatprep.mubr.msk.f32.mxu1 %vm17767_vm1, %v23355_v12 }
 0x4e8   : > { %14891 = vmatmul.mubr.msk.f32.gmra.mrb[56].mxu1 %vm599_vm0, %v19884_v13  ;;  %v6463_v13 = vld [vmem:[%s23310_s4 + $0x78] sm:$0xff] }
 0x4e9   : > { %14893 = vmatprep.mubr.msk.f32.mxu1 %vm17767_vm1, %v23355_v12 }
 0x4ec   : > { %14894 = vmatmul.mubr.msk.f32.gmra.mrb[58].mxu1 %vm599_vm0, %v19890_v61  ;;  %v5827_v61 = vld [vmem:[#allocation2 + $0xd1] sm:$0xf] }
 0x4ed   : > { %14896 = vmatprep.mubr.msk.f32.mxu1 %vm17767_vm1, %v23355_v12 }
 0x4f0   : > { %14897 = vmatmul.mubr.msk.f32.gmra.mrb[60].mxu1 %vm599_vm0, %v19896_v62  ;;  %v16088_v62 = vpack.c.bf16 %v6463_v13, %v6462_v4  ;;  %v6144_v4 = vld [vmem:[#allocation2 + $0xdd] sm:$0xf] }
 0x4f1   : > { %14899 = vmatprep.mubr.msk.f32.mxu1 %vm17767_vm1, %v23355_v12  ;;  %v6779_v13 = vld [vmem:[%s23310_s4 + $0x80] sm:$0xff] }
 0x4f4   : > { %14900 = vmatmul.mubr.msk.f32.gmra.mrb[62].mxu1 %vm599_vm0, %v19902_v8  ;;  %v6120_v8 = vld [vmem:[#allocation2 + $0x1d] sm:$0xff] }
 0x4f5   : > { %14902 = vmatprep.mubr.msk.f32.mxu1 %vm17767_vm1, %v23355_v12 }
 0x4f8   : > { %14903 = vmatmul.mubr.msk.f32.gmra.mrb[64].mxu1 %vm599_vm0, %v19908_v35  ;;  %v6121_v35 = vld [vmem:[#allocation2 + $0x25] sm:$0xff] }
 0x4f9   : > { %14905 = vmatprep.mubr.msk.f32.mxu1 %vm17767_vm1, %v23355_v12 }
 0x4fc   : > { %14906 = vmatmul.mubr.msk.f32.gmra.mrb[66].mxu1 %vm599_vm0, %v19914_v45  ;;  %v6122_v45 = vld [vmem:[#allocation2 + $0x2d] sm:$0xff] }
 0x4fd   : > { %14908 = vmatprep.mubr.msk.f32.mxu1 %vm17767_vm1, %v23355_v12 }
 0x500   : > { %14909 = vmatmul.mubr.msk.f32.gmra.mrb[68].mxu1 %vm599_vm0, %v19920_v37  ;;  %v6123_v37 = vld [vmem:[#allocation2 + $0x35] sm:$0xff] }
 0x501   : > { %14911 = vmatprep.mubr.msk.f32.mxu1 %vm17767_vm1, %v23355_v12 }
 0x504   : > { %14912 = vmatmul.mubr.msk.f32.gmra.mrb[70].mxu1 %vm599_vm0, %v19926_v5  ;;  %v6124_v5 = vld [vmem:[#allocation2 + $0x3d] sm:$0xff] }
 0x505   : > { %14914 = vmatprep.mubr.msk.f32.mxu1 %vm17767_vm1, %v23355_v12 }
 0x508   : > { %14915 = vmatmul.mubr.msk.f32.gmra.mrb[72].mxu1 %vm599_vm0, %v19932_v28  ;;  %v6125_v28 = vld [vmem:[#allocation2 + $0x45] sm:$0xff] }
 0x509   : > { %14917 = vmatprep.mubr.msk.f32.mxu1 %vm17767_vm1, %v23355_v12 }
 0x50c   : > { %14918 = vmatmul.mubr.msk.f32.gmra.mrb[74].mxu1 %vm599_vm0, %v19938_v26  ;;  %v6126_v26 = vld [vmem:[#allocation2 + $0x4d] sm:$0xff] }
 0x50d   : > { %14920 = vmatprep.mubr.msk.f32.mxu1 %vm17767_vm1, %v23355_v12 }
 0x510   : > { %14921 = vmatmul.mubr.msk.f32.gmra.mrb[76].mxu1 %vm599_vm0, %v19944_v63  ;;  %v6127_v63 = vld [vmem:[#allocation2 + $0x55] sm:$0xff] }
 0x511   : > { %14923 = vmatprep.mubr.msk.f32.mxu1 %vm17767_vm1, %v23355_v12 }
 0x514   : > { %14924 = vmatmul.mubr.msk.f32.gmra.mrb[78].mxu1 %vm599_vm0, %v19950_v1  ;;  %v6128_v1 = vld [vmem:[#allocation2 + $0x5d] sm:$0xff] }
 0x515   : > { %14926 = vmatprep.mubr.msk.f32.mxu1 %vm17767_vm1, %v23355_v12 }
 0x518   : > { %14927 = vmatmul.mubr.msk.f32.gmra.mrb[80].mxu1 %vm599_vm0, %v19956_v59  ;;  %v6129_v59 = vld [vmem:[#allocation2 + $0x65] sm:$0xff] }
 0x519   : > { %14929 = vmatprep.mubr.msk.f32.mxu1 %vm17767_vm1, %v23355_v12 }
 0x51c   : > { %14930 = vmatmul.mubr.msk.f32.gmra.mrb[82].mxu1 %vm599_vm0, %v19962_v11  ;;  %v6130_v11 = vld [vmem:[#allocation2 + $0x6d] sm:$0xff] }
 0x51d   : > { %14932 = vmatprep.mubr.msk.f32.mxu1 %vm17767_vm1, %v23355_v12 }
 0x520   : > { %14933 = vmatmul.mubr.msk.f32.gmra.mrb[84].mxu1 %vm599_vm0, %v19968_v40  ;;  %v6131_v40 = vld [vmem:[#allocation2 + $0x75] sm:$0xff] }
 0x521   : > { %14935 = vmatprep.mubr.msk.f32.mxu1 %vm17767_vm1, %v23355_v12 }
 0x524   : > { %14936 = vmatmul.mubr.msk.f32.gmra.mrb[86].mxu1 %vm599_vm0, %v19974_v16  ;;  %v6132_v16 = vld [vmem:[#allocation2 + $0x7d] sm:$0xff] }
 0x525   : > { %14938 = vmatprep.mubr.msk.f32.mxu1 %vm17767_vm1, %v23355_v12 }
 0x528   : > { %14939 = vmatmul.mubr.msk.f32.gmra.mrb[88].mxu1 %vm599_vm0, %v19980_v19  ;;  %v6133_v19 = vld [vmem:[#allocation2 + $0x85] sm:$0xff] }
 0x529   : > { %14941 = vmatprep.mubr.msk.f32.mxu1 %vm17767_vm1, %v23355_v12 }
 0x52c   : > { %14942 = vmatmul.mubr.msk.f32.gmra.mrb[90].mxu1 %vm599_vm0, %v19986_v42  ;;  %v6134_v42 = vld [vmem:[#allocation2 + $0x8d] sm:$0xff] }
 0x52d   : > { %14944 = vmatprep.mubr.msk.f32.mxu1 %vm17767_vm1, %v23355_v12 }
 0x530   : > { %14945 = vmatmul.mubr.msk.f32.gmra.mrb[92].mxu1 %vm599_vm0, %v19992_v24  ;;  %v6135_v24 = vld [vmem:[#allocation2 + $0x95] sm:$0xff] }
 0x531   : > { %14947 = vmatprep.mubr.msk.f32.mxu1 %vm17767_vm1, %v23355_v12 }
 0x534   : > { %14948 = vmatmul.mubr.msk.f32.gmra.mrb[94].mxu1 %vm599_vm0, %v5825_v44  ;;  %v6142_v44 = vld [vmem:[#allocation2 + $0xcd] sm:$0xff] }
 0x535   : > { %14950 = vmatprep.mubr.msk.f32.mxu1 %vm17767_vm1, %v23355_v12 }
 0x538   : > { %14951 = vmatmul.mubr.msk.f32.gmra.mrb[96].mxu1 %vm599_vm0, %v5826_v15  ;;  %v6143_v15 = vld [vmem:[#allocation2 + $0xd5] sm:$0xff] }
 0x539   : > { %14953 = vmatprep.mubr.msk.f32.mxu1 %vm17767_vm1, %v23355_v12 }
 0x53c   : > { %14954 = vmatmul.mubr.msk.f32.gmra.mrb[98].mxu1 %vm599_vm0, %v5827_v61  ;;  %v6780_v61 = vld [vmem:[%s23310_s4 + $0x88] sm:$0xff] }
 0x53d   : > { %14960 = vmatprep.mubr.msk.f32.mxu1 %vm17767_vm1, %v23355_v12 }
 0x540   : > { %14961 = vmatmul.mubr.msk.f32.vlgmr.msra.gmra.mrb[50].mxu1 %vm599_vm0, %v6120_v8  ;;  %v6437_v8 = vld [vmem:[#allocation2 + $0x1e] sm:$0xff] }
 0x541   : > { %14963 = vmatprep.mubr.msk.f32.mxu1 %vm17767_vm1, %v23355_v12  ;;  %16089 = vmatpush3.bf16.msra.mxu1 %v16088_v62  ;;  %v16091_v62 = vpack.c.bf16 %v6780_v61, %v6779_v13  ;;  %v6459_v13 = vld [vmem:[#allocation2 + $0xce] sm:$0xff]  ;;  %v6460_v61 = vld [vmem:[#allocation2 + $0xd6] sm:$0xff] }
 0x542   : > { %16090 = vmatprep.subr.bf16.mxu1 %v23357_v41 }
 0x544   : > { %14964 = vmatmul.mubr.msk.f32.gmra.mrb[52].mxu1 %vm599_vm0, %v6121_v35  ;;  %v6438_v35 = vld [vmem:[#allocation2 + $0x26] sm:$0xff] }
 0x545   : > { %14966 = vmatprep.mubr.msk.f32.mxu1 %vm17767_vm1, %v23355_v12 }
 0x548   : > { %14967 = vmatmul.mubr.msk.f32.gmra.mrb[54].mxu1 %vm599_vm0, %v6122_v45  ;;  %v6439_v45 = vld [vmem:[#allocation2 + $0x2e] sm:$0xff] }
 0x549   : > { %14969 = vmatprep.mubr.msk.f32.mxu1 %vm17767_vm1, %v23355_v12 }
 0x54c   : > { %14970 = vmatmul.mubr.msk.f32.gmra.mrb[56].mxu1 %vm599_vm0, %v6123_v37  ;;  %v6440_v37 = vld [vmem:[#allocation2 + $0x36] sm:$0xff] }
 0x54d   : > { %14972 = vmatprep.mubr.msk.f32.mxu1 %vm17767_vm1, %v23355_v12 }
 0x550   : > { %14973 = vmatmul.mubr.msk.f32.gmra.mrb[58].mxu1 %vm599_vm0, %v6124_v5  ;;  %v6441_v5 = vld [vmem:[#allocation2 + $0x3e] sm:$0xff] }
 0x551   : > { %14975 = vmatprep.mubr.msk.f32.mxu1 %vm17767_vm1, %v23355_v12 }
 0x554   : > { %14976 = vmatmul.mubr.msk.f32.gmra.mrb[60].mxu1 %vm599_vm0, %v6125_v28  ;;  %v6442_v28 = vld [vmem:[#allocation2 + $0x46] sm:$0xff] }
 0x555   : > { %14978 = vmatprep.mubr.msk.f32.mxu1 %vm17767_vm1, %v23355_v12 }
 0x558   : > { %14979 = vmatmul.mubr.msk.f32.gmra.mrb[62].mxu1 %vm599_vm0, %v6126_v26  ;;  %v6443_v26 = vld [vmem:[#allocation2 + $0x4e] sm:$0xff] }
 0x559   : > { %14981 = vmatprep.mubr.msk.f32.mxu1 %vm17767_vm1, %v23355_v12 }
 0x55c   : > { %14982 = vmatmul.mubr.msk.f32.gmra.mrb[64].mxu1 %vm599_vm0, %v6127_v63  ;;  %v6444_v63 = vld [vmem:[#allocation2 + $0x56] sm:$0xff] }
 0x55d   : > { %14984 = vmatprep.mubr.msk.f32.mxu1 %vm17767_vm1, %v23355_v12 }
 0x560   : > { %14985 = vmatmul.mubr.msk.f32.gmra.mrb[66].mxu1 %vm599_vm0, %v6128_v1  ;;  %v6445_v1 = vld [vmem:[#allocation2 + $0x5e] sm:$0xff] }
 0x561   : > { %14987 = vmatprep.mubr.msk.f32.mxu1 %vm17767_vm1, %v23355_v12 }
 0x564   : > { %14988 = vmatmul.mubr.msk.f32.gmra.mrb[68].mxu1 %vm599_vm0, %v6129_v59  ;;  %v6446_v59 = vld [vmem:[#allocation2 + $0x66] sm:$0xff] }
 0x565   : > { %14990 = vmatprep.mubr.msk.f32.mxu1 %vm17767_vm1, %v23355_v12 }
 0x568   : > { %14991 = vmatmul.mubr.msk.f32.gmra.mrb[70].mxu1 %vm599_vm0, %v6130_v11  ;;  %v6447_v11 = vld [vmem:[#allocation2 + $0x6e] sm:$0xff] }
 0x569   : > { %14993 = vmatprep.mubr.msk.f32.mxu1 %vm17767_vm1, %v23355_v12 }
 0x56c   : > { %14994 = vmatmul.mubr.msk.f32.gmra.mrb[72].mxu1 %vm599_vm0, %v6131_v40  ;;  %v6448_v40 = vld [vmem:[#allocation2 + $0x76] sm:$0xff] }
 0x56d   : > { %14996 = vmatprep.mubr.msk.f32.mxu1 %vm17767_vm1, %v23355_v12 }
 0x570   : > { %14997 = vmatmul.mubr.msk.f32.gmra.mrb[74].mxu1 %vm599_vm0, %v6132_v16  ;;  %v6449_v16 = vld [vmem:[#allocation2 + $0x7e] sm:$0xff] }
 0x571   : > { %14999 = vmatprep.mubr.msk.f32.mxu1 %vm17767_vm1, %v23355_v12 }
 0x574   : > { %15000 = vmatmul.mubr.msk.f32.gmra.mrb[76].mxu1 %vm599_vm0, %v6133_v19  ;;  %v6450_v19 = vld [vmem:[#allocation2 + $0x86] sm:$0xff] }
 0x575   : > { %15002 = vmatprep.mubr.msk.f32.mxu1 %vm17767_vm1, %v23355_v12 }
 0x578   : > { %15003 = vmatmul.mubr.msk.f32.gmra.mrb[78].mxu1 %vm599_vm0, %v6134_v42  ;;  %v6451_v42 = vld [vmem:[#allocation2 + $0x8e] sm:$0xff] }
 0x579   : > { %15005 = vmatprep.mubr.msk.f32.mxu1 %vm17767_vm1, %v23355_v12 }
 0x57c   : > { %15006 = vmatmul.mubr.msk.f32.gmra.mrb[80].mxu1 %vm599_vm0, %v6135_v24  ;;  %v6452_v24 = vld [vmem:[#allocation2 + $0x96] sm:$0xff] }
 0x57d   : > { %15008 = vmatprep.mubr.msk.f32.mxu1 %vm17767_vm1, %v23355_v12 }
 0x580   : > { %15009 = vmatmul.mubr.msk.f32.gmra.mrb[82].mxu1 %vm599_vm0, %v6136_v17  ;;  %v6453_v17 = vld [vmem:[#allocation2 + $0x9e] sm:$0xff] }
 0x581   : > { %15011 = vmatprep.mubr.msk.f32.mxu1 %vm17767_vm1, %v23355_v12 }
 0x584   : > { %15012 = vmatmul.mubr.msk.f32.gmra.mrb[84].mxu1 %vm599_vm0, %v6137_v51  ;;  %v6454_v51 = vld [vmem:[#allocation2 + $0xa6] sm:$0xff] }
 0x585   : > { %15014 = vmatprep.mubr.msk.f32.mxu1 %vm17767_vm1, %v23355_v12 }
 0x588   : > { %15015 = vmatmul.mubr.msk.f32.gmra.mrb[86].mxu1 %vm599_vm0, %v6138_v3  ;;  %v7920_v3 = vld [vmem:[%s23313_s7 + $0x20] sm:$0xff] }
 0x589   : > { %15017 = vmatprep.mubr.msk.f32.mxu1 %vm17767_vm1, %v23355_v12 }
 0x58c   : > { %15018 = vmatmul.mubr.msk.f32.gmra.mrb[88].mxu1 %vm599_vm0, %v6139_v36  ;;  %v7921_v36 = vld [vmem:[%s23313_s7 + $0x28] sm:$0xff] }
 0x58d   : > { %15020 = vmatprep.mubr.msk.f32.mxu1 %vm17767_vm1, %v23355_v12 }
 0x590   : > { %15021 = vmatmul.mubr.msk.f32.gmra.mrb[90].mxu1 %vm599_vm0, %v6140_v39  ;;  %v16094_v39 = vpack.c.bf16 %v7921_v36, %v7920_v3 }
 0x591   : > { %15023 = vmatprep.mubr.msk.f32.mxu1 %vm17767_vm1, %v23355_v12 }
 0x592   : > { %16095 = vmatpush3.bf16.msra.mxu0 %v16094_v39 }
 0x593   : > { %16096 = vmatprep.subr.bf16.mxu0 %v23357_v41 }
 0x594   : > { %15024 = vmatmul.mubr.msk.f32.gmra.mrb[92].mxu1 %vm599_vm0, %v6141_v0  ;;  %v6455_v0 = vld [vmem:[#allocation2 + $0xae] sm:$0xff] }
 0x595   : > { %15026 = vmatprep.mubr.msk.f32.mxu1 %vm17767_vm1, %v23355_v12 }
 0x598   : > { %15027 = vmatmul.mubr.msk.f32.gmra.mrb[94].mxu1 %vm599_vm0, %v6142_v44  ;;  %v6456_v44 = vld [vmem:[#allocation2 + $0xb6] sm:$0xff] }
 0x599   : > { %15029 = vmatprep.mubr.msk.f32.mxu1 %vm17767_vm1, %v23355_v12 }
 0x59c   : > { %15030 = vmatmul.mubr.msk.f32.gmra.mrb[96].mxu1 %vm599_vm0, %v6143_v15  ;;  %v6457_v15 = vld [vmem:[#allocation2 + $0xbe] sm:$0xff] }
 0x59d   : > { %15032 = vmatprep.mubr.msk.f32.mxu1 %vm17767_vm1, %v23355_v12 }
 0x5a0   : > { %15033 = vmatmul.mubr.msk.f32.gmra.mrb[98].mxu1 %vm599_vm0, %v6144_v4  ;;  %v6458_v4 = vld [vmem:[#allocation2 + $0xc6] sm:$0xff] }
 0x5a1   : > { %15039 = vmatprep.mubr.msk.f32.mxu1 %vm17767_vm1, %v23355_v12 }
 0x5a4   : > { %15040 = vmatmul.mubr.msk.f32.vlgmr.msra.gmra.mrb[50].mxu1 %vm599_vm0, %v6437_v8 }
 0x5a5   : > { %15042 = vmatprep.mubr.msk.f32.mxu1 %vm17767_vm1, %v23355_v12  ;;  %16092 = vmatpush3.bf16.msra.mxu1 %v16091_v62  ;;  %v6461_v62 = vld [vmem:[#allocation2 + $0xde] sm:$0xf] }
 0x5a6   : > { %16147 = vmatprep.subr.bf16.mxu1 %v23357_v41 }
 0x5a8   : > { %15043 = vmatmul.mubr.msk.f32.gmra.mrb[52].mxu1 %vm599_vm0, %v6438_v35 }
 0x5a9   : > { %15045 = vmatprep.mubr.msk.f32.mxu1 %vm17767_vm1, %v23355_v12 }
 0x5ac   : > { %15046 = vmatmul.mubr.msk.f32.gmra.mrb[54].mxu1 %vm599_vm0, %v6439_v45 }
 0x5ad   : > { %15048 = vmatprep.mubr.msk.f32.mxu1 %vm17767_vm1, %v23355_v12 }
 0x5b0   : > { %15049 = vmatmul.mubr.msk.f32.gmra.mrb[56].mxu1 %vm599_vm0, %v6440_v37 }
 0x5b1   : > { %15051 = vmatprep.mubr.msk.f32.mxu1 %vm17767_vm1, %v23355_v12 }
 0x5b4   : > { %15052 = vmatmul.mubr.msk.f32.gmra.mrb[58].mxu1 %vm599_vm0, %v6441_v5 }
 0x5b5   : > { %15054 = vmatprep.mubr.msk.f32.mxu1 %vm17767_vm1, %v23355_v12 }
 0x5b8   : > { %15055 = vmatmul.mubr.msk.f32.gmra.mrb[60].mxu1 %vm599_vm0, %v6442_v28 }
 0x5b9   : > { %15057 = vmatprep.mubr.msk.f32.mxu1 %vm17767_vm1, %v23355_v12 }
 0x5bc   : > { %15058 = vmatmul.mubr.msk.f32.gmra.mrb[62].mxu1 %vm599_vm0, %v6443_v26 }
 0x5bd   : > { %15060 = vmatprep.mubr.msk.f32.mxu1 %vm17767_vm1, %v23355_v12 }
 0x5c0   : > { %15061 = vmatmul.mubr.msk.f32.gmra.mrb[64].mxu1 %vm599_vm0, %v6444_v63 }
 0x5c1   : > { %15063 = vmatprep.mubr.msk.f32.mxu1 %vm17767_vm1, %v23355_v12 }
 0x5c4   : > { %15064 = vmatmul.mubr.msk.f32.gmra.mrb[66].mxu1 %vm599_vm0, %v6445_v1 }
 0x5c5   : > { %15066 = vmatprep.mubr.msk.f32.mxu1 %vm17767_vm1, %v23355_v12 }
 0x5c8   : > { %15067 = vmatmul.mubr.msk.f32.gmra.mrb[68].mxu1 %vm599_vm0, %v6446_v59 }
 0x5c9   : > { %15069 = vmatprep.mubr.msk.f32.mxu1 %vm17767_vm1, %v23355_v12 }
 0x5cc   : > { %15070 = vmatmul.mubr.msk.f32.gmra.mrb[70].mxu1 %vm599_vm0, %v6447_v11 }
 0x5cd   : > { %15072 = vmatprep.mubr.msk.f32.mxu1 %vm17767_vm1, %v23355_v12 }
 0x5d0   : > { %15073 = vmatmul.mubr.msk.f32.gmra.mrb[72].mxu1 %vm599_vm0, %v6448_v40 }
 0x5d1   : > { %15075 = vmatprep.mubr.msk.f32.mxu1 %vm17767_vm1, %v23355_v12 }
 0x5d4   : > { %15076 = vmatmul.mubr.msk.f32.gmra.mrb[74].mxu1 %vm599_vm0, %v6449_v16 }
 0x5d5   : > { %15078 = vmatprep.mubr.msk.f32.mxu1 %vm17767_vm1, %v23355_v12 }
 0x5d8   : > { %15079 = vmatmul.mubr.msk.f32.gmra.mrb[76].mxu1 %vm599_vm0, %v6450_v19 }
 0x5d9   : > { %15081 = vmatprep.mubr.msk.f32.mxu1 %vm17767_vm1, %v23355_v12 }
 0x5dc   : > { %15082 = vmatmul.mubr.msk.f32.gmra.mrb[78].mxu1 %vm599_vm0, %v6451_v42 }
 0x5dd   : > { %15084 = vmatprep.mubr.msk.f32.mxu1 %vm17767_vm1, %v23355_v12 }
 0x5e0   : > { %15085 = vmatmul.mubr.msk.f32.gmra.mrb[80].mxu1 %vm599_vm0, %v6452_v24 }
 0x5e1   : > { %15087 = vmatprep.mubr.msk.f32.mxu1 %vm17767_vm1, %v23355_v12 }
 0x5e4   : > { %15088 = vmatmul.mubr.msk.f32.gmra.mrb[82].mxu1 %vm599_vm0, %v6453_v17 }
 0x5e5   : > { %15090 = vmatprep.mubr.msk.f32.mxu1 %vm17767_vm1, %v23355_v12 }
 0x5e8   : > { %15091 = vmatmul.mubr.msk.f32.gmra.mrb[84].mxu1 %vm599_vm0, %v6454_v51 }
 0x5e9   : > { %15093 = vmatprep.mubr.msk.f32.mxu1 %vm17767_vm1, %v23355_v12 }
 0x5ec   : > { %15094 = vmatmul.mubr.msk.f32.gmra.mrb[86].mxu1 %vm599_vm0, %v6455_v0 }
 0x5ed   : > { %15096 = vmatprep.mubr.msk.f32.mxu1 %vm17767_vm1, %v23355_v12 }
 0x5f0   : > { %15097 = vmatmul.mubr.msk.f32.gmra.mrb[88].mxu1 %vm599_vm0, %v6456_v44 }
 0x5f1   : > { %15099 = vmatprep.mubr.msk.f32.mxu1 %vm17767_vm1, %v23355_v12 }
 0x5f4   : > { %15100 = vmatmul.mubr.msk.f32.gmra.mrb[90].mxu1 %vm599_vm0, %v6457_v15 }
 0x5f5   : > { %15102 = vmatprep.mubr.msk.f32.mxu1 %vm17767_vm1, %v23355_v12 }
 0x5f8   : > { %15103 = vmatmul.mubr.msk.f32.gmra.mrb[92].mxu1 %vm599_vm0, %v6458_v4 }
 0x5f9   : > { %15105 = vmatprep.mubr.msk.f32.mxu1 %vm17767_vm1, %v23355_v12 }
 0x5fc   : > { %15106 = vmatmul.mubr.msk.f32.gmra.mrb[94].mxu1 %vm599_vm0, %v6459_v13 }
 0x5fd   : > { %15108 = vmatprep.mubr.msk.f32.mxu1 %vm17767_vm1, %v23355_v12 }
 0x600   : > { %15109 = vmatmul.mubr.msk.f32.gmra.mrb[96].mxu1 %vm599_vm0, %v6460_v61 }
 0x601   : > { %15111 = vmatprep.mubr.msk.f32.mxu1 %vm17767_vm1, %v23355_v12 }
 0x604   : > { %15112 = vmatmul.mubr.msk.f32.gmra.mrb[98].mxu1 %vm599_vm0, %v6461_v62 }
 0x605   : > { %15118 = vmatprep.mubr.msk.f32.mxu1 %vm17767_vm1, %v23355_v12 }
 0x608   : > { %15119 = vmatmul.mubr.msk.f32.vlgmr.msra.gmra.mrb[50].mxu1 %vm599_vm0, %v20096_v18  ;;  %v7895_v18 = vld [vmem:[#allocation3 + $0x2] sm:$0xff] }
 0x609   : > { %15121 = vmatprep.mubr.msk.f32.mxu1 %vm17767_vm1, %v23355_v12 }
 0x60c   : > { %15122 = vmatmul.mubr.msk.f32.gmra.mrb[52].mxu1 %vm599_vm0, %v20102_v25  ;;  %v20752_v25 = vld [vmem:[%s23311_s5] ss:$0 sm:$0xff] }
 0x60d   : > { %15124 = vmatprep.mubr.msk.f32.mxu1 %vm17767_vm1, %v23355_v12 }
 0x610   : > { %15125 = vmatmul.mubr.msk.f32.gmra.mrb[54].mxu1 %vm599_vm0, %v20108_v14 }
 0x611   : > { %15127 = vmatprep.mubr.msk.f32.mxu1 %vm17767_vm1, %v23355_v12 }
 0x614   : > { %15128 = vmatmul.mubr.msk.f32.gmra.mrb[56].mxu1 %vm599_vm0, %v20114_v9  ;;  %v20757_v9 = vld [vmem:[%s23312_s6] ss:$0 sm:$0xff] }
 0x615   : > { %15130 = vmatprep.mubr.msk.f32.mxu1 %vm17767_vm1, %v23355_v12 }
 0x618   : > { %15131 = vmatmul.mubr.msk.f32.gmra.mrb[58].mxu1 %vm599_vm0, %v20120_v27 }
 0x619   : > { %15133 = vmatprep.mubr.msk.f32.mxu1 %vm17767_vm1, %v23355_v12 }
 0x61c   : > { %15134 = vmatmul.mubr.msk.f32.gmra.mrb[60].mxu1 %vm599_vm0, %v20126_v38 }
 0x61d   : > { %15136 = vmatprep.mubr.msk.f32.mxu1 %vm17767_vm1, %v23355_v12 }
 0x620   : > { %15137 = vmatmul.mubr.msk.f32.gmra.mrb[62].mxu1 %vm599_vm0, %v20132_v43 }
 0x621   : > { %15139 = vmatprep.mubr.msk.f32.mxu1 %vm17767_vm1, %v23355_v12 }
 0x624   : > { %15140 = vmatmul.mubr.msk.f32.gmra.mrb[64].mxu1 %vm599_vm0, %v20138_v7 }
 0x625   : > { %15142 = vmatprep.mubr.msk.f32.mxu1 %vm17767_vm1, %v23355_v12 }
 0x628   : > { %15143 = vmatmul.mubr.msk.f32.gmra.mrb[66].mxu1 %vm599_vm0, %v20144_v57 }
 0x629   : > { %15145 = vmatprep.mubr.msk.f32.mxu1 %vm17767_vm1, %v23355_v12 }
 0x62c   : > { %15146 = vmatmul.mubr.msk.f32.gmra.mrb[68].mxu1 %vm599_vm0, %v20150_v53 }
 0x62d   : > { %15148 = vmatprep.mubr.msk.f32.mxu1 %vm17767_vm1, %v23355_v12 }
 0x630   : > { %15149 = vmatmul.mubr.msk.f32.gmra.mrb[70].mxu1 %vm599_vm0, %v20156_v30 }
 0x631   : > { %15151 = vmatprep.mubr.msk.f32.mxu1 %vm17767_vm1, %v23355_v12 }
 0x634   : > { %15152 = vmatmul.mubr.msk.f32.gmra.mrb[72].mxu1 %vm599_vm0, %v20162_v60 }
 0x635   : > { %15154 = vmatprep.mubr.msk.f32.mxu1 %vm17767_vm1, %v23355_v12 }
 0x638   : > { %15155 = vmatmul.mubr.msk.f32.gmra.mrb[74].mxu1 %vm599_vm0, %v20168_v31 }
 0x639   : > { %15157 = vmatprep.mubr.msk.f32.mxu1 %vm17767_vm1, %v23355_v12 }
 0x63c   : > { %15158 = vmatmul.mubr.msk.f32.gmra.mrb[76].mxu1 %vm599_vm0, %v20174_v20 }
 0x63d   : > { %15160 = vmatprep.mubr.msk.f32.mxu1 %vm17767_vm1, %v23355_v12 }
 0x640   : > { %15161 = vmatmul.mubr.msk.f32.gmra.mrb[78].mxu1 %vm599_vm0, %v20180_v32 }
 0x641   : > { %15163 = vmatprep.mubr.msk.f32.mxu1 %vm17767_vm1, %v23355_v12 }
 0x644   : > { %15164 = vmatmul.mubr.msk.f32.gmra.mrb[80].mxu1 %vm599_vm0, %v20186_v2 }
 0x645   : > { %15166 = vmatprep.mubr.msk.f32.mxu1 %vm17767_vm1, %v23355_v12 }
 0x648   : > { %15167 = vmatmul.mubr.msk.f32.gmra.mrb[82].mxu1 %vm599_vm0, %v20192_v52 }
 0x649   : > { %15169 = vmatprep.mubr.msk.f32.mxu1 %vm17767_vm1, %v23355_v12 }
 0x64c   : > { %15170 = vmatmul.mubr.msk.f32.gmra.mrb[84].mxu1 %vm599_vm0, %v20198_v23  ;;  %v7923_v23 = vld [vmem:[%s23313_s7 + $0x38] sm:$0xff] }
 0x64d   : > { %15172 = vmatprep.mubr.msk.f32.mxu1 %vm17767_vm1, %v23355_v12 }
 0x650   : > { %15173 = vmatmul.mubr.msk.f32.gmra.mrb[86].mxu1 %vm599_vm0, %v20204_v22  ;;  %v6776_v22 = vld [vmem:[#allocation2 + $0xcf] sm:$0xff] }
 0x651   : > { %15175 = vmatprep.mubr.msk.f32.mxu1 %vm17767_vm1, %v23355_v12 }
 0x654   : > { %15176 = vmatmul.mubr.msk.f32.gmra.mrb[88].mxu1 %vm599_vm0, %v20210_v33  ;;  %v6777_v33 = vld [vmem:[#allocation2 + $0xd7] sm:$0xff] }
 0x655   : > { %15178 = vmatprep.mubr.msk.f32.mxu1 %vm17767_vm1, %v23355_v12 }
 0x658   : > { %15179 = vmatmul.mubr.msk.f32.gmra.mrb[90].mxu1 %vm599_vm0, %v20216_v29  ;;  %v6778_v29 = vld [vmem:[#allocation2 + $0xdf] sm:$0xf] }
 0x659   : > { %15181 = vmatprep.mubr.msk.f32.mxu1 %vm17767_vm1, %v23355_v12 }
 0x65c   : > { %15182 = vmatmul.mubr.msk.f32.gmra.mrb[92].mxu1 %vm599_vm0, %v20222_v56  ;;  %v7922_v56 = vld [vmem:[%s23313_s7 + $0x30] sm:$0xff] }
 0x65d   : > { %15184 = vmatprep.mubr.msk.f32.mxu1 %vm17767_vm1, %v23355_v12  ;;  %v16097_v52 = vpack.c.bf16 %v7923_v23, %v7922_v56 }
 0x65f   : > { %16098 = vmatpush3.bf16.msra.mxu0 %v16097_v52 }
 0x660   : > { %15185 = vmatmul.mubr.msk.f32.gmra.mrb[94].mxu1 %vm599_vm0, %v6776_v22  ;;  %16099 = vmatprep.subr.bf16.mxu0 %v23357_v41 }
 0x661   : > { %15187 = vmatprep.mubr.msk.f32.mxu1 %vm17767_vm1, %v23355_v12 }
 0x662   : > { %15202 = vmatmul.mubr.msk.f32.vlgmr.msra.gmra.mrb[50].mxu0 %vm7785_vm14, %v7895_v18 }
 0x663   : > { %15204 = vmatprep.mubr.msk.f32.mxu0 %vm17767_vm1, %v23355_v12 }
 0x664   : > { %15188 = vmatmul.mubr.msk.f32.gmra.mrb[96].mxu1 %vm599_vm0, %v6777_v33 }
 0x665   : > { %15190 = vmatprep.mubr.msk.f32.mxu1 %vm17767_vm1, %v23355_v12 }
 0x668   : > { %15191 = vmatmul.mubr.msk.f32.gmra.mrb[98].mxu1 %vm599_vm0, %v6778_v29 }
 0x6db   : > { %v6922_v14 = vpop.f32.mrb[50].mxu1 }
 0x6dc   : > { %v7078_v27 = vmul.f32 %v20752_v25, %v6922_v14  ;;  %v15120_v38 = vpop.f32.mrb[51].mxu1 }
 0x6de   : > { %v7110_v43 = vadd.f32 %v20757_v9, %v7078_v27 }
 0x6df   : > { %v6927_v7 = vpop.f32.mrb[52].mxu1 }
 0x6e0   : > { %v20761_v57 = vmul.f32 0.70710677, %v7110_v43  ;;  %v7079_v53 = vmul.f32 %v20752_v25, %v6927_v7  ;;  %v15123_v30 = vpop.f32.mrb[53].mxu1 }
 0x6e2   : > { %v7160_v60 = vand.u32 2147483647, %v20761_v57  ;;  %v20766_v31 = vadd.f32 %v20757_v9, %v7079_v53  ;;  %vm7635_vm0 = vcmp.ge.f32.partialorder %v20761_v57, 0.0 }
 0x6e3   : > { %v6932_v20 = vpop.f32.mrb[54].mxu1 }
 0x6e4   : > { %v7185_v32 = vmul.f32 0.3275911, %v7160_v60  ;;  %v20769_v2 = vmul.f32 0.70710677, %v20766_v31  ;;  %v7080_v8 = vmul.f32 %v20752_v25, %v6932_v20  ;;  %v15126_v35 = vpop.f32.mrb[55].mxu1  ;;  %v7485_v5 = vsub.f32 0.0, %v7160_v60 }
 0x6e5   : > { %v20806_v35 = vmul.f32 0.5, %v7110_v43 }
 0x6e6   : > { %v7210_v45 = vadd.f32 1.0, %v7185_v32  ;;  %v7161_v37 = vand.u32 2147483647, %v20769_v2  ;;  %v20774_v28 = vadd.f32 %v20757_v9, %v7080_v8  ;;  %v7510_v19 = vmul.f32 %v7485_v5, %v7160_v60 }
 0x6e7   : > { %v6937_v26 = vpop.f32.mrb[56].mxu1  ;;  %vm7636_vm15 = vcmp.ge.f32.partialorder %v20769_v2, 0.0 }
 0x6e8   : > { %17546 = vrcp.f32 %v7210_v45  ;;  %v7186_v63 = vmul.f32 0.3275911, %v7161_v37  ;;  %v7486_v1 = vsub.f32 0.0, %v7161_v37  ;;  %v15129_v59 = vpop.f32.mrb[57].mxu1  ;;  %v20777_v11 = vmul.f32 0.70710677, %v20774_v28 }
 0x6e9   : > { %v7081_v40 = vmul.f32 %v20752_v25, %v6937_v26  ;;  %v7535_v4 = vmul.f32 1.442695, %v7510_v19 }
 0x6ea   : > { %v7211_v16 = vadd.f32 1.0, %v7186_v63  ;;  %v7162_v42 = vand.u32 2147483647, %v20777_v11  ;;  %v7511_v51 = vmul.f32 %v7486_v1, %v7161_v37  ;;  %vm7637_vm2 = vcmp.ge.f32.partialorder %v20777_v11, 0.0 }
 0x6eb   : > { %v20782_v24 = vadd.f32 %v20757_v9, %v7081_v40  ;;  %v6942_v17 = vpop.f32.mrb[58].mxu1 }
 0x6ec   : > { %17548 = vrcp.f32 %v7211_v16  ;;  %v7082_v3 = vmul.f32 %v20752_v25, %v6942_v17  ;;  %v15132_v36 = vpop.f32.mrb[59].mxu1  ;;  %v7187_v39 = vmul.f32 0.3275911, %v7162_v42  ;;  %v7487_v44 = vsub.f32 0.0, %v7162_v42 }
 0x6ed   : > { %v20786_v0 = vmul.f32 0.70710677, %v20782_v24  ;;  %v7537_v22 = vmul.f32 1.442695, %v7511_v51  ;;  %v20818_v17 = vmul.f32 0.5, %v20766_v31 }
 0x6ee   : > { %v20789_v15 = vadd.f32 %v20757_v9, %v7082_v3  ;;  %v7212_v13 = vadd.f32 1.0, %v7187_v39  ;;  %v7512_v14 = vmul.f32 %v7487_v44, %v7162_v42 }
 0x6ef   : > { %v7163_v61 = vand.u32 2147483647, %v20786_v0  ;;  %v6947_v62 = vpop.f32.mrb[60].mxu1  ;;  %vm7638_vm3 = vcmp.ge.f32.partialorder %v20786_v0, 0.0 }
 0x6f0   : > { %v20793_v33 = vmul.f32 0.70710677, %v20789_v15  ;;  %v7083_v29 = vmul.f32 %v20752_v25, %v6947_v62  ;;  %v15135_v56 = vpop.f32.mrb[61].mxu1  ;;  %17550 = vrcp.f32 %v7212_v13  ;;  %v7539_v26 = vmul.f32 1.442695, %v7512_v14 }
 0x6f1   : > { %v7188_v23 = vmul.f32 0.3275911, %v7163_v61  ;;  %v7488_v52 = vsub.f32 0.0, %v7163_v61  ;;  %17552 = vpow2.f32 %v7535_v4 }
 0x6f2   : > { %v20796_v18 = vpop.eup %17546  ;;  %v7164_v27 = vand.u32 2147483647, %v20793_v33  ;;  %v20800_v38 = vadd.f32 %v20757_v9, %v7083_v29  ;;  %17554 = vpow2.f32 %v7537_v22  ;;  %vm7639_vm4 = vcmp.ge.f32.partialorder %v20793_v33, 0.0 }
 0x6f3   : > { %v7260_v7 = vmul.f32 1.0614054, %v20796_v18  ;;  %v7213_v53 = vadd.f32 1.0, %v7188_v23  ;;  %v7513_v30 = vmul.f32 %v7488_v52, %v7163_v61  ;;  %v6952_v60 = vpop.f32.mrb[62].mxu1  ;;  %v20825_v61 = vmul.f32 0.5, %v20774_v28 }
 0x6f4   : > { %v7189_v20 = vmul.f32 0.3275911, %v7164_v27  ;;  %v20804_v32 = vmul.f32 0.70710677, %v20800_v38  ;;  %v7084_v45 = vmul.f32 %v20752_v25, %v6952_v60  ;;  %v15138_v37 = vpop.f32.mrb[63].mxu1  ;;  %v7489_v1 = vsub.f32 0.0, %v7164_v27 }
 0x6f5   : > { %v7285_v8 = vadd.f32 -1.4531521, %v7260_v7  ;;  %17556 = vrcp.f32 %v7213_v53  ;;  %v7541_v19 = vmul.f32 1.442695, %v7513_v30  ;;  %v20834_v7 = vmul.f32 0.5, %v20782_v24 }
 0x6f6   : > { %v20809_v5 = vpop.eup %17548  ;;  %v7214_v63 = vadd.f32 1.0, %v7189_v20  ;;  %v7165_v59 = vand.u32 2147483647, %v20804_v32  ;;  %v20815_v42 = vadd.f32 %v20757_v9, %v7084_v45  ;;  %v7514_v62 = vmul.f32 %v7489_v1, %v7164_v27 }
 0x6f7   : > { %v7310_v40 = vmul.f32 %v20796_v18, %v7285_v8  ;;  %v7261_v16 = vmul.f32 1.0614054, %v20809_v5  ;;  %v6957_v43 = vpop.f32.mrb[64].mxu1  ;;  %vm7640_vm5 = vcmp.ge.f32.partialorder %v20804_v32, 0.0 }
 0x6f8   : > { %17558 = vrcp.f32 %v7214_v63  ;;  %v7190_v51 = vmul.f32 0.3275911, %v7165_v59  ;;  %v7490_v3 = vsub.f32 0.0, %v7165_v59  ;;  %v15141_v36 = vpop.f32.mrb[65].mxu1  ;;  %v20821_v4 = vmul.f32 0.70710677, %v20815_v42 }
 0x6f9   : > { %v7335_v39 = vadd.f32 1.4214138, %v7310_v40  ;;  %v7286_v44 = vadd.f32 -1.4531521, %v7261_v16  ;;  %v7085_v13 = vmul.f32 %v20752_v25, %v6957_v43  ;;  %17560 = vpow2.f32 %v7539_v26 }
 0x6fa   : > { %v7215_v22 = vadd.f32 1.0, %v7190_v51  ;;  %v20827_v29 = vpop.eup %17550  ;;  %17562 = vpow2.f32 %v7541_v19  ;;  %v7166_v23 = vand.u32 2147483647, %v20821_v4  ;;  %v7515_v20 = vmul.f32 %v7490_v3, %v7165_v59 }
 0x6fb   : > { %v7360_v31 = vmul.f32 %v20796_v18, %v7335_v39  ;;  %v7311_v56 = vmul.f32 %v20809_v5, %v7286_v44  ;;  %v6962_v52 = vpop.f32.mrb[66].mxu1  ;;  %v7262_v14 = vmul.f32 1.0614054, %v20827_v29  ;;  %v20837_v28 = vadd.f32 %v20757_v9, %v7085_v13  ;;  %v17553_v53 = vpop.eup %17552 }
 0x6fc   : > { %17564 = vrcp.f32 %v7215_v22  ;;  %v15144_v27 = vpop.f32.mrb[67].mxu1  ;;  %v7191_v8 = vmul.f32 0.3275911, %v7166_v23  ;;  %v17555_v45 = vpop.eup %17554  ;;  %v7491_v26 = vsub.f32 0.0, %v7166_v23  ;;  %v7086_v1 = vmul.f32 %v20752_v25, %v6962_v52 }
 0x6fd   : > { %v7385_v30 = vadd.f32 -0.28449672, %v7360_v31  ;;  %v7336_v60 = vadd.f32 1.4214138, %v7311_v56  ;;  %v7287_v37 = vadd.f32 -1.4531521, %v7262_v14 }
 0x6fe   : > { %v20840_v63 = vmul.f32 0.70710677, %v20837_v28  ;;  %v7543_v19 = vmul.f32 1.442695, %v7514_v62  ;;  %v7216_v43 = vadd.f32 1.0, %v7191_v8  ;;  %v7516_v36 = vmul.f32 %v7491_v26, %v7166_v23 }
 0x6ff   : > { %v20843_v24 = vpop.eup %17556  ;;  %v7410_v40 = vmul.f32 %v20796_v18, %v7385_v30  ;;  %v7361_v16 = vmul.f32 %v20809_v5, %v7336_v60  ;;  %v20847_v51 = vpop.f32.mrb[68].mxu1  ;;  %v7312_v59 = vmul.f32 %v20827_v29, %v7287_v37  ;;  %v20855_v31 = vmul.f32 0.5, %v20789_v15 }
 0x700   : > { %v7263_v3 = vmul.f32 1.0614054, %v20843_v24  ;;  %v20852_v39 = vand.u32 2147483647, %v20840_v63  ;;  %v15147_v44 = vpop.f32.mrb[69].mxu1  ;;  %17566 = vrcp.f32 %v7216_v43  ;;  %v20861_v27 = vadd.f32 %v20757_v9, %v7086_v1 }
 0x701   : > { %v7435_v13 = vadd.f32 0.2548296, %v7410_v40  ;;  %v7386_v22 = vadd.f32 -0.28449672, %v7361_v16  ;;  %v7337_v62 = vadd.f32 1.4214138, %v7312_v59  ;;  %17568 = vpow2.f32 %v7543_v19 }
 0x702   : > { %v20857_v56 = vpop.eup %17558  ;;  %v7288_v52 = vadd.f32 -1.4531521, %v7263_v3  ;;  %v7545_v14 = vmul.f32 1.442695, %v7515_v20  ;;  %v7192_v15 = vmul.f32 0.3275911, %v20852_v39 }
 0x703   : > { %v7460_v23 = vmul.f32 %v20796_v18, %v7435_v13  ;;  %v7411_v30 = vmul.f32 %v20809_v5, %v7386_v22  ;;  %v7264_v60 = vmul.f32 1.0614054, %v20857_v56  ;;  %v20867_v8 = vpop.f32.mrb[70].mxu1  ;;  %v17561_v37 = vpop.eup %17560  ;;  %v7362_v26 = vmul.f32 %v20827_v29, %v7337_v62 }
 0x704   : > { %v7313_v40 = vmul.f32 %v20843_v24, %v7288_v52  ;;  %v7547_v20 = vmul.f32 1.442695, %v7516_v36  ;;  %v15150_v16 = vpop.f32.mrb[71].mxu1  ;;  %v20871_v1 = vpop.eup %17562  ;;  %v7217_v3 = vadd.f32 1.0, %v7192_v15  ;;  %17570 = vpow2.f32 %v7545_v14 }
 0x705   : > { %v7585_v43 = vmul.f32 %v17553_v53, %v7460_v23  ;;  %v7436_v18 = vadd.f32 0.2548296, %v7411_v30  ;;  %v7289_v59 = vadd.f32 -1.4531521, %v7264_v60  ;;  %v7387_v13 = vadd.f32 -0.28449672, %v7362_v26 }
 0x706   : > { %v20873_v44 = vpop.eup %17564  ;;  %v7338_v22 = vadd.f32 1.4214138, %v7313_v40  ;;  %v20877_v62 = vmul.f32 0.70710677, %v20861_v27  ;;  %17572 = vrcp.f32 %v7217_v3  ;;  %v7492_v15 = vsub.f32 0.0, %v20852_v39 }
 0x707   : > { %v7610_v52 = vsub.f32 1.0, %v7585_v43  ;;  %v7461_v19 = vmul.f32 %v20809_v5, %v7436_v18  ;;  %v7314_v36 = vmul.f32 %v20857_v56, %v7289_v59  ;;  %v7265_v53 = vmul.f32 1.0614054, %v20873_v44  ;;  %v20882_v23 = vpop.f32.mrb[72].mxu1 }
 0x708   : > { %v7412_v30 = vmul.f32 %v20827_v29, %v7387_v13  ;;  %v7363_v60 = vmul.f32 %v20843_v24, %v7338_v22  ;;  %v15153_v14 = vpop.f32.mrb[73].mxu1  ;;  %17574 = vpow2.f32 %v7547_v20  ;;  %v20888_v18 = vand.u32 2147483647, %v20877_v62 }
 0x709   : > { %v7660_v26 = vsub.f32 0.0, %v7610_v52  ;;  %v7586_v40 = vmul.f32 %v17555_v45, %v7461_v19  ;;  %v7339_v16 = vadd.f32 1.4214138, %v7314_v36  ;;  %v7290_v43 = vadd.f32 -1.4531521, %v7265_v53 }
 0x70a   : > { %v7437_v55 = vadd.f32 0.2548296, %v7412_v30  ;;  %v7388_v5 = vadd.f32 -0.28449672, %v7363_v60  ;;  %v20890_v59 = vpop.eup %17566  ;;  %v7088_v0 = vmul.f32 %v20752_v25, %v20867_v8  ;;  %vm7641_vm6 = vcmp.ge.f32.partialorder %v20821_v4, 0.0 }
 0x70b   : > { %v7685_v13 = vsel %vm7635_vm0, %v7610_v52, %v7660_v26  ;;  %v7611_v22 = vsub.f32 1.0, %v7586_v40  ;;  %v7364_v3 = vmul.f32 %v20857_v56, %v7339_v16  ;;  %v7315_v45 = vmul.f32 %v20873_v44, %v7290_v43  ;;  %v20897_v19 = vpop.f32.mrb[74].mxu1  ;;  %v17569_v40 = vpop.eup %17568 }
 0x70c   : > { %v7735_v36 = vadd.f32 1.0, %v7685_v13  ;;  %v7462_v20 = vmul.f32 %v20827_v29, %v7437_v55  ;;  %v7413_v53 = vmul.f32 %v20843_v24, %v7388_v5  ;;  %v7266_v30 = vmul.f32 1.0614054, %v20890_v59  ;;  %v15156_v60 = vpop.f32.mrb[75].mxu1 }
 0x70d   : > { %v7661_v14 = vsub.f32 0.0, %v7611_v22  ;;  %v7389_v57 = vadd.f32 -0.28449672, %v7364_v3  ;;  %v7340_v52 = vadd.f32 1.4214138, %v7315_v45  ;;  %v7517_v26 = vmul.f32 %v7492_v15, %v20852_v39 }
 0x70e   : > { %v7760_v16 = vmul.f32 %v7735_v36, %v20806_v35  ;;  %v7587_v41 = vmul.f32 %v17561_v37, %v7462_v20  ;;  %v7438_v43 = vadd.f32 0.2548296, %v7413_v53  ;;  %v7291_v50 = vadd.f32 -1.4531521, %v7266_v30  ;;  %v17571_v39 = vpop.eup %17570 }
 0x70f   : > { %v7686_v13 = vsel %vm7636_vm15, %v7611_v22, %v7661_v14  ;;  %v7414_v55 = vmul.f32 %v20857_v56, %v7389_v57  ;;  %v7365_v29 = vmul.f32 %v20873_v44, %v7340_v52  ;;  %v7193_v5 = vmul.f32 0.3275911, %v20888_v18  ;;  %v20910_v3 = vpop.f32.mrb[76].mxu1 }
 0x710   : > { %v7816_v15 = vmul.f32 %v7760_v16, %v19220_v34  ;;  %v7736_v35 = vadd.f32 1.0, %v7686_v13  ;;  %v7612_v37 = vsub.f32 1.0, %v7587_v41  ;;  %v7463_v45 = vmul.f32 %v20843_v24, %v7438_v43  ;;  %v15159_v36 = vpop.f32.mrb[77].mxu1  ;;  %v20915_v30 = vpop.eup %17572 }
 0x711   : > { %v7439_v2 = vadd.f32 0.2548296, %v7414_v55  ;;  %v7390_v22 = vadd.f32 -0.28449672, %v7365_v29  ;;  %v7316_v20 = vmul.f32 %v20890_v59, %v7291_v50  ;;  %v7218_v53 = vadd.f32 1.0, %v7193_v5 }
 0x712   : > { %7841 = vst.msk [vmem:[#allocation3 + $0x10] sm:$0xff] %vm7785_vm14, %v7816_v15  ;;  %v7761_v60 = vmul.f32 %v7736_v35, %v20818_v17  ;;  %v7662_v14 = vsub.f32 0.0, %v7612_v37  ;;  %v7588_v57 = vmul.f32 %v20871_v1, %v7463_v45  ;;  %v7549_v34 = vmul.f32 1.442695, %v7517_v26  ;;  %v20925_v50 = vpop.eup %17574 }
 0x713   : > { %v7464_v41 = vmul.f32 %v20857_v56, %v7439_v2  ;;  %v7415_v24 = vmul.f32 %v20873_v44, %v7390_v22  ;;  %v7341_v52 = vadd.f32 1.4214138, %v7316_v20  ;;  %v7267_v16 = vmul.f32 1.0614054, %v20915_v30  ;;  %v20923_v43 = vpop.f32.mrb[78].mxu1 }
 0x714   : > { %v7817_v13 = vmul.f32 %v7761_v60, %v19244_v54  ;;  %v7687_v17 = vsel %vm7637_vm2, %v7612_v37, %v7662_v14  ;;  %v7613_v55 = vsub.f32 1.0, %v7588_v57  ;;  %17576 = vrcp.f32 %v7218_v53  ;;  %v15162_v1 = vpop.f32.mrb[79].mxu1 }
 0x715   : > { %v7737_v26 = vadd.f32 1.0, %v7687_v17  ;;  %v7589_v29 = vmul.f32 %v17569_v40, %v7464_v41  ;;  %v7440_v56 = vadd.f32 0.2548296, %v7415_v24  ;;  %v7366_v5 = vmul.f32 %v20890_v59, %v7341_v52 }
 0x716   : > { %7842 = vst.msk [vmem:[#allocation3 + $0x18] sm:$0xff] %vm7785_vm14, %v7817_v13  ;;  %v7663_v15 = vsub.f32 0.0, %v7613_v55  ;;  %v7292_v35 = vadd.f32 -1.4531521, %v7267_v16  ;;  %v7493_v45 = vsub.f32 0.0, %v20888_v18  ;;  %17578 = vpow2.f32 %v7549_v34 }
 0x717   : > { %v7762_v54 = vmul.f32 %v7737_v26, %v20825_v61  ;;  %v7614_v11 = vsub.f32 1.0, %v7589_v29  ;;  %v7465_v37 = vmul.f32 %v20873_v44, %v7440_v56  ;;  %v7391_v36 = vadd.f32 -0.28449672, %v7366_v5  ;;  %v20936_v2 = vpop.f32.mrb[80].mxu1 }
 0x718   : > { %v7688_v40 = vsel %vm7638_vm3, %v7613_v55, %v7663_v15  ;;  %v7317_v22 = vmul.f32 %v20915_v30, %v7292_v35  ;;  %v15165_v20 = vpop.f32.mrb[81].mxu1  ;;  %v7087_v24 = vmul.f32 %v20752_v25, %v20847_v51  ;;  %v7518_v52 = vmul.f32 %v7493_v45, %v20888_v18 }
 0x719   : > { %v7818_v53 = vmul.f32 %v7762_v54, %v19257_v58  ;;  %v7738_v60 = vadd.f32 1.0, %v7688_v40  ;;  %v7664_v14 = vsub.f32 0.0, %v7614_v11  ;;  %v7590_v61 = vmul.f32 %v17571_v39, %v7465_v37  ;;  %v7896_v57 = vld [vmem:[#allocation3 + $0xa] sm:$0xff] }
 0x71a   : > { %v7416_v44 = vmul.f32 %v20890_v59, %v7391_v36  ;;  %v7342_v41 = vadd.f32 1.4214138, %v7317_v22  ;;  %15205 = vmatmul.mubr.msk.f32.gmra.mrb[52].mxu0 %vm7785_vm14, %v7896_v57  ;;  %v20960_v17 = vadd.f32 %v20757_v9, %v7087_v24  ;;  %v20964_v1 = vadd.f32 %v20757_v9, %v7088_v0 }
 0x71b   : > { %7843 = vst.msk [vmem:[#allocation3 + $0x20] sm:$0xff] %vm7785_vm14, %v7818_v53  ;;  %v7763_v34 = vmul.f32 %v7738_v60, %v20834_v7  ;;  %v7689_v58 = vsel %vm7639_vm4, %v7614_v11, %v7664_v14  ;;  %v7615_v39 = vsub.f32 1.0, %v7590_v61  ;;  %v20954_v16 = vpop.f32.mrb[82].mxu1  ;;  %15207 = vmatprep.mubr.msk.f32.mxu0 %vm17767_vm1, %v23355_v12  ;;  %v7089_v18 = vmul.f32 %v20752_v25, %v20882_v23 }
 0x71c   : > { %v7739_v51 = vadd.f32 1.0, %v7689_v58  ;;  %v7441_v13 = vadd.f32 0.2548296, %v7416_v44  ;;  %v7367_v8 = vmul.f32 %v20915_v30, %v7342_v41  ;;  %v15168_v55 = vpop.f32.mrb[83].mxu1  ;;  %v20973_v35 = vmul.f32 0.70710677, %v20960_v17 }
 0x71d   : > { %v7819_v7 = vmul.f32 %v7763_v34, %v19279_v6  ;;  %v7665_v33 = vsub.f32 0.0, %v7615_v39  ;;  %v7897_v26 = vld [vmem:[#allocation3 + $0x12] sm:$0xff]  ;;  %v7715_v23 = vmul.f32 0.5, %v20800_v38  ;;  %v20982_v54 = vmul.f32 0.70710677, %v20964_v1 }
 0x71e   : > { %v20968_v29 = vpop.eup %17576  ;;  %v7764_v56 = vmul.f32 %v7739_v51, %v20855_v31  ;;  %v7466_v5 = vmul.f32 %v20890_v59, %v7441_v13  ;;  %v7392_v15 = vadd.f32 -0.28449672, %v7367_v8  ;;  %15208 = vmatmul.mubr.msk.f32.gmra.mrb[54].mxu0 %vm7785_vm14, %v7897_v26  ;;  %v7551_v38 = vmul.f32 1.442695, %v7518_v52 }
 0x71f   : > { %7844 = vst.msk [vmem:[#allocation3 + $0x28] sm:$0xff] %vm7785_vm14, %v7819_v7  ;;  %v7690_v6 = vsel %vm7640_vm5, %v7615_v39, %v7665_v33  ;;  %v7268_v45 = vmul.f32 1.0614054, %v20968_v29  ;;  %v20984_v31 = vpop.f32.mrb[84].mxu1  ;;  %15210 = vmatprep.mubr.msk.f32.mxu0 %vm17767_vm1, %v23355_v12  ;;  %v20993_v20 = vadd.f32 %v20757_v9, %v7089_v18  ;;  %vm7642_vm7 = vcmp.ge.f32.partialorder %v20840_v63, 0.0 }
 0x720   : > { %v7820_v59 = vmul.f32 %v7764_v56, %v19295_v46  ;;  %v7740_v11 = vadd.f32 1.0, %v7690_v6  ;;  %v7591_v37 = vmul.f32 %v20925_v50, %v7466_v5  ;;  %v7417_v32 = vmul.f32 %v20915_v30, %v7392_v15  ;;  %v15171_v36 = vpop.f32.mrb[85].mxu1  ;;  %v17579_v53 = vpop.eup %17578 }
 0x721   : > { %v7293_v40 = vadd.f32 -1.4531521, %v7268_v45  ;;  %v7169_v22 = vand.u32 2147483647, %v20973_v35  ;;  %v7170_v46 = vand.u32 2147483647, %v20982_v54  ;;  %17580 = vpow2.f32 %v7551_v38 }
 0x722   : > { %7845 = vst.msk [vmem:[#allocation3 + $0x30] sm:$0xff] %vm7785_vm14, %v7820_v59  ;;  %v7765_v60 = vmul.f32 %v7740_v11, %v7715_v23  ;;  %v7616_v14 = vsub.f32 1.0, %v7591_v37  ;;  %v7442_v61 = vadd.f32 0.2548296, %v7417_v32  ;;  %v7898_v57 = vld [vmem:[#allocation3 + $0x1a] sm:$0xff]  ;;  %v7716_v50 = vmul.f32 0.5, %v20815_v42 }
 0x723   : > { %v7318_v44 = vmul.f32 %v20968_v29, %v7293_v40  ;;  %v7194_v41 = vmul.f32 0.3275911, %v7169_v22  ;;  %15211 = vmatmul.mubr.msk.f32.gmra.mrb[56].mxu0 %vm7785_vm14, %v7898_v57  ;;  %v21000_v24 = vpop.f32.mrb[86].mxu1  ;;  %v7195_v39 = vmul.f32 0.3275911, %v7170_v46  ;;  %v7494_v18 = vsub.f32 0.0, %v7169_v22 }
 0x724   : > { %v7821_v0 = vmul.f32 %v7765_v60, %v19339_v47  ;;  %v7666_v34 = vsub.f32 0.0, %v7616_v14  ;;  %v7467_v58 = vmul.f32 %v20915_v30, %v7442_v61  ;;  %v15174_v52 = vpop.f32.mrb[87].mxu1  ;;  %15213 = vmatprep.mubr.msk.f32.mxu0 %vm17767_vm1, %v23355_v12  ;;  %v21009_v47 = vmul.f32 0.70710677, %v20993_v20 }
 0x725   : > { %v7343_v42 = vadd.f32 1.4214138, %v7318_v44  ;;  %v7219_v51 = vadd.f32 1.0, %v7194_v41  ;;  %v7220_v55 = vadd.f32 1.0, %v7195_v39  ;;  %v7495_v56 = vsub.f32 0.0, %v7170_v46  ;;  %v23379_v52 = vld [vmem:[#allocation12_spill] sm:$0xff] }
 0x726   : > { %7846 = vst.msk [vmem:[#allocation3 + $0x38] sm:$0xff] %vm7785_vm14, %v7821_v0  ;;  %v7691_v13 = vsel %vm7641_vm6, %v7616_v14, %v7666_v34  ;;  %v7592_v8 = vmul.f32 %v17579_v53, %v7467_v58  ;;  %v7899_v7 = vld [vmem:[#allocation3 + $0x22] sm:$0xff]  ;;  %v21016_v5 = vand.u32 2147483647, %v21009_v47  ;;  %v7519_v36 = vmul.f32 %v7494_v18, %v7169_v22 }
 0x727   : > { %v7741_v30 = vadd.f32 1.0, %v7691_v13  ;;  %v7368_v33 = vmul.f32 %v20968_v29, %v7343_v42  ;;  %17582 = vrcp.f32 %v7219_v51  ;;  %15214 = vmatmul.mubr.msk.f32.gmra.mrb[58].mxu0 %vm7785_vm14, %v7899_v7  ;;  %v21013_v4 = vpop.f32.mrb[88].mxu1  ;;  %v7090_v40 = vmul.f32 %v20752_v25, %v20897_v19 }
 0x728   : > { %v7617_v26 = vsub.f32 1.0, %v7592_v8  ;;  %17584 = vrcp.f32 %v7220_v55  ;;  %v15177_v15 = vpop.f32.mrb[89].mxu1  ;;  %15216 = vmatprep.mubr.msk.f32.mxu0 %vm17767_vm1, %v23355_v12  ;;  %v7196_v11 = vmul.f32 0.3275911, %v21016_v5  ;;  %v7717_v60 = vmul.f32 0.5, %v20837_v28 }
 0x729   : > { %v7766_v6 = vmul.f32 %v7741_v30, %v7716_v50  ;;  %v7393_v23 = vadd.f32 -0.28449672, %v7368_v33  ;;  %v7900_v45 = vld [vmem:[#allocation3 + $0x2a] sm:$0xff]  ;;  %v7520_v14 = vmul.f32 %v7495_v56, %v7170_v46  ;;  %v21034_v57 = vadd.f32 %v20757_v9, %v7090_v40 }
 0x72a   : > { %v7667_v59 = vsub.f32 0.0, %v7617_v26  ;;  %v7221_v63 = vadd.f32 1.0, %v7196_v11  ;;  %v7091_v19 = vmul.f32 %v20752_v25, %v20910_v3  ;;  %v7092_v28 = vmul.f32 %v20752_v25, %v20923_v43 }
 0x72b   : > { %v7822_v37 = vmul.f32 %v7766_v6, %v19347_v48  ;;  %v7418_v32 = vmul.f32 %v20968_v29, %v7393_v23  ;;  %15217 = vmatmul.mubr.msk.f32.gmra.mrb[60].mxu0 %vm7785_vm14, %v7900_v45  ;;  %v21027_v38 = vpop.f32.mrb[90].mxu1  ;;  %v17581_v46 = vpop.eup %17580  ;;  %v7553_v0 = vmul.f32 1.442695, %v7519_v36  ;;  %v21042_v34 = vmul.f32 0.70710677, %v21034_v57 }
 0x72c   : > { %v7692_v53 = vsel %vm7642_vm7, %v7617_v26, %v7667_v59  ;;  %v15180_v61 = vpop.f32.mrb[91].mxu1  ;;  %15219 = vmatprep.mubr.msk.f32.mxu0 %vm17767_vm1, %v23355_v12  ;;  %17586 = vrcp.f32 %v7221_v63  ;;  %vm7643_vm8 = vcmp.ge.f32.partialorder %v20877_v62, 0.0  ;;  %v7718_v3 = vmul.f32 0.5, %v20861_v27 }
 0x72d   : > { %7847 = vst.msk [vmem:[#allocation3 + $0x40] sm:$0xff] %vm7785_vm14, %v7822_v37  ;;  %v7742_v48 = vadd.f32 1.0, %v7692_v53  ;;  %v7443_v22 = vadd.f32 0.2548296, %v7418_v32  ;;  %v7901_v50 = vld [vmem:[#allocation3 + $0x32] sm:$0xff]  ;;  %v21050_v39 = vadd.f32 %v20757_v9, %v7091_v19  ;;  %v21062_v27 = vmul.f32 0.5, %v20960_v17 }
 0x72e   : > { %v7555_v13 = vmul.f32 1.442695, %v7520_v14  ;;  %v7172_v8 = vand.u32 2147483647, %v21042_v34  ;;  %v21068_v33 = vadd.f32 %v20757_v9, %v7092_v28  ;;  %17588 = vpow2.f32 %v7553_v0 }
 0x72f   : > { %v7767_v44 = vmul.f32 %v7742_v48, %v7717_v60  ;;  %v7468_v41 = vmul.f32 %v20968_v29, %v7443_v22  ;;  %15220 = vmatmul.mubr.msk.f32.gmra.mrb[62].mxu0 %vm7785_vm14, %v7901_v50  ;;  %v21045_v58 = vpop.f32.mrb[92].mxu1  ;;  %v21065_v30 = vmul.f32 0.70710677, %v21050_v39  ;;  %v7496_v6 = vsub.f32 0.0, %v21016_v5 }
 0x730   : > { %v15183_v43 = vpop.f32.mrb[93].mxu1  ;;  %15222 = vmatprep.mubr.msk.f32.mxu0 %vm17767_vm1, %v23355_v12  ;;  %v7197_v56 = vmul.f32 0.3275911, %v7172_v8  ;;  %v7497_v23 = vsub.f32 0.0, %v7172_v8  ;;  %17590 = vpow2.f32 %v7555_v13  ;;  %v21078_v53 = vmul.f32 0.70710677, %v21068_v33 }
 0x731   : > { %v21054_v29 = vpop.eup %17582  ;;  %v7823_v42 = vmul.f32 %v7767_v44, %v23379_v52  ;;  %v7593_v51 = vmul.f32 %v17581_v46, %v7468_v41  ;;  %v7173_v17 = vand.u32 2147483647, %v21065_v30  ;;  %v7093_v60 = vmul.f32 %v20752_v25, %v20936_v2 }
 0x732   : > { %v21058_v55 = vpop.eup %17584  ;;  %v7269_v7 = vmul.f32 1.0614054, %v21054_v29  ;;  %v7222_v11 = vadd.f32 1.0, %v7197_v56  ;;  %v21087_v48 = vmul.f32 0.5, %v20964_v1  ;;  %v7521_v28 = vmul.f32 %v7496_v6, %v21016_v5 }
 0x733   : > { %7848 = vst.msk [vmem:[#allocation3 + $0x48] sm:$0xff] %vm7785_vm14, %v7823_v42  ;;  %v7618_v18 = vsub.f32 1.0, %v7593_v51  ;;  %v7270_v26 = vmul.f32 1.0614054, %v21058_v55  ;;  %v21074_v32 = vpop.f32.mrb[94].mxu1  ;;  %v7522_v0 = vmul.f32 %v7497_v23, %v7172_v8  ;;  %v21100_v42 = vadd.f32 %v20757_v9, %v7093_v60 }
 0x734   : > { %v7294_v15 = vadd.f32 -1.4531521, %v7269_v7  ;;  %v7902_v37 = vld [vmem:[#allocation3 + $0x3a] sm:$0xff]  ;;  %v7198_v40 = vmul.f32 0.3275911, %v7173_v17  ;;  %v15186_v14 = vpop.f32.mrb[95].mxu1  ;;  %17592 = vrcp.f32 %v7222_v11 }
 0x735   : > { %v7668_v45 = vsub.f32 0.0, %v7618_v18  ;;  %v7295_v59 = vadd.f32 -1.4531521, %v7270_v26  ;;  %15223 = vmatmul.mubr.msk.f32.gmra.mrb[64].mxu0 %vm7785_vm14, %v7902_v37  ;;  %v7174_v1 = vand.u32 2147483647, %v21078_v53  ;;  %v7498_v5 = vsub.f32 0.0, %v7173_v17 }
 0x736   : > { %v7319_v36 = vmul.f32 %v21054_v29, %v7294_v15  ;;  %15225 = vmatprep.mubr.msk.f32.mxu0 %vm17767_vm1, %v23355_v12  ;;  %v21093_v19 = vpop.eup %17586  ;;  %v7223_v46 = vadd.f32 1.0, %v7198_v40  ;;  %v21108_v15 = vmul.f32 0.5, %v20993_v20  ;;  %v7559_v11 = vmul.f32 1.442695, %v7522_v0 }
 0x737   : > { %v7693_v63 = vsel %vm7643_vm8, %v7618_v18, %v7668_v45  ;;  %v7320_v61 = vmul.f32 %v21058_v55, %v7295_v59  ;;  %v21091_v22 = vpop.f32.mrb[96].mxu1  ;;  %v7271_v41 = vmul.f32 1.0614054, %v21093_v19  ;;  %v7199_v18 = vmul.f32 0.3275911, %v7174_v1 }
 0x738   : > { %v7743_v2 = vadd.f32 1.0, %v7693_v63  ;;  %v7344_v50 = vadd.f32 1.4214138, %v7319_v36  ;;  %v15189_v62 = vpop.f32.mrb[97].mxu1  ;;  %17594 = vrcp.f32 %v7223_v46  ;;  %v17589_v23 = vpop.eup %17588  ;;  %v21116_v40 = vmul.f32 0.70710677, %v21100_v42 }
 0x739   : > { %v7345_v44 = vadd.f32 1.4214138, %v7320_v61  ;;  %v7296_v7 = vadd.f32 -1.4531521, %v7271_v41  ;;  %v7224_v37 = vadd.f32 1.0, %v7199_v18  ;;  %v7094_v20 = vmul.f32 %v20752_v25, %v20954_v16 }
 0x73a   : > { %v7768_v43 = vmul.f32 %v7743_v2, %v7718_v3  ;;  %v7369_v52 = vmul.f32 %v21054_v29, %v7344_v50  ;;  %v7903_v51 = vld [vmem:[#allocation3 + $0x42] sm:$0xff]  ;;  %v7557_v3 = vmul.f32 1.442695, %v7521_v28  ;;  %v17591_v60 = vpop.eup %17590  ;;  %v7523_v61 = vmul.f32 %v7498_v5, %v7173_v17 }
 0x73b   : > { %v7370_v13 = vmul.f32 %v21058_v55, %v7345_v44  ;;  %15226 = vmatmul.mubr.msk.f32.gmra.mrb[66].mxu0 %vm7785_vm14, %v7903_v51  ;;  %v21104_v26 = vpop.f32.mrb[98].mxu1  ;;  %v7321_v59 = vmul.f32 %v21093_v19, %v7296_v7  ;;  %17596 = vrcp.f32 %v7224_v37  ;;  %v21122_v50 = vand.u32 2147483647, %v21116_v40 }
 0x73c   : > { %v7824_v8 = vmul.f32 %v7768_v43, %v19446_v49  ;;  %v7394_v56 = vadd.f32 -0.28449672, %v7369_v52  ;;  %15228 = vmatprep.mubr.msk.f32.mxu0 %vm17767_vm1, %v23355_v12  ;;  %v15192_v6 = vpop.f32.mrb[99].mxu1  ;;  %v7499_v49 = vsub.f32 0.0, %v7174_v1  ;;  %17598 = vpow2.f32 %v7557_v3 }
 0x73d   : > { %v7395_v45 = vadd.f32 -0.28449672, %v7370_v13  ;;  %v7346_v63 = vadd.f32 1.4214138, %v7321_v59  ;;  %v21125_v28 = vadd.f32 %v20757_v9, %v7094_v20  ;;  %vm7644_vm9 = vcmp.ge.f32.partialorder %v20973_v35, 0.0 }
 0x73e   : > { %7849 = vst.msk [vmem:[#allocation3 + $0x50] sm:$0xff] %vm7785_vm14, %v7824_v8  ;;  %v7419_v36 = vmul.f32 %v21054_v29, %v7394_v56  ;;  %v21127_v46 = vpop.eup %17592  ;;  %17600 = vpow2.f32 %v7559_v11  ;;  %v21132_v44 = vmul.f32 0.5, %v21034_v57  ;;  %vm7645_vm10 = vcmp.ge.f32.partialorder %v20982_v54, 0.0 }
 0x73f   : > { %v7420_v14 = vmul.f32 %v21058_v55, %v7395_v45  ;;  %v7371_v16 = vmul.f32 %v21093_v19, %v7346_v63  ;;  %v7272_v41 = vmul.f32 1.0614054, %v21127_v46  ;;  %v7524_v0 = vmul.f32 %v7499_v49, %v7174_v1 }
 0x740   : > { %v7444_v2 = vadd.f32 0.2548296, %v7419_v36  ;;  %v7200_v43 = vmul.f32 0.3275911, %v21122_v50  ;;  %v7561_v13 = vmul.f32 1.442695, %v7523_v61 }
 0x741   : > { %v7445_v62 = vadd.f32 0.2548296, %v7420_v14  ;;  %v7396_v51 = vadd.f32 -0.28449672, %v7371_v16  ;;  %v21140_v7 = vmul.f32 0.70710677, %v21125_v28 }
 0x742   : > { %v7469_v17 = vmul.f32 %v21054_v29, %v7444_v2  ;;  %v21142_v5 = vpop.eup %17594  ;;  %v7297_v18 = vadd.f32 -1.4531521, %v7272_v41  ;;  %v7225_v8 = vadd.f32 1.0, %v7200_v43  ;;  %v7095_v29 = vmul.f32 %v20752_v25, %v20984_v31 }
 0x743   : > { %v7470_v52 = vmul.f32 %v21058_v55, %v7445_v62  ;;  %v7421_v1 = vmul.f32 %v21093_v19, %v7396_v51  ;;  %v7273_v3 = vmul.f32 1.0614054, %v21142_v5  ;;  %v21149_v55 = vand.u32 2147483647, %v21140_v7 }
 0x744   : > { %v7594_v57 = vmul.f32 %v17589_v23, %v7469_v17  ;;  %v7322_v59 = vmul.f32 %v21127_v46, %v7297_v18  ;;  %v7563_v11 = vmul.f32 1.442695, %v7524_v0  ;;  %17602 = vrcp.f32 %v7225_v8 }
 0x745   : > { %v7595_v56 = vmul.f32 %v17591_v60, %v7470_v52  ;;  %v7904_v6 = vld [vmem:[#allocation3 + $0x4a] sm:$0xff]  ;;  %v7446_v37 = vadd.f32 0.2548296, %v7421_v1  ;;  %v7298_v36 = vadd.f32 -1.4531521, %v7273_v3  ;;  %17604 = vpow2.f32 %v7561_v13  ;;  %v21160_v60 = vpop.eup %17596 }
 0x746   : > { %v7619_v45 = vsub.f32 1.0, %v7594_v57  ;;  %15229 = vmatmul.mubr.msk.f32.gmra.mrb[68].mxu0 %vm7785_vm14, %v7904_v6  ;;  %vm7646_vm11 = vcmp.ge.f32.partialorder %v21009_v47, 0.0  ;;  %v7347_v31 = vadd.f32 1.4214138, %v7322_v59  ;;  %v7201_v49 = vmul.f32 0.3275911, %v21149_v55  ;;  %v17599_v62 = vpop.eup %17598 }
 0x747   : > { %v7620_v23 = vsub.f32 1.0, %v7595_v56  ;;  %15231 = vmatprep.mubr.msk.f32.mxu0 %vm17767_vm1, %v23355_v12  ;;  %v21158_v20 = vadd.f32 %v20757_v9, %v7095_v29  ;;  %v7471_v63 = vmul.f32 %v21093_v19, %v7446_v37  ;;  %v7323_v61 = vmul.f32 %v21142_v5, %v7298_v36 }
 0x748   : > { %v7669_v25 = vsub.f32 0.0, %v7619_v45  ;;  %v7500_v2 = vsub.f32 0.0, %v21122_v50  ;;  %v7372_v17 = vmul.f32 %v21127_v46, %v7347_v31  ;;  %v7274_v41 = vmul.f32 1.0614054, %v21160_v60  ;;  %v17601_v9 = vpop.eup %17600 }
 0x749   : > { %v7670_v14 = vsub.f32 0.0, %v7620_v23  ;;  %v7226_v0 = vadd.f32 1.0, %v7201_v49  ;;  %v7596_v51 = vmul.f32 %v17599_v62, %v7471_v63  ;;  %v7348_v19 = vadd.f32 1.4214138, %v7323_v61 }
 0x74a   : > { %v7694_v16 = vsel %vm7644_vm9, %v7619_v45, %v7669_v25  ;;  %v7397_v57 = vadd.f32 -0.28449672, %v7372_v17  ;;  %v7299_v18 = vadd.f32 -1.4531521, %v7274_v41  ;;  %v7525_v56 = vmul.f32 %v7500_v2, %v21122_v50  ;;  %v7892_v50 = vld [vmem:[%s23313_s7 + $0x8] sm:$0xff] }
 0x74b   : > { %v7744_v43 = vadd.f32 1.0, %v7694_v16  ;;  %v7695_v52 = vsel %vm7645_vm10, %v7620_v23, %v7670_v14  ;;  %17606 = vrcp.f32 %v7226_v0  ;;  %v7621_v35 = vsub.f32 1.0, %v7596_v51 }
 0x74c   : > { %v7745_v13 = vadd.f32 1.0, %v7695_v52  ;;  %v7373_v29 = vmul.f32 %v21142_v5, %v7348_v19  ;;  %v7422_v3 = vmul.f32 %v21127_v46, %v7397_v57  ;;  %v7324_v54 = vmul.f32 %v21160_v60, %v7299_v18 }
 0x74d   : > { %v7769_v8 = vmul.f32 %v7744_v43, %v21062_v27  ;;  %17608 = vpow2.f32 %v7563_v11  ;;  %v7671_v45 = vsub.f32 0.0, %v7621_v35  ;;  %v7501_v23 = vsub.f32 0.0, %v21149_v55  ;;  %v7891_v27 = vld [vmem:[%s23313_s7] sm:$0xff] }
 0x74e   : > { %v7770_v1 = vmul.f32 %v7745_v13, %v21087_v48  ;;  %v7398_v59 = vadd.f32 -0.28449672, %v7373_v29  ;;  %v21185_v48 = vpop.eup %17602  ;;  %v7447_v36 = vadd.f32 0.2548296, %v7422_v3  ;;  %v7349_v11 = vadd.f32 1.4214138, %v7324_v54 }
 0x74f   : > { %v7825_v6 = vmul.f32 %v7769_v8, %v19519_v21  ;;  %v21189_v21 = vmul.f32 0.70710677, %v21158_v20  ;;  %v17605_v25 = vpop.eup %17604  ;;  %v7696_v31 = vsel %vm7646_vm11, %v7621_v35, %v7671_v45  ;;  %vm7647_vm12 = vcmp.ge.f32.partialorder %v21042_v34, 0.0  ;;  %v21211_v13 = vld [vmem:[%s23311_s5] ss:$0 sm:$0xff] }
 0x750   : > { %v7826_v37 = vmul.f32 %v7770_v1, %v19531_v10  ;;  %v7423_v49 = vmul.f32 %v21142_v5, %v7398_v59  ;;  %v7275_v14 = vmul.f32 1.0614054, %v21185_v48  ;;  %v7565_v63 = vmul.f32 1.442695, %v7525_v56  ;;  %v21225_v45 = vld [vmem:[%s23312_s6] ss:$0 sm:$0xff] }
 0x751   : > { %7850 = vst.msk [vmem:[#allocation3 + $0x58] sm:$0xff] %vm7785_vm14, %v7825_v6  ;;  %v7746_v10 = vadd.f32 1.0, %v7696_v31  ;;  %v7472_v61 = vmul.f32 %v21127_v46, %v7447_v36  ;;  %v7374_v2 = vmul.f32 %v21160_v60, %v7349_v11  ;;  %v21201_v62 = vand.u32 2147483647, %v21189_v21 }
 0x752   : > { %7851 = vst.msk [vmem:[#allocation3 + $0x60] sm:$0xff] %vm7785_vm14, %v7826_v37  ;;  %v7448_v16 = vadd.f32 0.2548296, %v7423_v49  ;;  %v7300_v47 = vadd.f32 -1.4531521, %v7275_v14  ;;  %v7526_v17 = vmul.f32 %v7501_v23, %v21149_v55  ;;  %v16100_v41 = vpack.c.bf16 %v7892_v50, %v7891_v27 }
 0x753   : > { %v7771_v0 = vmul.f32 %v7746_v10, %v21108_v15  ;;  %v7597_v43 = vmul.f32 %v17601_v9, %v7472_v61  ;;  %v7399_v52 = vadd.f32 -0.28449672, %v7374_v2  ;;  %v7202_v51 = vmul.f32 0.3275911, %v21201_v62  ;;  %v23380_v15 = vld [vmem:[#allocation5_spill] sm:$0xff] }
 0x754   : > { %v7473_v19 = vmul.f32 %v21142_v5, %v7448_v16  ;;  %v7325_v46 = vmul.f32 %v21185_v48, %v7300_v47  ;;  %17610 = vpow2.f32 %v7565_v63  ;;  %16101 = vmatpush3.bf16.msra.mxu0 %v16100_v41  ;;  %v7096_v55 = vmul.f32 %v21211_v13, %v21000_v24 }
 0x755   : > { %v21215_v57 = vpop.eup %17606  ;;  %v7827_v9 = vmul.f32 %v7771_v0, %v23380_v15  ;;  %v7622_v18 = vsub.f32 1.0, %v7597_v43  ;;  %v7424_v8 = vmul.f32 %v21160_v60, %v7399_v52  ;;  %v7227_v5 = vadd.f32 1.0, %v7202_v51  ;;  %v23382_v52 = vld [vmem:[#allocation6_spill] sm:$0xff] }
 0x756   : > { %v23381_v35 = vmov 0.0|0.0   ;;  %v7598_v29 = vmul.f32 %v17605_v25, %v7473_v19  ;;  %v7350_v56 = vadd.f32 1.4214138, %v7325_v46  ;;  %v7276_v1 = vmul.f32 1.0614054, %v21215_v57 }
 0x757   : > { %16102 = vmatprep.subr.bf16.mxu0 %v23381_v35  ;;  %v7567_v3 = vmul.f32 1.442695, %v7526_v17  ;;  %v17609_v54 = vpop.eup %17608  ;;  %7852 = vst.msk [vmem:[#allocation3 + $0x68] sm:$0xff] %vm7785_vm14, %v7827_v9  ;;  %v7672_v6 = vsub.f32 0.0, %v7622_v18  ;;  %v7449_v24 = vadd.f32 0.2548296, %v7424_v8  ;;  %17612 = vrcp.f32 %v7227_v5 }
 0x758   : > { %v21228_v59 = vadd.f32 %v21225_v45, %v7096_v55  ;;  %v7905_v23 = vld [vmem:[#allocation3 + $0x52] sm:$0xff]  ;;  %v7623_v27 = vsub.f32 1.0, %v7598_v29  ;;  %v7723_v50 = vmul.f32 0.5, %v21050_v39  ;;  %v7375_v37 = vmul.f32 %v21185_v48, %v7350_v56 }
 0x759   : > { %v7301_v36 = vadd.f32 -1.4531521, %v7276_v1  ;;  %15232 = vmatmul.mubr.msk.f32.gmra.mrb[70].mxu0 %vm7785_vm14, %v7905_v23  ;;  %v7697_v11 = vsel %vm7647_vm12, %v7622_v18, %v7672_v6  ;;  %v7474_v25 = vmul.f32 %v21160_v60, %v7449_v24  ;;  %v7724_v31 = vmul.f32 0.5, %v21068_v33  ;;  %v7906_v14 = vld [vmem:[#allocation3 + $0x5a] sm:$0xff] }
 0x75a   : > { %v21238_v49 = vmul.f32 0.70710677, %v21228_v59  ;;  %15234 = vmatprep.mubr.msk.f32.mxu0 %vm17767_vm1, %v23355_v12  ;;  %v7747_v39 = vadd.f32 1.0, %v7697_v11  ;;  %v7673_v63 = vsub.f32 0.0, %v7623_v27  ;;  %v7400_v10 = vadd.f32 -0.28449672, %v7375_v37 }
 0x75b   : > { %v7326_v61 = vmul.f32 %v21215_v57, %v7301_v36  ;;  %vm7648_vm13 = vcmp.ge.f32.partialorder %v21065_v30, 0.0  ;;  %v7599_v34 = vmul.f32 %v17609_v54, %v7474_v25  ;;  %17614 = vpow2.f32 %v7567_v3  ;;  %v23383_v1 = vld [vmem:[#allocation7_spill] sm:$0xff] }
 0x75c   : > { %v21245_v60 = vand.u32 2147483647, %v21238_v49  ;;  %v7772_v33 = vmul.f32 %v7747_v39, %v21132_v44  ;;  %v7698_v2 = vsel %vm7648_vm13, %v7623_v27, %v7673_v63  ;;  %v7425_v16 = vmul.f32 %v21185_v48, %v7400_v10  ;;  %v23384_v10 = vld [vmem:[#allocation13_spill] sm:$0xff] }
 0x75d   : > { %v7351_v47 = vadd.f32 1.4214138, %v7326_v61  ;;  %15235 = vmatmul.mubr.msk.f32.gmra.mrb[72].mxu0 %vm7785_vm14, %v7906_v14  ;;  %v7748_v17 = vadd.f32 1.0, %v7698_v2  ;;  %v7624_v41 = vsub.f32 1.0, %v7599_v34  ;;  %v7502_v0 = vsub.f32 0.0, %v21201_v62 }
 0x75e   : > { %v7203_v43 = vmul.f32 0.3275911, %v21245_v60  ;;  %15237 = vmatprep.mubr.msk.f32.mxu0 %vm17767_vm1, %v23355_v12  ;;  %v17611_v30 = vpop.eup %17610  ;;  %v7828_v51 = vmul.f32 %v7772_v33, %v23382_v52  ;;  %v7450_v19 = vadd.f32 0.2548296, %v7425_v16  ;;  %v7097_v46 = vmul.f32 %v21211_v13, %v21013_v4  ;;  %v7907_v55 = vld [vmem:[#allocation3 + $0x62] sm:$0xff] }
 0x75f   : > { %v7376_v44 = vmul.f32 %v21215_v57, %v7351_v47  ;;  %v7773_v15 = vmul.f32 %v7748_v17, %v7723_v50  ;;  %vm7649_vm0 = vcmp.ge.f32.partialorder %v21078_v53, 0.0  ;;  %v7674_v9 = vsub.f32 0.0, %v7624_v41 }
 0x760   : > { %v7228_v18 = vadd.f32 1.0, %v7203_v43  ;;  %7853 = vst.msk [vmem:[#allocation3 + $0x70] sm:$0xff] %vm7785_vm14, %v7828_v51  ;;  %v7475_v8 = vmul.f32 %v21185_v48, %v7450_v19  ;;  %v21262_v29 = vadd.f32 %v21225_v45, %v7097_v46  ;;  %v7098_v56 = vmul.f32 %v21211_v13, %v21027_v38 }
 0x761   : > { %v7401_v5 = vadd.f32 -0.28449672, %v7376_v44  ;;  %15238 = vmatmul.mubr.msk.f32.gmra.mrb[74].mxu0 %vm7785_vm14, %v7907_v55  ;;  %v21267_v4 = vpop.eup %17612  ;;  %v7829_v3 = vmul.f32 %v7773_v15, %v23383_v1  ;;  %v7699_v53 = vsel %vm7649_vm0, %v7624_v41, %v7674_v9  ;;  %v7527_v54 = vmul.f32 %v7502_v0, %v21201_v62 }
 0x762   : > { %17616 = vrcp.f32 %v7228_v18  ;;  %15240 = vmatprep.mubr.msk.f32.mxu0 %vm17767_vm1, %v23355_v12  ;;  %v7749_v48 = vadd.f32 1.0, %v7699_v53  ;;  %v7600_v6 = vmul.f32 %v17611_v30, %v7475_v8  ;;  %v7277_v23 = vmul.f32 1.0614054, %v21267_v4 }
 0x763   : > { %v7426_v24 = vmul.f32 %v21215_v57, %v7401_v5  ;;  %7854 = vst.msk [vmem:[#allocation3 + $0x78] sm:$0xff] %vm7785_vm14, %v7829_v3  ;;  %v7725_v38 = vmul.f32 0.5, %v21100_v42  ;;  %v21278_v27 = vmul.f32 0.70710677, %v21262_v29  ;;  %v21281_v50 = vadd.f32 %v21225_v45, %v7098_v56  ;;  %v23385_v5 = vld [vmem:[#allocation8_spill] sm:$0xff] }
 0x764   : > { %v7774_v62 = vmul.f32 %v7749_v48, %v7724_v31  ;;  %v7625_v37 = vsub.f32 1.0, %v7600_v6  ;;  %v7302_v11 = vadd.f32 -1.4531521, %v7277_v23  ;;  %v7569_v14 = vmul.f32 1.442695, %v7527_v54 }
 0x765   : > { %v7451_v36 = vadd.f32 0.2548296, %v7426_v24  ;;  %v17615_v25 = vpop.eup %17614  ;;  %v7179_v39 = vand.u32 2147483647, %v21278_v27  ;;  %v21285_v63 = vmul.f32 0.70710677, %v21281_v50  ;;  %v7099_v0 = vmul.f32 %v21211_v13, %v21045_v58 }
 0x766   : > { %v7830_v61 = vmul.f32 %v7774_v62, %v23384_v10  ;;  %v7675_v42 = vsub.f32 0.0, %v7625_v37  ;;  %v7327_v33 = vmul.f32 %v21267_v4, %v7302_v11  ;;  %vm7650_vm15 = vcmp.ge.f32.partialorder %v21116_v40, 0.0 }
 0x767   : > { %v7476_v34 = vmul.f32 %v21215_v57, %v7451_v36  ;;  %v7503_v31 = vsub.f32 0.0, %v21245_v60  ;;  %v7204_v2 = vmul.f32 0.3275911, %v7179_v39  ;;  %v21293_v16 = vand.u32 2147483647, %v21285_v63  ;;  %v7908_v43 = vld [vmem:[#allocation3 + $0x6a] sm:$0xff] }
 0x768   : > { %7855 = vst.msk [vmem:[#allocation3 + $0x80] sm:$0xff] %vm7785_vm14, %v7830_v61  ;;  %v7700_v47 = vsel %vm7650_vm15, %v7625_v37, %v7675_v42  ;;  %v7352_v41 = vadd.f32 1.4214138, %v7327_v33  ;;  %17618 = vpow2.f32 %v7569_v14  ;;  %15241 = vmatmul.mubr.msk.f32.gmra.mrb[76].mxu0 %vm7785_vm14, %v7908_v43  ;;  %v21302_v19 = vadd.f32 %v21225_v45, %v7099_v0 }
 0x769   : > { %v7601_v17 = vmul.f32 %v17615_v25, %v7476_v34  ;;  %v7750_v57 = vadd.f32 1.0, %v7700_v47  ;;  %v7229_v30 = vadd.f32 1.0, %v7204_v2  ;;  %v7205_v40 = vmul.f32 0.3275911, %v21293_v16  ;;  %15243 = vmatprep.mubr.msk.f32.mxu0 %vm17767_vm1, %v23355_v12 }
 0x76a   : > { %v7377_v51 = vmul.f32 %v21267_v4, %v7352_v41  ;;  %v7909_v44 = vld [vmem:[#allocation3 + $0x72] sm:$0xff]  ;;  %v7528_v55 = vmul.f32 %v7503_v31, %v21245_v60  ;;  %vm7651_vm2 = vcmp.ge.f32.partialorder %v21140_v7, 0.0  ;;  %v7504_v1 = vsub.f32 0.0, %v7179_v39 }
 0x76b   : > { %v7626_v52 = vsub.f32 1.0, %v7601_v17  ;;  %v7775_v58 = vmul.f32 %v7750_v57, %v7725_v38  ;;  %17620 = vrcp.f32 %v7229_v30  ;;  %v7230_v15 = vadd.f32 1.0, %v7205_v40 }
 0x76c   : > { %v21306_v46 = vpop.eup %17616  ;;  %v7402_v18 = vadd.f32 -0.28449672, %v7377_v51  ;;  %v21313_v3 = vmul.f32 0.70710677, %v21302_v19  ;;  %15244 = vmatmul.mubr.msk.f32.gmra.mrb[78].mxu0 %vm7785_vm14, %v7909_v44  ;;  %v7726_v48 = vmul.f32 0.5, %v21125_v28  ;;  %v7100_v62 = vmul.f32 %v21211_v13, %v21074_v32 }
 0x76d   : > { %v7676_v9 = vsub.f32 0.0, %v7626_v52  ;;  %v7278_v8 = vmul.f32 1.0614054, %v21306_v46  ;;  %v7831_v56 = vmul.f32 %v7775_v58, %v23385_v5  ;;  %17622 = vrcp.f32 %v7230_v15  ;;  %15246 = vmatprep.mubr.msk.f32.mxu0 %vm17767_vm1, %v23355_v12 }
 0x76e   : > { %v7427_v54 = vmul.f32 %v21267_v4, %v7402_v18  ;;  %v7571_v7 = vmul.f32 1.442695, %v7528_v55  ;;  %v21322_v24 = vand.u32 2147483647, %v21313_v3  ;;  %v7101_v37 = vmul.f32 %v21211_v13, %v21091_v22  ;;  %v23386_v22 = vld [vmem:[#allocation9_spill] sm:$0xff] }
 0x76f   : > { %v7701_v53 = vsel %vm7651_vm2, %v7626_v52, %v7676_v9  ;;  %v7303_v60 = vadd.f32 -1.4531521, %v7278_v8  ;;  %7856 = vst.msk [vmem:[#allocation3 + $0x88] sm:$0xff] %vm7785_vm14, %v7831_v56  ;;  %v7910_v36 = vld [vmem:[#allocation3 + $0x7a] sm:$0xff]  ;;  %v7529_v25 = vmul.f32 %v7504_v1, %v7179_v39  ;;  %v21333_v61 = vadd.f32 %v21225_v45, %v7100_v62 }
 0x770   : > { %v7751_v6 = vadd.f32 1.0, %v7701_v53  ;;  %v7452_v23 = vadd.f32 0.2548296, %v7427_v54  ;;  %v7206_v14 = vmul.f32 0.3275911, %v21322_v24  ;;  %15247 = vmatmul.mubr.msk.f32.gmra.mrb[80].mxu0 %vm7785_vm14, %v7910_v36  ;;  %v21336_v42 = vadd.f32 %v21225_v45, %v7101_v37 }
 0x771   : > { %v7328_v38 = vmul.f32 %v21306_v46, %v7303_v60  ;;  %15249 = vmatprep.mubr.msk.f32.mxu0 %vm17767_vm1, %v23355_v12  ;;  %17624 = vpow2.f32 %v7571_v7  ;;  %v21344_v2 = vmul.f32 0.70710677, %v21333_v61  ;;  %v7573_v17 = vmul.f32 1.442695, %v7529_v25 }
 0x772   : > { %v7776_v11 = vmul.f32 %v7751_v6, %v7726_v48  ;;  %v7477_v28 = vmul.f32 %v21267_v4, %v7452_v23  ;;  %v17619_v32 = vpop.eup %17618  ;;  %v7231_v39 = vadd.f32 1.0, %v7206_v14  ;;  %v7505_v4 = vsub.f32 0.0, %v21293_v16 }
 0x773   : > { %v7353_v10 = vadd.f32 1.4214138, %v7328_v38  ;;  %v21350_v41 = vmul.f32 0.70710677, %v21336_v42  ;;  %v7727_v43 = vmul.f32 0.5, %v21158_v20  ;;  %vm7652_vm3 = vcmp.ge.f32.partialorder %v21189_v21, 0.0 }
 0x774   : > { %v7832_v34 = vmul.f32 %v7776_v11, %v23386_v22  ;;  %v7602_v33 = vmul.f32 %v17619_v32, %v7477_v28  ;;  %17626 = vrcp.f32 %v7231_v39  ;;  %v21356_v40 = vand.u32 2147483647, %v21344_v2  ;;  %v7894_v39 = vld [vmem:[%s23313_s7 + $0x18] sm:$0xff] }
 0x775   : > { %v7378_v31 = vmul.f32 %v21306_v46, %v7353_v10  ;;  %v21346_v47 = vpop.eup %17620  ;;  %v21359_v52 = vand.u32 2147483647, %v21350_v41  ;;  %v7102_v51 = vmul.f32 %v21211_v13, %v21104_v26  ;;  %v7530_v9 = vmul.f32 %v7505_v4, %v21293_v16 }
 0x776   : > { %7857 = vst.msk [vmem:[#allocation3 + $0x90] sm:$0xff] %vm7785_vm14, %v7832_v34  ;;  %v7627_v0 = vsub.f32 1.0, %v7602_v33  ;;  %v7279_v30 = vmul.f32 1.0614054, %v21346_v47  ;;  %v7911_v44 = vld [vmem:[#allocation3 + $0x82] sm:$0xff]  ;;  %17628 = vpow2.f32 %v7573_v17  ;;  %v7506_v8 = vsub.f32 0.0, %v21322_v24 }
 0x777   : > { %v7403_v57 = vadd.f32 -0.28449672, %v7378_v31  ;;  %v21363_v58 = vpop.eup %17622  ;;  %15250 = vmatmul.mubr.msk.f32.gmra.mrb[82].mxu0 %vm7785_vm14, %v7911_v44  ;;  %v7207_v5 = vmul.f32 0.3275911, %v21356_v40  ;;  %v7208_v16 = vmul.f32 0.3275911, %v21359_v52  ;;  %v21378_v60 = vadd.f32 %v21225_v45, %v7102_v51 }
 0x778   : > { %v7677_v55 = vsub.f32 0.0, %v7627_v0  ;;  %v7304_v15 = vadd.f32 -1.4531521, %v7279_v30  ;;  %v7280_v18 = vmul.f32 1.0614054, %v21363_v58  ;;  %15252 = vmatprep.mubr.msk.f32.mxu0 %vm17767_vm1, %v23355_v12  ;;  %v7531_v36 = vmul.f32 %v7506_v8, %v21322_v24  ;;  %v7893_v24 = vld [vmem:[%s23313_s7 + $0x10] sm:$0xff] }
 0x779   : > { %v7428_v20 = vmul.f32 %v21306_v46, %v7403_v57  ;;  %v7232_v54 = vadd.f32 1.0, %v7207_v5  ;;  %v7575_v7 = vmul.f32 1.442695, %v7530_v9  ;;  %v7233_v23 = vadd.f32 1.0, %v7208_v16 }
 0x77a   : > { %v7702_v26 = vsel %vm7652_vm3, %v7627_v0, %v7677_v55  ;;  %v7329_v56 = vmul.f32 %v21346_v47, %v7304_v15  ;;  %v7305_v53 = vadd.f32 -1.4531521, %v7280_v18  ;;  %v21391_v10 = vmul.f32 0.70710677, %v21378_v60 }
 0x77b   : > { %v7453_v13 = vadd.f32 0.2548296, %v7428_v20  ;;  %v7752_v1 = vadd.f32 1.0, %v7702_v26  ;;  %v17625_v62 = vpop.eup %17624  ;;  %17630 = vrcp.f32 %v7232_v54  ;;  %vm7653_vm4 = vcmp.ge.f32.partialorder %v21238_v49, 0.0 }
 0x77c   : > { %v7354_v6 = vadd.f32 1.4214138, %v7329_v56  ;;  %v7330_v37 = vmul.f32 %v21363_v58, %v7305_v53  ;;  %17632 = vrcp.f32 %v7233_v23  ;;  %v7577_v31 = vmul.f32 1.442695, %v7531_v36 }
 0x77d   : > { %v7478_v48 = vmul.f32 %v21306_v46, %v7453_v13  ;;  %v7912_v38 = vld [vmem:[#allocation3 + $0x8a] sm:$0xff]  ;;  %v7777_v21 = vmul.f32 %v7752_v1, %v7727_v43  ;;  %17634 = vpow2.f32 %v7575_v7  ;;  %v21404_v4 = vand.u32 2147483647, %v21391_v10 }
 0x77e   : > { %15253 = vmatmul.mubr.msk.f32.gmra.mrb[84].mxu0 %vm7785_vm14, %v7912_v38  ;;  %v7379_v25 = vmul.f32 %v21346_v47, %v7354_v6  ;;  %v21387_v45 = vpop.eup %17626  ;;  %v23387_v46 = vld [vmem:[#allocation10_spill] sm:$0xff]  ;;  %v7355_v28 = vadd.f32 1.4214138, %v7330_v37  ;;  %vm7814_vm5 = vcmask 257024   ;;  %v7507_v51 = vsub.f32 0.0, %v21356_v40  ;;  %v23388_v38 = vld [vmem:[#allocation11_spill] sm:$0xff] }
 0x77f   : > { %v7603_v11 = vmul.f32 %v17625_v62, %v7478_v48  ;;  %15255 = vmatprep.mubr.msk.f32.mxu0 %vm17767_vm1, %v23355_v12  ;;  %v7833_v14 = vmul.f32 %v7777_v21, %v23387_v46  ;;  %v7281_v34 = vmul.f32 1.0614054, %v21387_v45  ;;  %v7209_v44 = vmul.f32 0.3275911, %v21404_v4  ;;  %7815 = vst.msk [vmem:[#allocation3 + $0xe0] sm:$0xf] %vm7814_vm5, %v23355_v12 }
 0x780   : > { %v7404_v22 = vadd.f32 -0.28449672, %v7379_v25  ;;  %v7380_v33 = vmul.f32 %v21363_v58, %v7355_v28  ;;  %v17629_v57 = vpop.eup %17628  ;;  %v16103_v49 = vpack.c.bf16 %v7894_v39, %v7893_v24  ;;  %v7508_v9 = vsub.f32 0.0, %v21359_v52 }
 0x781   : > { %v7628_v32 = vsub.f32 1.0, %v7603_v11  ;;  %7858 = vst.msk [vmem:[#allocation3 + $0x98] sm:$0xff] %vm7785_vm14, %v7833_v14  ;;  %v7306_v43 = vadd.f32 -1.4531521, %v7281_v34  ;;  %v7728_v18 = vmul.f32 0.5, %v21228_v59  ;;  %v7234_v26 = vadd.f32 1.0, %v7209_v44 }
 0x782   : > { %v7429_v0 = vmul.f32 %v21346_v47, %v7404_v22  ;;  %v7405_v30 = vadd.f32 -0.28449672, %v7380_v33  ;;  %16104 = vmatpush3.bf16.msra.mxu0 %v16103_v49  ;;  %17636 = vpow2.f32 %v7577_v31  ;;  %v7532_v54 = vmul.f32 %v7507_v51, %v21356_v40 }
 0x783   : > { %v7678_v17 = vsub.f32 0.0, %v7628_v32  ;;  %v7331_v15 = vmul.f32 %v21387_v45, %v7306_v43  ;;  %16105 = vmatprep.subr.bf16.mxu0 %v23381_v35  ;;  %17638 = vrcp.f32 %v7234_v26  ;;  %vm7654_vm6 = vcmp.ge.f32.partialorder %v21278_v27, 0.0 }
 0x784   : > { %v7454_v20 = vadd.f32 0.2548296, %v7429_v0  ;;  %v7430_v5 = vmul.f32 %v21363_v58, %v7405_v30  ;;  %v7579_v14 = vmul.f32 1.442695, %v7532_v54  ;;  %v7509_v33 = vsub.f32 0.0, %v21404_v4 }
 0x785   : > { %v7703_v55 = vsel %vm7653_vm4, %v7628_v32, %v7678_v17  ;;  %v7356_v56 = vadd.f32 1.4214138, %v7331_v15  ;;  %v21417_v16 = vpop.eup %17630  ;;  %v7730_v17 = vmul.f32 0.5, %v21281_v50  ;;  %vm7655_vm7 = vcmp.ge.f32.partialorder %v21285_v63, 0.0  ;;  %v23389_v63 = vld [vmem:[#allocation14_spill] sm:$0xff] }
 0x786   : > { %v7753_v8 = vadd.f32 1.0, %v7703_v55  ;;  %v7479_v13 = vmul.f32 %v21346_v47, %v7454_v20  ;;  %v7455_v53 = vadd.f32 0.2548296, %v7430_v5  ;;  %v21420_v48 = vpop.eup %17632  ;;  %v7282_v7 = vmul.f32 1.0614054, %v21417_v16 }
 0x787   : > { %v7381_v6 = vmul.f32 %v21387_v45, %v7356_v56  ;;  %v7533_v47 = vmul.f32 %v7508_v9, %v21359_v52  ;;  %v7283_v37 = vmul.f32 1.0614054, %v21420_v48  ;;  %v17635_v40 = vpop.eup %17634  ;;  %v7729_v52 = vmul.f32 0.5, %v21262_v29 }
 0x788   : > { %v7778_v1 = vmul.f32 %v7753_v8, %v7728_v18  ;;  %v7604_v59 = vmul.f32 %v17629_v57, %v7479_v13  ;;  %v7913_v23 = vld [vmem:[#allocation3 + $0x92] sm:$0xff]  ;;  %v7480_v21 = vmul.f32 %v21363_v58, %v7455_v53  ;;  %v7307_v25 = vadd.f32 -1.4531521, %v7282_v7 }
 0x789   : > { %15256 = vmatmul.mubr.msk.f32.gmra.mrb[86].mxu0 %vm7785_vm14, %v7913_v23  ;;  %v7406_v11 = vadd.f32 -0.28449672, %v7381_v6  ;;  %v7308_v28 = vadd.f32 -1.4531521, %v7283_v37  ;;  %v7581_v22 = vmul.f32 1.442695, %v7533_v47  ;;  %17640 = vpow2.f32 %v7579_v14 }
 0x78a   : > { %v7834_v62 = vmul.f32 %v7778_v1, %v23388_v38  ;;  %v7629_v36 = vsub.f32 1.0, %v7604_v59  ;;  %15258 = vmatprep.mubr.msk.f32.mxu0 %vm17767_vm1, %v23355_v12  ;;  %v7605_v46 = vmul.f32 %v17635_v40, %v7480_v21  ;;  %v7332_v32 = vmul.f32 %v21417_v16, %v7307_v25  ;;  %v23390_v6 = vld [vmem:[#allocation15_spill] sm:$0xff] }
 0x78b   : > { %v7431_v58 = vmul.f32 %v21387_v45, %v7406_v11  ;;  %v7333_v39 = vmul.f32 %v21420_v48, %v7308_v28  ;;  %17642 = vpow2.f32 %v7581_v22  ;;  %v7534_v15 = vmul.f32 %v7509_v33, %v21404_v4 }
 0x78c   : > { %7859 = vst.msk [vmem:[#allocation3 + $0xa0] sm:$0xff] %vm7785_vm14, %v7834_v62  ;;  %v7679_v24 = vsub.f32 0.0, %v7629_v36  ;;  %v7630_v34 = vsub.f32 1.0, %v7605_v46  ;;  %v7357_v0 = vadd.f32 1.4214138, %v7332_v32  ;;  %v17637_v51 = vpop.eup %17636  ;;  %vm7656_vm8 = vcmp.ge.f32.partialorder %v21313_v3, 0.0 }
 0x78d   : > { %v7456_v29 = vadd.f32 0.2548296, %v7431_v58  ;;  %v7358_v30 = vadd.f32 1.4214138, %v7333_v39  ;;  %v21442_v49 = vpop.eup %17638  ;;  %v7583_v59 = vmul.f32 1.442695, %v7534_v15 }
 0x78e   : > { %v7704_v31 = vsel %vm7654_vm6, %v7629_v36, %v7679_v24  ;;  %v7680_v57 = vsub.f32 0.0, %v7630_v34  ;;  %v7382_v27 = vmul.f32 %v21417_v16, %v7357_v0  ;;  %v7284_v5 = vmul.f32 1.0614054, %v21442_v49  ;;  %v23393_v15 = vld [vmem:[#allocation18_spill] sm:$0xff] }
 0x78f   : > { %v7754_v43 = vadd.f32 1.0, %v7704_v31  ;;  %v7481_v44 = vmul.f32 %v21387_v45, %v7456_v29  ;;  %v7383_v50 = vmul.f32 %v21420_v48, %v7358_v30  ;;  %v7731_v11 = vmul.f32 0.5, %v21302_v19 }
 0x790   : > { %v7705_v20 = vsel %vm7655_vm7, %v7630_v34, %v7680_v57  ;;  %v7407_v8 = vadd.f32 -0.28449672, %v7382_v27  ;;  %v7309_v54 = vadd.f32 -1.4531521, %v7284_v5  ;;  %17644 = vpow2.f32 %v7583_v59  ;;  %v23391_v34 = vld [vmem:[#allocation16_spill] sm:$0xff] }
 0x791   : > { %v7779_v55 = vmul.f32 %v7754_v43, %v7729_v52  ;;  %v7755_v9 = vadd.f32 1.0, %v7705_v20  ;;  %v7606_v18 = vmul.f32 %v17637_v51, %v7481_v44  ;;  %v7408_v45 = vadd.f32 -0.28449672, %v7383_v50 }
 0x792   : > { %v7432_v53 = vmul.f32 %v21417_v16, %v7407_v8  ;;  %v7334_v38 = vmul.f32 %v21442_v49, %v7309_v54  ;;  %vm7657_vm9 = vcmp.ge.f32.partialorder %v21344_v2, 0.0  ;;  %vm7658_vm10 = vcmp.ge.f32.partialorder %v21350_v41, 0.0  ;;  %v23392_v41 = vld [vmem:[#allocation17_spill] sm:$0xff] }
 0x793   : > { %v7914_v26 = vld [vmem:[#allocation3 + $0x9a] sm:$0xff]  ;;  %v7835_v13 = vmul.f32 %v7779_v55, %v23389_v63  ;;  %v7780_v56 = vmul.f32 %v7755_v9, %v7730_v17  ;;  %v7631_v1 = vsub.f32 1.0, %v7606_v18  ;;  %v7433_v4 = vmul.f32 %v21420_v48, %v7408_v45  ;;  %v17641_v36 = vpop.eup %17640  ;;  %v8481_v54 = vld [vmem:[%s23313_s7 + $0x50] sm:$0xff] }
 0x794   : > { %15259 = vmatmul.mubr.msk.f32.gmra.mrb[88].mxu0 %vm7785_vm14, %v7914_v26  ;;  %v7457_v23 = vadd.f32 0.2548296, %v7432_v53  ;;  %v7359_v40 = vadd.f32 1.4214138, %v7334_v38  ;;  %v7732_v0 = vmul.f32 0.5, %v21333_v61  ;;  %v7733_v30 = vmul.f32 0.5, %v21336_v42 }
 0x795   : > { %15261 = vmatprep.mubr.msk.f32.mxu0 %vm17767_vm1, %v23355_v12  ;;  %7860 = vst.msk [vmem:[#allocation3 + $0xa8] sm:$0xff] %vm7785_vm14, %v7835_v13  ;;  %v7836_v7 = vmul.f32 %v7780_v56, %v23390_v6  ;;  %v7681_v47 = vsub.f32 0.0, %v7631_v1  ;;  %v7458_v62 = vadd.f32 0.2548296, %v7433_v4  ;;  %v17643_v46 = vpop.eup %17642  ;;  %vm7659_vm11 = vcmp.ge.f32.partialorder %v21391_v10, 0.0  ;;  %v23394_v13 = vld [vmem:[#allocation19_spill] sm:$0xff] }
 0x796   : > { %v7482_v37 = vmul.f32 %v21417_v16, %v7457_v23  ;;  %v7384_v28 = vmul.f32 %v21442_v49, %v7359_v40  ;;  %v7734_v8 = vmul.f32 0.5, %v21378_v60  ;;  %v8479_v56 = vld [vmem:[%s23313_s7 + $0x40] sm:$0xff]  ;;  %v8480_v60 = vld [vmem:[%s23313_s7 + $0x48] sm:$0xff]  ;;  %v8482_v4 = vld [vmem:[%s23313_s7 + $0x58] sm:$0xff] }
 0x797   : > { %7861 = vst.msk [vmem:[#allocation3 + $0xb0] sm:$0xff] %vm7785_vm14, %v7836_v7  ;;  %v7706_v21 = vsel %vm7656_vm8, %v7631_v1, %v7681_v47  ;;  %v7483_v52 = vmul.f32 %v21420_v48, %v7458_v62  ;;  %v7866_v1 = vld [vmem:[#allocation3 + $0x1] sm:$0xff]  ;;  %v16106_v53 = vpack.c.bf16 %v8480_v60, %v8479_v56  ;;  %v16109_v59 = vpack.c.bf16 %v8482_v4, %v8481_v54  ;;  %v7867_v6 = vld [vmem:[#allocation3 + $0x9] sm:$0xff]  ;;  %v21513_v7 = vld [vmem:[#allocation3 + $0x11] sm:$0xff] }
 0x798   : > { %v7756_v25 = vadd.f32 1.0, %v7706_v21  ;;  %v7607_v14 = vmul.f32 %v17641_v36, %v7482_v37  ;;  %v7409_v32 = vadd.f32 -0.28449672, %v7384_v28  ;;  %v21519_v47 = vld [vmem:[#allocation3 + $0x19] sm:$0xff]  ;;  %v21525_v23 = vld [vmem:[#allocation3 + $0x21] sm:$0xff]  ;;  %v21531_v38 = vld [vmem:[#allocation3 + $0x29] sm:$0xff] }
 0x799   : > { %v7608_v3 = vmul.f32 %v17643_v46, %v7483_v52  ;;  %v21537_v62 = vld [vmem:[#allocation3 + $0x31] sm:$0xff]  ;;  %v21543_v21 = vld [vmem:[#allocation3 + $0x39] sm:$0xff]  ;;  %v21549_v37 = vld [vmem:[#allocation3 + $0x41] sm:$0xff] }
 0x79a   : > { %v7781_v24 = vmul.f32 %v7756_v25, %v7731_v11  ;;  %v7632_v58 = vsub.f32 1.0, %v7607_v14  ;;  %v7434_v19 = vmul.f32 %v21442_v49, %v7409_v32  ;;  %v17645_v2 = vpop.eup %17644  ;;  %v21555_v40 = vld [vmem:[#allocation3 + $0x49] sm:$0xff]  ;;  %v21561_v36 = vld [vmem:[#allocation3 + $0x51] sm:$0xff]  ;;  %v21567_v11 = vld [vmem:[#allocation3 + $0x59] sm:$0xff] }
 0x79b   : > { %v7633_v16 = vsub.f32 1.0, %v7608_v3  ;;  %v21573_v25 = vld [vmem:[#allocation3 + $0x61] sm:$0xff]  ;;  %v21579_v52 = vld [vmem:[#allocation3 + $0x69] sm:$0xff]  ;;  %v21585_v46 = vld [vmem:[#allocation3 + $0x71] sm:$0xff] }
 0x79c   : > { %v7915_v22 = vld [vmem:[#allocation3 + $0xa2] sm:$0xff]  ;;  %v7837_v39 = vmul.f32 %v7781_v24, %v23391_v34  ;;  %v7682_v33 = vsub.f32 0.0, %v7632_v58  ;;  %v7459_v29 = vadd.f32 0.2548296, %v7434_v19  ;;  %v21591_v14 = vld [vmem:[#allocation3 + $0x79] sm:$0xff]  ;;  %v21609_v3 = vld [vmem:[#allocation3 + $0x91] sm:$0xff] }
 0x79d   : > { %15262 = vmatmul.mubr.msk.f32.gmra.mrb[90].mxu0 %vm7785_vm14, %v7915_v22  ;;  %v7683_v48 = vsub.f32 0.0, %v7633_v16  ;;  %v21597_v28 = vld [vmem:[#allocation3 + $0x81] sm:$0xff]  ;;  %v21603_v24 = vld [vmem:[#allocation3 + $0x89] sm:$0xff]  ;;  %v9117_v56 = vld [vmem:[%s23313_s7 + $0x80] sm:$0xff] }
 0x79e   : > { %15264 = vmatprep.mubr.msk.f32.mxu0 %vm17767_vm1, %v23355_v12  ;;  %7862 = vst.msk [vmem:[#allocation3 + $0xb8] sm:$0xff] %vm7785_vm14, %v7837_v39  ;;  %v7916_v31 = vld [vmem:[#allocation3 + $0xaa] sm:$0xff]  ;;  %v7707_v17 = vsel %vm7657_vm9, %v7632_v58, %v7682_v33  ;;  %v7484_v44 = vmul.f32 %v21442_v49, %v7459_v29  ;;  %v21615_v58 = vld [vmem:[#allocation3 + $0x99] sm:$0xff]  ;;  %v21621_v32 = vld [vmem:[#allocation3 + $0xa1] sm:$0xff] }
 0x79f   : > { %v7757_v43 = vadd.f32 1.0, %v7707_v17  ;;  %v7708_v57 = vsel %vm7658_vm10, %v7633_v16, %v7683_v48  ;;  %v21627_v22 = vld [vmem:[#allocation3 + $0xa9] sm:$0xff]  ;;  %v8798_v16 = vld [vmem:[%s23313_s7 + $0x60] sm:$0xff]  ;;  %v8799_v33 = vld [vmem:[%s23313_s7 + $0x68] sm:$0xff] }
 0x7a0   : > { %v7758_v51 = vadd.f32 1.0, %v7708_v57  ;;  %v7609_v20 = vmul.f32 %v17645_v2, %v7484_v44  ;;  %v8454_v48 = vld [vmem:[#allocation3 + $0x3] sm:$0xff]  ;;  %v8801_v29 = vld [vmem:[%s23313_s7 + $0x78] sm:$0xff] }
 0x7a1   : > { %15265 = vmatmul.mubr.msk.f32.gmra.mrb[92].mxu0 %vm7785_vm14, %v7916_v31  ;;  %v7782_v27 = vmul.f32 %v7757_v43, %v7732_v0  ;;  %v16112_v31 = vpack.c.bf16 %v8799_v33, %v8798_v16  ;;  %v8800_v17 = vld [vmem:[%s23313_s7 + $0x70] sm:$0xff]  ;;  %v8456_v57 = vld [vmem:[#allocation3 + $0x13] sm:$0xff]  ;;  %v9118_v60 = vld [vmem:[%s23313_s7 + $0x88] sm:$0xff] }
 0x7a2   : > { %15267 = vmatprep.mubr.msk.f32.mxu0 %vm17767_vm1, %v23355_v12  ;;  %v7783_v55 = vmul.f32 %v7758_v51, %v7733_v30  ;;  %v7634_v9 = vsub.f32 1.0, %v7609_v20  ;;  %v16115_v0 = vpack.c.bf16 %v8801_v29, %v8800_v17  ;;  %v8455_v43 = vld [vmem:[#allocation3 + $0xb] sm:$0xff]  ;;  %v8457_v30 = vld [vmem:[#allocation3 + $0x1b] sm:$0xff]  ;;  %v8458_v51 = vld [vmem:[#allocation3 + $0x23] sm:$0xff] }
 0x7a3   : > { %v7838_v50 = vmul.f32 %v7782_v27, %v23392_v41  ;;  %v8459_v44 = vld [vmem:[#allocation3 + $0x2b] sm:$0xff]  ;;  %v8460_v2 = vld [vmem:[#allocation3 + $0x33] sm:$0xff]  ;;  %v8461_v27 = vld [vmem:[#allocation3 + $0x3b] sm:$0xff] }
 0x7a4   : > { %v7839_v61 = vmul.f32 %v7783_v55, %v23393_v15  ;;  %v7684_v42 = vsub.f32 0.0, %v7634_v9  ;;  %v8462_v55 = vld [vmem:[#allocation3 + $0x43] sm:$0xff]  ;;  %v8463_v20 = vld [vmem:[#allocation3 + $0x4b] sm:$0xff]  ;;  %v8464_v41 = vld [vmem:[#allocation3 + $0x53] sm:$0xff] }
 0x7a5   : > { %v7917_v18 = vld [vmem:[#allocation3 + $0xb2] sm:$0xff]  ;;  %7863 = vst.msk [vmem:[#allocation3 + $0xc0] sm:$0xff] %vm7785_vm14, %v7838_v50  ;;  %v8465_v50 = vld [vmem:[#allocation3 + $0x5b] sm:$0xff]  ;;  %v8466_v15 = vld [vmem:[#allocation3 + $0x63] sm:$0xff] }
 0x7a6   : > { %15268 = vmatmul.mubr.msk.f32.gmra.mrb[94].mxu0 %vm7785_vm14, %v7917_v18  ;;  %7864 = vst.msk [vmem:[#allocation3 + $0xc8] sm:$0xff] %vm7785_vm14, %v7839_v61  ;;  %v7709_v49 = vsel %vm7659_vm11, %v7634_v9, %v7684_v42  ;;  %v21633_v34 = vld [vmem:[#allocation3 + $0xb1] sm:$0xff]  ;;  %v8469_v18 = vld [vmem:[#allocation3 + $0x7b] sm:$0xff]  ;;  %v8470_v42 = vld [vmem:[#allocation3 + $0x83] sm:$0xff] }
 0x7a7   : > { %15270 = vmatprep.mubr.msk.f32.mxu0 %vm17767_vm1, %v23355_v12  ;;  %v7759_v5 = vadd.f32 1.0, %v7709_v49  ;;  %v8467_v61 = vld [vmem:[#allocation3 + $0x6b] sm:$0xff]  ;;  %v8468_v9 = vld [vmem:[#allocation3 + $0x73] sm:$0xff]  ;;  %v21757_v16 = vld [vmem:[#allocation3 + $0x1f] sm:$0xff] }
 0x7a8   : > { %v8471_v49 = vld [vmem:[#allocation3 + $0x8b] sm:$0xff] }
 0x7a9   : > { %v7784_v26 = vmul.f32 %v7759_v5, %v7734_v8  ;;  %v8472_v8 = vld [vmem:[#allocation3 + $0x93] sm:$0xff]  ;;  %v8473_v5 = vld [vmem:[#allocation3 + $0x9b] sm:$0xff]  ;;  %v21763_v33 = vld [vmem:[#allocation3 + $0x27] sm:$0xff] }
 0x7aa   : > { %v9120_v54 = vld [vmem:[%s23313_s7 + $0x98] sm:$0xff]  ;;  %v21787_v17 = vld [vmem:[#allocation3 + $0x47] sm:$0xff] }
 0x7ab   : > { %v7840_v45 = vmul.f32 %v7784_v26, %v23394_v13  ;;  %v8474_v26 = vld [vmem:[#allocation3 + $0xa3] sm:$0xff]  ;;  %v8476_v13 = vld [vmem:[#allocation3 + $0xb3] sm:$0xff] }
 0x7ac   : > { %v7918_v63 = vld [vmem:[#allocation3 + $0xba] sm:$0xff]  ;;  %v7919_v10 = vld [vmem:[#allocation3 + $0xc2] sm:$0xf]  ;;  %v8773_v4 = vld [vmem:[#allocation3 + $0xf] sm:$0xff] }
 0x7ad   : > { %15271 = vmatmul.mubr.msk.f32.gmra.mrb[96].mxu0 %vm7785_vm14, %v7918_v63  ;;  %7865 = vst.msk [vmem:[#allocation3 + $0xd0] sm:$0xf] %vm7814_vm5, %v7840_v45  ;;  %v21639_v39 = vld [vmem:[#allocation3 + $0xb9] sm:$0xff]  ;;  %v7890_v19 = vld [vmem:[#allocation3 + $0xc1] sm:$0xf]  ;;  %v8475_v63 = vld [vmem:[#allocation3 + $0xab] sm:$0xff] }
 0x7ae   : > { %15273 = vmatprep.mubr.msk.f32.mxu0 %vm17767_vm1, %v23355_v12  ;;  %v8477_v45 = vld [vmem:[#allocation3 + $0xbb] sm:$0xff]  ;;  %v21793_v29 = vld [vmem:[#allocation3 + $0x4f] sm:$0xff] }
 0x7b1   : > { %15274 = vmatmul.mubr.msk.f32.gmra.mrb[98].mxu0 %vm7785_vm14, %v7919_v10  ;;  %v8478_v10 = vld [vmem:[#allocation3 + $0xc3] sm:$0xf] }
 0x7b2   : > { %15284 = vmatprep.mubr.msk.f32.mxu0 %vm17767_vm1, %v23355_v12 }
 0x7b5   : > { %15285 = vmatmul.mubr.msk.f32.vlgmr.msra.gmra.mrb[50].mxu0 %vm7785_vm14, %v7866_v1  ;;  %v16118_v1 = vpack.c.bf16 %v9118_v60, %v9117_v56  ;;  %v9094_v56 = vld [vmem:[#allocation3 + $0x20] sm:$0xff]  ;;  %v9095_v60 = vld [vmem:[#allocation3 + $0x28] sm:$0xff] }
 0x7b6   : > { %15287 = vmatprep.mubr.msk.f32.mxu0 %vm17767_vm1, %v23355_v12  ;;  %16107 = vmatpush3.bf16.msra.mxu0 %v16106_v53  ;;  %v9119_v53 = vld [vmem:[%s23313_s7 + $0x90] sm:$0xff] }
 0x7b7   : > { %16108 = vmatprep.subr.bf16.mxu0 %v23381_v35 }
 0x7b9   : > { %15288 = vmatmul.mubr.msk.f32.gmra.mrb[52].mxu0 %vm7785_vm14, %v7867_v6  ;;  %v8774_v6 = vld [vmem:[#allocation3 + $0x17] sm:$0xff] }
 0x7ba   : > { %15290 = vmatprep.mubr.msk.f32.mxu0 %vm17767_vm1, %v23355_v12  ;;  %16110 = vmatpush3.bf16.msra.mxu0 %v16109_v59  ;;  %v16121_v59 = vpack.c.bf16 %v9120_v54, %v9119_v53  ;;  %v9098_v53 = vld [vmem:[#allocation3 + $0x40] sm:$0xff]  ;;  %v9099_v54 = vld [vmem:[#allocation3 + $0x48] sm:$0xff] }
 0x7bb   : > { %16111 = vmatprep.subr.bf16.mxu0 %v23381_v35 }
 0x7bd   : > { %15291 = vmatmul.mubr.msk.f32.gmra.mrb[54].mxu0 %vm7785_vm14, %v21513_v7 }
 0x7be   : > { %15293 = vmatprep.mubr.msk.f32.mxu0 %vm17767_vm1, %v23355_v12 }
 0x7c1   : > { %15294 = vmatmul.mubr.msk.f32.gmra.mrb[56].mxu0 %vm7785_vm14, %v21519_v47 }
 0x7c2   : > { %15296 = vmatprep.mubr.msk.f32.mxu0 %vm17767_vm1, %v23355_v12 }
 0x7c5   : > { %15297 = vmatmul.mubr.msk.f32.gmra.mrb[58].mxu0 %vm7785_vm14, %v21525_v23 }
 0x7c6   : > { %15299 = vmatprep.mubr.msk.f32.mxu0 %vm17767_vm1, %v23355_v12 }
 0x7c9   : > { %15300 = vmatmul.mubr.msk.f32.gmra.mrb[60].mxu0 %vm7785_vm14, %v21531_v38 }
 0x7ca   : > { %15302 = vmatprep.mubr.msk.f32.mxu0 %vm17767_vm1, %v23355_v12 }
 0x7cd   : > { %15303 = vmatmul.mubr.msk.f32.gmra.mrb[62].mxu0 %vm7785_vm14, %v21537_v62 }
 0x7ce   : > { %15305 = vmatprep.mubr.msk.f32.mxu0 %vm17767_vm1, %v23355_v12 }
 0x7d1   : > { %15306 = vmatmul.mubr.msk.f32.gmra.mrb[64].mxu0 %vm7785_vm14, %v21543_v21 }
 0x7d2   : > { %15308 = vmatprep.mubr.msk.f32.mxu0 %vm17767_vm1, %v23355_v12 }
 0x7d5   : > { %15309 = vmatmul.mubr.msk.f32.gmra.mrb[66].mxu0 %vm7785_vm14, %v21549_v37 }
 0x7d6   : > { %15311 = vmatprep.mubr.msk.f32.mxu0 %vm17767_vm1, %v23355_v12 }
 0x7d9   : > { %15312 = vmatmul.mubr.msk.f32.gmra.mrb[68].mxu0 %vm7785_vm14, %v21555_v40 }
 0x7da   : > { %15314 = vmatprep.mubr.msk.f32.mxu0 %vm17767_vm1, %v23355_v12 }
 0x7dd   : > { %15315 = vmatmul.mubr.msk.f32.gmra.mrb[70].mxu0 %vm7785_vm14, %v21561_v36 }
 0x7de   : > { %15317 = vmatprep.mubr.msk.f32.mxu0 %vm17767_vm1, %v23355_v12 }
 0x7e1   : > { %15318 = vmatmul.mubr.msk.f32.gmra.mrb[72].mxu0 %vm7785_vm14, %v21567_v11 }
 0x7e2   : > { %15320 = vmatprep.mubr.msk.f32.mxu0 %vm17767_vm1, %v23355_v12 }
 0x7e5   : > { %15321 = vmatmul.mubr.msk.f32.gmra.mrb[74].mxu0 %vm7785_vm14, %v21573_v25 }
 0x7e6   : > { %15323 = vmatprep.mubr.msk.f32.mxu0 %vm17767_vm1, %v23355_v12 }
 0x7e9   : > { %15324 = vmatmul.mubr.msk.f32.gmra.mrb[76].mxu0 %vm7785_vm14, %v21579_v52 }
 0x7ea   : > { %15326 = vmatprep.mubr.msk.f32.mxu0 %vm17767_vm1, %v23355_v12 }
 0x7ed   : > { %15327 = vmatmul.mubr.msk.f32.gmra.mrb[78].mxu0 %vm7785_vm14, %v21585_v46 }
 0x7ee   : > { %15329 = vmatprep.mubr.msk.f32.mxu0 %vm17767_vm1, %v23355_v12 }
 0x7f1   : > { %15330 = vmatmul.mubr.msk.f32.gmra.mrb[80].mxu0 %vm7785_vm14, %v21591_v14 }
 0x7f2   : > { %15332 = vmatprep.mubr.msk.f32.mxu0 %vm17767_vm1, %v23355_v12 }
 0x7f5   : > { %15333 = vmatmul.mubr.msk.f32.gmra.mrb[82].mxu0 %vm7785_vm14, %v21597_v28 }
 0x7f6   : > { %15335 = vmatprep.mubr.msk.f32.mxu0 %vm17767_vm1, %v23355_v12 }
 0x7f9   : > { %15336 = vmatmul.mubr.msk.f32.gmra.mrb[84].mxu0 %vm7785_vm14, %v21603_v24 }
 0x7fa   : > { %15338 = vmatprep.mubr.msk.f32.mxu0 %vm17767_vm1, %v23355_v12 }
 0x7fd   : > { %15339 = vmatmul.mubr.msk.f32.gmra.mrb[86].mxu0 %vm7785_vm14, %v21609_v3 }
 0x7fe   : > { %15341 = vmatprep.mubr.msk.f32.mxu0 %vm17767_vm1, %v23355_v12 }
 0x801   : > { %15342 = vmatmul.mubr.msk.f32.gmra.mrb[88].mxu0 %vm7785_vm14, %v21615_v58 }
 0x802   : > { %15344 = vmatprep.mubr.msk.f32.mxu0 %vm17767_vm1, %v23355_v12 }
 0x805   : > { %15345 = vmatmul.mubr.msk.f32.gmra.mrb[90].mxu0 %vm7785_vm14, %v21621_v32 }
 0x806   : > { %15347 = vmatprep.mubr.msk.f32.mxu0 %vm17767_vm1, %v23355_v12 }
 0x809   : > { %15348 = vmatmul.mubr.msk.f32.gmra.mrb[92].mxu0 %vm7785_vm14, %v21627_v22 }
 0x80a   : > { %15350 = vmatprep.mubr.msk.f32.mxu0 %vm17767_vm1, %v23355_v12 }
 0x80d   : > { %15351 = vmatmul.mubr.msk.f32.gmra.mrb[94].mxu0 %vm7785_vm14, %v21633_v34 }
 0x80e   : > { %15353 = vmatprep.mubr.msk.f32.mxu0 %vm17767_vm1, %v23355_v12 }
 0x811   : > { %15354 = vmatmul.mubr.msk.f32.gmra.mrb[96].mxu0 %vm7785_vm14, %v21639_v39 }
 0x812   : > { %15356 = vmatprep.mubr.msk.f32.mxu0 %vm17767_vm1, %v23355_v12 }
 0x815   : > { %15357 = vmatmul.mubr.msk.f32.gmra.mrb[98].mxu0 %vm7785_vm14, %v7890_v19  ;;  %v21769_v19 = vld [vmem:[#allocation3 + $0x2f] sm:$0xff] }
 0x816   : > { %15367 = vmatprep.mubr.msk.f32.mxu0 %vm17767_vm1, %v23355_v12 }
 0x819   : > { %15368 = vmatmul.mubr.msk.f32.vlgmr.msra.gmra.mrb[50].mxu0 %vm7785_vm14, %v8454_v48  ;;  %v21775_v48 = vld [vmem:[#allocation3 + $0x37] sm:$0xff] }
 0x81a   : > { %15370 = vmatprep.mubr.msk.f32.mxu0 %vm17767_vm1, %v23355_v12  ;;  %16113 = vmatpush3.bf16.msra.mxu0 %v16112_v31  ;;  %v21781_v31 = vld [vmem:[#allocation3 + $0x3f] sm:$0xff] }
 0x81b   : > { %16114 = vmatprep.subr.bf16.mxu0 %v23381_v35 }
 0x81d   : > { %15371 = vmatmul.mubr.msk.f32.gmra.mrb[52].mxu0 %vm7785_vm14, %v8455_v43  ;;  %v21805_v43 = vld [vmem:[#allocation3 + $0x5f] sm:$0xff] }
 0x81e   : > { %15373 = vmatprep.mubr.msk.f32.mxu0 %vm17767_vm1, %v23355_v12  ;;  %16116 = vmatpush3.bf16.msra.mxu0 %v16115_v0  ;;  %v21799_v0 = vld [vmem:[#allocation3 + $0x57] sm:$0xff] }
 0x81f   : > { %16117 = vmatprep.subr.bf16.mxu0 %v23381_v35 }
 0x821   : > { %15374 = vmatmul.mubr.msk.f32.gmra.mrb[54].mxu0 %vm7785_vm14, %v8456_v57  ;;  %v21811_v57 = vld [vmem:[#allocation3 + $0x67] sm:$0xff] }
 0x822   : > { %15376 = vmatprep.mubr.msk.f32.mxu0 %vm17767_vm1, %v23355_v12 }
 0x825   : > { %15377 = vmatmul.mubr.msk.f32.gmra.mrb[56].mxu0 %vm7785_vm14, %v8457_v30  ;;  %v21817_v30 = vld [vmem:[#allocation3 + $0x6f] sm:$0xff] }
 0x826   : > { %15379 = vmatprep.mubr.msk.f32.mxu0 %vm17767_vm1, %v23355_v12 }
 0x829   : > { %15380 = vmatmul.mubr.msk.f32.gmra.mrb[58].mxu0 %vm7785_vm14, %v8458_v51  ;;  %v21823_v51 = vld [vmem:[#allocation3 + $0x77] sm:$0xff] }
 0x82a   : > { %15382 = vmatprep.mubr.msk.f32.mxu0 %vm17767_vm1, %v23355_v12 }
 0x82d   : > { %15383 = vmatmul.mubr.msk.f32.gmra.mrb[60].mxu0 %vm7785_vm14, %v8459_v44  ;;  %v21829_v44 = vld [vmem:[#allocation3 + $0x7f] sm:$0xff] }
 0x82e   : > { %15385 = vmatprep.mubr.msk.f32.mxu0 %vm17767_vm1, %v23355_v12 }
 0x831   : > { %15386 = vmatmul.mubr.msk.f32.gmra.mrb[62].mxu0 %vm7785_vm14, %v8460_v2  ;;  %v21835_v2 = vld [vmem:[#allocation3 + $0x87] sm:$0xff] }
 0x832   : > { %15388 = vmatprep.mubr.msk.f32.mxu0 %vm17767_vm1, %v23355_v12 }
 0x835   : > { %15389 = vmatmul.mubr.msk.f32.gmra.mrb[64].mxu0 %vm7785_vm14, %v8461_v27  ;;  %v21841_v27 = vld [vmem:[#allocation3 + $0x8f] sm:$0xff] }
 0x836   : > { %15391 = vmatprep.mubr.msk.f32.mxu0 %vm17767_vm1, %v23355_v12 }
 0x839   : > { %15392 = vmatmul.mubr.msk.f32.gmra.mrb[66].mxu0 %vm7785_vm14, %v8462_v55  ;;  %v21847_v55 = vld [vmem:[#allocation3 + $0x97] sm:$0xff] }
 0x83a   : > { %15394 = vmatprep.mubr.msk.f32.mxu0 %vm17767_vm1, %v23355_v12 }
 0x83d   : > { %15395 = vmatmul.mubr.msk.f32.gmra.mrb[68].mxu0 %vm7785_vm14, %v8463_v20  ;;  %v21853_v20 = vld [vmem:[#allocation3 + $0x9f] sm:$0xff] }
 0x83e   : > { %15397 = vmatprep.mubr.msk.f32.mxu0 %vm17767_vm1, %v23355_v12 }
 0x841   : > { %15398 = vmatmul.mubr.msk.f32.gmra.mrb[70].mxu0 %vm7785_vm14, %v8464_v41  ;;  %v21859_v41 = vld [vmem:[#allocation3 + $0xa7] sm:$0xff] }
 0x842   : > { %15400 = vmatprep.mubr.msk.f32.mxu0 %vm17767_vm1, %v23355_v12 }
 0x845   : > { %15401 = vmatmul.mubr.msk.f32.gmra.mrb[72].mxu0 %vm7785_vm14, %v8465_v50  ;;  %v21865_v50 = vld [vmem:[#allocation3 + $0xaf] sm:$0xff] }
 0x846   : > { %15403 = vmatprep.mubr.msk.f32.mxu0 %vm17767_vm1, %v23355_v12 }
 0x849   : > { %15404 = vmatmul.mubr.msk.f32.gmra.mrb[74].mxu0 %vm7785_vm14, %v8466_v15  ;;  %v21871_v15 = vld [vmem:[#allocation3 + $0xb7] sm:$0xff] }
 0x84a   : > { %15406 = vmatprep.mubr.msk.f32.mxu0 %vm17767_vm1, %v23355_v12 }
 0x84d   : > { %15407 = vmatmul.mubr.msk.f32.gmra.mrb[76].mxu0 %vm7785_vm14, %v8467_v61  ;;  %v21877_v61 = vld [vmem:[#allocation3 + $0xbf] sm:$0xff] }
 0x84e   : > { %15409 = vmatprep.mubr.msk.f32.mxu0 %vm17767_vm1, %v23355_v12 }
 0x851   : > { %15410 = vmatmul.mubr.msk.f32.gmra.mrb[78].mxu0 %vm7785_vm14, %v8468_v9  ;;  %v21883_v9 = vld [vmem:[#allocation3 + $0xc7] sm:$0xff] }
 0x852   : > { %15412 = vmatprep.mubr.msk.f32.mxu0 %vm17767_vm1, %v23355_v12 }
 0x855   : > { %15413 = vmatmul.mubr.msk.f32.gmra.mrb[80].mxu0 %vm7785_vm14, %v8469_v18  ;;  %v9436_v18 = vld [vmem:[%s23313_s7 + $0xa0] sm:$0xff] }
 0x856   : > { %15415 = vmatprep.mubr.msk.f32.mxu0 %vm17767_vm1, %v23355_v12 }
 0x859   : > { %15416 = vmatmul.mubr.msk.f32.gmra.mrb[82].mxu0 %vm7785_vm14, %v8470_v42  ;;  %v9437_v42 = vld [vmem:[%s23313_s7 + $0xa8] sm:$0xff] }
 0x85a   : > { %15418 = vmatprep.mubr.msk.f32.mxu0 %vm17767_vm1, %v23355_v12 }
 0x85d   : > { %15419 = vmatmul.mubr.msk.f32.gmra.mrb[84].mxu0 %vm7785_vm14, %v8471_v49  ;;  %v8797_v49 = vld [vmem:[#allocation3 + $0xcf] sm:$0xf] }
 0x85e   : > { %15421 = vmatprep.mubr.msk.f32.mxu0 %vm17767_vm1, %v23355_v12 }
 0x861   : > { %15422 = vmatmul.mubr.msk.f32.gmra.mrb[86].mxu0 %vm7785_vm14, %v8472_v8  ;;  %v16124_v8 = vpack.c.bf16 %v9437_v42, %v9436_v18  ;;  %v9103_v18 = vld [vmem:[#allocation3 + $0x68] sm:$0xff]  ;;  %v9104_v42 = vld [vmem:[#allocation3 + $0x70] sm:$0xff] }
 0x862   : > { %15424 = vmatprep.mubr.msk.f32.mxu0 %vm17767_vm1, %v23355_v12 }
 0x865   : > { %15425 = vmatmul.mubr.msk.f32.gmra.mrb[88].mxu0 %vm7785_vm14, %v8473_v5  ;;  %v9438_v5 = vld [vmem:[%s23313_s7 + $0xb0] sm:$0xff] }
 0x866   : > { %15427 = vmatprep.mubr.msk.f32.mxu0 %vm17767_vm1, %v23355_v12 }
 0x869   : > { %15428 = vmatmul.mubr.msk.f32.gmra.mrb[90].mxu0 %vm7785_vm14, %v8474_v26  ;;  %v9439_v26 = vld [vmem:[%s23313_s7 + $0xb8] sm:$0xff] }
 0x86a   : > { %15430 = vmatprep.mubr.msk.f32.mxu0 %vm17767_vm1, %v23355_v12 }
 0x86d   : > { %15431 = vmatmul.mubr.msk.f32.gmra.mrb[92].mxu0 %vm7785_vm14, %v8475_v63  ;;  %v9092_v63 = vld [vmem:[#allocation3 + $0x10] sm:$0xff] }
 0x86e   : > { %15433 = vmatprep.mubr.msk.f32.mxu0 %vm17767_vm1, %v23355_v12 }
 0x871   : > { %15434 = vmatmul.mubr.msk.f32.gmra.mrb[94].mxu0 %vm7785_vm14, %v8476_v13  ;;  %v16127_v13 = vpack.c.bf16 %v9439_v26, %v9438_v5  ;;  %v9107_v5 = vld [vmem:[#allocation3 + $0x88] sm:$0xff]  ;;  %v9108_v26 = vld [vmem:[#allocation3 + $0x90] sm:$0xff] }
 0x872   : > { %15436 = vmatprep.mubr.msk.f32.mxu0 %vm17767_vm1, %v23355_v12 }
 0x875   : > { %15437 = vmatmul.mubr.msk.f32.gmra.mrb[96].mxu0 %vm7785_vm14, %v8477_v45  ;;  %v9093_v45 = vld [vmem:[#allocation3 + $0x18] sm:$0xff] }
 0x876   : > { %15439 = vmatprep.mubr.msk.f32.mxu0 %vm17767_vm1, %v23355_v12 }
 0x879   : > { %15440 = vmatmul.mubr.msk.f32.gmra.mrb[98].mxu0 %vm7785_vm14, %v8478_v10  ;;  %v9096_v10 = vld [vmem:[#allocation3 + $0x30] sm:$0xff] }
 0x87a   : > { %15450 = vmatprep.mubr.msk.f32.mxu0 %vm17767_vm1, %v23355_v12 }
 0x87d   : > { %15451 = vmatmul.mubr.msk.f32.vlgmr.msra.gmra.mrb[50].mxu0 %vm7785_vm14, %v8773_v4  ;;  %v9100_v4 = vld [vmem:[#allocation3 + $0x50] sm:$0xff] }
 0x87e   : > { %15453 = vmatprep.mubr.msk.f32.mxu0 %vm17767_vm1, %v23355_v12  ;;  %16119 = vmatpush3.bf16.msra.mxu0 %v16118_v1  ;;  %v9097_v1 = vld [vmem:[#allocation3 + $0x38] sm:$0xff] }
 0x87f   : > { %16120 = vmatprep.subr.bf16.mxu0 %v23381_v35 }
 0x881   : > { %15454 = vmatmul.mubr.msk.f32.gmra.mrb[52].mxu0 %vm7785_vm14, %v8774_v6  ;;  %v9102_v6 = vld [vmem:[#allocation3 + $0x60] sm:$0xff] }
 0x882   : > { %15456 = vmatprep.mubr.msk.f32.mxu0 %vm17767_vm1, %v23355_v12  ;;  %16122 = vmatpush3.bf16.msra.mxu0 %v16121_v59  ;;  %v9101_v59 = vld [vmem:[#allocation3 + $0x58] sm:$0xff] }
 0x883   : > { %16123 = vmatprep.subr.bf16.mxu0 %v23381_v35 }
 0x885   : > { %15457 = vmatmul.mubr.msk.f32.gmra.mrb[54].mxu0 %vm7785_vm14, %v21757_v16 }
 0x886   : > { %15459 = vmatprep.mubr.msk.f32.mxu0 %vm17767_vm1, %v23355_v12 }
 0x889   : > { %15460 = vmatmul.mubr.msk.f32.gmra.mrb[56].mxu0 %vm7785_vm14, %v21763_v33 }
 0x88a   : > { %15462 = vmatprep.mubr.msk.f32.mxu0 %vm17767_vm1, %v23355_v12 }
 0x88d   : > { %15463 = vmatmul.mubr.msk.f32.gmra.mrb[58].mxu0 %vm7785_vm14, %v21769_v19 }
 0x88e   : > { %15465 = vmatprep.mubr.msk.f32.mxu0 %vm17767_vm1, %v23355_v12 }
 0x891   : > { %15466 = vmatmul.mubr.msk.f32.gmra.mrb[60].mxu0 %vm7785_vm14, %v21775_v48 }
 0x892   : > { %15468 = vmatprep.mubr.msk.f32.mxu0 %vm17767_vm1, %v23355_v12 }
 0x895   : > { %15469 = vmatmul.mubr.msk.f32.gmra.mrb[62].mxu0 %vm7785_vm14, %v21781_v31 }
 0x896   : > { %15471 = vmatprep.mubr.msk.f32.mxu0 %vm17767_vm1, %v23355_v12 }
 0x899   : > { %15472 = vmatmul.mubr.msk.f32.gmra.mrb[64].mxu0 %vm7785_vm14, %v21787_v17 }
 0x89a   : > { %15474 = vmatprep.mubr.msk.f32.mxu0 %vm17767_vm1, %v23355_v12 }
 0x89d   : > { %15475 = vmatmul.mubr.msk.f32.gmra.mrb[66].mxu0 %vm7785_vm14, %v21793_v29 }
 0x89e   : > { %15477 = vmatprep.mubr.msk.f32.mxu0 %vm17767_vm1, %v23355_v12 }
 0x8a1   : > { %15478 = vmatmul.mubr.msk.f32.gmra.mrb[68].mxu0 %vm7785_vm14, %v21799_v0 }
 0x8a2   : > { %15480 = vmatprep.mubr.msk.f32.mxu0 %vm17767_vm1, %v23355_v12 }
 0x8a5   : > { %15481 = vmatmul.mubr.msk.f32.gmra.mrb[70].mxu0 %vm7785_vm14, %v21805_v43 }
 0x8a6   : > { %15483 = vmatprep.mubr.msk.f32.mxu0 %vm17767_vm1, %v23355_v12 }
 0x8a9   : > { %15484 = vmatmul.mubr.msk.f32.gmra.mrb[72].mxu0 %vm7785_vm14, %v21811_v57 }
 0x8aa   : > { %15486 = vmatprep.mubr.msk.f32.mxu0 %vm17767_vm1, %v23355_v12 }
 0x8ad   : > { %15487 = vmatmul.mubr.msk.f32.gmra.mrb[74].mxu0 %vm7785_vm14, %v21817_v30 }
 0x8ae   : > { %15489 = vmatprep.mubr.msk.f32.mxu0 %vm17767_vm1, %v23355_v12 }
 0x8b1   : > { %15490 = vmatmul.mubr.msk.f32.gmra.mrb[76].mxu0 %vm7785_vm14, %v21823_v51 }
 0x8b2   : > { %15492 = vmatprep.mubr.msk.f32.mxu0 %vm17767_vm1, %v23355_v12 }
 0x8b5   : > { %15493 = vmatmul.mubr.msk.f32.gmra.mrb[78].mxu0 %vm7785_vm14, %v21829_v44 }
 0x8b6   : > { %15495 = vmatprep.mubr.msk.f32.mxu0 %vm17767_vm1, %v23355_v12 }
 0x8b9   : > { %15496 = vmatmul.mubr.msk.f32.gmra.mrb[80].mxu0 %vm7785_vm14, %v21835_v2 }
 0x8ba   : > { %15498 = vmatprep.mubr.msk.f32.mxu0 %vm17767_vm1, %v23355_v12 }
 0x8bd   : > { %15499 = vmatmul.mubr.msk.f32.gmra.mrb[82].mxu0 %vm7785_vm14, %v21841_v27 }
 0x8be   : > { %15501 = vmatprep.mubr.msk.f32.mxu0 %vm17767_vm1, %v23355_v12 }
 0x8c1   : > { %15502 = vmatmul.mubr.msk.f32.gmra.mrb[84].mxu0 %vm7785_vm14, %v21847_v55 }
 0x8c2   : > { %15504 = vmatprep.mubr.msk.f32.mxu0 %vm17767_vm1, %v23355_v12 }
 0x8c5   : > { %15505 = vmatmul.mubr.msk.f32.gmra.mrb[86].mxu0 %vm7785_vm14, %v21853_v20 }
 0x8c6   : > { %15507 = vmatprep.mubr.msk.f32.mxu0 %vm17767_vm1, %v23355_v12 }
 0x8c9   : > { %15508 = vmatmul.mubr.msk.f32.gmra.mrb[88].mxu0 %vm7785_vm14, %v21859_v41 }
 0x8ca   : > { %15510 = vmatprep.mubr.msk.f32.mxu0 %vm17767_vm1, %v23355_v12 }
 0x8cd   : > { %15511 = vmatmul.mubr.msk.f32.gmra.mrb[90].mxu0 %vm7785_vm14, %v21865_v50 }
 0x8ce   : > { %15513 = vmatprep.mubr.msk.f32.mxu0 %vm17767_vm1, %v23355_v12 }
 0x8d1   : > { %15514 = vmatmul.mubr.msk.f32.gmra.mrb[92].mxu0 %vm7785_vm14, %v21871_v15 }
 0x8d2   : > { %15516 = vmatprep.mubr.msk.f32.mxu0 %vm17767_vm1, %v23355_v12 }
 0x8d5   : > { %15517 = vmatmul.mubr.msk.f32.gmra.mrb[94].mxu0 %vm7785_vm14, %v21877_v61 }
 0x8d6   : > { %15519 = vmatprep.mubr.msk.f32.mxu0 %vm17767_vm1, %v23355_v12 }
 0x8d9   : > { %15520 = vmatmul.mubr.msk.f32.gmra.mrb[96].mxu0 %vm7785_vm14, %v21883_v9 }
 0x8da   : > { %15522 = vmatprep.mubr.msk.f32.mxu0 %vm17767_vm1, %v23355_v12 }
 0x8dd   : > { %15523 = vmatmul.mubr.msk.f32.gmra.mrb[98].mxu0 %vm7785_vm14, %v8797_v49  ;;  %v9105_v49 = vld [vmem:[#allocation3 + $0x78] sm:$0xff] }
 0x8de   : > { %15533 = vmatprep.mubr.msk.f32.mxu0 %vm17767_vm1, %v23355_v12 }
 0x8e1   : > { %15534 = vmatmul.mubr.msk.f32.vlgmr.msra.gmra.mrb[50].mxu0 %vm7785_vm14, %v9092_v63  ;;  %v9109_v63 = vld [vmem:[#allocation3 + $0x98] sm:$0xff] }
 0x8e2   : > { %15536 = vmatprep.mubr.msk.f32.mxu0 %vm17767_vm1, %v23355_v12  ;;  %16125 = vmatpush3.bf16.msra.mxu0 %v16124_v8  ;;  %v9106_v8 = vld [vmem:[#allocation3 + $0x80] sm:$0xff] }
 0x8e3   : > { %16126 = vmatprep.subr.bf16.mxu0 %v23381_v35 }
 0x8e5   : > { %15537 = vmatmul.mubr.msk.f32.gmra.mrb[52].mxu0 %vm7785_vm14, %v9093_v45  ;;  %v9111_v45 = vld [vmem:[#allocation3 + $0xa8] sm:$0xff] }
 0x8e6   : > { %15539 = vmatprep.mubr.msk.f32.mxu0 %vm17767_vm1, %v23355_v12  ;;  %16128 = vmatpush3.bf16.msra.mxu0 %v16127_v13  ;;  %v9110_v13 = vld [vmem:[#allocation3 + $0xa0] sm:$0xff] }
 0x8e7   : > { %16129 = vmatprep.subr.bf16.mxu0 %v23381_v35 }
 0x8e9   : > { %15540 = vmatmul.mubr.msk.f32.gmra.mrb[54].mxu0 %vm7785_vm14, %v9094_v56  ;;  %v9112_v56 = vld [vmem:[#allocation3 + $0xb0] sm:$0xff] }
 0x8ea   : > { %15542 = vmatprep.mubr.msk.f32.mxu0 %vm17767_vm1, %v23355_v12 }
 0x8ed   : > { %15543 = vmatmul.mubr.msk.f32.gmra.mrb[56].mxu0 %vm7785_vm14, %v9095_v60  ;;  %v9113_v60 = vld [vmem:[#allocation3 + $0xb8] sm:$0xff] }
 0x8ee   : > { %15545 = vmatprep.mubr.msk.f32.mxu0 %vm17767_vm1, %v23355_v12 }
 0x8f1   : > { %15546 = vmatmul.mubr.msk.f32.gmra.mrb[58].mxu0 %vm7785_vm14, %v9096_v10  ;;  %v9114_v10 = vld [vmem:[#allocation3 + $0xc0] sm:$0xff] }
 0x8f2   : > { %15548 = vmatprep.mubr.msk.f32.mxu0 %vm17767_vm1, %v23355_v12 }
 0x8f5   : > { %15549 = vmatmul.mubr.msk.f32.gmra.mrb[60].mxu0 %vm7785_vm14, %v9097_v1  ;;  %v9115_v1 = vld [vmem:[#allocation3 + $0xc8] sm:$0xff] }
 0x8f6   : > { %15551 = vmatprep.mubr.msk.f32.mxu0 %vm17767_vm1, %v23355_v12 }
 0x8f9   : > { %15552 = vmatmul.mubr.msk.f32.gmra.mrb[62].mxu0 %vm7785_vm14, %v9098_v53  ;;  %v9755_v53 = vld [vmem:[%s23313_s7 + $0xc0] sm:$0xff] }
 0x8fa   : > { %15554 = vmatprep.mubr.msk.f32.mxu0 %vm17767_vm1, %v23355_v12 }
 0x8fd   : > { %15555 = vmatmul.mubr.msk.f32.gmra.mrb[64].mxu0 %vm7785_vm14, %v9099_v54  ;;  %v9756_v54 = vld [vmem:[%s23313_s7 + $0xc8] sm:$0xff] }
 0x8fe   : > { %15557 = vmatprep.mubr.msk.f32.mxu0 %vm17767_vm1, %v23355_v12 }
 0x901   : > { %15558 = vmatmul.mubr.msk.f32.gmra.mrb[66].mxu0 %vm7785_vm14, %v9100_v4  ;;  %v9116_v4 = vld [vmem:[#allocation3 + $0xd0] sm:$0xf] }
 0x902   : > { %15560 = vmatprep.mubr.msk.f32.mxu0 %vm17767_vm1, %v23355_v12 }
 0x905   : > { %15561 = vmatmul.mubr.msk.f32.gmra.mrb[68].mxu0 %vm7785_vm14, %v9101_v59  ;;  %v16130_v59 = vpack.c.bf16 %v9756_v54, %v9755_v53  ;;  %v9754_v53 = vld [vmem:[#allocation3 + $0xdd] sm:$0xf] }
 0x906   : > { %15563 = vmatprep.mubr.msk.f32.mxu0 %vm17767_vm1, %v23355_v12  ;;  %v10393_v54 = vld [vmem:[%s23313_s7 + $0x100] sm:$0xff] }
 0x909   : > { %15564 = vmatmul.mubr.msk.f32.gmra.mrb[70].mxu0 %vm7785_vm14, %v9102_v6  ;;  %v9757_v6 = vld [vmem:[%s23313_s7 + $0xd0] sm:$0xff] }
 0x90a   : > { %15566 = vmatprep.mubr.msk.f32.mxu0 %vm17767_vm1, %v23355_v12 }
 0x90d   : > { %15567 = vmatmul.mubr.msk.f32.gmra.mrb[72].mxu0 %vm7785_vm14, %v9103_v18  ;;  %v9758_v18 = vld [vmem:[%s23313_s7 + $0xd8] sm:$0xff] }
 0x90e   : > { %15569 = vmatprep.mubr.msk.f32.mxu0 %vm17767_vm1, %v23355_v12 }
 0x911   : > { %15570 = vmatmul.mubr.msk.f32.gmra.mrb[74].mxu0 %vm7785_vm14, %v9104_v42  ;;  %v16133_v42 = vpack.c.bf16 %v9758_v18, %v9757_v6  ;;  %v10395_v6 = vld [vmem:[%s23313_s7 + $0x110] sm:$0xff]  ;;  %v10396_v18 = vld [vmem:[%s23313_s7 + $0x118] sm:$0xff] }
 0x912   : > { %15572 = vmatprep.mubr.msk.f32.mxu0 %vm17767_vm1, %v23355_v12 }
 0x915   : > { %15573 = vmatmul.mubr.msk.f32.gmra.mrb[76].mxu0 %vm7785_vm14, %v9105_v49  ;;  %v9743_v49 = vld [vmem:[#allocation3 + $0x85] sm:$0xff] }
 0x916   : > { %15575 = vmatprep.mubr.msk.f32.mxu0 %vm17767_vm1, %v23355_v12 }
 0x919   : > { %15576 = vmatmul.mubr.msk.f32.gmra.mrb[78].mxu0 %vm7785_vm14, %v9106_v8  ;;  %v9744_v8 = vld [vmem:[#allocation3 + $0x8d] sm:$0xff] }
 0x91a   : > { %15578 = vmatprep.mubr.msk.f32.mxu0 %vm17767_vm1, %v23355_v12 }
 0x91d   : > { %15579 = vmatmul.mubr.msk.f32.gmra.mrb[80].mxu0 %vm7785_vm14, %v9107_v5  ;;  %v9745_v5 = vld [vmem:[#allocation3 + $0x95] sm:$0xff] }
 0x91e   : > { %15581 = vmatprep.mubr.msk.f32.mxu0 %vm17767_vm1, %v23355_v12 }
 0x921   : > { %15582 = vmatmul.mubr.msk.f32.gmra.mrb[82].mxu0 %vm7785_vm14, %v9108_v26  ;;  %v9746_v26 = vld [vmem:[#allocation3 + $0x9d] sm:$0xff] }
 0x922   : > { %15584 = vmatprep.mubr.msk.f32.mxu0 %vm17767_vm1, %v23355_v12 }
 0x925   : > { %15585 = vmatmul.mubr.msk.f32.gmra.mrb[84].mxu0 %vm7785_vm14, %v9109_v63  ;;  %v9747_v63 = vld [vmem:[#allocation3 + $0xa5] sm:$0xff] }
 0x926   : > { %15587 = vmatprep.mubr.msk.f32.mxu0 %vm17767_vm1, %v23355_v12 }
 0x929   : > { %15588 = vmatmul.mubr.msk.f32.gmra.mrb[86].mxu0 %vm7785_vm14, %v9110_v13  ;;  %v9748_v13 = vld [vmem:[#allocation3 + $0xad] sm:$0xff] }
 0x92a   : > { %15590 = vmatprep.mubr.msk.f32.mxu0 %vm17767_vm1, %v23355_v12 }
 0x92d   : > { %15591 = vmatmul.mubr.msk.f32.gmra.mrb[88].mxu0 %vm7785_vm14, %v9111_v45  ;;  %v9749_v45 = vld [vmem:[#allocation3 + $0xb5] sm:$0xff] }
 0x92e   : > { %15593 = vmatprep.mubr.msk.f32.mxu0 %vm17767_vm1, %v23355_v12 }
 0x931   : > { %15594 = vmatmul.mubr.msk.f32.gmra.mrb[90].mxu0 %vm7785_vm14, %v9112_v56  ;;  %v9750_v56 = vld [vmem:[#allocation3 + $0xbd] sm:$0xff] }
 0x932   : > { %15596 = vmatprep.mubr.msk.f32.mxu0 %vm17767_vm1, %v23355_v12 }
 0x935   : > { %15597 = vmatmul.mubr.msk.f32.gmra.mrb[92].mxu0 %vm7785_vm14, %v9113_v60  ;;  %v9751_v60 = vld [vmem:[#allocation3 + $0xc5] sm:$0xff] }
 0x936   : > { %15599 = vmatprep.mubr.msk.f32.mxu0 %vm17767_vm1, %v23355_v12 }
 0x939   : > { %15600 = vmatmul.mubr.msk.f32.gmra.mrb[94].mxu0 %vm7785_vm14, %v9114_v10  ;;  %v9752_v10 = vld [vmem:[#allocation3 + $0xcd] sm:$0xff] }
 0x93a   : > { %15602 = vmatprep.mubr.msk.f32.mxu0 %vm17767_vm1, %v23355_v12 }
 0x93d   : > { %15603 = vmatmul.mubr.msk.f32.gmra.mrb[96].mxu0 %vm7785_vm14, %v9115_v1  ;;  %v9753_v1 = vld [vmem:[#allocation3 + $0xd5] sm:$0xff] }
 0x93e   : > { %15605 = vmatprep.mubr.msk.f32.mxu0 %vm17767_vm1, %v23355_v12 }
 0x941   : > { %15606 = vmatmul.mubr.msk.f32.gmra.mrb[98].mxu0 %vm7785_vm14, %v9116_v4  ;;  %v10394_v4 = vld [vmem:[%s23313_s7 + $0x108] sm:$0xff] }
 0x942   : > { %15616 = vmatprep.mubr.msk.f32.mxu0 %vm17767_vm1, %v23355_v12 }
 0x945   : > { %15617 = vmatmul.mubr.msk.f32.vlgmr.msra.gmra.mrb[50].mxu0 %vm7785_vm14, %v21513_v7  ;;  %v9433_v7 = vld [vmem:[#allocation3 + $0xc1] sm:$0xff] }
 0x946   : > { %15619 = vmatprep.mubr.msk.f32.mxu0 %vm17767_vm1, %v23355_v12  ;;  %16131 = vmatpush3.bf16.msra.mxu0 %v16130_v59  ;;  %v16142_v59 = vpack.c.bf16 %v10394_v4, %v10393_v54 }
 0x947   : > { %16132 = vmatprep.subr.bf16.mxu0 %v23381_v35 }
 0x949   : > { %15620 = vmatmul.mubr.msk.f32.gmra.mrb[52].mxu0 %vm7785_vm14, %v21519_v47  ;;  %v9434_v47 = vld [vmem:[#allocation3 + $0xc9] sm:$0xff] }
 0x94a   : > { %15622 = vmatprep.mubr.msk.f32.mxu0 %vm17767_vm1, %v23355_v12  ;;  %16134 = vmatpush3.bf16.msra.mxu0 %v16133_v42  ;;  %v10049_v42 = vld [vmem:[#allocation3 + $0x1e] sm:$0xff] }
 0x94b   : > { %16135 = vmatprep.subr.bf16.mxu0 %v23381_v35 }
 0x94d   : > { %15623 = vmatmul.mubr.msk.f32.gmra.mrb[54].mxu0 %vm7785_vm14, %v21525_v23  ;;  %v10074_v23 = vld [vmem:[%s23313_s7 + $0xe0] sm:$0xff] }
 0x94e   : > { %15625 = vmatprep.mubr.msk.f32.mxu0 %vm17767_vm1, %v23355_v12 }
 0x951   : > { %15626 = vmatmul.mubr.msk.f32.gmra.mrb[56].mxu0 %vm7785_vm14, %v21531_v38  ;;  %v10075_v38 = vld [vmem:[%s23313_s7 + $0xe8] sm:$0xff] }
 0x952   : > { %15628 = vmatprep.mubr.msk.f32.mxu0 %vm17767_vm1, %v23355_v12 }
 0x955   : > { %15629 = vmatmul.mubr.msk.f32.gmra.mrb[58].mxu0 %vm7785_vm14, %v21537_v62  ;;  %v9435_v62 = vld [vmem:[#allocation3 + $0xd1] sm:$0xf] }
 0x956   : > { %15631 = vmatprep.mubr.msk.f32.mxu0 %vm17767_vm1, %v23355_v12 }
 0x959   : > { %15632 = vmatmul.mubr.msk.f32.gmra.mrb[60].mxu0 %vm7785_vm14, %v21543_v21  ;;  %v16136_v21 = vpack.c.bf16 %v10075_v38, %v10074_v23  ;;  %v10051_v23 = vld [vmem:[#allocation3 + $0x2e] sm:$0xff]  ;;  %v10052_v38 = vld [vmem:[#allocation3 + $0x36] sm:$0xff] }
 0x95a   : > { %15634 = vmatprep.mubr.msk.f32.mxu0 %vm17767_vm1, %v23355_v12 }
 0x95d   : > { %15635 = vmatmul.mubr.msk.f32.gmra.mrb[62].mxu0 %vm7785_vm14, %v21549_v37  ;;  %v10076_v37 = vld [vmem:[%s23313_s7 + $0xf0] sm:$0xff] }
 0x95e   : > { %15637 = vmatprep.mubr.msk.f32.mxu0 %vm17767_vm1, %v23355_v12 }
 0x961   : > { %15638 = vmatmul.mubr.msk.f32.gmra.mrb[64].mxu0 %vm7785_vm14, %v21555_v40  ;;  %v10077_v40 = vld [vmem:[%s23313_s7 + $0xf8] sm:$0xff] }
 0x962   : > { %15640 = vmatprep.mubr.msk.f32.mxu0 %vm17767_vm1, %v23355_v12 }
 0x965   : > { %15641 = vmatmul.mubr.msk.f32.gmra.mrb[66].mxu0 %vm7785_vm14, %v21561_v36  ;;  %v9730_v36 = vld [vmem:[#allocation3 + $0x1d] sm:$0xff] }
 0x966   : > { %15643 = vmatprep.mubr.msk.f32.mxu0 %vm17767_vm1, %v23355_v12 }
 0x969   : > { %15644 = vmatmul.mubr.msk.f32.gmra.mrb[68].mxu0 %vm7785_vm14, %v21567_v11  ;;  %v16139_v11 = vpack.c.bf16 %v10077_v40, %v10076_v37  ;;  %v10055_v37 = vld [vmem:[#allocation3 + $0x4e] sm:$0xff]  ;;  %v10056_v40 = vld [vmem:[#allocation3 + $0x56] sm:$0xff] }
 0x96a   : > { %15646 = vmatprep.mubr.msk.f32.mxu0 %vm17767_vm1, %v23355_v12 }
 0x96d   : > { %15647 = vmatmul.mubr.msk.f32.gmra.mrb[70].mxu0 %vm7785_vm14, %v21573_v25  ;;  %v9731_v25 = vld [vmem:[#allocation3 + $0x25] sm:$0xff] }
 0x96e   : > { %15649 = vmatprep.mubr.msk.f32.mxu0 %vm17767_vm1, %v23355_v12 }
 0x971   : > { %15650 = vmatmul.mubr.msk.f32.gmra.mrb[72].mxu0 %vm7785_vm14, %v21579_v52  ;;  %v9732_v52 = vld [vmem:[#allocation3 + $0x2d] sm:$0xff] }
 0x972   : > { %15652 = vmatprep.mubr.msk.f32.mxu0 %vm17767_vm1, %v23355_v12 }
 0x975   : > { %15653 = vmatmul.mubr.msk.f32.gmra.mrb[74].mxu0 %vm7785_vm14, %v21585_v46  ;;  %v9733_v46 = vld [vmem:[#allocation3 + $0x35] sm:$0xff] }
 0x976   : > { %15655 = vmatprep.mubr.msk.f32.mxu0 %vm17767_vm1, %v23355_v12 }
 0x979   : > { %15656 = vmatmul.mubr.msk.f32.gmra.mrb[76].mxu0 %vm7785_vm14, %v21591_v14  ;;  %v9734_v14 = vld [vmem:[#allocation3 + $0x3d] sm:$0xff] }
 0x97a   : > { %15658 = vmatprep.mubr.msk.f32.mxu0 %vm17767_vm1, %v23355_v12 }
 0x97d   : > { %15659 = vmatmul.mubr.msk.f32.gmra.mrb[78].mxu0 %vm7785_vm14, %v21597_v28  ;;  %v9735_v28 = vld [vmem:[#allocation3 + $0x45] sm:$0xff] }
 0x97e   : > { %15661 = vmatprep.mubr.msk.f32.mxu0 %vm17767_vm1, %v23355_v12 }
 0x981   : > { %15662 = vmatmul.mubr.msk.f32.gmra.mrb[80].mxu0 %vm7785_vm14, %v21603_v24  ;;  %v9736_v24 = vld [vmem:[#allocation3 + $0x4d] sm:$0xff] }
 0x982   : > { %15664 = vmatprep.mubr.msk.f32.mxu0 %vm17767_vm1, %v23355_v12 }
 0x985   : > { %15665 = vmatmul.mubr.msk.f32.gmra.mrb[82].mxu0 %vm7785_vm14, %v21609_v3  ;;  %v9737_v3 = vld [vmem:[#allocation3 + $0x55] sm:$0xff] }
 0x986   : > { %15667 = vmatprep.mubr.msk.f32.mxu0 %vm17767_vm1, %v23355_v12 }
 0x989   : > { %15668 = vmatmul.mubr.msk.f32.gmra.mrb[84].mxu0 %vm7785_vm14, %v21615_v58  ;;  %v9738_v58 = vld [vmem:[#allocation3 + $0x5d] sm:$0xff] }
 0x98a   : > { %15670 = vmatprep.mubr.msk.f32.mxu0 %vm17767_vm1, %v23355_v12 }
 0x98d   : > { %15671 = vmatmul.mubr.msk.f32.gmra.mrb[86].mxu0 %vm7785_vm14, %v21621_v32  ;;  %v9739_v32 = vld [vmem:[#allocation3 + $0x65] sm:$0xff] }
 0x98e   : > { %15673 = vmatprep.mubr.msk.f32.mxu0 %vm17767_vm1, %v23355_v12 }
 0x991   : > { %15674 = vmatmul.mubr.msk.f32.gmra.mrb[88].mxu0 %vm7785_vm14, %v21627_v22  ;;  %v9740_v22 = vld [vmem:[#allocation3 + $0x6d] sm:$0xff] }
 0x992   : > { %15676 = vmatprep.mubr.msk.f32.mxu0 %vm17767_vm1, %v23355_v12 }
 0x995   : > { %15677 = vmatmul.mubr.msk.f32.gmra.mrb[90].mxu0 %vm7785_vm14, %v21633_v34  ;;  %v9741_v34 = vld [vmem:[#allocation3 + $0x75] sm:$0xff] }
 0x996   : > { %15679 = vmatprep.mubr.msk.f32.mxu0 %vm17767_vm1, %v23355_v12 }
 0x999   : > { %15680 = vmatmul.mubr.msk.f32.gmra.mrb[92].mxu0 %vm7785_vm14, %v21639_v39  ;;  %v9742_v39 = vld [vmem:[#allocation3 + $0x7d] sm:$0xff] }
 0x99a   : > { %15682 = vmatprep.mubr.msk.f32.mxu0 %vm17767_vm1, %v23355_v12 }
 0x99d   : > { %15683 = vmatmul.mubr.msk.f32.gmra.mrb[94].mxu0 %vm7785_vm14, %v9433_v7  ;;  %v16145_v7 = vpack.c.bf16 %v10396_v18, %v10395_v6 }
 0x99e   : > { %15685 = vmatprep.mubr.msk.f32.mxu0 %vm17767_vm1, %v23355_v12 }
 0x9a1   : > { %15686 = vmatmul.mubr.msk.f32.gmra.mrb[96].mxu0 %vm7785_vm14, %v9434_v47  ;;  %v10050_v47 = vld [vmem:[#allocation3 + $0x26] sm:$0xff] }
 0x9a2   : > { %15688 = vmatprep.mubr.msk.f32.mxu0 %vm17767_vm1, %v23355_v12 }
 0x9a5   : > { %15689 = vmatmul.mubr.msk.f32.gmra.mrb[98].mxu0 %vm7785_vm14, %v9435_v62  ;;  %v10053_v62 = vld [vmem:[#allocation3 + $0x3e] sm:$0xff] }
 0x9a6   : > { %15699 = vmatprep.mubr.msk.f32.mxu0 %vm17767_vm1, %v23355_v12 }
 0x9a9   : > { %15700 = vmatmul.mubr.msk.f32.vlgmr.msra.gmra.mrb[50].mxu0 %vm7785_vm14, %v9730_v36  ;;  %v10057_v36 = vld [vmem:[#allocation3 + $0x5e] sm:$0xff] }
 0x9aa   : > { %15702 = vmatprep.mubr.msk.f32.mxu0 %vm17767_vm1, %v23355_v12  ;;  %16137 = vmatpush3.bf16.msra.mxu0 %v16136_v21  ;;  %v10054_v21 = vld [vmem:[#allocation3 + $0x46] sm:$0xff] }
 0x9ab   : > { %16138 = vmatprep.subr.bf16.mxu0 %v23381_v35 }
 0x9ad   : > { %15703 = vmatmul.mubr.msk.f32.gmra.mrb[52].mxu0 %vm7785_vm14, %v9731_v25  ;;  %v10059_v25 = vld [vmem:[#allocation3 + $0x6e] sm:$0xff] }
 0x9ae   : > { %15705 = vmatprep.mubr.msk.f32.mxu0 %vm17767_vm1, %v23355_v12  ;;  %16140 = vmatpush3.bf16.msra.mxu0 %v16139_v11  ;;  %v10058_v11 = vld [vmem:[#allocation3 + $0x66] sm:$0xff] }
 0x9af   : > { %16141 = vmatprep.subr.bf16.mxu0 %v23381_v35 }
 0x9b1   : > { %15706 = vmatmul.mubr.msk.f32.gmra.mrb[54].mxu0 %vm7785_vm14, %v9732_v52  ;;  %v10060_v52 = vld [vmem:[#allocation3 + $0x76] sm:$0xff] }
 0x9b2   : > { %15708 = vmatprep.mubr.msk.f32.mxu0 %vm17767_vm1, %v23355_v12 }
 0x9b5   : > { %15709 = vmatmul.mubr.msk.f32.gmra.mrb[56].mxu0 %vm7785_vm14, %v9733_v46  ;;  %v10061_v46 = vld [vmem:[#allocation3 + $0x7e] sm:$0xff] }
 0x9b6   : > { %15711 = vmatprep.mubr.msk.f32.mxu0 %vm17767_vm1, %v23355_v12 }
 0x9b9   : > { %15712 = vmatmul.mubr.msk.f32.gmra.mrb[58].mxu0 %vm7785_vm14, %v9734_v14  ;;  %v10062_v14 = vld [vmem:[#allocation3 + $0x86] sm:$0xff] }
 0x9ba   : > { %15714 = vmatprep.mubr.msk.f32.mxu0 %vm17767_vm1, %v23355_v12 }
 0x9bd   : > { %15715 = vmatmul.mubr.msk.f32.gmra.mrb[60].mxu0 %vm7785_vm14, %v9735_v28  ;;  %v10063_v28 = vld [vmem:[#allocation3 + $0x8e] sm:$0xff] }
 0x9be   : > { %15717 = vmatprep.mubr.msk.f32.mxu0 %vm17767_vm1, %v23355_v12 }
 0x9c1   : > { %15718 = vmatmul.mubr.msk.f32.gmra.mrb[62].mxu0 %vm7785_vm14, %v9736_v24  ;;  %v10064_v24 = vld [vmem:[#allocation3 + $0x96] sm:$0xff] }
 0x9c2   : > { %15720 = vmatprep.mubr.msk.f32.mxu0 %vm17767_vm1, %v23355_v12 }
 0x9c5   : > { %15721 = vmatmul.mubr.msk.f32.gmra.mrb[64].mxu0 %vm7785_vm14, %v9737_v3  ;;  %v10065_v3 = vld [vmem:[#allocation3 + $0x9e] sm:$0xff] }
 0x9c6   : > { %15723 = vmatprep.mubr.msk.f32.mxu0 %vm17767_vm1, %v23355_v12 }
 0x9c9   : > { %15724 = vmatmul.mubr.msk.f32.gmra.mrb[66].mxu0 %vm7785_vm14, %v9738_v58  ;;  %v10066_v58 = vld [vmem:[#allocation3 + $0xa6] sm:$0xff] }
 0x9ca   : > { %15726 = vmatprep.mubr.msk.f32.mxu0 %vm17767_vm1, %v23355_v12 }
 0x9cd   : > { %15727 = vmatmul.mubr.msk.f32.gmra.mrb[68].mxu0 %vm7785_vm14, %v9739_v32  ;;  %v10067_v32 = vld [vmem:[#allocation3 + $0xae] sm:$0xff] }
 0x9ce   : > { %15729 = vmatprep.mubr.msk.f32.mxu0 %vm17767_vm1, %v23355_v12 }
 0x9d1   : > { %15730 = vmatmul.mubr.msk.f32.gmra.mrb[70].mxu0 %vm7785_vm14, %v9740_v22  ;;  %v10068_v22 = vld [vmem:[#allocation3 + $0xb6] sm:$0xff] }
 0x9d2   : > { %15732 = vmatprep.mubr.msk.f32.mxu0 %vm17767_vm1, %v23355_v12 }
 0x9d5   : > { %15733 = vmatmul.mubr.msk.f32.gmra.mrb[72].mxu0 %vm7785_vm14, %v9741_v34  ;;  %v10069_v34 = vld [vmem:[#allocation3 + $0xbe] sm:$0xff] }
 0x9d6   : > { %15735 = vmatprep.mubr.msk.f32.mxu0 %vm17767_vm1, %v23355_v12 }
 0x9d9   : > { %15736 = vmatmul.mubr.msk.f32.gmra.mrb[74].mxu0 %vm7785_vm14, %v9742_v39  ;;  %v10070_v39 = vld [vmem:[#allocation3 + $0xc6] sm:$0xff] }
 0x9da   : > { %15738 = vmatprep.mubr.msk.f32.mxu0 %vm17767_vm1, %v23355_v12 }
 0x9dd   : > { %15739 = vmatmul.mubr.msk.f32.gmra.mrb[76].mxu0 %vm7785_vm14, %v9743_v49  ;;  %v10071_v49 = vld [vmem:[#allocation3 + $0xce] sm:$0xff] }
 0x9de   : > { %15741 = vmatprep.mubr.msk.f32.mxu0 %vm17767_vm1, %v23355_v12 }
 0x9e1   : > { %15742 = vmatmul.mubr.msk.f32.gmra.mrb[78].mxu0 %vm7785_vm14, %v9744_v8  ;;  %v10072_v8 = vld [vmem:[#allocation3 + $0xd6] sm:$0xff] }
 0x9e2   : > { %15744 = vmatprep.mubr.msk.f32.mxu0 %vm17767_vm1, %v23355_v12 }
 0x9e5   : > { %15745 = vmatmul.mubr.msk.f32.gmra.mrb[80].mxu0 %vm7785_vm14, %v9745_v5  ;;  %v10073_v5 = vld [vmem:[#allocation3 + $0xde] sm:$0xf] }
 0x9e6   : > { %15747 = vmatprep.mubr.msk.f32.mxu0 %vm17767_vm1, %v23355_v12 }
 0x9e9   : > { %15748 = vmatmul.mubr.msk.f32.gmra.mrb[82].mxu0 %vm7785_vm14, %v9746_v26 }
 0x9ea   : > { %15750 = vmatprep.mubr.msk.f32.mxu0 %vm17767_vm1, %v23355_v12 }
 0x9ed   : > { %15751 = vmatmul.mubr.msk.f32.gmra.mrb[84].mxu0 %vm7785_vm14, %v9747_v63 }
 0x9ee   : > { %15753 = vmatprep.mubr.msk.f32.mxu0 %vm17767_vm1, %v23355_v12 }
 0x9f1   : > { %15754 = vmatmul.mubr.msk.f32.gmra.mrb[86].mxu0 %vm7785_vm14, %v9748_v13 }
 0x9f2   : > { %15756 = vmatprep.mubr.msk.f32.mxu0 %vm17767_vm1, %v23355_v12 }
 0x9f5   : > { %15757 = vmatmul.mubr.msk.f32.gmra.mrb[88].mxu0 %vm7785_vm14, %v9749_v45 }
 0x9f6   : > { %15759 = vmatprep.mubr.msk.f32.mxu0 %vm17767_vm1, %v23355_v12 }
 0x9f9   : > { %15760 = vmatmul.mubr.msk.f32.gmra.mrb[90].mxu0 %vm7785_vm14, %v9750_v56 }
 0x9fa   : > { %15762 = vmatprep.mubr.msk.f32.mxu0 %vm17767_vm1, %v23355_v12 }
 0x9fd   : > { %15763 = vmatmul.mubr.msk.f32.gmra.mrb[92].mxu0 %vm7785_vm14, %v9751_v60 }
 0x9fe   : > { %15765 = vmatprep.mubr.msk.f32.mxu0 %vm17767_vm1, %v23355_v12 }
 0xa01   : > { %15766 = vmatmul.mubr.msk.f32.gmra.mrb[94].mxu0 %vm7785_vm14, %v9752_v10 }
 0xa02   : > { %15768 = vmatprep.mubr.msk.f32.mxu0 %vm17767_vm1, %v23355_v12 }
 0xa05   : > { %15769 = vmatmul.mubr.msk.f32.gmra.mrb[96].mxu0 %vm7785_vm14, %v9753_v1 }
 0xa06   : > { %15771 = vmatprep.mubr.msk.f32.mxu0 %vm17767_vm1, %v23355_v12 }
 0xa09   : > { %15772 = vmatmul.mubr.msk.f32.gmra.mrb[98].mxu0 %vm7785_vm14, %v9754_v53 }
 0xa0a   : > { %15782 = vmatprep.mubr.msk.f32.mxu0 %vm17767_vm1, %v23355_v12 }
 0xa0d   : > { %15783 = vmatmul.mubr.msk.f32.vlgmr.msra.gmra.mrb[50].mxu0 %vm7785_vm14, %v10049_v42 }
 0xa0e   : > { %15785 = vmatprep.mubr.msk.f32.mxu0 %vm17767_vm1, %v23355_v12  ;;  %16143 = vmatpush3.bf16.msra.mxu0 %v16142_v59 }
 0xa0f   : > { %16144 = vmatprep.subr.bf16.mxu0 %v23381_v35 }
 0xa11   : > { %15786 = vmatmul.mubr.msk.f32.gmra.mrb[52].mxu0 %vm7785_vm14, %v10050_v47 }
 0xa12   : > { %15788 = vmatprep.mubr.msk.f32.mxu0 %vm17767_vm1, %v23355_v12  ;;  %16146 = vmatpush3.bf16.msra.mxu0 %v16145_v7 }
 0xa15   : > { %15789 = vmatmul.mubr.msk.f32.gmra.mrb[54].mxu0 %vm7785_vm14, %v10051_v23 }
 0xa16   : > { %15791 = vmatprep.mubr.msk.f32.mxu0 %vm17767_vm1, %v23355_v12 }
 0xa19   : > { %15792 = vmatmul.mubr.msk.f32.gmra.mrb[56].mxu0 %vm7785_vm14, %v10052_v38 }
 0xa1a   : > { %15794 = vmatprep.mubr.msk.f32.mxu0 %vm17767_vm1, %v23355_v12 }
 0xa1d   : > { %15795 = vmatmul.mubr.msk.f32.gmra.mrb[58].mxu0 %vm7785_vm14, %v10053_v62 }
 0xa1e   : > { %15797 = vmatprep.mubr.msk.f32.mxu0 %vm17767_vm1, %v23355_v12 }
 0xa21   : > { %15798 = vmatmul.mubr.msk.f32.gmra.mrb[60].mxu0 %vm7785_vm14, %v10054_v21 }
 0xa22   : > { %15800 = vmatprep.mubr.msk.f32.mxu0 %vm17767_vm1, %v23355_v12 }
 0xa25   : > { %15801 = vmatmul.mubr.msk.f32.gmra.mrb[62].mxu0 %vm7785_vm14, %v10055_v37 }
 0xa26   : > { %15803 = vmatprep.mubr.msk.f32.mxu0 %vm17767_vm1, %v23355_v12 }
 0xa29   : > { %15804 = vmatmul.mubr.msk.f32.gmra.mrb[64].mxu0 %vm7785_vm14, %v10056_v40 }
 0xa2a   : > { %15806 = vmatprep.mubr.msk.f32.mxu0 %vm17767_vm1, %v23355_v12 }
 0xa2d   : > { %15807 = vmatmul.mubr.msk.f32.gmra.mrb[66].mxu0 %vm7785_vm14, %v10057_v36 }
 0xa2e   : > { %15809 = vmatprep.mubr.msk.f32.mxu0 %vm17767_vm1, %v23355_v12 }
 0xa31   : > { %15810 = vmatmul.mubr.msk.f32.gmra.mrb[68].mxu0 %vm7785_vm14, %v10058_v11 }
 0xa32   : > { %15812 = vmatprep.mubr.msk.f32.mxu0 %vm17767_vm1, %v23355_v12 }
 0xa35   : > { %15813 = vmatmul.mubr.msk.f32.gmra.mrb[70].mxu0 %vm7785_vm14, %v10059_v25 }
 0xa36   : > { %15815 = vmatprep.mubr.msk.f32.mxu0 %vm17767_vm1, %v23355_v12 }
 0xa39   : > { %15816 = vmatmul.mubr.msk.f32.gmra.mrb[72].mxu0 %vm7785_vm14, %v10060_v52 }
 0xa3a   : > { %15818 = vmatprep.mubr.msk.f32.mxu0 %vm17767_vm1, %v23355_v12 }
 0xa3d   : > { %15819 = vmatmul.mubr.msk.f32.gmra.mrb[74].mxu0 %vm7785_vm14, %v10061_v46 }
 0xa3e   : > { %15821 = vmatprep.mubr.msk.f32.mxu0 %vm17767_vm1, %v23355_v12 }
 0xa41   : > { %15822 = vmatmul.mubr.msk.f32.gmra.mrb[76].mxu0 %vm7785_vm14, %v10062_v14 }
 0xa42   : > { %15824 = vmatprep.mubr.msk.f32.mxu0 %vm17767_vm1, %v23355_v12 }
 0xa45   : > { %15825 = vmatmul.mubr.msk.f32.gmra.mrb[78].mxu0 %vm7785_vm14, %v10063_v28 }
 0xa46   : > { %15827 = vmatprep.mubr.msk.f32.mxu0 %vm17767_vm1, %v23355_v12 }
 0xa49   : > { %15828 = vmatmul.mubr.msk.f32.gmra.mrb[80].mxu0 %vm7785_vm14, %v10064_v24 }
 0xa4a   : > { %15830 = vmatprep.mubr.msk.f32.mxu0 %vm17767_vm1, %v23355_v12 }
 0xa4d   : > { %15831 = vmatmul.mubr.msk.f32.gmra.mrb[82].mxu0 %vm7785_vm14, %v10065_v3 }
 0xa4e   : > { %15833 = vmatprep.mubr.msk.f32.mxu0 %vm17767_vm1, %v23355_v12 }
 0xa51   : > { %15834 = vmatmul.mubr.msk.f32.gmra.mrb[84].mxu0 %vm7785_vm14, %v10066_v58 }
 0xa52   : > { %15836 = vmatprep.mubr.msk.f32.mxu0 %vm17767_vm1, %v23355_v12 }
 0xa55   : > { %15837 = vmatmul.mubr.msk.f32.gmra.mrb[86].mxu0 %vm7785_vm14, %v10067_v32 }
 0xa56   : > { %15839 = vmatprep.mubr.msk.f32.mxu0 %vm17767_vm1, %v23355_v12 }
 0xa59   : > { %15840 = vmatmul.mubr.msk.f32.gmra.mrb[88].mxu0 %vm7785_vm14, %v10068_v22 }
 0xa5a   : > { %15842 = vmatprep.mubr.msk.f32.mxu0 %vm17767_vm1, %v23355_v12 }
 0xa5d   : > { %15843 = vmatmul.mubr.msk.f32.gmra.mrb[90].mxu0 %vm7785_vm14, %v10069_v34 }
 0xa5e   : > { %15845 = vmatprep.mubr.msk.f32.mxu0 %vm17767_vm1, %v23355_v12 }
 0xa61   : > { %15846 = vmatmul.mubr.msk.f32.gmra.mrb[92].mxu0 %vm7785_vm14, %v10070_v39 }
 0xa62   : > { %15848 = vmatprep.mubr.msk.f32.mxu0 %vm17767_vm1, %v23355_v12 }
 0xa65   : > { %15849 = vmatmul.mubr.msk.f32.gmra.mrb[94].mxu0 %vm7785_vm14, %v10071_v49 }
 0xa66   : > { %15851 = vmatprep.mubr.msk.f32.mxu0 %vm17767_vm1, %v23355_v12 }
 0xa69   : > { %15852 = vmatmul.mubr.msk.f32.gmra.mrb[96].mxu0 %vm7785_vm14, %v10072_v8 }
 0xa6a   : > { %15854 = vmatprep.mubr.msk.f32.mxu0 %vm17767_vm1, %v23355_v12 }
 0xa6d   : > { %15855 = vmatmul.mubr.msk.f32.gmra.mrb[98].mxu0 %vm7785_vm14, %v10073_v5 }
 0xa6e   : > { %15865 = vmatprep.mubr.msk.f32.mxu0 %vm17767_vm1, %v23355_v12 }
 0xa71   : > { %15866 = vmatmul.mubr.msk.f32.vlgmr.msra.gmra.mrb[50].mxu0 %vm7785_vm14, %v21757_v16  ;;  %v10390_v16 = vld [vmem:[#allocation3 + $0xcf] sm:$0xff] }
 0xa72   : > { %15868 = vmatprep.mubr.msk.f32.mxu0 %vm17767_vm1, %v23355_v12 }
 0xa75   : > { %15869 = vmatmul.mubr.msk.f32.gmra.mrb[52].mxu0 %vm7785_vm14, %v21763_v33  ;;  %v10391_v33 = vld [vmem:[#allocation3 + $0xd7] sm:$0xff] }
 0xa76   : > { %15871 = vmatprep.mubr.msk.f32.mxu0 %vm17767_vm1, %v23355_v12 }
 0xa79   : > { %15872 = vmatmul.mubr.msk.f32.gmra.mrb[54].mxu0 %vm7785_vm14, %v21769_v19  ;;  %v10392_v19 = vld [vmem:[#allocation3 + $0xdf] sm:$0xf] }
 0xa7a   : > { %15874 = vmatprep.mubr.msk.f32.mxu0 %vm17767_vm1, %v23355_v12 }
 0xa7d   : > { %15875 = vmatmul.mubr.msk.f32.gmra.mrb[56].mxu0 %vm7785_vm14, %v21775_v48  ;;  %v22367_v48 = vld [vmem:[%s23314_s8] ss:$0 sm:$0xff] }
 0xa7e   : > { %15877 = vmatprep.mubr.msk.f32.mxu0 %vm17767_vm1, %v23355_v12 }
 0xa81   : > { %15878 = vmatmul.mubr.msk.f32.gmra.mrb[58].mxu0 %vm7785_vm14, %v21781_v31 }
 0xa82   : > { %15880 = vmatprep.mubr.msk.f32.mxu0 %vm17767_vm1, %v23355_v12 }
 0xa85   : > { %15881 = vmatmul.mubr.msk.f32.gmra.mrb[60].mxu0 %vm7785_vm14, %v21787_v17  ;;  %v22372_v17 = vld [vmem:[%s23315_s9] ss:$0 sm:$0xff] }
 0xa86   : > { %15883 = vmatprep.mubr.msk.f32.mxu0 %vm17767_vm1, %v23355_v12 }
 0xa89   : > { %15884 = vmatmul.mubr.msk.f32.gmra.mrb[62].mxu0 %vm7785_vm14, %v21793_v29 }
 0xa8a   : > { %15886 = vmatprep.mubr.msk.f32.mxu0 %vm17767_vm1, %v23355_v12 }
 0xa8d   : > { %15887 = vmatmul.mubr.msk.f32.gmra.mrb[64].mxu0 %vm7785_vm14, %v21799_v0 }
 0xa8e   : > { %15889 = vmatprep.mubr.msk.f32.mxu0 %vm17767_vm1, %v23355_v12 }
 0xa91   : > { %15890 = vmatmul.mubr.msk.f32.gmra.mrb[66].mxu0 %vm7785_vm14, %v21805_v43 }
 0xa92   : > { %15892 = vmatprep.mubr.msk.f32.mxu0 %vm17767_vm1, %v23355_v12 }
 0xa95   : > { %15893 = vmatmul.mubr.msk.f32.gmra.mrb[68].mxu0 %vm7785_vm14, %v21811_v57 }
 0xa96   : > { %15895 = vmatprep.mubr.msk.f32.mxu0 %vm17767_vm1, %v23355_v12 }
 0xa99   : > { %15896 = vmatmul.mubr.msk.f32.gmra.mrb[70].mxu0 %vm7785_vm14, %v21817_v30 }
 0xa9a   : > { %15898 = vmatprep.mubr.msk.f32.mxu0 %vm17767_vm1, %v23355_v12 }
 0xa9d   : > { %15899 = vmatmul.mubr.msk.f32.gmra.mrb[72].mxu0 %vm7785_vm14, %v21823_v51 }
 0xa9e   : > { %15901 = vmatprep.mubr.msk.f32.mxu0 %vm17767_vm1, %v23355_v12 }
 0xaa1   : > { %15902 = vmatmul.mubr.msk.f32.gmra.mrb[74].mxu0 %vm7785_vm14, %v21829_v44 }
 0xaa2   : > { %15904 = vmatprep.mubr.msk.f32.mxu0 %vm17767_vm1, %v23355_v12 }
 0xaa5   : > { %15905 = vmatmul.mubr.msk.f32.gmra.mrb[76].mxu0 %vm7785_vm14, %v21835_v2 }
 0xaa6   : > { %15907 = vmatprep.mubr.msk.f32.mxu0 %vm17767_vm1, %v23355_v12 }
 0xaa9   : > { %15908 = vmatmul.mubr.msk.f32.gmra.mrb[78].mxu0 %vm7785_vm14, %v21841_v27 }
 0xaaa   : > { %15910 = vmatprep.mubr.msk.f32.mxu0 %vm17767_vm1, %v23355_v12 }
 0xaad   : > { %15911 = vmatmul.mubr.msk.f32.gmra.mrb[80].mxu0 %vm7785_vm14, %v21847_v55 }
 0xaae   : > { %15913 = vmatprep.mubr.msk.f32.mxu0 %vm17767_vm1, %v23355_v12 }
 0xab1   : > { %15914 = vmatmul.mubr.msk.f32.gmra.mrb[82].mxu0 %vm7785_vm14, %v21853_v20 }
 0xab2   : > { %15916 = vmatprep.mubr.msk.f32.mxu0 %vm17767_vm1, %v23355_v12 }
 0xab5   : > { %15917 = vmatmul.mubr.msk.f32.gmra.mrb[84].mxu0 %vm7785_vm14, %v21859_v41 }
 0xab6   : > { %15919 = vmatprep.mubr.msk.f32.mxu0 %vm17767_vm1, %v23355_v12 }
 0xab9   : > { %15920 = vmatmul.mubr.msk.f32.gmra.mrb[86].mxu0 %vm7785_vm14, %v21865_v50 }
 0xaba   : > { %15922 = vmatprep.mubr.msk.f32.mxu0 %vm17767_vm1, %v23355_v12 }
 0xabd   : > { %15923 = vmatmul.mubr.msk.f32.gmra.mrb[88].mxu0 %vm7785_vm14, %v21871_v15 }
 0xabe   : > { %15925 = vmatprep.mubr.msk.f32.mxu0 %vm17767_vm1, %v23355_v12 }
 0xac1   : > { %15926 = vmatmul.mubr.msk.f32.gmra.mrb[90].mxu0 %vm7785_vm14, %v21877_v61 }
 0xac2   : > { %15928 = vmatprep.mubr.msk.f32.mxu0 %vm17767_vm1, %v23355_v12 }
 0xac5   : > { %15929 = vmatmul.mubr.msk.f32.gmra.mrb[92].mxu0 %vm7785_vm14, %v21883_v9 }
 0xac6   : > { %15931 = vmatprep.mubr.msk.f32.mxu0 %vm17767_vm1, %v23355_v12 }
 0xac9   : > { %15932 = vmatmul.mubr.msk.f32.gmra.mrb[94].mxu0 %vm7785_vm14, %v10390_v16 }
 0xaca   : > { %15934 = vmatprep.mubr.msk.f32.mxu0 %vm17767_vm1, %v23355_v12 }
 0xacd   : > { %15935 = vmatmul.mubr.msk.f32.gmra.mrb[96].mxu0 %vm7785_vm14, %v10391_v33 }
 0xace   : > { %15937 = vmatprep.mubr.msk.f32.mxu0 %vm17767_vm1, %v23355_v12 }
 0xad1   : > { %15938 = vmatmul.mubr.msk.f32.gmra.mrb[98].mxu0 %vm7785_vm14, %v10392_v19 }
 0xb44   : > { %v10538_v31 = vpop.f32.mrb[50].mxu0 }
 0xb45   : > { %v10694_v29 = vmul.f32 %v22367_v48, %v10538_v31  ;;  %v15867_v0 = vpop.f32.mrb[51].mxu0 }
 0xb47   : > { %v22376_v43 = vadd.f32 %v22372_v17, %v10694_v29 }
 0xb48   : > { %v10543_v57 = vpop.f32.mrb[52].mxu0 }
 0xb49   : > { %v22379_v30 = vmul.f32 0.70710677, %v22376_v43  ;;  %v10695_v51 = vmul.f32 %v22367_v48, %v10543_v57  ;;  %v15870_v44 = vpop.f32.mrb[53].mxu0 }
 0xb4b   : > { %v22383_v2 = vand.u32 2147483647, %v22379_v30  ;;  %v22386_v27 = vadd.f32 %v22372_v17, %v10695_v51  ;;  %vm11251_vm12 = vcmp.ge.f32.partialorder %v22379_v30, 0.0 }
 0xb4c   : > { %v10548_v55 = vpop.f32.mrb[54].mxu0 }
 0xb4d   : > { %v10801_v20 = vmul.f32 0.3275911, %v22383_v2  ;;  %v22390_v41 = vmul.f32 0.70710677, %v22386_v27  ;;  %v10696_v50 = vmul.f32 %v22367_v48, %v10548_v55  ;;  %v15873_v15 = vpop.f32.mrb[55].mxu0  ;;  %v11101_v57 = vsub.f32 0.0, %v22383_v2 }
 0xb4f   : > { %v10826_v61 = vadd.f32 1.0, %v10801_v20  ;;  %v22394_v9 = vand.u32 2147483647, %v22390_v41  ;;  %v22397_v26 = vadd.f32 %v22372_v17, %v10696_v50  ;;  %vm11252_vm13 = vcmp.ge.f32.partialorder %v22390_v41, 0.0 }
 0xb50   : > { %v10553_v63 = vpop.f32.mrb[56].mxu0 }
 0xb51   : > { %17646 = vrcp.f32 %v10826_v61  ;;  %v10802_v13 = vmul.f32 0.3275911, %v22394_v9  ;;  %v15876_v45 = vpop.f32.mrb[57].mxu0  ;;  %v22401_v56 = vmul.f32 0.70710677, %v22397_v26  ;;  %v10697_v60 = vmul.f32 %v22367_v48, %v10553_v63 }
 0xb52   : > { %v11102_v15 = vsub.f32 0.0, %v22394_v9 }
 0xb53   : > { %v10827_v10 = vadd.f32 1.0, %v10802_v13  ;;  %v22405_v1 = vand.u32 2147483647, %v22401_v56  ;;  %v22408_v53 = vadd.f32 %v22372_v17, %v10697_v60  ;;  %vm11253_vm0 = vcmp.ge.f32.partialorder %v22401_v56, 0.0 }
 0xb54   : > { %v10558_v54 = vpop.f32.mrb[58].mxu0 }
 0xb55   : > { %17648 = vrcp.f32 %v10827_v10  ;;  %v10698_v4 = vmul.f32 %v22367_v48, %v10558_v54  ;;  %v15879_v59 = vpop.f32.mrb[59].mxu0  ;;  %v10803_v6 = vmul.f32 0.3275911, %v22405_v1  ;;  %v22413_v18 = vmul.f32 0.70710677, %v22408_v53 }
 0xb56   : > { %v11126_v54 = vmul.f32 %v11101_v57, %v22383_v2  ;;  %v11103_v59 = vsub.f32 0.0, %v22405_v1 }
 0xb57   : > { %v22416_v42 = vadd.f32 %v22372_v17, %v10698_v4  ;;  %v10828_v7 = vadd.f32 1.0, %v10803_v6  ;;  %v22419_v47 = vand.u32 2147483647, %v22413_v18  ;;  %vm11254_vm15 = vcmp.ge.f32.partialorder %v22413_v18, 0.0 }
 0xb58   : > { %v10563_v23 = vpop.f32.mrb[60].mxu0 }
 0xb59   : > { %v22422_v38 = vmul.f32 0.70710677, %v22416_v42  ;;  %v10699_v62 = vmul.f32 %v22367_v48, %v10563_v23  ;;  %v15882_v21 = vpop.f32.mrb[61].mxu0  ;;  %17650 = vrcp.f32 %v10828_v7  ;;  %v10804_v37 = vmul.f32 0.3275911, %v22419_v47 }
 0xb5b   : > { %v22426_v40 = vpop.eup %17646  ;;  %v22429_v36 = vand.u32 2147483647, %v22422_v38  ;;  %v22432_v11 = vadd.f32 %v22372_v17, %v10699_v62  ;;  %v10829_v52 = vadd.f32 1.0, %v10804_v37  ;;  %v11127_v37 = vmul.f32 %v11102_v15, %v22394_v9 }
 0xb5c   : > { %v10876_v25 = vmul.f32 1.0614054, %v22426_v40  ;;  %v10568_v46 = vpop.f32.mrb[62].mxu0  ;;  %v11104_v9 = vsub.f32 0.0, %v22419_v47  ;;  %vm11255_vm2 = vcmp.ge.f32.partialorder %v22422_v38, 0.0 }
 0xb5d   : > { %v10805_v14 = vmul.f32 0.3275911, %v22429_v36  ;;  %v22437_v28 = vmul.f32 0.70710677, %v22432_v11  ;;  %17652 = vrcp.f32 %v10829_v52  ;;  %v10700_v3 = vmul.f32 %v22367_v48, %v10568_v46  ;;  %v15885_v58 = vpop.f32.mrb[63].mxu0 }
 0xb5e   : > { %v10901_v24 = vadd.f32 -1.4531521, %v10876_v25  ;;  %v11151_v58 = vmul.f32 1.442695, %v11126_v54 }
 0xb5f   : > { %v22440_v32 = vpop.eup %17648  ;;  %v10830_v22 = vadd.f32 1.0, %v10805_v14  ;;  %v22443_v34 = vand.u32 2147483647, %v22437_v28  ;;  %v22448_v8 = vadd.f32 %v22372_v17, %v10700_v3  ;;  %vm11256_vm3 = vcmp.ge.f32.partialorder %v22437_v28, 0.0 }
 0xb60   : > { %v10926_v39 = vmul.f32 %v22426_v40, %v10901_v24  ;;  %v10877_v49 = vmul.f32 1.0614054, %v22440_v32  ;;  %v10573_v5 = vpop.f32.mrb[64].mxu0 }
 0xb61   : > { %17654 = vrcp.f32 %v10830_v22  ;;  %v10806_v16 = vmul.f32 0.3275911, %v22443_v34  ;;  %v15888_v33 = vpop.f32.mrb[65].mxu0  ;;  %v22452_v29 = vmul.f32 0.70710677, %v22448_v8  ;;  %v10701_v0 = vmul.f32 %v22367_v48, %v10573_v5 }
 0xb62   : > { %v10951_v19 = vadd.f32 1.4214138, %v10926_v39  ;;  %v10902_v31 = vadd.f32 -1.4531521, %v10877_v49  ;;  %v11128_v39 = vmul.f32 %v11103_v59, %v22405_v1 }
 0xb63   : > { %v10831_v51 = vadd.f32 1.0, %v10806_v16  ;;  %v22456_v44 = vpop.eup %17650  ;;  %v22460_v20 = vand.u32 2147483647, %v22452_v29  ;;  %v22465_v63 = vadd.f32 %v22372_v17, %v10701_v0  ;;  %vm11257_vm4 = vcmp.ge.f32.partialorder %v22452_v29, 0.0 }
 0xb64   : > { %v10927_v55 = vmul.f32 %v22440_v32, %v10902_v31  ;;  %v10578_v50 = vpop.f32.mrb[66].mxu0  ;;  %v10878_v61 = vmul.f32 1.0614054, %v22456_v44  ;;  %v10976_v45 = vmul.f32 %v22426_v40, %v10951_v19  ;;  %v11153_v31 = vmul.f32 1.442695, %v11127_v37 }
 0xb65   : > { %17656 = vrcp.f32 %v10831_v51  ;;  %v15891_v13 = vpop.f32.mrb[67].mxu0  ;;  %v10807_v10 = vmul.f32 0.3275911, %v22460_v20  ;;  %v22472_v6 = vmul.f32 0.70710677, %v22465_v63  ;;  %v10702_v62 = vmul.f32 %v22367_v48, %v10578_v50 }
 0xb66   : > { %v10952_v60 = vadd.f32 1.4214138, %v10927_v55  ;;  %v10903_v4 = vadd.f32 -1.4531521, %v10878_v61  ;;  %v11001_v14 = vadd.f32 -0.28449672, %v10976_v45 }
 0xb67   : > { %v22474_v7 = vpop.eup %17652  ;;  %v10832_v23 = vadd.f32 1.0, %v10807_v10  ;;  %v22483_v2 = vand.u32 2147483647, %v22472_v6  ;;  %v22493_v33 = vadd.f32 %v22372_v17, %v10702_v62  ;;  %v11155_v45 = vmul.f32 1.442695, %v11128_v39 }
 0xb68   : > { %v22477_v21 = vpop.f32.mrb[68].mxu0  ;;  %v10928_v25 = vmul.f32 %v22456_v44, %v10903_v4  ;;  %v10879_v52 = vmul.f32 1.0614054, %v22474_v7  ;;  %v10977_v24 = vmul.f32 %v22440_v32, %v10952_v60  ;;  %v11026_v1 = vmul.f32 %v22426_v40, %v11001_v14 }
 0xb69   : > { %v15894_v46 = vpop.f32.mrb[69].mxu0  ;;  %17658 = vrcp.f32 %v10832_v23  ;;  %v10808_v16 = vmul.f32 0.3275911, %v22483_v2  ;;  %v11129_v10 = vmul.f32 %v11104_v9, %v22419_v47  ;;  %v22506_v59 = vmul.f32 0.70710677, %v22493_v33 }
 0xb6a   : > { %v10953_v22 = vadd.f32 1.4214138, %v10928_v25  ;;  %v10904_v49 = vadd.f32 -1.4531521, %v10879_v52  ;;  %v11002_v55 = vadd.f32 -0.28449672, %v10977_v24  ;;  %17660 = vpow2.f32 %v11151_v58 }
 0xb6b   : > { %v22486_v3 = vpop.eup %17654  ;;  %v10833_v15 = vadd.f32 1.0, %v10808_v16  ;;  %v11105_v37 = vsub.f32 0.0, %v22429_v36  ;;  %v11106_v25 = vsub.f32 0.0, %v22443_v34  ;;  %v11051_v46 = vadd.f32 0.2548296, %v11026_v1 }
 0xb6c   : > { %v10880_v5 = vmul.f32 1.0614054, %v22486_v3  ;;  %v22495_v19 = vpop.f32.mrb[70].mxu0  ;;  %v10978_v0 = vmul.f32 %v22456_v44, %v10953_v22  ;;  %v10929_v57 = vmul.f32 %v22474_v7, %v10904_v49  ;;  %v11027_v47 = vmul.f32 %v22440_v32, %v11002_v55 }
 0xb6d   : > { %v15897_v51 = vpop.f32.mrb[71].mxu0  ;;  %17662 = vrcp.f32 %v10833_v15  ;;  %v11157_v49 = vmul.f32 1.442695, %v11129_v10  ;;  %v22520_v16 = vand.u32 2147483647, %v22506_v59  ;;  %v11076_v55 = vmul.f32 %v22426_v40, %v11051_v46 }
 0xb6e   : > { %v10905_v50 = vadd.f32 -1.4531521, %v10880_v5  ;;  %v11003_v13 = vadd.f32 -0.28449672, %v10978_v0  ;;  %v10954_v60 = vadd.f32 1.4214138, %v10929_v57  ;;  %17664 = vpow2.f32 %v11153_v31 }
 0xb6f   : > { %v22500_v61 = vpop.eup %17656  ;;  %17666 = vpow2.f32 %v11155_v45  ;;  %v11130_v57 = vmul.f32 %v11105_v37, %v22429_v36  ;;  %v11131_v31 = vmul.f32 %v11106_v25, %v22443_v34  ;;  %v10809_v36 = vmul.f32 0.3275911, %v22520_v16 }
 0xb70   : > { %v10930_v54 = vmul.f32 %v22486_v3, %v10905_v50  ;;  %v10881_v4 = vmul.f32 1.0614054, %v22500_v61  ;;  %v22508_v23 = vpop.f32.mrb[72].mxu0  ;;  %v10979_v62 = vmul.f32 %v22474_v7, %v10954_v60  ;;  %v11028_v58 = vmul.f32 %v22456_v44, %v11003_v13 }
 0xb71   : > { %v15900_v52 = vpop.f32.mrb[73].mxu0  ;;  %v11052_v50 = vadd.f32 0.2548296, %v11027_v47  ;;  %17668 = vpow2.f32 %v11157_v49  ;;  %v22535_v37 = vmul.f32 0.5, %v22376_v43  ;;  %v11159_v40 = vmul.f32 1.442695, %v11130_v57 }
 0xb72   : > { %v10955_v14 = vadd.f32 1.4214138, %v10930_v54  ;;  %v10906_v24 = vadd.f32 -1.4531521, %v10881_v4  ;;  %v11004_v22 = vadd.f32 -0.28449672, %v10979_v62  ;;  %v10705_v30 = vmul.f32 %v22367_v48, %v22508_v23 }
 0xb73   : > { %v22515_v39 = vpop.eup %17658  ;;  %v11053_v13 = vadd.f32 0.2548296, %v11028_v58  ;;  %v11107_v54 = vsub.f32 0.0, %v22460_v20  ;;  %v11161_v25 = vmul.f32 1.442695, %v11131_v31  ;;  %v10834_v58 = vadd.f32 1.0, %v10809_v36 }
 0xb74   : > { %v10980_v9 = vmul.f32 %v22486_v3, %v10955_v14  ;;  %v10931_v5 = vmul.f32 %v22500_v61, %v10906_v24  ;;  %v22522_v0 = vpop.f32.mrb[74].mxu0  ;;  %v10882_v51 = vmul.f32 1.0614054, %v22515_v39  ;;  %v11029_v60 = vmul.f32 %v22474_v7, %v11004_v22  ;;  %v17661_v62 = vpop.eup %17660 }
 0xb75   : > { %v15903_v1 = vpop.f32.mrb[75].mxu0  ;;  %v22538_v47 = vmul.f32 %v17661_v62, %v11076_v55  ;;  %v11077_v14 = vmul.f32 %v22440_v32, %v11052_v50  ;;  %v22544_v49 = vmul.f32 0.5, %v22386_v27  ;;  %v11132_v43 = vmul.f32 %v11107_v54, %v22460_v20 }
 0xb76   : > { %v10956_v15 = vadd.f32 1.4214138, %v10931_v5  ;;  %v10907_v10 = vadd.f32 -1.4531521, %v10882_v51  ;;  %v11005_v4 = vadd.f32 -0.28449672, %v10980_v9  ;;  %v11078_v57 = vmul.f32 %v22456_v44, %v11053_v13 }
 0xb77   : > { %v22541_v22 = vpop.eup %17662  ;;  %v11054_v9 = vadd.f32 0.2548296, %v11029_v60  ;;  %17670 = vrcp.f32 %v10834_v58  ;;  %v11108_v50 = vsub.f32 0.0, %v22483_v2  ;;  %v11226_v44 = vsub.f32 1.0, %v22538_v47 }
 0xb78   : > { %v10981_v45 = vmul.f32 %v22500_v61, %v10956_v15  ;;  %v22532_v34 = vpop.f32.mrb[76].mxu0  ;;  %v10932_v52 = vmul.f32 %v22515_v39, %v10907_v10  ;;  %v11030_v31 = vmul.f32 %v22486_v3, %v11005_v4  ;;  %v10883_v51 = vmul.f32 1.0614054, %v22541_v22  ;;  %v17665_v32 = vpop.eup %17664 }
 0xb79   : > { %v15906_v46 = vpop.f32.mrb[77].mxu0  ;;  %17672 = vpow2.f32 %v11159_v40  ;;  %v22557_v15 = vmul.f32 %v17665_v32, %v11077_v14  ;;  %v17667_v60 = vpop.eup %17666  ;;  %v22560_v10 = vmul.f32 0.5, %v22397_v26  ;;  %v11079_v54 = vmul.f32 %v22474_v7, %v11054_v9 }
 0xb7a   : > { %v11006_v24 = vadd.f32 -0.28449672, %v10981_v45  ;;  %v10957_v5 = vadd.f32 1.4214138, %v10932_v52  ;;  %17674 = vpow2.f32 %v11161_v25  ;;  %v10908_v13 = vadd.f32 -1.4531521, %v10883_v51 }
 0xb7b   : > { %v22564_v4 = vmul.f32 0.5, %v22408_v53  ;;  %v11163_v45 = vmul.f32 1.442695, %v11132_v43  ;;  %v22566_v36 = vmul.f32 %v17667_v60, %v11078_v57  ;;  %v11055_v62 = vadd.f32 0.2548296, %v11030_v31  ;;  %v17669_v14 = vpop.eup %17668 }
 0xb7c   : > { %v22550_v1 = vpop.f32.mrb[78].mxu0  ;;  %v11031_v27 = vmul.f32 %v22500_v61, %v11006_v24  ;;  %v10982_v55 = vmul.f32 %v22515_v39, %v10957_v5  ;;  %v10933_v52 = vmul.f32 %v22541_v22, %v10908_v13  ;;  %v22573_v25 = vmul.f32 0.5, %v22416_v42 }
 0xb7d   : > { %v15909_v20 = vpop.f32.mrb[79].mxu0  ;;  %v11133_v7 = vmul.f32 %v11108_v50, %v22483_v2  ;;  %v10703_v53 = vmul.f32 %v22367_v48, %v22477_v21  ;;  %v11276_v24 = vsub.f32 0.0, %v11226_v44  ;;  %v11227_v58 = vsub.f32 1.0, %v22557_v15 }
 0xb7e   : > { %v11007_v40 = vadd.f32 -0.28449672, %v10982_v55  ;;  %v11056_v26 = vadd.f32 0.2548296, %v11031_v27  ;;  %v22580_v9 = vmul.f32 0.5, %v22432_v11  ;;  %v22583_v43 = vmul.f32 %v17669_v14, %v11079_v54 }
 0xb7f   : > { %v10958_v5 = vadd.f32 1.4214138, %v10933_v52  ;;  %v22586_v42 = vmul.f32 0.5, %v22448_v8  ;;  %v22589_v2 = vadd.f32 %v22372_v17, %v10703_v53  ;;  %v10704_v21 = vmul.f32 %v22367_v48, %v22495_v19 }
 0xb80   : > { %v22569_v46 = vpop.f32.mrb[80].mxu0  ;;  %v11228_v57 = vsub.f32 1.0, %v22566_v36  ;;  %v11080_v31 = vmul.f32 %v22486_v3, %v11055_v62  ;;  %v11032_v11 = vmul.f32 %v22515_v39, %v11007_v40  ;;  %17676 = vpow2.f32 %v11163_v45 }
 0xb81   : > { %v15912_v47 = vpop.f32.mrb[81].mxu0  ;;  %v11081_v32 = vmul.f32 %v22500_v61, %v11056_v26  ;;  %v10983_v8 = vmul.f32 %v22541_v22, %v10958_v5  ;;  %v11165_v27 = vmul.f32 1.442695, %v11133_v7  ;;  %v22601_v55 = vmul.f32 0.70710677, %v22589_v2  ;;  %v22603_v20 = vpop.eup %17670 }
 0xb82   : > { %v11301_v19 = vsel %vm11251_vm12, %v11226_v44, %v11276_v24  ;;  %v11277_v3 = vsub.f32 0.0, %v11227_v58  ;;  %v11109_v15 = vsub.f32 0.0, %v22520_v16  ;;  %v22610_v13 = vadd.f32 %v22372_v17, %v10704_v21 }
 0xb83   : > { %v17673_v61 = vpop.eup %17672  ;;  %v11229_v60 = vsub.f32 1.0, %v22583_v43  ;;  %v10884_v54 = vmul.f32 1.0614054, %v22603_v20  ;;  %v22615_v45 = vand.u32 2147483647, %v22601_v55  ;;  %v11278_v36 = vsub.f32 0.0, %v11228_v57 }
 0xb84   : > { %v22596_v51 = vpop.f32.mrb[82].mxu0  ;;  %v17675_v44 = vpop.eup %17674  ;;  %v11205_v62 = vmul.f32 %v17673_v61, %v11080_v31  ;;  %v11057_v40 = vadd.f32 0.2548296, %v11032_v11  ;;  %v22620_v52 = vmul.f32 0.70710677, %v22610_v13  ;;  %v11351_v24 = vadd.f32 1.0, %v11301_v19 }
 0xb85   : > { %v15915_v50 = vpop.f32.mrb[83].mxu0  ;;  %v11206_v7 = vmul.f32 %v17675_v44, %v11081_v32  ;;  %v11008_v53 = vadd.f32 -0.28449672, %v10983_v8  ;;  %v10909_v47 = vadd.f32 -1.4531521, %v10884_v54  ;;  %v11302_v5 = vsel %vm11252_vm13, %v11227_v58, %v11277_v3 }
 0xb86   : > { %v10810_v14 = vmul.f32 0.3275911, %v22615_v45  ;;  %v11134_v23 = vmul.f32 %v11109_v15, %v22520_v16  ;;  %v22629_v43 = vand.u32 2147483647, %v22620_v52  ;;  %v11279_v21 = vsub.f32 0.0, %v11229_v60 }
 0xb87   : > { %v10934_v31 = vmul.f32 %v22603_v20, %v10909_v47  ;;  %v22634_v32 = vadd.f32 %v22372_v17, %v10705_v30  ;;  %v11303_v50 = vsel %vm11253_vm0, %v11228_v57, %v11278_v36  ;;  %v11230_v41 = vsub.f32 1.0, %v11205_v62 }
 0xb88   : > { %v22622_v26 = vpop.f32.mrb[84].mxu0  ;;  %v10835_v11 = vadd.f32 1.0, %v10810_v14  ;;  %v11082_v16 = vmul.f32 %v22515_v39, %v11057_v40  ;;  %v10811_v58 = vmul.f32 0.3275911, %v22629_v43  ;;  %v11231_v3 = vsub.f32 1.0, %v11206_v7 }
 0xb89   : > { %v15918_v8 = vpop.f32.mrb[85].mxu0  ;;  %v11033_v15 = vmul.f32 %v22541_v22, %v11008_v53  ;;  %v22645_v61 = vmul.f32 0.5, %v22465_v63  ;;  %v11352_v56 = vadd.f32 1.0, %v11302_v5  ;;  %v11167_v57 = vmul.f32 1.442695, %v11134_v23 }
 0xb8a   : > { %17678 = vrcp.f32 %v10835_v11  ;;  %v17677_v30 = vpop.eup %17676  ;;  %v10836_v44 = vadd.f32 1.0, %v10811_v58  ;;  %v11353_v36 = vadd.f32 1.0, %v11303_v50  ;;  %v11304_v39 = vsel %vm11254_vm15, %v11229_v60, %v11279_v21 }
 0xb8b   : > { %17680 = vpow2.f32 %v11165_v27  ;;  %v10959_v62 = vadd.f32 1.4214138, %v10934_v31  ;;  %v22650_v40 = vmul.f32 0.70710677, %v22634_v32  ;;  %v11376_v7 = vmul.f32 %v11351_v24, %v22535_v37 }
 0xb8c   : > { %v22641_v19 = vpop.f32.mrb[86].mxu0  ;;  %v11280_v53 = vsub.f32 0.0, %v11230_v41  ;;  %v11207_v63 = vmul.f32 %v17677_v30, %v11082_v16  ;;  %v10706_v47 = vmul.f32 %v22367_v48, %v22522_v0  ;;  %v11281_v27 = vsub.f32 0.0, %v11231_v3 }
 0xb8d   : > { %v15921_v54 = vpop.f32.mrb[87].mxu0  ;;  %v11058_v5 = vadd.f32 0.2548296, %v11033_v15  ;;  %17682 = vrcp.f32 %v10836_v44  ;;  %v22658_v23 = vand.u32 2147483647, %v22650_v40  ;;  %v11377_v18 = vmul.f32 %v11352_v56, %v22544_v49 }
 0xb8e   : > { %v11354_v60 = vadd.f32 1.0, %v11304_v39  ;;  %v22662_v21 = vadd.f32 %v22372_v17, %v10706_v47  ;;  %v10707_v37 = vmul.f32 %v22367_v48, %v22532_v34  ;;  %v22667_v0 = vmul.f32 %v11353_v36, %v22560_v10 }
 0xb8f   : > { %v10984_v31 = vmul.f32 %v22603_v20, %v10959_v62  ;;  %17684 = vpow2.f32 %v11167_v57  ;;  %v10812_v11 = vmul.f32 0.3275911, %v22658_v23  ;;  %v11305_v49 = vsel %vm11255_vm2, %v11230_v41, %v11280_v53 }
 0xb90   : > { %v22655_v14 = vpop.f32.mrb[88].mxu0  ;;  %v11232_v8 = vsub.f32 1.0, %v11207_v63  ;;  %v22675_v50 = vmul.f32 0.70710677, %v22662_v21  ;;  %v22678_v34 = vadd.f32 %v22372_v17, %v10707_v37  ;;  %v11306_v10 = vsel %vm11256_vm3, %v11231_v3, %v11281_v27 }
 0xb91   : > { %v15924_v24 = vpop.f32.mrb[89].mxu0  ;;  %v11083_v58 = vmul.f32 %v22541_v22, %v11058_v5  ;;  %v22686_v15 = vmul.f32 0.5, %v22493_v33  ;;  %v10837_v54 = vadd.f32 1.0, %v10812_v11  ;;  %v22689_v41 = vmul.f32 %v11354_v60, %v22564_v4 }
 0xb92   : > { %v11110_v30 = vsub.f32 0.0, %v22615_v45  ;;  %v22693_v56 = vand.u32 2147483647, %v22675_v50  ;;  %v22696_v57 = vmul.f32 0.70710677, %v22678_v34  ;;  %v11355_v3 = vadd.f32 1.0, %v11305_v49 }
 0xb93   : > { %v11009_v22 = vadd.f32 -0.28449672, %v10984_v31  ;;  %v22701_v33 = vmul.f32 0.5, %v22589_v2  ;;  %17686 = vrcp.f32 %v10837_v54  ;;  %v11356_v36 = vadd.f32 1.0, %v11306_v10 }
 0xb94   : > { %v22680_v16 = vpop.f32.mrb[90].mxu0  ;;  %v22698_v28 = vpop.eup %17678  ;;  %v11282_v4 = vsub.f32 0.0, %v11232_v8  ;;  %v10813_v62 = vmul.f32 0.3275911, %v22693_v56  ;;  %v11111_v63 = vsub.f32 0.0, %v22629_v43  ;;  %v10708_v27 = vmul.f32 %v22367_v48, %v22550_v1 }
 0xb95   : > { %v15927_v38 = vpop.f32.mrb[91].mxu0  ;;  %v17681_v44 = vpop.eup %17680  ;;  %v10885_v39 = vmul.f32 1.0614054, %v22698_v28  ;;  %v22709_v47 = vand.u32 2147483647, %v22696_v57  ;;  %v11135_v60 = vmul.f32 %v11110_v30, %v22615_v45  ;;  %v16148_v24 = vpack.c.bf16 %v11377_v18, %v11376_v7 }
 0xb96   : > { %v22705_v53 = vmul.f32 %v17681_v44, %v11083_v58  ;;  %v10838_v37 = vadd.f32 1.0, %v10813_v62  ;;  %v22719_v49 = vmul.f32 %v11355_v3, %v22573_v25  ;;  %v11034_v10 = vmul.f32 %v22603_v20, %v11009_v22 }
 0xb97   : > { %v10910_v5 = vadd.f32 -1.4531521, %v10885_v39  ;;  %v22716_v11 = vpop.eup %17682  ;;  %v10814_v58 = vmul.f32 0.3275911, %v22709_v47  ;;  %v22724_v54 = vadd.f32 %v22372_v17, %v10708_v27  ;;  %v11307_v1 = vsel %vm11257_vm4, %v11232_v8, %v11282_v4  ;;  %16149 = vmatpush1.bf16.msra.mxu1 %v16148_v24 }
 0xb98   : > { %v22713_v2 = vpop.f32.mrb[92].mxu0  ;;  %v10886_v7 = vmul.f32 1.0614054, %v22716_v11  ;;  %17688 = vrcp.f32 %v10838_v37  ;;  %v11233_v38 = vsub.f32 1.0, %v22705_v53  ;;  %v11136_v30 = vmul.f32 %v11111_v63, %v22629_v43  ;;  %16150 = vmatprep.subr.bf16.mxu1 %v23381_v35 }
 0xb99   : > { %v15930_v31 = vpop.f32.mrb[93].mxu0  ;;  %v10935_v45 = vmul.f32 %v22698_v28, %v10910_v5  ;;  %v17685_v25 = vpop.eup %17684  ;;  %v10839_v3 = vadd.f32 1.0, %v10814_v58  ;;  %v22735_v22 = vmul.f32 0.70710677, %v22724_v54  ;;  %v22739_v8 = vmul.f32 %v11356_v36, %v22580_v9 }
 0xb9a   : > { %vm11258_vm5 = vcmp.ge.f32.partialorder %v22472_v6, 0.0  ;;  %v11169_v4 = vmul.f32 1.442695, %v11135_v60  ;;  %v10911_v39 = vadd.f32 -1.4531521, %v10886_v7  ;;  %v22743_v53 = vmul.f32 0.5, %v22610_v13 }
 0xb9b   : > { %v10960_v44 = vadd.f32 1.4214138, %v10935_v45  ;;  %v11059_v62 = vadd.f32 0.2548296, %v11034_v10  ;;  %17690 = vrcp.f32 %v10839_v3  ;;  %v22746_v43 = vand.u32 2147483647, %v22735_v22 }
 0xb9c   : > { %v22730_v18 = vpop.f32.mrb[94].mxu0  ;;  %v11357_v63 = vadd.f32 1.0, %v11307_v1  ;;  %v10936_v5 = vmul.f32 %v22716_v11, %v10911_v39  ;;  %v22751_v9 = vmul.f32 0.5, %v22634_v32  ;;  %v11283_v37 = vsub.f32 0.0, %v11233_v38 }
 0xb9d   : > { %v15933_v29 = vpop.f32.mrb[95].mxu0  ;;  %v10985_v27 = vmul.f32 %v22698_v28, %v10960_v44  ;;  %v22755_v60 = vpop.eup %17686  ;;  %v11171_v24 = vmul.f32 1.442695, %v11136_v30  ;;  %v10815_v13 = vmul.f32 0.3275911, %v22746_v43  ;;  %v10709_v31 = vmul.f32 %v22367_v48, %v22569_v46 }
 0xb9e   : > { %17692 = vpow2.f32 %v11169_v4  ;;  %v10961_v1 = vadd.f32 1.4214138, %v10936_v5  ;;  %v10887_v45 = vmul.f32 1.0614054, %v22755_v60  ;;  %v11084_v32 = vmul.f32 %v22603_v20, %v11059_v62 }
 0xb9f   : > { %v11010_v58 = vadd.f32 -0.28449672, %v10985_v27  ;;  %v10840_v7 = vadd.f32 1.0, %v10815_v13  ;;  %v22763_v3 = vadd.f32 %v22372_v17, %v10709_v31  ;;  %v10710_v30 = vmul.f32 %v22367_v48, %v22596_v51 }
 0xba0   : > { %v22753_v36 = vpop.f32.mrb[96].mxu0  ;;  %v10986_v44 = vmul.f32 %v22716_v11, %v10961_v1  ;;  %v10912_v46 = vadd.f32 -1.4531521, %v10887_v45  ;;  %v16151_v4 = vpack.c.bf16 %v22689_v41, %v22667_v0  ;;  %v22774_v27 = vmul.f32 %v11357_v63, %v22586_v42 }
 0xba1   : > { %23395 = vst [vmem:[#allocation12_spill] sm:$0xff] %v22753_v36  ;;  %v15936_v10 = vpop.f32.mrb[97].mxu0  ;;  %v11035_v29 = vmul.f32 %v22698_v28, %v11010_v58  ;;  %v11112_v20 = vsub.f32 0.0, %v22658_v23  ;;  %17694 = vrcp.f32 %v10840_v7  ;;  %v22778_v62 = vmul.f32 0.70710677, %v22763_v3 }
 0xba2   : > { %v22780_v5 = vpop.eup %17688  ;;  %v11011_v13 = vadd.f32 -0.28449672, %v10986_v44  ;;  %17696 = vpow2.f32 %v11171_v24  ;;  %v10937_v31 = vmul.f32 %v22755_v60, %v10912_v46  ;;  %v22784_v0 = vadd.f32 %v22372_v17, %v10710_v30  ;;  %16152 = vmatpush1.bf16.msra.mxu1 %v16151_v4 }
 0xba3   : > { %v11308_v42 = vsel %vm11258_vm5, %v11233_v38, %v11283_v37  ;;  %v11060_v41 = vadd.f32 0.2548296, %v11035_v29  ;;  %v10888_v63 = vmul.f32 1.0614054, %v22780_v5  ;;  %v22790_v10 = vand.u32 2147483647, %v22778_v62  ;;  %16153 = vmatprep.subr.bf16.mxu1 %v23381_v35 }
 0xba4   : > { %v22771_v39 = vpop.f32.mrb[98].mxu0  ;;  %23397 = vst [vmem:[#allocation6_spill] sm:$0xff] %v22784_v0  ;;  %v11209_v58 = vmul.f32 %v17685_v25, %v11084_v32  ;;  %v10962_v1 = vadd.f32 1.4214138, %v10937_v31  ;;  %v11113_v24 = vsub.f32 0.0, %v22693_v56  ;;  %v11137_v6 = vmul.f32 %v11112_v20, %v22658_v23 }
 0xba5   : > { %23396 = vst [vmem:[#allocation5_spill] sm:$0xff] %v22771_v39  ;;  %v15939_v51 = vpop.f32.mrb[99].mxu0  ;;  %v22795_v45 = vmul.f32 0.70710677, %v22784_v0  ;;  %v22797_v7 = vpop.eup %17690  ;;  %v10913_v38 = vadd.f32 -1.4531521, %v10888_v63  ;;  %v11036_v29 = vmul.f32 %v22716_v11, %v11011_v13  ;;  %v11085_v46 = vmul.f32 %v22698_v28, %v11060_v41 }
 0xba6   : > { %v22801_v37 = vmul.f32 0.5, %v22662_v21  ;;  %v10816_v30 = vmul.f32 0.3275911, %v22790_v10  ;;  %v10987_v25 = vmul.f32 %v22755_v60, %v10962_v1  ;;  %v10889_v32 = vmul.f32 1.0614054, %v22797_v7 }
 0xba7   : > { %v11114_v44 = vsub.f32 0.0, %v22709_v47  ;;  %vm11259_vm6 = vcmp.ge.f32.partialorder %v22506_v59, 0.0  ;;  %v10938_v23 = vmul.f32 %v22780_v5, %v10913_v38  ;;  %v22812_v21 = vand.u32 2147483647, %v22795_v45 }
 0xba8   : > { %v10841_v4 = vadd.f32 1.0, %v10816_v30  ;;  %v17693_v20 = vpop.eup %17692  ;;  %v11358_v51 = vadd.f32 1.0, %v11308_v42  ;;  %v11234_v31 = vsub.f32 1.0, %v11209_v58  ;;  %v11138_v13 = vmul.f32 %v11113_v24, %v22693_v56 }
 0xba9   : > { %v10914_v63 = vadd.f32 -1.4531521, %v10889_v32  ;;  %v11012_v1 = vadd.f32 -0.28449672, %v10987_v25  ;;  %v10963_v12 = vadd.f32 1.4214138, %v10938_v23  ;;  %v11139_v41 = vmul.f32 %v11114_v44, %v22709_v47 }
 0xbaa   : > { %17698 = vrcp.f32 %v10841_v4  ;;  %v10817_v0 = vmul.f32 0.3275911, %v22812_v21  ;;  %v11061_v39 = vadd.f32 0.2548296, %v11036_v29  ;;  %v11173_v36 = vmul.f32 1.442695, %v11137_v6 }
 0xbab   : > { %v10939_v28 = vmul.f32 %v22797_v7, %v10914_v63  ;;  %v22818_v38 = vpop.eup %17694  ;;  %v11210_v30 = vmul.f32 %v17693_v20, %v11085_v46  ;;  %v10988_v42 = vmul.f32 %v22780_v5, %v10963_v12  ;;  %v11115_v58 = vsub.f32 0.0, %v22746_v43 }
 0xbac   : > { %v10842_v56 = vadd.f32 1.0, %v10817_v0  ;;  %v17697_v24 = vpop.eup %17696  ;;  %v11284_v25 = vsub.f32 0.0, %v11234_v31  ;;  %v11175_v32 = vmul.f32 1.442695, %v11138_v13  ;;  %v22823_v4 = vmul.f32 0.5, %v22678_v34 }
 0xbad   : > { %v10964_v23 = vadd.f32 1.4214138, %v10939_v28  ;;  %v11037_v6 = vmul.f32 %v22755_v60, %v11012_v1  ;;  %v11013_v29 = vadd.f32 -0.28449672, %v10988_v42  ;;  %v10890_v47 = vmul.f32 1.0614054, %v22818_v38 }
 0xbae   : > { %17700 = vrcp.f32 %v10842_v56  ;;  %vm11260_vm7 = vcmp.ge.f32.partialorder %v22601_v55, 0.0  ;;  %v11086_v12 = vmul.f32 %v22716_v11, %v11061_v39  ;;  %v11177_v44 = vmul.f32 1.442695, %v11139_v41 }
 0xbaf   : > { %17702 = vpow2.f32 %v11173_v36  ;;  %v10989_v0 = vmul.f32 %v22797_v7, %v10964_v23  ;;  %v22831_v46 = vmul.f32 %v11358_v51, %v22645_v61  ;;  %v11235_v20 = vsub.f32 1.0, %v11210_v30 }
 0xbb0   : > { %v10915_v34 = vadd.f32 -1.4531521, %v10890_v47  ;;  %v11140_v13 = vmul.f32 %v11115_v58, %v22746_v43  ;;  %v11309_v63 = vsel %vm11259_vm6, %v11234_v31, %v11284_v25  ;;  %17704 = vpow2.f32 %v11175_v32 }
 0xbb1   : > { %v11014_v1 = vadd.f32 -0.28449672, %v10989_v0  ;;  %v22837_v28 = vmul.f32 0.5, %v22724_v54  ;;  %v11062_v11 = vadd.f32 0.2548296, %v11037_v6  ;;  %v11038_v36 = vmul.f32 %v22780_v5, %v11013_v29 }
 0xbb2   : > { %v10940_v39 = vmul.f32 %v22818_v38, %v10915_v34  ;;  %v10711_v61 = vmul.f32 %v22367_v48, %v22622_v26  ;;  %v11211_v51 = vmul.f32 %v17697_v24, %v11086_v12  ;;  %17706 = vpow2.f32 %v11177_v44 }
 0xbb3   : > { %v11116_v43 = vsub.f32 0.0, %v22790_v10  ;;  %v10712_v59 = vmul.f32 %v22367_v48, %v22641_v19  ;;  %v11285_v41 = vsub.f32 0.0, %v11235_v20  ;;  %v11179_v30 = vmul.f32 1.442695, %v11140_v13 }
 0xbb4   : > { %v22846_v31 = vpop.eup %17698  ;;  %v10965_v54 = vadd.f32 1.4214138, %v10940_v39  ;;  %v22849_v42 = vadd.f32 %v22372_v17, %v10711_v61  ;;  %v11039_v58 = vmul.f32 %v22797_v7, %v11014_v1  ;;  %v11117_v26 = vsub.f32 0.0, %v22812_v21 }
 0xbb5   : > { %v10891_v56 = vmul.f32 1.0614054, %v22846_v31  ;;  %v22855_v24 = vadd.f32 %v22372_v17, %v10712_v59  ;;  %vm11261_vm8 = vcmp.ge.f32.partialorder %v22620_v52, 0.0  ;;  %v11087_v48 = vmul.f32 %v22755_v60, %v11062_v11 }
 0xbb6   : > { %v11063_v19 = vadd.f32 0.2548296, %v11038_v36  ;;  %v10990_v25 = vmul.f32 %v22818_v38, %v10965_v54  ;;  %v22861_v32 = vmul.f32 0.70710677, %v22849_v42  ;;  %v11359_v23 = vadd.f32 1.0, %v11309_v63 }
 0xbb7   : > { %v11236_v6 = vsub.f32 1.0, %v11211_v51  ;;  %v10916_v29 = vadd.f32 -1.4531521, %v10891_v56  ;;  %v11141_v47 = vmul.f32 %v11116_v43, %v22790_v10  ;;  %v11310_v17 = vsel %vm11260_vm7, %v11235_v20, %v11285_v41 }
 0xbb8   : > { %v22864_v12 = vpop.eup %17700  ;;  %v11015_v0 = vadd.f32 -0.28449672, %v10990_v25  ;;  %v10793_v44 = vand.u32 2147483647, %v22861_v32  ;;  %v22870_v60 = vmul.f32 0.70710677, %v22855_v24  ;;  %v11142_v11 = vmul.f32 %v11117_v26, %v22812_v21 }
 0xbb9   : > { %v17703_v34 = vpop.eup %17702  ;;  %v11064_v13 = vadd.f32 0.2548296, %v11039_v58  ;;  %v10941_v1 = vmul.f32 %v22846_v31, %v10916_v29  ;;  %v10892_v63 = vmul.f32 1.0614054, %v22864_v12  ;;  %v11088_v36 = vmul.f32 %v22780_v5, %v11063_v19 }
 0xbba   : > { %v22875_v10 = vmul.f32 %v17703_v34, %v11087_v48  ;;  %17708 = vpow2.f32 %v11179_v30  ;;  %v10818_v55 = vmul.f32 0.3275911, %v10793_v44  ;;  %v17705_v20 = vpop.eup %17704  ;;  %v11286_v39 = vsub.f32 0.0, %v11236_v6 }
 0xbbb   : > { %v11040_v61 = vmul.f32 %v22818_v38, %v11015_v0  ;;  %v10966_v51 = vadd.f32 1.4214138, %v10941_v1  ;;  %v10917_v43 = vadd.f32 -1.4531521, %v10892_v63  ;;  %v11360_v59 = vadd.f32 1.0, %v11310_v17 }
 0xbbc   : > { %v11181_v41 = vmul.f32 1.442695, %v11141_v47  ;;  %v10843_v54 = vadd.f32 1.0, %v10818_v55  ;;  %v22880_v58 = vand.u32 2147483647, %v22870_v60  ;;  %v17707_v56 = vpop.eup %17706  ;;  %v11089_v21 = vmul.f32 %v22797_v7, %v11064_v13 }
 0xbbd   : > { %v10991_v26 = vmul.f32 %v22846_v31, %v10966_v51  ;;  %v10942_v5 = vmul.f32 %v22864_v12, %v10917_v43  ;;  %v11183_v30 = vmul.f32 1.442695, %v11142_v11  ;;  %v11237_v48 = vsub.f32 1.0, %v22875_v10 }
 0xbbe   : > { %v11213_v19 = vmul.f32 %v17705_v20, %v11088_v36  ;;  %17710 = vrcp.f32 %v10843_v54  ;;  %v10819_v25 = vmul.f32 0.3275911, %v22880_v58  ;;  %v11311_v29 = vsel %vm11261_vm8, %v11236_v6, %v11286_v39 }
 0xbbf   : > { %v11065_v47 = vadd.f32 0.2548296, %v11040_v61  ;;  %v11016_v17 = vadd.f32 -0.28449672, %v10991_v26  ;;  %v10967_v0 = vadd.f32 1.4214138, %v10942_v5  ;;  %v22890_v34 = vmul.f32 %v11359_v23, %v22686_v15 }
 0xbc0   : > { %vm11262_vm9 = vcmp.ge.f32.partialorder %v22650_v40, 0.0  ;;  %17712 = vpow2.f32 %v11181_v41  ;;  %v22894_v7 = vmul.f32 0.5, %v22763_v3  ;;  %v10844_v13 = vadd.f32 1.0, %v10819_v25 }
 0xbc1   : > { %vm11263_vm10 = vcmp.ge.f32.partialorder %v22675_v50, 0.0  ;;  %v22897_v1 = vmul.f32 %v17707_v56, %v11089_v21  ;;  %v11041_v52 = vmul.f32 %v22846_v31, %v11016_v17  ;;  %v10992_v6 = vmul.f32 %v22864_v12, %v10967_v0 }
 0xbc2   : > { %v11118_v63 = vsub.f32 0.0, %v10793_v44  ;;  %v22902_v11 = vmul.f32 %v11360_v59, %v22701_v33  ;;  %v11361_v15 = vadd.f32 1.0, %v11311_v29  ;;  %v11238_v23 = vsub.f32 1.0, %v11213_v19  ;;  %v22911_v33 = vld [vmem:[%s23314_s8] ss:$0 sm:$0xff] }
 0xbc3   : > { %17714 = vpow2.f32 %v11183_v30  ;;  %v11287_v10 = vsub.f32 0.0, %v11237_v48  ;;  %v11090_v3 = vmul.f32 %v22818_v38, %v11065_v47  ;;  %v11017_v36 = vadd.f32 -0.28449672, %v10992_v6 }
 0xbc4   : > { %17716 = vrcp.f32 %v10844_v13  ;;  %v17709_v55 = vpop.eup %17708  ;;  %vm11264_vm11 = vcmp.ge.f32.partialorder %v22696_v57, 0.0  ;;  %v11066_v20 = vadd.f32 0.2548296, %v11041_v52  ;;  %v16154_v39 = vpack.c.bf16 %v22739_v8, %v22719_v49 }
 0xbc5   : > { %v10713_v61 = vmul.f32 %v22911_v33, %v22655_v14  ;;  %v10714_v38 = vmul.f32 %v22911_v33, %v22680_v16  ;;  %v11239_v51 = vsub.f32 1.0, %v22897_v1  ;;  %v11042_v43 = vmul.f32 %v22864_v12, %v11017_v36  ;;  %v22927_v14 = vld [vmem:[%s23315_s9] ss:$0 sm:$0xff] }
 0xbc6   : > { %v11143_v59 = vmul.f32 %v11118_v63, %v10793_v44  ;;  %v16157_v41 = vpack.c.bf16 %v22831_v46, %v22774_v27  ;;  %v22922_v49 = vmul.f32 %v11361_v15, %v22743_v53  ;;  %v11288_v8 = vsub.f32 0.0, %v11238_v23  ;;  %16155 = vmatpush1.bf16.msra.mxu1 %v16154_v39 }
 0xbc7   : > { %v22930_v16 = vadd.f32 %v22927_v14, %v10713_v61  ;;  %v22933_v54 = vadd.f32 %v22927_v14, %v10714_v38  ;;  %v11215_v44 = vmul.f32 %v17709_v55, %v11090_v3  ;;  %v11067_v56 = vadd.f32 0.2548296, %v11042_v43  ;;  %16156 = vmatprep.subr.bf16.mxu1 %v23381_v35 }
 0xbc8   : > { %v11119_v27 = vsub.f32 0.0, %v22880_v58  ;;  %v10715_v53 = vmul.f32 %v22911_v33, %v22713_v2  ;;  %v22939_v46 = vpop.eup %17710  ;;  %v11091_v21 = vmul.f32 %v22846_v31, %v11066_v20  ;;  %v22943_v26 = vmul.f32 0.5, %v22849_v42 }
 0xbc9   : > { %v22946_v5 = vmul.f32 0.70710677, %v22930_v16  ;;  %v22949_v30 = vmul.f32 0.70710677, %v22933_v54  ;;  %v11312_v19 = vsel %vm11262_vm9, %v11237_v48, %v11287_v10  ;;  %v11289_v25 = vsub.f32 0.0, %v11239_v51 }
 0xbca   : > { %v10893_v29 = vmul.f32 1.0614054, %v22939_v46  ;;  %v11185_v2 = vmul.f32 1.442695, %v11143_v59  ;;  %v17713_v47 = vpop.eup %17712  ;;  %v11313_v31 = vsel %vm11263_vm10, %v11238_v23, %v11288_v8  ;;  %vm11265_vm12 = vcmp.ge.f32.partialorder %v22735_v22, 0.0  ;;  %16158 = vmatpush1.bf16.msra.mxu1 %v16157_v41 }
 0xbcb   : > { %v11092_v42 = vmul.f32 %v22864_v12, %v11067_v56  ;;  %v10795_v17 = vand.u32 2147483647, %v22946_v5  ;;  %v10796_v0 = vand.u32 2147483647, %v22949_v30  ;;  %v11240_v13 = vsub.f32 1.0, %v11215_v44  ;;  %16159 = vmatprep.subr.bf16.mxu1 %v23381_v35 }
 0xbcc   : > { %v10918_v40 = vadd.f32 -1.4531521, %v10893_v29  ;;  %v11144_v48 = vmul.f32 %v11119_v27, %v22880_v58  ;;  %v22962_v1 = vadd.f32 %v22927_v14, %v10715_v53  ;;  %v11362_v52 = vadd.f32 1.0, %v11312_v19 }
 0xbcd   : > { %v17715_v50 = vpop.eup %17714  ;;  %v22965_v6 = vmul.f32 %v17713_v47, %v11091_v21  ;;  %v10820_v63 = vmul.f32 0.3275911, %v10795_v17  ;;  %v10821_v12 = vmul.f32 0.3275911, %v10796_v0  ;;  %v11363_v23 = vadd.f32 1.0, %v11313_v31 }
 0xbce   : > { %v22967_v15 = vpop.eup %17716  ;;  %v11314_v10 = vsel %vm11264_vm11, %v11239_v51, %v11289_v25  ;;  %v10943_v3 = vmul.f32 %v22939_v46, %v10918_v40  ;;  %17718 = vpow2.f32 %v11185_v2  ;;  %v11217_v58 = vmul.f32 %v17715_v50, %v11092_v42 }
 0xbcf   : > { %v10894_v36 = vmul.f32 1.0614054, %v22967_v15  ;;  %v10845_v55 = vadd.f32 1.0, %v10820_v63  ;;  %v22974_v20 = vmul.f32 0.70710677, %v22962_v1  ;;  %v11290_v39 = vsub.f32 0.0, %v11240_v13 }
 0xbd0   : > { %v10968_v61 = vadd.f32 1.4214138, %v10943_v3  ;;  %v11187_v38 = vmul.f32 1.442695, %v11144_v48  ;;  %v10846_v43 = vadd.f32 1.0, %v10821_v12  ;;  %v11241_v59 = vsub.f32 1.0, %v22965_v6 }
 0xbd1   : > { %v10919_v41 = vadd.f32 -1.4531521, %v10894_v36  ;;  %17720 = vrcp.f32 %v10845_v55  ;;  %v11120_v57 = vsub.f32 0.0, %v10795_v17  ;;  %v11387_v51 = vmul.f32 %v11362_v52, %v22751_v9  ;;  %v23398_v48 = vld [vmem:[#allocation12_spill] sm:$0xff]  ;;  %v23399_v36 = vld [vmem:[#allocation5_spill] sm:$0xff] }
 0xbd2   : > { %v22979_v8 = vmul.f32 %v11363_v23, %v22801_v37  ;;  %vm11266_vm13 = vcmp.ge.f32.partialorder %v22778_v62, 0.0  ;;  %vm11267_vm0 = vcmp.ge.f32.partialorder %v22795_v45, 0.0  ;;  %v10993_v44 = vmul.f32 %v22939_v46, %v10968_v61 }
 0xbd3   : > { %17722 = vrcp.f32 %v10846_v43  ;;  %v11242_v56 = vsub.f32 1.0, %v11217_v58  ;;  %v10944_v27 = vmul.f32 %v22967_v15, %v10919_v41  ;;  %v11121_v53 = vsub.f32 0.0, %v10796_v0 }
 0xbd4   : > { %v22986_v21 = vand.u32 2147483647, %v22974_v20  ;;  %v11364_v19 = vadd.f32 1.0, %v11314_v10  ;;  %v11315_v9 = vsel %vm11265_vm12, %v11240_v13, %v11290_v39  ;;  %v11018_v37 = vadd.f32 -0.28449672, %v10993_v44 }
 0xbd5   : > { %17724 = vpow2.f32 %v11187_v38  ;;  %v11291_v25 = vsub.f32 0.0, %v11241_v59  ;;  %v10969_v29 = vadd.f32 1.4214138, %v10944_v27  ;;  %v11145_v2 = vmul.f32 %v11120_v57, %v10795_v17 }
 0xbd6   : > { %v10822_v47 = vmul.f32 0.3275911, %v22986_v21  ;;  %v11043_v31 = vmul.f32 %v22939_v46, %v11018_v37  ;;  %v10716_v42 = vmul.f32 %v22911_v33, %v22730_v18  ;;  %v16160_v40 = vpack.c.bf16 %v22902_v11, %v22890_v34 }
 0xbd7   : > { %v10717_v50 = vmul.f32 %v22911_v33, %v23398_v48  ;;  %v11292_v22 = vsub.f32 0.0, %v11242_v56  ;;  %v10994_v13 = vmul.f32 %v22967_v15, %v10969_v29  ;;  %v11146_v52 = vmul.f32 %v11121_v53, %v10796_v0 }
 0xbd8   : > { %v10847_v6 = vadd.f32 1.0, %v10822_v47  ;;  %v17719_v63 = vpop.eup %17718  ;;  %v11068_v17 = vadd.f32 0.2548296, %v11043_v31  ;;  %v23000_v12 = vadd.f32 %v22927_v14, %v10716_v42  ;;  %16161 = vmatpush1.bf16.msra.mxu1 %v16160_v40  ;;  %v16163_v18 = vpack.c.bf16 %v11387_v51, %v22922_v49 }
 0xbd9   : > { %v23003_v23 = vadd.f32 %v22927_v14, %v10717_v50  ;;  %v11389_v34 = vmul.f32 %v11364_v19, %v22823_v4  ;;  %v11365_v11 = vadd.f32 1.0, %v11315_v9  ;;  %vm11268_vm15 = vcmp.ge.f32.partialorder %v22861_v32, 0.0  ;;  %16162 = vmatprep.subr.bf16.mxu1 %v23381_v35 }
 0xbda   : > { %v11019_v10 = vadd.f32 -0.28449672, %v10994_v13  ;;  %17726 = vrcp.f32 %v10847_v6  ;;  %v11093_v0 = vmul.f32 %v22939_v46, %v11068_v17  ;;  %v23011_v3 = vmul.f32 0.70710677, %v23000_v12 }
 0xbdb   : > { %v23014_v58 = vmul.f32 0.70710677, %v23003_v23  ;;  %v10718_v49 = vmul.f32 %v22911_v33, %v23399_v36  ;;  %v23018_v55 = vpop.eup %17720  ;;  %v11316_v4 = vsel %vm11266_vm13, %v11241_v59, %v11291_v25  ;;  %v11317_v39 = vsel %vm11267_vm0, %v11242_v56, %v11292_v22 }
 0xbdc   : > { %v11044_v61 = vmul.f32 %v22967_v15, %v11019_v10  ;;  %v11189_v46 = vmul.f32 1.442695, %v11145_v2  ;;  %v11218_v43 = vmul.f32 %v17719_v63, %v11093_v0  ;;  %v10895_v41 = vmul.f32 1.0614054, %v23018_v55  ;;  %16164 = vmatpush1.bf16.msra.mxu1 %v16163_v18 }
 0xbdd   : > { %v23025_v38 = vpop.eup %17722  ;;  %v11191_v57 = vmul.f32 1.442695, %v11146_v52  ;;  %v23029_v51 = vand.u32 2147483647, %v23011_v3  ;;  %v23033_v59 = vand.u32 2147483647, %v23014_v58  ;;  %16165 = vmatprep.subr.bf16.mxu1 %v23381_v35  ;;  %v16166_v45 = vpack.c.bf16 %v11389_v34, %v22979_v8 }
 0xbde   : > { %v11069_v33 = vadd.f32 0.2548296, %v11044_v61  ;;  %v10896_v62 = vmul.f32 1.0614054, %v23025_v38  ;;  %v11243_v56 = vsub.f32 1.0, %v11218_v43  ;;  %v23039_v19 = vadd.f32 %v22927_v14, %v10718_v49  ;;  %v23400_v34 = vld [vmem:[#allocation6_spill] sm:$0xff] }
 0xbdf   : > { %v17725_v44 = vpop.eup %17724  ;;  %v10920_v27 = vadd.f32 -1.4531521, %v10895_v41  ;;  %v10823_v53 = vmul.f32 0.3275911, %v23029_v51  ;;  %v11366_v9 = vadd.f32 1.0, %v11316_v4  ;;  %v11122_v25 = vsub.f32 0.0, %v22986_v21 }
 0xbe0   : > { %v10921_v37 = vadd.f32 -1.4531521, %v10896_v62  ;;  %v10824_v29 = vmul.f32 0.3275911, %v23033_v59  ;;  %v11293_v2 = vsub.f32 0.0, %v11243_v56  ;;  %v11094_v47 = vmul.f32 %v22967_v15, %v11069_v33  ;;  %16167 = vmatpush1.bf16.msra.mxu1 %v16166_v45 }
 0xbe1   : > { %v10945_v31 = vmul.f32 %v23018_v55, %v10920_v27  ;;  %v10848_v8 = vadd.f32 1.0, %v10823_v53  ;;  %v11367_v42 = vadd.f32 1.0, %v11317_v39  ;;  %17728 = vpow2.f32 %v11189_v46  ;;  %16168 = vmatprep.subr.bf16.mxu1 %v23381_v35 }
 0xbe2   : > { %v10946_v40 = vmul.f32 %v23025_v38, %v10921_v37  ;;  %v10849_v48 = vadd.f32 1.0, %v10824_v29  ;;  %v11318_v14 = vsel %vm11268_vm15, %v11243_v56, %v11293_v2  ;;  %v23050_v22 = vmul.f32 0.70710677, %v23039_v19 }
 0xbe3   : > { %v10970_v50 = vadd.f32 1.4214138, %v10945_v31  ;;  %17730 = vrcp.f32 %v10848_v8  ;;  %v11368_v13 = vadd.f32 1.0, %v11318_v14  ;;  %v11147_v6 = vmul.f32 %v11122_v25, %v22986_v21 }
 0xbe4   : > { %v23052_v15 = vpop.eup %17726  ;;  %v10971_v52 = vadd.f32 1.4214138, %v10946_v40  ;;  %17732 = vrcp.f32 %v10849_v48  ;;  %v11219_v63 = vmul.f32 %v17725_v44, %v11094_v47  ;;  %v11391_v32 = vmul.f32 %v11366_v9, %v22894_v7  ;;  %v11402_v44 = vld [vmem:[%s23317_s11 + $0x8] sm:$0xff] }
 0xbe5   : > { %v10995_v17 = vmul.f32 %v23018_v55, %v10970_v50  ;;  %17734 = vpow2.f32 %v11191_v57  ;;  %v10897_v18 = vmul.f32 1.0614054, %v23052_v15  ;;  %v11342_v10 = vmul.f32 0.5, %v23400_v34 }
 0xbe6   : > { %v11393_v0 = vmul.f32 %v11368_v13, %v22943_v26  ;;  %v10996_v36 = vmul.f32 %v23025_v38, %v10971_v52  ;;  %v11390_v49 = vmul.f32 %v11365_v11, %v22837_v28  ;;  %v23063_v21 = vand.u32 2147483647, %v23050_v22 }
 0xbe7   : > { %v11020_v4 = vadd.f32 -0.28449672, %v10995_v17  ;;  %v10922_v39 = vadd.f32 -1.4531521, %v10897_v18  ;;  %v11392_v61 = vmul.f32 %v11367_v42, %v11342_v10  ;;  %v11193_v43 = vmul.f32 1.442695, %v11147_v6 }
 0xbe8   : > { %v11021_v46 = vadd.f32 -0.28449672, %v10996_v36  ;;  %v11123_v41 = vsub.f32 0.0, %v23029_v51  ;;  %v11244_v57 = vsub.f32 1.0, %v11219_v63  ;;  %v10825_v26 = vmul.f32 0.3275911, %v23063_v21 }
 0xbe9   : > { %v11045_v7 = vmul.f32 %v23018_v55, %v11020_v4  ;;  %v10947_v33 = vmul.f32 %v23052_v15, %v10922_v39  ;;  %v11124_v28 = vsub.f32 0.0, %v23033_v59  ;;  %v16169_v11 = vpack.c.bf16 %v11391_v32, %v11390_v49 }
 0xbea   : > { %v11046_v62 = vmul.f32 %v23025_v38, %v11021_v46  ;;  %v16172_v45 = vpack.c.bf16 %v11393_v0, %v11392_v61  ;;  %v10850_v53 = vadd.f32 1.0, %v10825_v26  ;;  %17736 = vpow2.f32 %v11193_v43 }
 0xbeb   : > { %v11070_v56 = vadd.f32 0.2548296, %v11045_v7  ;;  %v10972_v27 = vadd.f32 1.4214138, %v10947_v33  ;;  %v17729_v9 = vpop.eup %17728  ;;  %v11148_v25 = vmul.f32 %v11123_v41, %v23029_v51  ;;  %16170 = vmatpush1.bf16.msra.mxu1 %v16169_v11  ;;  %vm11405_vm2 = vcmask 556032  }
 0xbec   : > { %v11071_v37 = vadd.f32 0.2548296, %v11046_v62  ;;  %v11294_v2 = vsub.f32 0.0, %v11244_v57  ;;  %17738 = vrcp.f32 %v10850_v53  ;;  %16171 = vmatprep.subr.bf16.mxu1 %v23381_v35  ;;  %12966 = vmatprep.mubr.msk.f32.mxu1 %vm11405_vm2, %v11402_v44  ;;  %v11149_v40 = vmul.f32 %v11124_v28, %v23033_v59 }
 0xbed   : > { %v23075_v29 = vpop.eup %17730  ;;  %v11095_v47 = vmul.f32 %v23018_v55, %v11070_v56  ;;  %v10997_v31 = vmul.f32 %v23052_v15, %v10972_v27  ;;  %vm11269_vm3 = vcmp.ge.f32.partialorder %v22870_v60, 0.0  ;;  %v11195_v6 = vmul.f32 1.442695, %v11148_v25 }
 0xbee   : > { %v23081_v8 = vpop.eup %17732  ;;  %v11096_v42 = vmul.f32 %v23025_v38, %v11071_v37  ;;  %v10898_v51 = vmul.f32 1.0614054, %v23075_v29  ;;  %v11319_v63 = vsel %vm11269_vm3, %v11244_v57, %v11294_v2  ;;  %v11344_v59 = vmul.f32 0.5, %v22855_v24 }
 0xbef   : > { %v17735_v48 = vpop.eup %17734  ;;  %v11220_v14 = vmul.f32 %v17729_v9, %v11095_v47  ;;  %v11022_v50 = vadd.f32 -0.28449672, %v10997_v31  ;;  %v10899_v55 = vmul.f32 1.0614054, %v23081_v8  ;;  %16173 = vmatpush1.bf16.msra.mxu1 %v16172_v45  ;;  %v11197_v10 = vmul.f32 1.442695, %v11149_v40 }
 0xbf0   : > { %v11221_v13 = vmul.f32 %v17735_v48, %v11096_v42  ;;  %v10923_v52 = vadd.f32 -1.4531521, %v10898_v51  ;;  %16174 = vmatprep.subr.bf16.mxu1 %v23381_v35  ;;  %v11125_v49 = vsub.f32 0.0, %v23063_v21  ;;  %v11369_v4 = vadd.f32 1.0, %v11319_v63 }
 0xbf1   : > { %v11245_v17 = vsub.f32 1.0, %v11220_v14  ;;  %v11047_v18 = vmul.f32 %v23052_v15, %v11022_v50  ;;  %v10924_v38 = vadd.f32 -1.4531521, %v10899_v55  ;;  %vm11270_vm4 = vcmp.ge.f32.partialorder %v22946_v5, 0.0 }
 0xbf2   : > { %v11246_v32 = vsub.f32 1.0, %v11221_v13  ;;  %v10948_v34 = vmul.f32 %v23075_v29, %v10923_v52  ;;  %17740 = vpow2.f32 %v11195_v6  ;;  %v11345_v57 = vmul.f32 0.5, %v22930_v16 }
 0xbf3   : > { %v11295_v0 = vsub.f32 0.0, %v11245_v17  ;;  %v11072_v36 = vadd.f32 0.2548296, %v11047_v18  ;;  %v10949_v60 = vmul.f32 %v23081_v8, %v10924_v38  ;;  %17742 = vpow2.f32 %v11197_v10 }
 0xbf4   : > { %v10973_v39 = vadd.f32 1.4214138, %v10948_v34  ;;  %v11296_v46 = vsub.f32 0.0, %v11246_v32  ;;  %v17737_v41 = vpop.eup %17736  ;;  %vm11271_vm5 = vcmp.ge.f32.partialorder %v22949_v30, 0.0  ;;  %v11150_v28 = vmul.f32 %v11125_v49, %v23063_v21 }
 0xbf5   : > { %v11320_v61 = vsel %vm11270_vm4, %v11245_v17, %v11295_v0  ;;  %v11097_v43 = vmul.f32 %v23052_v15, %v11072_v36  ;;  %v10974_v24 = vadd.f32 1.4214138, %v10949_v60  ;;  %v11394_v11 = vmul.f32 %v11369_v4, %v11344_v59 }
 0xbf6   : > { %v11370_v7 = vadd.f32 1.0, %v11320_v61  ;;  %v10998_v33 = vmul.f32 %v23075_v29, %v10973_v39  ;;  %v17739_v26 = vpop.eup %17738  ;;  %v11321_v56 = vsel %vm11271_vm5, %v11246_v32, %v11296_v46  ;;  %v11199_v30 = vmul.f32 1.442695, %v11150_v28 }
 0xbf7   : > { %v11222_v62 = vmul.f32 %v17737_v41, %v11097_v43  ;;  %v10999_v5 = vmul.f32 %v23081_v8, %v10974_v24  ;;  %v10900_v15 = vmul.f32 1.0614054, %v17739_v26  ;;  %v11371_v47 = vadd.f32 1.0, %v11321_v56  ;;  %v11570_v56 = vld [vmem:[%s23318_s12 + $0x20] sm:$0xff] }
 0xbf8   : > { %v11395_v45 = vmul.f32 %v11370_v7, %v11345_v57  ;;  %v11023_v44 = vadd.f32 -0.28449672, %v10998_v33  ;;  %vm11272_vm6 = vcmp.ge.f32.partialorder %v22974_v20, 0.0  ;;  %v11346_v42 = vmul.f32 0.5, %v22933_v54 }
 0xbf9   : > { %v11247_v27 = vsub.f32 1.0, %v11222_v62  ;;  %v11024_v53 = vadd.f32 -0.28449672, %v10999_v5  ;;  %v10925_v9 = vadd.f32 -1.4531521, %v10900_v15  ;;  %v11347_v14 = vmul.f32 0.5, %v22962_v1 }
 0xbfa   : > { %v11048_v16 = vmul.f32 %v23075_v29, %v11023_v44  ;;  %v16175_v37 = vpack.c.bf16 %v11395_v45, %v11394_v11  ;;  %17744 = vpow2.f32 %v11199_v30  ;;  %v11396_v6 = vmul.f32 %v11371_v47, %v11346_v42  ;;  %v11404_v11 = vld [vmem:[%s23317_s11 + $0x18] sm:$0x1]  ;;  %v11494_v45 = vld [vmem:[%s23318_s12 + $0x10] sm:$0xff]  ;;  %v11648_v30 = vld [vmem:[%s23318_s12 + $0x40] sm:$0xff] }
 0xbfb   : > { %v11297_v25 = vsub.f32 0.0, %v11247_v27  ;;  %v11049_v2 = vmul.f32 %v23081_v8, %v11024_v53  ;;  %v10950_v21 = vmul.f32 %v17739_v26, %v10925_v9  ;;  %vm11273_vm7 = vcmp.ge.f32.partialorder %v23011_v3, 0.0  ;;  %v11403_v44 = vld [vmem:[%s23317_s11 + $0x10] sm:$0x1]  ;;  %v11573_v9 = vld [vmem:[%s23318_s12 + $0x38] sm:$0xff]  ;;  %v11649_v47 = vld [vmem:[%s23318_s12 + $0x48] sm:$0xff] }
 0xbfc   : > { %v11073_v31 = vadd.f32 0.2548296, %v11048_v16  ;;  %16176 = vmatpush1.bf16.msra.mxu1 %v16175_v37  ;;  %v17741_v48 = vpop.eup %17740  ;;  %vm11274_vm8 = vcmp.ge.f32.partialorder %v23014_v58, 0.0  ;;  %v11348_v49 = vmul.f32 0.5, %v23000_v12  ;;  %v11349_v4 = vmul.f32 0.5, %v23003_v23  ;;  %v11492_v12 = vld [vmem:[%s23318_s12] sm:$0xff] }
 0xbfd   : > { %v11322_v51 = vsel %vm11272_vm6, %v11247_v27, %v11297_v25  ;;  %v11074_v40 = vadd.f32 0.2548296, %v11049_v2  ;;  %16177 = vmatprep.subr.bf16.mxu1 %v23381_v35  ;;  %v10975_v13 = vadd.f32 1.4214138, %v10950_v21  ;;  %v17743_v20 = vpop.eup %17742  ;;  %vm11275_vm9 = vcmp.ge.f32.partialorder %v23050_v22, 0.0  ;;  %v11493_v23 = vld [vmem:[%s23318_s12 + $0x8] sm:$0xff] }
 0xbfe   : > { %v11372_v50 = vadd.f32 1.0, %v11322_v51  ;;  %v11098_v55 = vmul.f32 %v23075_v29, %v11073_v31  ;;  %v23401_v58 = vmov 0.0   ;;  %vm11412_vm10 = vcmask 1043456   ;;  %v11401_v22 = vld [vmem:[%s23317_s11] sm:$0xff]  ;;  %v11571_v27 = vld [vmem:[%s23318_s12 + $0x28] sm:$0xff]  ;;  %v11572_v16 = vld [vmem:[%s23318_s12 + $0x30] sm:$0xff] }
 0xbff   : > { %v11099_v52 = vmul.f32 %v23081_v8, %v11074_v40  ;;  %v11000_v18 = vmul.f32 %v17739_v26, %v10975_v13  ;;  %v16184_v28 = vpack.c.bf16 %v11493_v23, %v11492_v12  ;;  %v16190_v53 = vpack.c.bf16 %v11571_v27, %v11570_v56  ;;  %v11650_v40 = vld [vmem:[%s23318_s12 + $0x50] sm:$0xff]  ;;  %v12041_v12 = vld [vmem:[%s23318_s12 + $0xf8] sm:$0xff] }
 0xc00   : > { %v11397_v63 = vmul.f32 %v11372_v50, %v11347_v14  ;;  %v11223_v17 = vmul.f32 %v17741_v48, %v11098_v55  ;;  %v16193_v2 = vpack.c.bf16 %v11573_v9, %v11572_v16  ;;  %v16196_v42 = vpack.c.bf16 %v11649_v47, %v11648_v30  ;;  %v11651_v48 = vld [vmem:[%s23318_s12 + $0x58] sm:$0xff]  ;;  %v11726_v50 = vld [vmem:[%s23318_s12 + $0x60] sm:$0xff]  ;;  %v11727_v55 = vld [vmem:[%s23318_s12 + $0x68] sm:$0xff] }
 0xc01   : > { %v11224_v54 = vmul.f32 %v17743_v20, %v11099_v52  ;;  %v11025_v59 = vadd.f32 -0.28449672, %v11000_v18  ;;  %v16199_v14 = vpack.c.bf16 %v11651_v48, %v11650_v40  ;;  %v16202_v13 = vpack.c.bf16 %v11727_v55, %v11726_v50  ;;  %v11728_v20 = vld [vmem:[%s23318_s12 + $0x70] sm:$0xff]  ;;  %v11805_v18 = vld [vmem:[%s23318_s12 + $0x88] sm:$0xff] }
 0xc02   : > { %v11248_v38 = vsub.f32 1.0, %v11223_v17  ;;  %v16178_v32 = vpack.c.bf16 %v11397_v63, %v11396_v6  ;;  %v11729_v6 = vld [vmem:[%s23318_s12 + $0x78] sm:$0xff]  ;;  %v11804_v17 = vld [vmem:[%s23318_s12 + $0x80] sm:$0xff]  ;;  %vm12229_vm11 = vcmask 0  }
 0xc03   : > { %v11249_v34 = vsub.f32 1.0, %v11224_v54  ;;  %v11050_v0 = vmul.f32 %v17739_v26, %v11025_v59  ;;  %v16205_v63 = vpack.c.bf16 %v11729_v6, %v11728_v20  ;;  %v16208_v54 = vpack.c.bf16 %v11805_v18, %v11804_v17  ;;  %v11806_v59 = vld [vmem:[%s23318_s12 + $0x90] sm:$0xff] }
 0xc04   : > { %v11298_v10 = vsub.f32 0.0, %v11248_v38  ;;  %16179 = vmatpush1.bf16.msra.mxu1 %v16178_v32  ;;  %v17745_v46 = vpop.eup %17744  ;;  %v11807_v32 = vld [vmem:[%s23318_s12 + $0x98] sm:$0xff] }
 0xc05   : > { %v11299_v1 = vsub.f32 0.0, %v11249_v34  ;;  %16180 = vmatprep.subr.bf16.mxu1 %v23381_v35  ;;  %v11075_v8 = vadd.f32 0.2548296, %v11050_v0  ;;  %v11883_v0 = vld [vmem:[%s23318_s12 + $0xa8] sm:$0xff] }
 0xc06   : > { %v11323_v29 = vsel %vm11273_vm7, %v11248_v38, %v11298_v10  ;;  %v11882_v10 = vld [vmem:[%s23318_s12 + $0xa0] sm:$0xff] }
 0xc07   : > { %v11373_v36 = vadd.f32 1.0, %v11323_v29  ;;  %v11324_v60 = vsel %vm11274_vm8, %v11249_v34, %v11299_v1  ;;  %v11100_v61 = vmul.f32 %v17739_v26, %v11075_v8  ;;  %v11350_v26 = vmul.f32 0.5, %v23039_v19  ;;  %v11495_v19 = vld [vmem:[%s23318_s12 + $0x18] sm:$0xff]  ;;  %v11884_v8 = vld [vmem:[%s23318_s12 + $0xb0] sm:$0xff] }
 0xc08   : > { %v11374_v39 = vadd.f32 1.0, %v11324_v60  ;;  %v16187_v15 = vpack.c.bf16 %v11495_v19, %v11494_v45  ;;  %v16211_v34 = vpack.c.bf16 %v11807_v32, %v11806_v59  ;;  %v16214_v1 = vpack.c.bf16 %v11883_v0, %v11882_v10  ;;  %v11491_v19 = vld [vmem:[%s23319_s13] sm:$0x1] }
 0xc09   : > { %v11398_v43 = vmul.f32 %v11373_v36, %v11348_v49  ;;  %v11225_v41 = vmul.f32 %v17745_v46, %v11100_v61  ;;  %v11885_v36 = vld [vmem:[%s23318_s12 + $0xb8] sm:$0xff]  ;;  %v11960_v49 = vld [vmem:[%s23318_s12 + $0xc0] sm:$0xff]  ;;  %v11962_v46 = vld [vmem:[%s23318_s12 + $0xd0] sm:$0xff] }
 0xc0a   : > { %v11399_v24 = vmul.f32 %v11374_v39, %v11349_v4  ;;  %v16217_v60 = vpack.c.bf16 %v11885_v36, %v11884_v8  ;;  %v11961_v4 = vld [vmem:[%s23318_s12 + $0xc8] sm:$0xff] }
 0xc0b   : > { %v11250_v3 = vsub.f32 1.0, %v11225_v41  ;;  %v16220_v39 = vpack.c.bf16 %v11961_v4, %v11960_v49  ;;  %v12038_v41 = vld [vmem:[%s23318_s12 + $0xe0] sm:$0xff] }
 0xc0c   : > { %v16181_v57 = vpack.c.bf16 %v11399_v24, %v11398_v43  ;;  %v11963_v43 = vld [vmem:[%s23318_s12 + $0xd8] sm:$0xff] }
 0xc0d   : > { %v11300_v7 = vsub.f32 0.0, %v11250_v3  ;;  %v16223_v24 = vpack.c.bf16 %v11963_v43, %v11962_v46 }
 0xc0e   : > { %16182 = vmatpush1.bf16.msra.mxu1 %v16181_v57 }
 0xc0f   : > { %11464 = vmatprep.subr.mxu1 %v23401_v58  ;;  %v11325_v33 = vsel %vm11275_vm9, %v11250_v3, %v11300_v7  ;;  %v12039_v3 = vld [vmem:[%s23318_s12 + $0xe8] sm:$0xff] }
 0xc10   : > { %v11375_v62 = vadd.f32 1.0, %v11325_v33  ;;  %v16226_v57 = vpack.c.bf16 %v12039_v3, %v12038_v41  ;;  %v12040_v33 = vld [vmem:[%s23318_s12 + $0xf0] sm:$0xff] }
 0xc11   : > { %v16229_v23 = vpack.c.bf16 %v12041_v12, %v12040_v33 }
 0xc12   : > { %v11400_v5 = vmul.f32 %v11375_v62, %v11350_v26  ;;  %v12116_v26 = vld [vmem:[%s23318_s12 + $0x100] sm:$0xff]  ;;  %v12117_v62 = vld [vmem:[%s23318_s12 + $0x108] sm:$0xff] }
 0xc14   : > { %12965 = vmatpush1.msk.msra.mxu1 %vm11412_vm10, %v11400_v5  ;;  %v16232_v5 = vpack.c.bf16 %v12117_v62, %v12116_v26 }
 0xc15   : > { %11481 = vmatmul.mubr.f32.vlgmr.msra.gmra.mrb[100].mxu1 %v11401_v22  ;;  %16183 = vmatprep.subr.bf16.mxu1 %v23381_v35 }
 0xc16   : > { %12967 = vmatprep.mubr.msk.f32.mxu1 %vm11405_vm2, %v11404_v11  ;;  %16185 = vmatpush3.bf16.msra.mxu1 %v16184_v28  ;;  %v12118_v28 = vld [vmem:[%s23318_s12 + $0x110] sm:$0xff]  ;;  %v12119_v11 = vld [vmem:[%s23318_s12 + $0x118] sm:$0xff] }
 0xc17   : > { %16186 = vmatprep.subr.bf16.mxu1 %v23381_v35  ;;  %v16235_v45 = vpack.c.bf16 %v12119_v11, %v12118_v28 }
 0xc19   : > { %11486 = vmatmul.mubr.f32.gmra.mrb[102].mxu1 %v11403_v44 }
 0xc1a   : > { %16188 = vmatpush3.bf16.msra.mxu1 %v16187_v15  ;;  %15948 = vmatprep.mubr.msk.f32.mxu1 %vm17767_vm1, %v23401_v58 }
 0xc1b   : > { %16189 = vmatprep.subr.bf16.mxu1 %v23381_v35 }
 0xce8   : > { %v23156_v37 = vpop.f32.mrb[100].mxu1 }
 0xce9   : > { %15949 = vmatmul.mubr.msk.f32.vlgmr.msra.gmra.mrb[104].mxu1 %vm7785_vm14, %v23156_v37  ;;  %v11484_v25 = vpop.f32.mrb[101].mxu1  ;;  %v11574_v51 = vrot.slane %v23156_v37, 1  ;;  %v11652_v52 = vrot.slane %v23156_v37, 2  ;;  %v11730_v38 = vrot.slane %v23156_v37, 3  ;;  %v11808_v29 = vrot.slane %v23156_v37, 4 }
 0xcea   : > { %16191 = vmatpush3.bf16.msra.mxu1 %v16190_v53  ;;  %15959 = vmatprep.mubr.msk.f32.mxu1 %vm17767_vm1, %v23401_v58  ;;  %v11886_v61 = vrot.slane %v23156_v37, 5  ;;  %v11964_v7 = vrot.slane %v23156_v37, 6  ;;  %v12042_v22 = vrot.slane %v23156_v37, 7 }
 0xceb   : > { %16192 = vmatprep.subr.bf16.mxu1 %v23381_v35 }
 0xcec   : > { %v23169_v31 = vpop.f32.mrb[102].mxu1 }
 0xced   : > { %v11489_v21 = vpop.f32.mrb[103].mxu1 }
 0xcee   : > { %16194 = vmatpush3.bf16.msra.mxu1 %v16193_v2 }
 0xcef   : > { %16195 = vmatprep.subr.bf16.mxu1 %v23381_v35 }
 0xcf1   : > { %15960 = vmatmul.mubr.msk.f32.vlgmr.msra.gmra.mrb[104].mxu1 %vm7785_vm14, %v11574_v51 }
 0xcf2   : > { %16197 = vmatpush3.bf16.msra.mxu1 %v16196_v42  ;;  %15970 = vmatprep.mubr.msk.f32.mxu1 %vm17767_vm1, %v23401_v58 }
 0xcf3   : > { %16198 = vmatprep.subr.bf16.mxu1 %v23381_v35 }
 0xcf6   : > { %16200 = vmatpush3.bf16.msra.mxu1 %v16199_v14 }
 0xcf7   : > { %16201 = vmatprep.subr.bf16.mxu1 %v23381_v35 }
 0xcf9   : > { %15971 = vmatmul.mubr.msk.f32.vlgmr.msra.gmra.mrb[104].mxu1 %vm7785_vm14, %v11652_v52 }
 0xcfa   : > { %16203 = vmatpush3.bf16.msra.mxu1 %v16202_v13  ;;  %15981 = vmatprep.mubr.msk.f32.mxu1 %vm17767_vm1, %v23401_v58 }
 0xcfb   : > { %16204 = vmatprep.subr.bf16.mxu1 %v23381_v35 }
 0xcfe   : > { %16206 = vmatpush3.bf16.msra.mxu1 %v16205_v63  ;;  %v12220_v63 = vld [vmem:[%s23320_s14] sm:$0x1] }
 0xcff   : > { %16207 = vmatprep.subr.bf16.mxu1 %v23381_v35 }
 0xd01   : > { %15982 = vmatmul.mubr.msk.f32.vlgmr.msra.gmra.mrb[104].mxu1 %vm7785_vm14, %v11730_v38  ;;  %v12226_v38 = vld [vmem:[#allocation4] sm:$0x1] }
 0xd02   : > { %16209 = vmatpush3.bf16.msra.mxu1 %v16208_v54  ;;  %15992 = vmatprep.mubr.msk.f32.mxu1 %vm17767_vm1, %v23401_v58 }
 0xd03   : > { %16210 = vmatprep.subr.bf16.mxu1 %v23381_v35 }
 0xd06   : > { %16212 = vmatpush3.bf16.msra.mxu1 %v16211_v34 }
 0xd07   : > { %16213 = vmatprep.subr.bf16.mxu1 %v23381_v35 }
 0xd09   : > { %15993 = vmatmul.mubr.msk.f32.vlgmr.msra.gmra.mrb[104].mxu1 %vm7785_vm14, %v11808_v29 }
 0xd0a   : > { %16215 = vmatpush3.bf16.msra.mxu1 %v16214_v1  ;;  %16003 = vmatprep.mubr.msk.f32.mxu1 %vm17767_vm1, %v23401_v58 }
 0xd0b   : > { %16216 = vmatprep.subr.bf16.mxu1 %v23381_v35 }
 0xd0e   : > { %16218 = vmatpush3.bf16.msra.mxu1 %v16217_v60 }
 0xd0f   : > { %16219 = vmatprep.subr.bf16.mxu1 %v23381_v35 }
 0xd11   : > { %16004 = vmatmul.mubr.msk.f32.vlgmr.msra.gmra.mrb[104].mxu1 %vm7785_vm14, %v11886_v61 }
 0xd12   : > { %16221 = vmatpush3.bf16.msra.mxu1 %v16220_v39  ;;  %16014 = vmatprep.mubr.msk.f32.mxu1 %vm17767_vm1, %v23401_v58 }
 0xd13   : > { %16222 = vmatprep.subr.bf16.mxu1 %v23381_v35 }
 0xd16   : > { %16224 = vmatpush3.bf16.msra.mxu1 %v16223_v24 }
 0xd17   : > { %16225 = vmatprep.subr.bf16.mxu1 %v23381_v35 }
 0xd19   : > { %16015 = vmatmul.mubr.msk.f32.vlgmr.msra.gmra.mrb[104].mxu1 %vm7785_vm14, %v11964_v7 }
 0xd1a   : > { %16227 = vmatpush3.bf16.msra.mxu1 %v16226_v57  ;;  %16025 = vmatprep.mubr.msk.f32.mxu1 %vm17767_vm1, %v23401_v58 }
 0xd1b   : > { %16228 = vmatprep.subr.bf16.mxu1 %v23381_v35 }
 0xd1e   : > { %16230 = vmatpush3.bf16.msra.mxu1 %v16229_v23 }
 0xd1f   : > { %16231 = vmatprep.subr.bf16.mxu1 %v23381_v35 }
 0xd21   : > { %16026 = vmatmul.mubr.msk.f32.vlgmr.msra.gmra.mrb[104].mxu1 %vm7785_vm14, %v12042_v22 }
 0xd22   : > { %16233 = vmatpush3.bf16.msra.mxu1 %v16232_v5  ;;  %16036 = vmatprep.mubr.msk.f32.mxu1 %vm17767_vm1, %v23401_v58 }
 0xd23   : > { %16234 = vmatprep.subr.bf16.mxu1 %v23381_v35 }
 0xd26   : > { %16236 = vmatpush3.bf16.msra.mxu1 %v16235_v45 }
 0xd29   : > { %16037 = vmatmul.mubr.msk.f32.vlgmr.msra.gmra.mrb[104].mxu1 %vm7785_vm14, %v23169_v31  ;;  %vm12222_vm14 = vcmask 253952  }
 0xdfc   : > { %v12189_v44 = vpop.f32.mrb[104].mxu1 }
 0xdfd   : > { %v16264_v15 = vadd.f32 %v12189_v44, %v11491_v19  ;;  %v16038_v56 = vpop.f32.mrb[105].mxu1 }
 0xdff   : > { %v12194_v27 = vmul.f32 0.70710677, %v16264_v15  ;;  %v12217_v20 = vmul.f32 0.5, %v16264_v15 }
 0xe01   : > { %v12195_v53 = vand.u32 2147483647, %v12194_v27  ;;  %vm12214_vm1 = vcmp.ge.f32.partialorder %v12194_v27, 0.0 }
 0xe03   : > { %v12196_v16 = vmul.f32 0.3275911, %v12195_v53  ;;  %v12208_v37 = vsub.f32 0.0, %v12195_v53 }
 0xe05   : > { %v12197_v9 = vadd.f32 1.0, %v12196_v16  ;;  %v12209_v25 = vmul.f32 %v12208_v37, %v12195_v53 }
 0xe07   : > { %17746 = vrcp.f32 %v12197_v9  ;;  %v12210_v30 = vmul.f32 1.442695, %v12209_v25 }
 0xe09   : > { %17748 = vpow2.f32 %v12210_v30 }
 0xe11   : > { %v17747_v58 = vpop.eup %17746 }
 0xe12   : > { %v12199_v35 = vmul.f32 1.0614054, %v17747_v58 }
 0xe13   : > { %v17749_v14 = vpop.eup %17748 }
 0xe14   : > { %v12200_v2 = vadd.f32 -1.4531521, %v12199_v35 }
 0xe16   : > { %v12201_v47 = vmul.f32 %v17747_v58, %v12200_v2 }
 0xe18   : > { %v12202_v31 = vadd.f32 1.4214138, %v12201_v47 }
 0xe1a   : > { %v12203_v21 = vmul.f32 %v17747_v58, %v12202_v31 }
 0xe1c   : > { %v12204_v42 = vadd.f32 -0.28449672, %v12203_v21 }
 0xe1e   : > { %v12205_v51 = vmul.f32 %v17747_v58, %v12204_v42 }
 0xe20   : > { %v12206_v40 = vadd.f32 0.2548296, %v12205_v51 }
 0xe22   : > { %v12207_v48 = vmul.f32 %v17747_v58, %v12206_v40 }
 0xe24   : > { %v12212_v50 = vmul.f32 %v17749_v14, %v12207_v48 }
 0xe26   : > { %v12213_v55 = vsub.f32 1.0, %v12212_v50 }
 0xe28   : > { %v12215_v13 = vsub.f32 0.0, %v12213_v55 }
 0xe2a   : > { %v12216_v52 = vsel %vm12214_vm1, %v12213_v55, %v12215_v13 }
 0xe2b   : > { %v12218_v6 = vadd.f32 1.0, %v12216_v52 }
 0xe2d   : > { %v12219_v17 = vmul.f32 %v12218_v6, %v12217_v20 }
 0xe2f   : > { %v12221_v18 = vmul.f32 %v12220_v63, %v12219_v17 }
 0xe31   : > { %v12223_v54 = vsel %vm12222_vm14, %v12221_v18, 0.0 }
 0xe32   : > { %12224 = vadd.xlane.f32.xlu1 %v12223_v54 }
 0xebf   : > { %v12225_v59 = vpop.xlane.xlu1 %12224 }
 0xec0   : > { %v12227_v32 = vadd.f32 %v12226_v38, %v12225_v59 }
 0xec2   : > { %17750 = vtanh.f32 %v12227_v32 }
 0xecc   : > { %v17751_v34 = vpop.eup %17750 }
 0xecd   : > { %12230 = vst.msk [vmem:[%s519_s30] sm:$0x1] %vm12229_vm11, %v17751_v34 }
 0xece PF: > { %s28_s23 = sadd.s32 1, %s17764_s23  }
 0xecf   : > { %p25_p4 = scmp.ge.s32.totalorder %s28_s23, 4  }
 0xed1   :  { %27 = sbr.rel (!%p25_p4) target bundleno = 3 (0x3), region = 114 }

</bundles_post_ra>
